<compile_context>
chip_gen: v5e
topology: v5e:2x2
jax: 0.10.0
libtpu: 0.0.40
codegen_flags: <defaults>
</compile_context>

<pallas_src>
import functools

import numpy as np
import jax
import jax.numpy as jnp
from jax.experimental import pallas as pl
from jax.experimental.pallas import tpu as pltpu


# ----------------------------------------------------------------------------
# Fused Pallas kernel: front conv + all residual layers + skip accumulation
# ----------------------------------------------------------------------------
def _wavenet_kernel(x_ref, cc_ref, wfront_ref, wconv_ref, wcc_ref, wrs_ref,
                    misc_ref, skip_ref, hpad_ref,
                    *, H, W, C, K, dils, top, left):
    """One batch element of the whole WaveNet stack.

    x_ref     : (1, H, W, Cin_p)   input (channels zero-padded to a multiple of 8)
    cc_ref    : (1, H, W, Ccc)     concat(c, context) conditioning (zero-padded)
    wfront_ref: (Cin_p, C)         front 1x1 conv weight
    wconv_ref : (L, K*K, C, 2C)    dilated conv weights, tap-major, f+g fused
    wcc_ref   : (L, Ccc, 2C)       fused 1x1 conditioning conv weights
    wrs_ref   : (L, C, 2C)         res/skip 1x1 conv weights (res | skip)
    misc_ref  : (L, 4, 2C)         rows: [bias_fg+bias_c+bias_h, bias_rs,
                                          multgate|0, b_front|0]
    skip_ref  : (1, H, W, C)       accumulated skip output
    hpad_ref  : (Hp, Wp, C)        VMEM halo scratch (zero padding region)
    """
    HW = H * W
    Cin_p = x_ref.shape[3]
    Ccc = cc_ref.shape[3]

    # Zero the halo scratch once per batch element (padding region must be 0).
    hpad_ref[...] = jnp.zeros_like(hpad_ref)

    # Front 1x1 conv fused into the same kernel (hides under the input DMA).
    b_front = misc_ref[0][3:4, :C]                       # (1, C)
    x2 = x_ref[0].reshape(HW, Cin_p)
    h = jnp.dot(x2, wfront_ref[...], preferred_element_type=jnp.float32) + b_front

    cc2 = cc_ref[0].reshape(HW, Ccc)                     # shared across layers
    skip = jnp.zeros((HW, C), jnp.float32)

    for l, (dh, dw) in enumerate(dils):                  # statically unrolled
        ml = misc_ref[l]                                 # (4, 2C) small load

        # Store current residual into the centre of the zero-padded halo
        # scratch (left is a multiple of 8 -> sublane-aligned store).
        hpad_ref[top:top + H, left:left + W, :] = h.reshape(H, W, C)

        # Fused filter+gate pre-activation: conditioning 1x1 conv (c and
        # context already concatenated) + sum of all three biases.
        acc = jnp.dot(cc2, wcc_ref[l], preferred_element_type=jnp.float32) + ml[0:1, :]

        # Dilated causal KxK conv as K*K shifted (HW,C)@(C,2C) matmuls with
        # filter and gate halves fused into one 2C-wide output.
        pw_l = dw * ((K - 1) // 2)
        for kh in range(K):
            r0 = top - dh * (K - 1) + kh * dh            # causal: only past rows
            for kw in range(K):
                c0 = left - pw_l + kw * dw
                tap = hpad_ref[r0:r0 + H, c0:c0 + W, :].reshape(HW, C)
                acc = acc + jnp.dot(tap, wconv_ref[l, kh * K + kw],
                                    preferred_element_type=jnp.float32)

        acts = jnp.tanh(acc[:, :C]) * jax.nn.sigmoid(acc[:, C:])

        # Fused res/skip 1x1 conv, then residual multgate update + skip accum.
        rs = jnp.dot(acts, wrs_ref[l], preferred_element_type=jnp.float32) + ml[1:2, :]
        gate = ml[2:3, :C]
        h = h + rs[:, :C] * gate
        skip = skip + rs[:, C:]

    skip_ref[0] = skip.reshape(H, W, C)


# ----------------------------------------------------------------------------
# Wrapper / parameter packing
# ----------------------------------------------------------------------------
def _pad_axis(a, axis, mult):
    pad = (-a.shape[axis]) % mult
    if pad == 0:
        return a
    widths = [(0, 0)] * a.ndim
    widths[axis] = (0, pad)
    return jnp.pad(a, widths)


def wavenet2d_hyper_multgate_forward(x, c, context, multgate, params, dil_h, dil_w, K=3):
    """Pallas implementation of Wavenet2DHyperMultGate.forward.
    Inputs are NCHW (PyTorch convention); output (accumulated skip) is NCHW."""
    B, _, H, W = x.shape
    C = params['b_front'].shape[0]
    L = len(dil_h)
    assert W % 8 == 0, "W must be a multiple of 8 so (H,W,C)<->(H*W,C) reshapes are pure retilings"

    # Channels-last layout; pad tiny channel dims to a multiple of 8 with zeros.
    x_nhwc = _pad_axis(jnp.transpose(x, (0, 2, 3, 1)), 3, 8)
    c_nhwc = jnp.transpose(c, (0, 2, 3, 1))
    ctx_nhwc = jnp.transpose(context, (0, 2, 3, 1))
    cc = _pad_axis(jnp.concatenate([c_nhwc, ctx_nhwc], axis=3), 3, 8)
    Cin_p, Ccc = x_nhwc.shape[3], cc.shape[3]

    # Front 1x1 conv weight (zero rows match the zero-padded input channels).
    w_front = _pad_axis(params['w_front'][:, :, 0, 0].T, 0, 8)          # (Cin_p, C)

    # Stack per-layer weights; keep filter+gate (and res+skip) halves fused.
    wconv_l, wcc_l, wrs_l, misc_l = [], [], [], []
    zc = jnp.zeros((C,), jnp.float32)
    for i in range(L):
        w_fg = jnp.transpose(params['w_fg'][i], (2, 3, 1, 0))            # (K,K,C,2C)
        wconv_l.append(w_fg.reshape(K * K, C, 2 * C))
        w_c = params['w_c'][i][:, :, 0, 0].T                             # (Ccin, 2C)
        w_h = params['w_h'][i][:, :, 0, 0].T                             # (Chyp, 2C)
        wcc_l.append(_pad_axis(jnp.concatenate([w_c, w_h], axis=0), 0, 8))
        wrs_l.append(params['w_rs'][i][:, :, 0, 0].T)                    # (C, 2C)
        bias_fg = params['b_fg'][i] + params['b_c'][i] + params['b_h'][i]  # (2C,)
        misc_l.append(jnp.stack([bias_fg,
                                 params['b_rs'][i],
                                 jnp.concatenate([multgate[i], zc]),
                                 jnp.concatenate([params['b_front'], zc])], axis=0))
    wconv = jnp.stack(wconv_l, 0)                                        # (L,K*K,C,2C)
    wcc = jnp.stack(wcc_l, 0)                                            # (L,Ccc,2C)
    assert wcc.shape[1] == Ccc
    wrs = jnp.stack(wrs_l, 0)                                            # (L,C,2C)
    misc = jnp.stack(misc_l, 0)                                          # (L,4,2C)

    # Halo geometry (static): enough zero padding for the largest dilation.
    top = max(dil_h[i] * (K - 1) for i in range(L))                      # causal top pad
    left = max(dil_w[i] * ((K - 1) // 2) for i in range(L))
    right = max(dil_w[i] * (K - 1) - dil_w[i] * ((K - 1) // 2) for i in range(L))
    left = ((left + 7) // 8) * 8                                         # align centre store
    Hp, Wp = H + top, left + W + right

    kernel = functools.partial(_wavenet_kernel, H=H, W=W, C=C, K=K,
                               dils=tuple(zip(dil_h, dil_w)), top=top, left=left)

    skip = pl.pallas_call(
        kernel,
        out_shape=jax.ShapeDtypeStruct((B, H, W, C), jnp.float32),
        grid=(B,),
        in_specs=[
            pl.BlockSpec((1, H, W, Cin_p), lambda b: (b, 0, 0, 0)),
            pl.BlockSpec((1, H, W, Ccc), lambda b: (b, 0, 0, 0)),
            # Weights: constant index maps -> DMA'd once, VMEM-resident.
            pl.BlockSpec((Cin_p, C), lambda b: (0, 0)),
            pl.BlockSpec((L, K * K, C, 2 * C), lambda b: (0, 0, 0, 0)),
            pl.BlockSpec((L, Ccc, 2 * C), lambda b: (0, 0, 0)),
            pl.BlockSpec((L, C, 2 * C), lambda b: (0, 0, 0)),
            pl.BlockSpec((L, 4, 2 * C), lambda b: (0, 0, 0)),
        ],
        out_specs=pl.BlockSpec((1, H, W, C), lambda b: (b, 0, 0, 0)),
        scratch_shapes=[pltpu.VMEM((Hp, Wp, C), jnp.float32)],
        compiler_params=pltpu.CompilerParams(dimension_semantics=("parallel",)),
    )(x_nhwc, cc, w_front, wconv, wcc, wrs, misc)

    # TODO(synk): for production H/W/C, add an H-tiled grid axis (with a
    # per-layer halo) and bf16 matmul inputs to fit v7x's 64 MiB VMEM budget.
    return jnp.transpose(skip, (0, 3, 1, 2))                             # back to NCHW


# ----------------------------------------------------------------------------
# Pure-JAX reference (mirrors the PyTorch module semantics, NCHW)
# ----------------------------------------------------------------------------
def _conv_nchw(x, w, b, dilation=(1, 1), padding=(0, 0)):
    y = jax.lax.conv_general_dilated(
        x, w, window_strides=(1, 1),
        padding=[(padding[0], padding[0]), (padding[1], padding[1])],
        rhs_dilation=dilation,
        dimension_numbers=('NCHW', 'OIHW', 'NCHW'))
    return y + b[None, :, None, None]


def reference_forward(x, c, context, multgate, params, dil_h, dil_w, K=3):
    h = _conv_nchw(x, params['w_front'], params['b_front'])
    C = params['b_front'].shape[0]
    skip = jnp.zeros_like(h)
    for i in range(len(dil_h)):
        dh, dw = dil_h[i], dil_w[i]
        ph, pw = dh * (K - 1), dw * (K - 1) // 2
        hfg = _conv_nchw(h, params['w_fg'][i], params['b_fg'][i], (dh, dw), (ph, pw))
        if ph:
            hfg = hfg[:, :, :-ph, :]                                     # causal trim
        cfg = _conv_nchw(c, params['w_c'][i], params['b_c'][i])
        xfg = _conv_nchw(context, params['w_h'][i], params['b_h'][i])
        ia = hfg + cfg + xfg
        acts = jnp.tanh(ia[:, :C]) * jax.nn.sigmoid(ia[:, C:])
        rs = _conv_nchw(acts, params['w_rs'][i], params['b_rs'][i])
        h = h + rs[:, :C] * multgate[i][None, :, None, None]
        skip = skip + rs[:, C:]
    return skip


# ----------------------------------------------------------------------------
# Deterministic synthetic parameters
# ----------------------------------------------------------------------------
def init_params(key, *, Cin, C, Ccin, Chyp, L, K):
    def normal(k, shape, scale):
        return scale * jax.random.normal(k, shape, jnp.float32)

    keys = iter(jax.random.split(key, 2 + 8 * L))
    p = {
        'w_front': normal(next(keys), (C, Cin, 1, 1), 1.0 / np.sqrt(Cin)),
        'b_front': normal(next(keys), (C,), 0.05),
        'w_fg': [], 'b_fg': [], 'w_c': [], 'b_c': [],
        'w_h': [], 'b_h': [], 'w_rs': [], 'b_rs': [],
    }
    for _ in range(L):
        p['w_fg'].append(normal(next(keys), (2 * C, C, K, K), 1.0 / np.sqrt(C * K * K)))
        p['b_fg'].append(normal(next(keys), (2 * C,), 0.05))
        p['w_c'].append(normal(next(keys), (2 * C, Ccin, 1, 1), 1.0 / np.sqrt(Ccin)))
        p['b_c'].append(normal(next(keys), (2 * C,), 0.05))
        p['w_h'].append(normal(next(keys), (2 * C, Chyp, 1, 1), 1.0 / np.sqrt(Chyp)))
        p['b_h'].append(normal(next(keys), (2 * C,), 0.05))
        p['w_rs'].append(normal(next(keys), (2 * C, C, 1, 1), 1.0 / np.sqrt(C)))
        p['b_rs'].append(normal(next(keys), (2 * C,), 0.05))
    return p


# ----------------------------------------------------------------------------
if __name__ == "__main__":
    # small shapes consistent with the module defaults
    B, Cin, H, W = 2, 1, 8, 16
    C = 16                         # residual = gate = skip channels
    Ccin, Chyp = 8, 7              # cin_channels, hyper_channels
    L, K = 3, 3                    # num_layers, kernel_size
    dil_h = [1, 2, 4]
    dil_w = [1, 1, 2]

    root = jax.random.PRNGKey(0)
    kx, kc, kh, kg, kp = jax.random.split(root, 5)
    x = jax.random.normal(kx, (B, Cin, H, W), jnp.float32)
    c = jax.random.normal(kc, (B, Ccin, H, W), jnp.float32)
    context = jax.random.normal(kh, (B, Chyp, H, W), jnp.float32)
    multgate = 0.5 * jax.random.normal(kg, (L, C), jnp.float32) + 1.0
    params = init_params(kp, Cin=Cin, C=C, Ccin=Ccin, Chyp=Chyp, L=L, K=K)

    out = wavenet2d_hyper_multgate_forward(x, c, context, multgate, params, dil_h, dil_w, K)
    out = jax.block_until_ready(out)

    ref = reference_forward(x, c, context, multgate, params, dil_h, dil_w, K)
    np.testing.assert_allclose(np.asarray(out), np.asarray(ref), rtol=1e-2, atol=1e-2)
    assert out.shape == (B, C, H, W)
    print("KERNEL_OK")
</pallas_src>

<mosaic_0001>
module attributes {stable_mosaic.version = 11 : i64} {
  func.func @_wavenet_kernel(%arg0: i32, %arg1: memref<1x8x16x8xf32, #tpu.memory_space<vmem>>, %arg2: memref<1x8x16x16xf32, #tpu.memory_space<vmem>>, %arg3: memref<8x16xf32, #tpu.memory_space<vmem>>, %arg4: memref<3x9x16x32xf32, #tpu.memory_space<vmem>>, %arg5: memref<3x16x32xf32, #tpu.memory_space<vmem>>, %arg6: memref<3x16x32xf32, #tpu.memory_space<vmem>>, %arg7: memref<3x4x32xf32, #tpu.memory_space<vmem>>, %arg8: memref<1x8x16x16xf32, #tpu.memory_space<vmem>>, %arg9: memref<16x26x16xf32, #tpu.memory_space<vmem>>) attributes {dimension_semantics = [#tpu.dimension_semantics<parallel>], iteration_bounds = array<i64: 2>, scalar_prefetch = 0 : i64, scratch_operands = 1 : i64, tpu.core_type = #tpu.core_type<tc>, window_params = [{transform_indices = @transform_0, window_bounds = array<i64: 1, 8, 16, 8>}, {transform_indices = @transform_1, window_bounds = array<i64: 1, 8, 16, 16>}, {pipeline_mode = #tpu.pipeline_mode<synchronous>, transform_indices = @transform_2, window_bounds = array<i64: 8, 16>}, {pipeline_mode = #tpu.pipeline_mode<synchronous>, transform_indices = @transform_3, window_bounds = array<i64: 3, 9, 16, 32>}, {pipeline_mode = #tpu.pipeline_mode<synchronous>, transform_indices = @transform_4, window_bounds = array<i64: 3, 16, 32>}, {pipeline_mode = #tpu.pipeline_mode<synchronous>, transform_indices = @transform_5, window_bounds = array<i64: 3, 16, 32>}, {pipeline_mode = #tpu.pipeline_mode<synchronous>, transform_indices = @transform_6, window_bounds = array<i64: 3, 4, 32>}, {transform_indices = @transform_7, window_bounds = array<i64: 1, 8, 16, 16>}]} {
    %cst = arith.constant 0.000000e+00 : f32
    %0 = vector.broadcast %cst : f32 to vector<16x26x16xf32>
    %c0 = arith.constant 0 : index
    %c0_0 = arith.constant 0 : index
    %c0_1 = arith.constant 0 : index
    %1 = vector.load %arg9[%c0, %c0_0, %c0_1] : memref<16x26x16xf32, #tpu.memory_space<vmem>>, vector<16x26x16xf32>
    tpu.vector_store %arg9[%c0, %c0_0, %c0_1], %0 {strides = array<i32>} : memref<16x26x16xf32, #tpu.memory_space<vmem>>, vector<16x26x16xf32>,
    %c0_2 = arith.constant 0 : index
    %c0_3 = arith.constant 0 : index
    %c0_4 = arith.constant 0 : index
    %2 = vector.load %arg7[%c0_2, %c0_3, %c0_4] : memref<3x4x32xf32, #tpu.memory_space<vmem>>, vector<1x4x32xf32>
    %3 = vector.shape_cast %2 : vector<1x4x32xf32> to vector<4x32xf32>
    %4 = vector.extract_strided_slice %3 {offsets = [3, 0], sizes = [1, 16], strides = [1, 1]} : vector<4x32xf32> to vector<1x16xf32>
    %c0_5 = arith.constant 0 : index
    %c0_6 = arith.constant 0 : index
    %c0_7 = arith.constant 0 : index
    %c0_8 = arith.constant 0 : index
    %5 = vector.load %arg1[%c0_5, %c0_6, %c0_7, %c0_8] : memref<1x8x16x8xf32, #tpu.memory_space<vmem>>, vector<1x8x16x8xf32>
    %6 = vector.shape_cast %5 : vector<1x8x16x8xf32> to vector<8x16x8xf32>
    %7 = vector.shape_cast %6 : vector<8x16x8xf32> to vector<128x8xf32>
    %c0_9 = arith.constant 0 : index
    %c0_10 = arith.constant 0 : index
    %8 = vector.load %arg3[%c0_9, %c0_10] : memref<8x16xf32, #tpu.memory_space<vmem>>, vector<8x16xf32>
    %cst_11 = arith.constant dense<0.000000e+00> : vector<128x16xf32>
    %9 = tpu.matmul %7, %8, %cst_11 {dimension_numbers = #tpu.dot_dimension_numbers<[1], [0], [0], [1], [0, 0, 1, 1], [], []>} : vector<128x8xf32>, vector<8x16xf32>, vector<128x16xf32> -> vector<128x16xf32>
    %10 = vector.broadcast %4 : vector<1x16xf32> to vector<128x16xf32>
    %11 = arith.addf %9, %10 : vector<128x16xf32>
    %c0_12 = arith.constant 0 : index
    %c0_13 = arith.constant 0 : index
    %c0_14 = arith.constant 0 : index
    %c0_15 = arith.constant 0 : index
    %12 = vector.load %arg2[%c0_12, %c0_13, %c0_14, %c0_15] : memref<1x8x16x16xf32, #tpu.memory_space<vmem>>, vector<1x8x16x16xf32>
    %13 = vector.shape_cast %12 : vector<1x8x16x16xf32> to vector<8x16x16xf32>
    %14 = vector.shape_cast %13 : vector<8x16x16xf32> to vector<128x16xf32>
    %cst_16 = arith.constant 0.000000e+00 : f32
    %15 = vector.broadcast %cst_16 : f32 to vector<128x16xf32>
    %c0_17 = arith.constant 0 : index
    %c0_18 = arith.constant 0 : index
    %c0_19 = arith.constant 0 : index
    %16 = vector.load %arg7[%c0_17, %c0_18, %c0_19] : memref<3x4x32xf32, #tpu.memory_space<vmem>>, vector<1x4x32xf32>
    %17 = vector.shape_cast %16 : vector<1x4x32xf32> to vector<4x32xf32>
    %18 = vector.shape_cast %11 : vector<128x16xf32> to vector<8x16x16xf32>
    %c8 = arith.constant 8 : index
    %c8_20 = arith.constant 8 : index
    %c0_21 = arith.constant 0 : index
    %19 = vector.load %arg9[%c8, %c8_20, %c0_21] : memref<16x26x16xf32, #tpu.memory_space<vmem>>, vector<8x16x16xf32>
    tpu.vector_store %arg9[%c8, %c8_20, %c0_21], %18 {strides = array<i32>} : memref<16x26x16xf32, #tpu.memory_space<vmem>>, vector<8x16x16xf32>,
    %c0_22 = arith.constant 0 : index
    %c0_23 = arith.constant 0 : index
    %c0_24 = arith.constant 0 : index
    %20 = vector.load %arg5[%c0_22, %c0_23, %c0_24] : memref<3x16x32xf32, #tpu.memory_space<vmem>>, vector<1x16x32xf32>
    %21 = vector.shape_cast %20 : vector<1x16x32xf32> to vector<16x32xf32>
    %cst_25 = arith.constant dense<0.000000e+00> : vector<128x32xf32>
    %22 = tpu.matmul %14, %21, %cst_25 {dimension_numbers = #tpu.dot_dimension_numbers<[1], [0], [0], [1], [0, 0, 1, 1], [], []>} : vector<128x16xf32>, vector<16x32xf32>, vector<128x32xf32> -> vector<128x32xf32>
    %23 = vector.extract_strided_slice %17 {offsets = [0, 0], sizes = [1, 32], strides = [1, 1]} : vector<4x32xf32> to vector<1x32xf32>
    %24 = vector.broadcast %23 : vector<1x32xf32> to vector<128x32xf32>
    %25 = arith.addf %22, %24 : vector<128x32xf32>
    %c6 = arith.constant 6 : index
    %c7 = arith.constant 7 : index
    %c0_26 = arith.constant 0 : index
    %26 = vector.load %arg9[%c6, %c7, %c0_26] : memref<16x26x16xf32, #tpu.memory_space<vmem>>, vector<8x16x16xf32>
    %27 = vector.shape_cast %26 : vector<8x16x16xf32> to vector<128x16xf32>
    %c0_27 = arith.constant 0 : index
    %c0_28 = arith.constant 0 : index
    %c0_29 = arith.constant 0 : index
    %c0_30 = arith.constant 0 : index
    %28 = vector.load %arg4[%c0_27, %c0_28, %c0_29, %c0_30] : memref<3x9x16x32xf32, #tpu.memory_space<vmem>>, vector<1x1x16x32xf32>
    %29 = vector.shape_cast %28 : vector<1x1x16x32xf32> to vector<16x32xf32>
    %cst_31 = arith.constant dense<0.000000e+00> : vector<128x32xf32>
    %30 = tpu.matmul %27, %29, %cst_31 {dimension_numbers = #tpu.dot_dimension_numbers<[1], [0], [0], [1], [0, 0, 1, 1], [], []>} : vector<128x16xf32>, vector<16x32xf32>, vector<128x32xf32> -> vector<128x32xf32>
    %31 = arith.addf %25, %30 : vector<128x32xf32>
    %c6_32 = arith.constant 6 : index
    %c8_33 = arith.constant 8 : index
    %c0_34 = arith.constant 0 : index
    %32 = vector.load %arg9[%c6_32, %c8_33, %c0_34] : memref<16x26x16xf32, #tpu.memory_space<vmem>>, vector<8x16x16xf32>
    %33 = vector.shape_cast %32 : vector<8x16x16xf32> to vector<128x16xf32>
    %c0_35 = arith.constant 0 : index
    %c1 = arith.constant 1 : index
    %c0_36 = arith.constant 0 : index
    %c0_37 = arith.constant 0 : index
    %34 = vector.load %arg4[%c0_35, %c1, %c0_36, %c0_37] : memref<3x9x16x32xf32, #tpu.memory_space<vmem>>, vector<1x1x16x32xf32>
    %35 = vector.shape_cast %34 : vector<1x1x16x32xf32> to vector<16x32xf32>
    %cst_38 = arith.constant dense<0.000000e+00> : vector<128x32xf32>
    %36 = tpu.matmul %33, %35, %cst_38 {dimension_numbers = #tpu.dot_dimension_numbers<[1], [0], [0], [1], [0, 0, 1, 1], [], []>} : vector<128x16xf32>, vector<16x32xf32>, vector<128x32xf32> -> vector<128x32xf32>
    %37 = arith.addf %31, %36 : vector<128x32xf32>
    %c6_39 = arith.constant 6 : index
    %c9 = arith.constant 9 : index
    %c0_40 = arith.constant 0 : index
    %38 = vector.load %arg9[%c6_39, %c9, %c0_40] : memref<16x26x16xf32, #tpu.memory_space<vmem>>, vector<8x16x16xf32>
    %39 = vector.shape_cast %38 : vector<8x16x16xf32> to vector<128x16xf32>
    %c0_41 = arith.constant 0 : index
    %c2 = arith.constant 2 : index
    %c0_42 = arith.constant 0 : index
    %c0_43 = arith.constant 0 : index
    %40 = vector.load %arg4[%c0_41, %c2, %c0_42, %c0_43] : memref<3x9x16x32xf32, #tpu.memory_space<vmem>>, vector<1x1x16x32xf32>
    %41 = vector.shape_cast %40 : vector<1x1x16x32xf32> to vector<16x32xf32>
    %cst_44 = arith.constant dense<0.000000e+00> : vector<128x32xf32>
    %42 = tpu.matmul %39, %41, %cst_44 {dimension_numbers = #tpu.dot_dimension_numbers<[1], [0], [0], [1], [0, 0, 1, 1], [], []>} : vector<128x16xf32>, vector<16x32xf32>, vector<128x32xf32> -> vector<128x32xf32>
    %43 = arith.addf %37, %42 : vector<128x32xf32>
    %c7_45 = arith.constant 7 : index
    %c7_46 = arith.constant 7 : index
    %c0_47 = arith.constant 0 : index
    %44 = vector.load %arg9[%c7_45, %c7_46, %c0_47] : memref<16x26x16xf32, #tpu.memory_space<vmem>>, vector<8x16x16xf32>
    %45 = vector.shape_cast %44 : vector<8x16x16xf32> to vector<128x16xf32>
    %c0_48 = arith.constant 0 : index
    %c3 = arith.constant 3 : index
    %c0_49 = arith.constant 0 : index
    %c0_50 = arith.constant 0 : index
    %46 = vector.load %arg4[%c0_48, %c3, %c0_49, %c0_50] : memref<3x9x16x32xf32, #tpu.memory_space<vmem>>, vector<1x1x16x32xf32>
    %47 = vector.shape_cast %46 : vector<1x1x16x32xf32> to vector<16x32xf32>
    %cst_51 = arith.constant dense<0.000000e+00> : vector<128x32xf32>
    %48 = tpu.matmul %45, %47, %cst_51 {dimension_numbers = #tpu.dot_dimension_numbers<[1], [0], [0], [1], [0, 0, 1, 1], [], []>} : vector<128x16xf32>, vector<16x32xf32>, vector<128x32xf32> -> vector<128x32xf32>
    %49 = arith.addf %43, %48 : vector<128x32xf32>
    %c7_52 = arith.constant 7 : index
    %c8_53 = arith.constant 8 : index
    %c0_54 = arith.constant 0 : index
    %50 = vector.load %arg9[%c7_52, %c8_53, %c0_54] : memref<16x26x16xf32, #tpu.memory_space<vmem>>, vector<8x16x16xf32>
    %51 = vector.shape_cast %50 : vector<8x16x16xf32> to vector<128x16xf32>
    %c0_55 = arith.constant 0 : index
    %c4 = arith.constant 4 : index
    %c0_56 = arith.constant 0 : index
    %c0_57 = arith.constant 0 : index
    %52 = vector.load %arg4[%c0_55, %c4, %c0_56, %c0_57] : memref<3x9x16x32xf32, #tpu.memory_space<vmem>>, vector<1x1x16x32xf32>
    %53 = vector.shape_cast %52 : vector<1x1x16x32xf32> to vector<16x32xf32>
    %cst_58 = arith.constant dense<0.000000e+00> : vector<128x32xf32>
    %54 = tpu.matmul %51, %53, %cst_58 {dimension_numbers = #tpu.dot_dimension_numbers<[1], [0], [0], [1], [0, 0, 1, 1], [], []>} : vector<128x16xf32>, vector<16x32xf32>, vector<128x32xf32> -> vector<128x32xf32>
    %55 = arith.addf %49, %54 : vector<128x32xf32>
    %c7_59 = arith.constant 7 : index
    %c9_60 = arith.constant 9 : index
    %c0_61 = arith.constant 0 : index
    %56 = vector.load %arg9[%c7_59, %c9_60, %c0_61] : memref<16x26x16xf32, #tpu.memory_space<vmem>>, vector<8x16x16xf32>
    %57 = vector.shape_cast %56 : vector<8x16x16xf32> to vector<128x16xf32>
    %c0_62 = arith.constant 0 : index
    %c5 = arith.constant 5 : index
    %c0_63 = arith.constant 0 : index
    %c0_64 = arith.constant 0 : index
    %58 = vector.load %arg4[%c0_62, %c5, %c0_63, %c0_64] : memref<3x9x16x32xf32, #tpu.memory_space<vmem>>, vector<1x1x16x32xf32>
    %59 = vector.shape_cast %58 : vector<1x1x16x32xf32> to vector<16x32xf32>
    %cst_65 = arith.constant dense<0.000000e+00> : vector<128x32xf32>
    %60 = tpu.matmul %57, %59, %cst_65 {dimension_numbers = #tpu.dot_dimension_numbers<[1], [0], [0], [1], [0, 0, 1, 1], [], []>} : vector<128x16xf32>, vector<16x32xf32>, vector<128x32xf32> -> vector<128x32xf32>
    %61 = arith.addf %55, %60 : vector<128x32xf32>
    %c8_66 = arith.constant 8 : index
    %c7_67 = arith.constant 7 : index
    %c0_68 = arith.constant 0 : index
    %62 = vector.load %arg9[%c8_66, %c7_67, %c0_68] : memref<16x26x16xf32, #tpu.memory_space<vmem>>, vector<8x16x16xf32>
    %63 = vector.shape_cast %62 : vector<8x16x16xf32> to vector<128x16xf32>
    %c0_69 = arith.constant 0 : index
    %c6_70 = arith.constant 6 : index
    %c0_71 = arith.constant 0 : index
    %c0_72 = arith.constant 0 : index
    %64 = vector.load %arg4[%c0_69, %c6_70, %c0_71, %c0_72] : memref<3x9x16x32xf32, #tpu.memory_space<vmem>>, vector<1x1x16x32xf32>
    %65 = vector.shape_cast %64 : vector<1x1x16x32xf32> to vector<16x32xf32>
    %cst_73 = arith.constant dense<0.000000e+00> : vector<128x32xf32>
    %66 = tpu.matmul %63, %65, %cst_73 {dimension_numbers = #tpu.dot_dimension_numbers<[1], [0], [0], [1], [0, 0, 1, 1], [], []>} : vector<128x16xf32>, vector<16x32xf32>, vector<128x32xf32> -> vector<128x32xf32>
    %67 = arith.addf %61, %66 : vector<128x32xf32>
    %c8_74 = arith.constant 8 : index
    %c8_75 = arith.constant 8 : index
    %c0_76 = arith.constant 0 : index
    %68 = vector.load %arg9[%c8_74, %c8_75, %c0_76] : memref<16x26x16xf32, #tpu.memory_space<vmem>>, vector<8x16x16xf32>
    %69 = vector.shape_cast %68 : vector<8x16x16xf32> to vector<128x16xf32>
    %c0_77 = arith.constant 0 : index
    %c7_78 = arith.constant 7 : index
    %c0_79 = arith.constant 0 : index
    %c0_80 = arith.constant 0 : index
    %70 = vector.load %arg4[%c0_77, %c7_78, %c0_79, %c0_80] : memref<3x9x16x32xf32, #tpu.memory_space<vmem>>, vector<1x1x16x32xf32>
    %71 = vector.shape_cast %70 : vector<1x1x16x32xf32> to vector<16x32xf32>
    %cst_81 = arith.constant dense<0.000000e+00> : vector<128x32xf32>
    %72 = tpu.matmul %69, %71, %cst_81 {dimension_numbers = #tpu.dot_dimension_numbers<[1], [0], [0], [1], [0, 0, 1, 1], [], []>} : vector<128x16xf32>, vector<16x32xf32>, vector<128x32xf32> -> vector<128x32xf32>
    %73 = arith.addf %67, %72 : vector<128x32xf32>
    %c8_82 = arith.constant 8 : index
    %c9_83 = arith.constant 9 : index
    %c0_84 = arith.constant 0 : index
    %74 = vector.load %arg9[%c8_82, %c9_83, %c0_84] : memref<16x26x16xf32, #tpu.memory_space<vmem>>, vector<8x16x16xf32>
    %75 = vector.shape_cast %74 : vector<8x16x16xf32> to vector<128x16xf32>
    %c0_85 = arith.constant 0 : index
    %c8_86 = arith.constant 8 : index
    %c0_87 = arith.constant 0 : index
    %c0_88 = arith.constant 0 : index
    %76 = vector.load %arg4[%c0_85, %c8_86, %c0_87, %c0_88] : memref<3x9x16x32xf32, #tpu.memory_space<vmem>>, vector<1x1x16x32xf32>
    %77 = vector.shape_cast %76 : vector<1x1x16x32xf32> to vector<16x32xf32>
    %cst_89 = arith.constant dense<0.000000e+00> : vector<128x32xf32>
    %78 = tpu.matmul %75, %77, %cst_89 {dimension_numbers = #tpu.dot_dimension_numbers<[1], [0], [0], [1], [0, 0, 1, 1], [], []>} : vector<128x16xf32>, vector<16x32xf32>, vector<128x32xf32> -> vector<128x32xf32>
    %79 = arith.addf %73, %78 : vector<128x32xf32>
    %80 = vector.extract_strided_slice %79 {offsets = [0, 0], sizes = [128, 16], strides = [1, 1]} : vector<128x32xf32> to vector<128x16xf32>
    %81 = math.tanh %80 : vector<128x16xf32>
    %82 = vector.extract_strided_slice %79 {offsets = [0, 16], sizes = [128, 16], strides = [1, 1]} : vector<128x32xf32> to vector<128x16xf32>
    %83 = arith.negf %82 : vector<128x16xf32>
    %84 = math.exp %83 : vector<128x16xf32>
    %cst_90 = arith.constant 1.000000e+00 : f32
    %85 = vector.broadcast %cst_90 : f32 to vector<128x16xf32>
    %86 = arith.addf %85, %84 : vector<128x16xf32>
    %87 = arith.divf %85, %86 : vector<128x16xf32>
    %88 = arith.mulf %81, %87 : vector<128x16xf32>
    %c0_91 = arith.constant 0 : index
    %c0_92 = arith.constant 0 : index
    %c0_93 = arith.constant 0 : index
    %89 = vector.load %arg6[%c0_91, %c0_92, %c0_93] : memref<3x16x32xf32, #tpu.memory_space<vmem>>, vector<1x16x32xf32>
    %90 = vector.shape_cast %89 : vector<1x16x32xf32> to vector<16x32xf32>
    %cst_94 = arith.constant dense<0.000000e+00> : vector<128x32xf32>
    %91 = tpu.matmul %88, %90, %cst_94 {dimension_numbers = #tpu.dot_dimension_numbers<[1], [0], [0], [1], [0, 0, 1, 1], [], []>} : vector<128x16xf32>, vector<16x32xf32>, vector<128x32xf32> -> vector<128x32xf32>
    %92 = vector.extract_strided_slice %17 {offsets = [1, 0], sizes = [1, 32], strides = [1, 1]} : vector<4x32xf32> to vector<1x32xf32>
    %93 = vector.broadcast %92 : vector<1x32xf32> to vector<128x32xf32>
    %94 = arith.addf %91, %93 : vector<128x32xf32>
    %95 = vector.extract_strided_slice %17 {offsets = [2, 0], sizes = [1, 16], strides = [1, 1]} : vector<4x32xf32> to vector<1x16xf32>
    %96 = vector.extract_strided_slice %94 {offsets = [0, 0], sizes = [128, 16], strides = [1, 1]} : vector<128x32xf32> to vector<128x16xf32>
    %97 = vector.broadcast %95 : vector<1x16xf32> to vector<128x16xf32>
    %98 = arith.mulf %96, %97 : vector<128x16xf32>
    %99 = arith.addf %11, %98 : vector<128x16xf32>
    %100 = vector.extract_strided_slice %94 {offsets = [0, 16], sizes = [128, 16], strides = [1, 1]} : vector<128x32xf32> to vector<128x16xf32>
    %101 = arith.addf %15, %100 : vector<128x16xf32>
    %c1_95 = arith.constant 1 : index
    %c0_96 = arith.constant 0 : index
    %c0_97 = arith.constant 0 : index
    %102 = vector.load %arg7[%c1_95, %c0_96, %c0_97] : memref<3x4x32xf32, #tpu.memory_space<vmem>>, vector<1x4x32xf32>
    %103 = vector.shape_cast %102 : vector<1x4x32xf32> to vector<4x32xf32>
    %104 = vector.shape_cast %99 : vector<128x16xf32> to vector<8x16x16xf32>
    %c8_98 = arith.constant 8 : index
    %c8_99 = arith.constant 8 : index
    %c0_100 = arith.constant 0 : index
    %105 = vector.load %arg9[%c8_98, %c8_99, %c0_100] : memref<16x26x16xf32, #tpu.memory_space<vmem>>, vector<8x16x16xf32>
    tpu.vector_store %arg9[%c8_98, %c8_99, %c0_100], %104 {strides = array<i32>} : memref<16x26x16xf32, #tpu.memory_space<vmem>>, vector<8x16x16xf32>,
    %c1_101 = arith.constant 1 : index
    %c0_102 = arith.constant 0 : index
    %c0_103 = arith.constant 0 : index
    %106 = vector.load %arg5[%c1_101, %c0_102, %c0_103] : memref<3x16x32xf32, #tpu.memory_space<vmem>>, vector<1x16x32xf32>
    %107 = vector.shape_cast %106 : vector<1x16x32xf32> to vector<16x32xf32>
    %cst_104 = arith.constant dense<0.000000e+00> : vector<128x32xf32>
    %108 = tpu.matmul %14, %107, %cst_104 {dimension_numbers = #tpu.dot_dimension_numbers<[1], [0], [0], [1], [0, 0, 1, 1], [], []>} : vector<128x16xf32>, vector<16x32xf32>, vector<128x32xf32> -> vector<128x32xf32>
    %109 = vector.extract_strided_slice %103 {offsets = [0, 0], sizes = [1, 32], strides = [1, 1]} : vector<4x32xf32> to vector<1x32xf32>
    %110 = vector.broadcast %109 : vector<1x32xf32> to vector<128x32xf32>
    %111 = arith.addf %108, %110 : vector<128x32xf32>
    %c4_105 = arith.constant 4 : index
    %c7_106 = arith.constant 7 : index
    %c0_107 = arith.constant 0 : index
    %112 = vector.load %arg9[%c4_105, %c7_106, %c0_107] : memref<16x26x16xf32, #tpu.memory_space<vmem>>, vector<8x16x16xf32>
    %113 = vector.shape_cast %112 : vector<8x16x16xf32> to vector<128x16xf32>
    %c1_108 = arith.constant 1 : index
    %c0_109 = arith.constant 0 : index
    %c0_110 = arith.constant 0 : index
    %c0_111 = arith.constant 0 : index
    %114 = vector.load %arg4[%c1_108, %c0_109, %c0_110, %c0_111] : memref<3x9x16x32xf32, #tpu.memory_space<vmem>>, vector<1x1x16x32xf32>
    %115 = vector.shape_cast %114 : vector<1x1x16x32xf32> to vector<16x32xf32>
    %cst_112 = arith.constant dense<0.000000e+00> : vector<128x32xf32>
    %116 = tpu.matmul %113, %115, %cst_112 {dimension_numbers = #tpu.dot_dimension_numbers<[1], [0], [0], [1], [0, 0, 1, 1], [], []>} : vector<128x16xf32>, vector<16x32xf32>, vector<128x32xf32> -> vector<128x32xf32>
    %117 = arith.addf %111, %116 : vector<128x32xf32>
    %c4_113 = arith.constant 4 : index
    %c8_114 = arith.constant 8 : index
    %c0_115 = arith.constant 0 : index
    %118 = vector.load %arg9[%c4_113, %c8_114, %c0_115] : memref<16x26x16xf32, #tpu.memory_space<vmem>>, vector<8x16x16xf32>
    %119 = vector.shape_cast %118 : vector<8x16x16xf32> to vector<128x16xf32>
    %c1_116 = arith.constant 1 : index
    %c1_117 = arith.constant 1 : index
    %c0_118 = arith.constant 0 : index
    %c0_119 = arith.constant 0 : index
    %120 = vector.load %arg4[%c1_116, %c1_117, %c0_118, %c0_119] : memref<3x9x16x32xf32, #tpu.memory_space<vmem>>, vector<1x1x16x32xf32>
    %121 = vector.shape_cast %120 : vector<1x1x16x32xf32> to vector<16x32xf32>
    %cst_120 = arith.constant dense<0.000000e+00> : vector<128x32xf32>
    %122 = tpu.matmul %119, %121, %cst_120 {dimension_numbers = #tpu.dot_dimension_numbers<[1], [0], [0], [1], [0, 0, 1, 1], [], []>} : vector<128x16xf32>, vector<16x32xf32>, vector<128x32xf32> -> vector<128x32xf32>
    %123 = arith.addf %117, %122 : vector<128x32xf32>
    %c4_121 = arith.constant 4 : index
    %c9_122 = arith.constant 9 : index
    %c0_123 = arith.constant 0 : index
    %124 = vector.load %arg9[%c4_121, %c9_122, %c0_123] : memref<16x26x16xf32, #tpu.memory_space<vmem>>, vector<8x16x16xf32>
    %125 = vector.shape_cast %124 : vector<8x16x16xf32> to vector<128x16xf32>
    %c1_124 = arith.constant 1 : index
    %c2_125 = arith.constant 2 : index
    %c0_126 = arith.constant 0 : index
    %c0_127 = arith.constant 0 : index
    %126 = vector.load %arg4[%c1_124, %c2_125, %c0_126, %c0_127] : memref<3x9x16x32xf32, #tpu.memory_space<vmem>>, vector<1x1x16x32xf32>
    %127 = vector.shape_cast %126 : vector<1x1x16x32xf32> to vector<16x32xf32>
    %cst_128 = arith.constant dense<0.000000e+00> : vector<128x32xf32>
    %128 = tpu.matmul %125, %127, %cst_128 {dimension_numbers = #tpu.dot_dimension_numbers<[1], [0], [0], [1], [0, 0, 1, 1], [], []>} : vector<128x16xf32>, vector<16x32xf32>, vector<128x32xf32> -> vector<128x32xf32>
    %129 = arith.addf %123, %128 : vector<128x32xf32>
    %c6_129 = arith.constant 6 : index
    %c7_130 = arith.constant 7 : index
    %c0_131 = arith.constant 0 : index
    %130 = vector.load %arg9[%c6_129, %c7_130, %c0_131] : memref<16x26x16xf32, #tpu.memory_space<vmem>>, vector<8x16x16xf32>
    %131 = vector.shape_cast %130 : vector<8x16x16xf32> to vector<128x16xf32>
    %c1_132 = arith.constant 1 : index
    %c3_133 = arith.constant 3 : index
    %c0_134 = arith.constant 0 : index
    %c0_135 = arith.constant 0 : index
    %132 = vector.load %arg4[%c1_132, %c3_133, %c0_134, %c0_135] : memref<3x9x16x32xf32, #tpu.memory_space<vmem>>, vector<1x1x16x32xf32>
    %133 = vector.shape_cast %132 : vector<1x1x16x32xf32> to vector<16x32xf32>
    %cst_136 = arith.constant dense<0.000000e+00> : vector<128x32xf32>
    %134 = tpu.matmul %131, %133, %cst_136 {dimension_numbers = #tpu.dot_dimension_numbers<[1], [0], [0], [1], [0, 0, 1, 1], [], []>} : vector<128x16xf32>, vector<16x32xf32>, vector<128x32xf32> -> vector<128x32xf32>
    %135 = arith.addf %129, %134 : vector<128x32xf32>
    %c6_137 = arith.constant 6 : index
    %c8_138 = arith.constant 8 : index
    %c0_139 = arith.constant 0 : index
    %136 = vector.load %arg9[%c6_137, %c8_138, %c0_139] : memref<16x26x16xf32, #tpu.memory_space<vmem>>, vector<8x16x16xf32>
    %137 = vector.shape_cast %136 : vector<8x16x16xf32> to vector<128x16xf32>
    %c1_140 = arith.constant 1 : index
    %c4_141 = arith.constant 4 : index
    %c0_142 = arith.constant 0 : index
    %c0_143 = arith.constant 0 : index
    %138 = vector.load %arg4[%c1_140, %c4_141, %c0_142, %c0_143] : memref<3x9x16x32xf32, #tpu.memory_space<vmem>>, vector<1x1x16x32xf32>
    %139 = vector.shape_cast %138 : vector<1x1x16x32xf32> to vector<16x32xf32>
    %cst_144 = arith.constant dense<0.000000e+00> : vector<128x32xf32>
    %140 = tpu.matmul %137, %139, %cst_144 {dimension_numbers = #tpu.dot_dimension_numbers<[1], [0], [0], [1], [0, 0, 1, 1], [], []>} : vector<128x16xf32>, vector<16x32xf32>, vector<128x32xf32> -> vector<128x32xf32>
    %141 = arith.addf %135, %140 : vector<128x32xf32>
    %c6_145 = arith.constant 6 : index
    %c9_146 = arith.constant 9 : index
    %c0_147 = arith.constant 0 : index
    %142 = vector.load %arg9[%c6_145, %c9_146, %c0_147] : memref<16x26x16xf32, #tpu.memory_space<vmem>>, vector<8x16x16xf32>
    %143 = vector.shape_cast %142 : vector<8x16x16xf32> to vector<128x16xf32>
    %c1_148 = arith.constant 1 : index
    %c5_149 = arith.constant 5 : index
    %c0_150 = arith.constant 0 : index
    %c0_151 = arith.constant 0 : index
    %144 = vector.load %arg4[%c1_148, %c5_149, %c0_150, %c0_151] : memref<3x9x16x32xf32, #tpu.memory_space<vmem>>, vector<1x1x16x32xf32>
    %145 = vector.shape_cast %144 : vector<1x1x16x32xf32> to vector<16x32xf32>
    %cst_152 = arith.constant dense<0.000000e+00> : vector<128x32xf32>
    %146 = tpu.matmul %143, %145, %cst_152 {dimension_numbers = #tpu.dot_dimension_numbers<[1], [0], [0], [1], [0, 0, 1, 1], [], []>} : vector<128x16xf32>, vector<16x32xf32>, vector<128x32xf32> -> vector<128x32xf32>
    %147 = arith.addf %141, %146 : vector<128x32xf32>
    %c8_153 = arith.constant 8 : index
    %c7_154 = arith.constant 7 : index
    %c0_155 = arith.constant 0 : index
    %148 = vector.load %arg9[%c8_153, %c7_154, %c0_155] : memref<16x26x16xf32, #tpu.memory_space<vmem>>, vector<8x16x16xf32>
    %149 = vector.shape_cast %148 : vector<8x16x16xf32> to vector<128x16xf32>
    %c1_156 = arith.constant 1 : index
    %c6_157 = arith.constant 6 : index
    %c0_158 = arith.constant 0 : index
    %c0_159 = arith.constant 0 : index
    %150 = vector.load %arg4[%c1_156, %c6_157, %c0_158, %c0_159] : memref<3x9x16x32xf32, #tpu.memory_space<vmem>>, vector<1x1x16x32xf32>
    %151 = vector.shape_cast %150 : vector<1x1x16x32xf32> to vector<16x32xf32>
    %cst_160 = arith.constant dense<0.000000e+00> : vector<128x32xf32>
    %152 = tpu.matmul %149, %151, %cst_160 {dimension_numbers = #tpu.dot_dimension_numbers<[1], [0], [0], [1], [0, 0, 1, 1], [], []>} : vector<128x16xf32>, vector<16x32xf32>, vector<128x32xf32> -> vector<128x32xf32>
    %153 = arith.addf %147, %152 : vector<128x32xf32>
    %c8_161 = arith.constant 8 : index
    %c8_162 = arith.constant 8 : index
    %c0_163 = arith.constant 0 : index
    %154 = vector.load %arg9[%c8_161, %c8_162, %c0_163] : memref<16x26x16xf32, #tpu.memory_space<vmem>>, vector<8x16x16xf32>
    %155 = vector.shape_cast %154 : vector<8x16x16xf32> to vector<128x16xf32>
    %c1_164 = arith.constant 1 : index
    %c7_165 = arith.constant 7 : index
    %c0_166 = arith.constant 0 : index
    %c0_167 = arith.constant 0 : index
    %156 = vector.load %arg4[%c1_164, %c7_165, %c0_166, %c0_167] : memref<3x9x16x32xf32, #tpu.memory_space<vmem>>, vector<1x1x16x32xf32>
    %157 = vector.shape_cast %156 : vector<1x1x16x32xf32> to vector<16x32xf32>
    %cst_168 = arith.constant dense<0.000000e+00> : vector<128x32xf32>
    %158 = tpu.matmul %155, %157, %cst_168 {dimension_numbers = #tpu.dot_dimension_numbers<[1], [0], [0], [1], [0, 0, 1, 1], [], []>} : vector<128x16xf32>, vector<16x32xf32>, vector<128x32xf32> -> vector<128x32xf32>
    %159 = arith.addf %153, %158 : vector<128x32xf32>
    %c8_169 = arith.constant 8 : index
    %c9_170 = arith.constant 9 : index
    %c0_171 = arith.constant 0 : index
    %160 = vector.load %arg9[%c8_169, %c9_170, %c0_171] : memref<16x26x16xf32, #tpu.memory_space<vmem>>, vector<8x16x16xf32>
    %161 = vector.shape_cast %160 : vector<8x16x16xf32> to vector<128x16xf32>
    %c1_172 = arith.constant 1 : index
    %c8_173 = arith.constant 8 : index
    %c0_174 = arith.constant 0 : index
    %c0_175 = arith.constant 0 : index
    %162 = vector.load %arg4[%c1_172, %c8_173, %c0_174, %c0_175] : memref<3x9x16x32xf32, #tpu.memory_space<vmem>>, vector<1x1x16x32xf32>
    %163 = vector.shape_cast %162 : vector<1x1x16x32xf32> to vector<16x32xf32>
    %cst_176 = arith.constant dense<0.000000e+00> : vector<128x32xf32>
    %164 = tpu.matmul %161, %163, %cst_176 {dimension_numbers = #tpu.dot_dimension_numbers<[1], [0], [0], [1], [0, 0, 1, 1], [], []>} : vector<128x16xf32>, vector<16x32xf32>, vector<128x32xf32> -> vector<128x32xf32>
    %165 = arith.addf %159, %164 : vector<128x32xf32>
    %166 = vector.extract_strided_slice %165 {offsets = [0, 0], sizes = [128, 16], strides = [1, 1]} : vector<128x32xf32> to vector<128x16xf32>
    %167 = math.tanh %166 : vector<128x16xf32>
    %168 = vector.extract_strided_slice %165 {offsets = [0, 16], sizes = [128, 16], strides = [1, 1]} : vector<128x32xf32> to vector<128x16xf32>
    %169 = arith.negf %168 : vector<128x16xf32>
    %170 = math.exp %169 : vector<128x16xf32>
    %cst_177 = arith.constant 1.000000e+00 : f32
    %171 = vector.broadcast %cst_177 : f32 to vector<128x16xf32>
    %172 = arith.addf %171, %170 : vector<128x16xf32>
    %173 = arith.divf %171, %172 : vector<128x16xf32>
    %174 = arith.mulf %167, %173 : vector<128x16xf32>
    %c1_178 = arith.constant 1 : index
    %c0_179 = arith.constant 0 : index
    %c0_180 = arith.constant 0 : index
    %175 = vector.load %arg6[%c1_178, %c0_179, %c0_180] : memref<3x16x32xf32, #tpu.memory_space<vmem>>, vector<1x16x32xf32>
    %176 = vector.shape_cast %175 : vector<1x16x32xf32> to vector<16x32xf32>
    %cst_181 = arith.constant dense<0.000000e+00> : vector<128x32xf32>
    %177 = tpu.matmul %174, %176, %cst_181 {dimension_numbers = #tpu.dot_dimension_numbers<[1], [0], [0], [1], [0, 0, 1, 1], [], []>} : vector<128x16xf32>, vector<16x32xf32>, vector<128x32xf32> -> vector<128x32xf32>
    %178 = vector.extract_strided_slice %103 {offsets = [1, 0], sizes = [1, 32], strides = [1, 1]} : vector<4x32xf32> to vector<1x32xf32>
    %179 = vector.broadcast %178 : vector<1x32xf32> to vector<128x32xf32>
    %180 = arith.addf %177, %179 : vector<128x32xf32>
    %181 = vector.extract_strided_slice %103 {offsets = [2, 0], sizes = [1, 16], strides = [1, 1]} : vector<4x32xf32> to vector<1x16xf32>
    %182 = vector.extract_strided_slice %180 {offsets = [0, 0], sizes = [128, 16], strides = [1, 1]} : vector<128x32xf32> to vector<128x16xf32>
    %183 = vector.broadcast %181 : vector<1x16xf32> to vector<128x16xf32>
    %184 = arith.mulf %182, %183 : vector<128x16xf32>
    %185 = arith.addf %99, %184 : vector<128x16xf32>
    %186 = vector.extract_strided_slice %180 {offsets = [0, 16], sizes = [128, 16], strides = [1, 1]} : vector<128x32xf32> to vector<128x16xf32>
    %187 = arith.addf %101, %186 : vector<128x16xf32>
    %c2_182 = arith.constant 2 : index
    %c0_183 = arith.constant 0 : index
    %c0_184 = arith.constant 0 : index
    %188 = vector.load %arg7[%c2_182, %c0_183, %c0_184] : memref<3x4x32xf32, #tpu.memory_space<vmem>>, vector<1x4x32xf32>
    %189 = vector.shape_cast %188 : vector<1x4x32xf32> to vector<4x32xf32>
    %190 = vector.shape_cast %185 : vector<128x16xf32> to vector<8x16x16xf32>
    %c8_185 = arith.constant 8 : index
    %c8_186 = arith.constant 8 : index
    %c0_187 = arith.constant 0 : index
    %191 = vector.load %arg9[%c8_185, %c8_186, %c0_187] : memref<16x26x16xf32, #tpu.memory_space<vmem>>, vector<8x16x16xf32>
    tpu.vector_store %arg9[%c8_185, %c8_186, %c0_187], %190 {strides = array<i32>} : memref<16x26x16xf32, #tpu.memory_space<vmem>>, vector<8x16x16xf32>,
    %c2_188 = arith.constant 2 : index
    %c0_189 = arith.constant 0 : index
    %c0_190 = arith.constant 0 : index
    %192 = vector.load %arg5[%c2_188, %c0_189, %c0_190] : memref<3x16x32xf32, #tpu.memory_space<vmem>>, vector<1x16x32xf32>
    %193 = vector.shape_cast %192 : vector<1x16x32xf32> to vector<16x32xf32>
    %cst_191 = arith.constant dense<0.000000e+00> : vector<128x32xf32>
    %194 = tpu.matmul %14, %193, %cst_191 {dimension_numbers = #tpu.dot_dimension_numbers<[1], [0], [0], [1], [0, 0, 1, 1], [], []>} : vector<128x16xf32>, vector<16x32xf32>, vector<128x32xf32> -> vector<128x32xf32>
    %195 = vector.extract_strided_slice %189 {offsets = [0, 0], sizes = [1, 32], strides = [1, 1]} : vector<4x32xf32> to vector<1x32xf32>
    %196 = vector.broadcast %195 : vector<1x32xf32> to vector<128x32xf32>
    %197 = arith.addf %194, %196 : vector<128x32xf32>
    %c0_192 = arith.constant 0 : index
    %c6_193 = arith.constant 6 : index
    %c0_194 = arith.constant 0 : index
    %198 = vector.load %arg9[%c0_192, %c6_193, %c0_194] : memref<16x26x16xf32, #tpu.memory_space<vmem>>, vector<8x16x16xf32>
    %199 = vector.shape_cast %198 : vector<8x16x16xf32> to vector<128x16xf32>
    %c2_195 = arith.constant 2 : index
    %c0_196 = arith.constant 0 : index
    %c0_197 = arith.constant 0 : index
    %c0_198 = arith.constant 0 : index
    %200 = vector.load %arg4[%c2_195, %c0_196, %c0_197, %c0_198] : memref<3x9x16x32xf32, #tpu.memory_space<vmem>>, vector<1x1x16x32xf32>
    %201 = vector.shape_cast %200 : vector<1x1x16x32xf32> to vector<16x32xf32>
    %cst_199 = arith.constant dense<0.000000e+00> : vector<128x32xf32>
    %202 = tpu.matmul %199, %201, %cst_199 {dimension_numbers = #tpu.dot_dimension_numbers<[1], [0], [0], [1], [0, 0, 1, 1], [], []>} : vector<128x16xf32>, vector<16x32xf32>, vector<128x32xf32> -> vector<128x32xf32>
    %203 = arith.addf %197, %202 : vector<128x32xf32>
    %c0_200 = arith.constant 0 : index
    %c8_201 = arith.constant 8 : index
    %c0_202 = arith.constant 0 : index
    %204 = vector.load %arg9[%c0_200, %c8_201, %c0_202] : memref<16x26x16xf32, #tpu.memory_space<vmem>>, vector<8x16x16xf32>
    %205 = vector.shape_cast %204 : vector<8x16x16xf32> to vector<128x16xf32>
    %c2_203 = arith.constant 2 : index
    %c1_204 = arith.constant 1 : index
    %c0_205 = arith.constant 0 : index
    %c0_206 = arith.constant 0 : index
    %206 = vector.load %arg4[%c2_203, %c1_204, %c0_205, %c0_206] : memref<3x9x16x32xf32, #tpu.memory_space<vmem>>, vector<1x1x16x32xf32>
    %207 = vector.shape_cast %206 : vector<1x1x16x32xf32> to vector<16x32xf32>
    %cst_207 = arith.constant dense<0.000000e+00> : vector<128x32xf32>
    %208 = tpu.matmul %205, %207, %cst_207 {dimension_numbers = #tpu.dot_dimension_numbers<[1], [0], [0], [1], [0, 0, 1, 1], [], []>} : vector<128x16xf32>, vector<16x32xf32>, vector<128x32xf32> -> vector<128x32xf32>
    %209 = arith.addf %203, %208 : vector<128x32xf32>
    %c0_208 = arith.constant 0 : index
    %c10 = arith.constant 10 : index
    %c0_209 = arith.constant 0 : index
    %210 = vector.load %arg9[%c0_208, %c10, %c0_209] : memref<16x26x16xf32, #tpu.memory_space<vmem>>, vector<8x16x16xf32>
    %211 = vector.shape_cast %210 : vector<8x16x16xf32> to vector<128x16xf32>
    %c2_210 = arith.constant 2 : index
    %c2_211 = arith.constant 2 : index
    %c0_212 = arith.constant 0 : index
    %c0_213 = arith.constant 0 : index
    %212 = vector.load %arg4[%c2_210, %c2_211, %c0_212, %c0_213] : memref<3x9x16x32xf32, #tpu.memory_space<vmem>>, vector<1x1x16x32xf32>
    %213 = vector.shape_cast %212 : vector<1x1x16x32xf32> to vector<16x32xf32>
    %cst_214 = arith.constant dense<0.000000e+00> : vector<128x32xf32>
    %214 = tpu.matmul %211, %213, %cst_214 {dimension_numbers = #tpu.dot_dimension_numbers<[1], [0], [0], [1], [0, 0, 1, 1], [], []>} : vector<128x16xf32>, vector<16x32xf32>, vector<128x32xf32> -> vector<128x32xf32>
    %215 = arith.addf %209, %214 : vector<128x32xf32>
    %c4_215 = arith.constant 4 : index
    %c6_216 = arith.constant 6 : index
    %c0_217 = arith.constant 0 : index
    %216 = vector.load %arg9[%c4_215, %c6_216, %c0_217] : memref<16x26x16xf32, #tpu.memory_space<vmem>>, vector<8x16x16xf32>
    %217 = vector.shape_cast %216 : vector<8x16x16xf32> to vector<128x16xf32>
    %c2_218 = arith.constant 2 : index
    %c3_219 = arith.constant 3 : index
    %c0_220 = arith.constant 0 : index
    %c0_221 = arith.constant 0 : index
    %218 = vector.load %arg4[%c2_218, %c3_219, %c0_220, %c0_221] : memref<3x9x16x32xf32, #tpu.memory_space<vmem>>, vector<1x1x16x32xf32>
    %219 = vector.shape_cast %218 : vector<1x1x16x32xf32> to vector<16x32xf32>
    %cst_222 = arith.constant dense<0.000000e+00> : vector<128x32xf32>
    %220 = tpu.matmul %217, %219, %cst_222 {dimension_numbers = #tpu.dot_dimension_numbers<[1], [0], [0], [1], [0, 0, 1, 1], [], []>} : vector<128x16xf32>, vector<16x32xf32>, vector<128x32xf32> -> vector<128x32xf32>
    %221 = arith.addf %215, %220 : vector<128x32xf32>
    %c4_223 = arith.constant 4 : index
    %c8_224 = arith.constant 8 : index
    %c0_225 = arith.constant 0 : index
    %222 = vector.load %arg9[%c4_223, %c8_224, %c0_225] : memref<16x26x16xf32, #tpu.memory_space<vmem>>, vector<8x16x16xf32>
    %223 = vector.shape_cast %222 : vector<8x16x16xf32> to vector<128x16xf32>
    %c2_226 = arith.constant 2 : index
    %c4_227 = arith.constant 4 : index
    %c0_228 = arith.constant 0 : index
    %c0_229 = arith.constant 0 : index
    %224 = vector.load %arg4[%c2_226, %c4_227, %c0_228, %c0_229] : memref<3x9x16x32xf32, #tpu.memory_space<vmem>>, vector<1x1x16x32xf32>
    %225 = vector.shape_cast %224 : vector<1x1x16x32xf32> to vector<16x32xf32>
    %cst_230 = arith.constant dense<0.000000e+00> : vector<128x32xf32>
    %226 = tpu.matmul %223, %225, %cst_230 {dimension_numbers = #tpu.dot_dimension_numbers<[1], [0], [0], [1], [0, 0, 1, 1], [], []>} : vector<128x16xf32>, vector<16x32xf32>, vector<128x32xf32> -> vector<128x32xf32>
    %227 = arith.addf %221, %226 : vector<128x32xf32>
    %c4_231 = arith.constant 4 : index
    %c10_232 = arith.constant 10 : index
    %c0_233 = arith.constant 0 : index
    %228 = vector.load %arg9[%c4_231, %c10_232, %c0_233] : memref<16x26x16xf32, #tpu.memory_space<vmem>>, vector<8x16x16xf32>
    %229 = vector.shape_cast %228 : vector<8x16x16xf32> to vector<128x16xf32>
    %c2_234 = arith.constant 2 : index
    %c5_235 = arith.constant 5 : index
    %c0_236 = arith.constant 0 : index
    %c0_237 = arith.constant 0 : index
    %230 = vector.load %arg4[%c2_234, %c5_235, %c0_236, %c0_237] : memref<3x9x16x32xf32, #tpu.memory_space<vmem>>, vector<1x1x16x32xf32>
    %231 = vector.shape_cast %230 : vector<1x1x16x32xf32> to vector<16x32xf32>
    %cst_238 = arith.constant dense<0.000000e+00> : vector<128x32xf32>
    %232 = tpu.matmul %229, %231, %cst_238 {dimension_numbers = #tpu.dot_dimension_numbers<[1], [0], [0], [1], [0, 0, 1, 1], [], []>} : vector<128x16xf32>, vector<16x32xf32>, vector<128x32xf32> -> vector<128x32xf32>
    %233 = arith.addf %227, %232 : vector<128x32xf32>
    %c8_239 = arith.constant 8 : index
    %c6_240 = arith.constant 6 : index
    %c0_241 = arith.constant 0 : index
    %234 = vector.load %arg9[%c8_239, %c6_240, %c0_241] : memref<16x26x16xf32, #tpu.memory_space<vmem>>, vector<8x16x16xf32>
    %235 = vector.shape_cast %234 : vector<8x16x16xf32> to vector<128x16xf32>
    %c2_242 = arith.constant 2 : index
    %c6_243 = arith.constant 6 : index
    %c0_244 = arith.constant 0 : index
    %c0_245 = arith.constant 0 : index
    %236 = vector.load %arg4[%c2_242, %c6_243, %c0_244, %c0_245] : memref<3x9x16x32xf32, #tpu.memory_space<vmem>>, vector<1x1x16x32xf32>
    %237 = vector.shape_cast %236 : vector<1x1x16x32xf32> to vector<16x32xf32>
    %cst_246 = arith.constant dense<0.000000e+00> : vector<128x32xf32>
    %238 = tpu.matmul %235, %237, %cst_246 {dimension_numbers = #tpu.dot_dimension_numbers<[1], [0], [0], [1], [0, 0, 1, 1], [], []>} : vector<128x16xf32>, vector<16x32xf32>, vector<128x32xf32> -> vector<128x32xf32>
    %239 = arith.addf %233, %238 : vector<128x32xf32>
    %c8_247 = arith.constant 8 : index
    %c8_248 = arith.constant 8 : index
    %c0_249 = arith.constant 0 : index
    %240 = vector.load %arg9[%c8_247, %c8_248, %c0_249] : memref<16x26x16xf32, #tpu.memory_space<vmem>>, vector<8x16x16xf32>
    %241 = vector.shape_cast %240 : vector<8x16x16xf32> to vector<128x16xf32>
    %c2_250 = arith.constant 2 : index
    %c7_251 = arith.constant 7 : index
    %c0_252 = arith.constant 0 : index
    %c0_253 = arith.constant 0 : index
    %242 = vector.load %arg4[%c2_250, %c7_251, %c0_252, %c0_253] : memref<3x9x16x32xf32, #tpu.memory_space<vmem>>, vector<1x1x16x32xf32>
    %243 = vector.shape_cast %242 : vector<1x1x16x32xf32> to vector<16x32xf32>
    %cst_254 = arith.constant dense<0.000000e+00> : vector<128x32xf32>
    %244 = tpu.matmul %241, %243, %cst_254 {dimension_numbers = #tpu.dot_dimension_numbers<[1], [0], [0], [1], [0, 0, 1, 1], [], []>} : vector<128x16xf32>, vector<16x32xf32>, vector<128x32xf32> -> vector<128x32xf32>
    %245 = arith.addf %239, %244 : vector<128x32xf32>
    %c8_255 = arith.constant 8 : index
    %c10_256 = arith.constant 10 : index
    %c0_257 = arith.constant 0 : index
    %246 = vector.load %arg9[%c8_255, %c10_256, %c0_257] : memref<16x26x16xf32, #tpu.memory_space<vmem>>, vector<8x16x16xf32>
    %247 = vector.shape_cast %246 : vector<8x16x16xf32> to vector<128x16xf32>
    %c2_258 = arith.constant 2 : index
    %c8_259 = arith.constant 8 : index
    %c0_260 = arith.constant 0 : index
    %c0_261 = arith.constant 0 : index
    %248 = vector.load %arg4[%c2_258, %c8_259, %c0_260, %c0_261] : memref<3x9x16x32xf32, #tpu.memory_space<vmem>>, vector<1x1x16x32xf32>
    %249 = vector.shape_cast %248 : vector<1x1x16x32xf32> to vector<16x32xf32>
    %cst_262 = arith.constant dense<0.000000e+00> : vector<128x32xf32>
    %250 = tpu.matmul %247, %249, %cst_262 {dimension_numbers = #tpu.dot_dimension_numbers<[1], [0], [0], [1], [0, 0, 1, 1], [], []>} : vector<128x16xf32>, vector<16x32xf32>, vector<128x32xf32> -> vector<128x32xf32>
    %251 = arith.addf %245, %250 : vector<128x32xf32>
    %252 = vector.extract_strided_slice %251 {offsets = [0, 0], sizes = [128, 16], strides = [1, 1]} : vector<128x32xf32> to vector<128x16xf32>
    %253 = math.tanh %252 : vector<128x16xf32>
    %254 = vector.extract_strided_slice %251 {offsets = [0, 16], sizes = [128, 16], strides = [1, 1]} : vector<128x32xf32> to vector<128x16xf32>
    %255 = arith.negf %254 : vector<128x16xf32>
    %256 = math.exp %255 : vector<128x16xf32>
    %cst_263 = arith.constant 1.000000e+00 : f32
    %257 = vector.broadcast %cst_263 : f32 to vector<128x16xf32>
    %258 = arith.addf %257, %256 : vector<128x16xf32>
    %259 = arith.divf %257, %258 : vector<128x16xf32>
    %260 = arith.mulf %253, %259 : vector<128x16xf32>
    %c2_264 = arith.constant 2 : index
    %c0_265 = arith.constant 0 : index
    %c0_266 = arith.constant 0 : index
    %261 = vector.load %arg6[%c2_264, %c0_265, %c0_266] : memref<3x16x32xf32, #tpu.memory_space<vmem>>, vector<1x16x32xf32>
    %262 = vector.shape_cast %261 : vector<1x16x32xf32> to vector<16x32xf32>
    %cst_267 = arith.constant dense<0.000000e+00> : vector<128x32xf32>
    %263 = tpu.matmul %260, %262, %cst_267 {dimension_numbers = #tpu.dot_dimension_numbers<[1], [0], [0], [1], [0, 0, 1, 1], [], []>} : vector<128x16xf32>, vector<16x32xf32>, vector<128x32xf32> -> vector<128x32xf32>
    %264 = vector.extract_strided_slice %189 {offsets = [1, 0], sizes = [1, 32], strides = [1, 1]} : vector<4x32xf32> to vector<1x32xf32>
    %265 = vector.broadcast %264 : vector<1x32xf32> to vector<128x32xf32>
    %266 = arith.addf %263, %265 : vector<128x32xf32>
    %267 = vector.extract_strided_slice %266 {offsets = [0, 16], sizes = [128, 16], strides = [1, 1]} : vector<128x32xf32> to vector<128x16xf32>
    %268 = arith.addf %187, %267 : vector<128x16xf32>
    %269 = vector.shape_cast %268 : vector<128x16xf32> to vector<8x16x16xf32>
    %c0_268 = arith.constant 0 : index
    %c0_269 = arith.constant 0 : index
    %c0_270 = arith.constant 0 : index
    %c0_271 = arith.constant 0 : index
    %270 = vector.load %arg8[%c0_268, %c0_269, %c0_270, %c0_271] : memref<1x8x16x16xf32, #tpu.memory_space<vmem>>, vector<1x8x16x16xf32>
    %271 = vector.shape_cast %270 : vector<1x8x16x16xf32> to vector<8x16x16xf32>
    %272 = vector.shape_cast %269 : vector<8x16x16xf32> to vector<1x8x16x16xf32>
    tpu.vector_store %arg8[%c0_268, %c0_269, %c0_270, %c0_271], %272 {strides = array<i32>} : memref<1x8x16x16xf32, #tpu.memory_space<vmem>>, vector<1x8x16x16xf32>,
    return
  }
  func.func @transform_0(%arg0: i32) -> (i32, i32, i32, i32) {
    %c0_i32 = arith.constant 0 : i32
    %c0_i32_0 = arith.constant 0 : i32
    %c0_i32_1 = arith.constant 0 : i32
    %c0_i32_2 = arith.constant 0 : i32
    return %arg0, %c0_i32, %c0_i32_0, %c0_i32_1 : i32, i32, i32, i32
  }
  func.func @transform_1(%arg0: i32) -> (i32, i32, i32, i32) {
    %c0_i32 = arith.constant 0 : i32
    %c0_i32_0 = arith.constant 0 : i32
    %c0_i32_1 = arith.constant 0 : i32
    %c0_i32_2 = arith.constant 0 : i32
    return %arg0, %c0_i32, %c0_i32_0, %c0_i32_1 : i32, i32, i32, i32
  }
  func.func @transform_2(%arg0: i32) -> (i32, i32) {
    %c0_i32 = arith.constant 0 : i32
    %c0_i32_0 = arith.constant 0 : i32
    %c0_i32_1 = arith.constant 0 : i32
    return %c0_i32, %c0_i32_0 : i32, i32
  }
  func.func @transform_3(%arg0: i32) -> (i32, i32, i32, i32) {
    %c0_i32 = arith.constant 0 : i32
    %c0_i32_0 = arith.constant 0 : i32
    %c0_i32_1 = arith.constant 0 : i32
    %c0_i32_2 = arith.constant 0 : i32
    %c0_i32_3 = arith.constant 0 : i32
    return %c0_i32, %c0_i32_0, %c0_i32_1, %c0_i32_2 : i32, i32, i32, i32
  }
  func.func @transform_4(%arg0: i32) -> (i32, i32, i32) {
    %c0_i32 = arith.constant 0 : i32
    %c0_i32_0 = arith.constant 0 : i32
    %c0_i32_1 = arith.constant 0 : i32
    %c0_i32_2 = arith.constant 0 : i32
    return %c0_i32, %c0_i32_0, %c0_i32_1 : i32, i32, i32
  }
  func.func @transform_5(%arg0: i32) -> (i32, i32, i32) {
    %c0_i32 = arith.constant 0 : i32
    %c0_i32_0 = arith.constant 0 : i32
    %c0_i32_1 = arith.constant 0 : i32
    %c0_i32_2 = arith.constant 0 : i32
    return %c0_i32, %c0_i32_0, %c0_i32_1 : i32, i32, i32
  }
  func.func @transform_6(%arg0: i32) -> (i32, i32, i32) {
    %c0_i32 = arith.constant 0 : i32
    %c0_i32_0 = arith.constant 0 : i32
    %c0_i32_1 = arith.constant 0 : i32
    %c0_i32_2 = arith.constant 0 : i32
    return %c0_i32, %c0_i32_0, %c0_i32_1 : i32, i32, i32
  }
  func.func @transform_7(%arg0: i32) -> (i32, i32, i32, i32) {
    %c0_i32 = arith.constant 0 : i32
    %c0_i32_0 = arith.constant 0 : i32
    %c0_i32_1 = arith.constant 0 : i32
    %c0_i32_2 = arith.constant 0 : i32
    return %arg0, %c0_i32, %c0_i32_0, %c0_i32_1 : i32, i32, i32, i32
  }
}

</mosaic_0001>

<bundles_post_ra>
// kernel: tpu_custom_call.1
= control target key start
LH: loop header
LB: loop body
LE: loop exit
PB: predicated region body
PF: predicated region fallthrough
CT: control target
= control target key end

     0   :  { %12 = vsyncpa [#allocation4], 0  ;;  %s11085_s0 = inlined_call_operand.vmem [shape: f32[2,8,16,8], index: 0, kind: input, shape index: {}]   ;;  %s11086_s1 = inlined_call_operand.vmem [shape: f32[2,8,16,16], index: 1, kind: input, shape index: {}]   ;;  %s11087_s2 = inlined_call_operand.vmem [shape: f32[8,16], index: 2, kind: input, shape index: {}]   ;;  %s11088_s3 = inlined_call_operand.hbm [shape: f32[3,9,16,32], index: 3, kind: input, shape index: {}]   ;;  %s11089_s4 = inlined_call_operand.vmem [shape: f32[3,16,32], index: 4, kind: input, shape index: {}]   ;;  %s11090_s5 = inlined_call_operand.vmem [shape: f32[3,16,32], index: 5, kind: input, shape index: {}]   ;;  %s11091_s6 = inlined_call_operand.vmem [shape: f32[3,4,32], index: 6, kind: input, shape index: {}]   ;;  %s11092_s7 = inlined_call_operand.hbm [shape: f32[2,8,16,16], index: 7, kind: output, shape index: {}]  }
   0x1   :  { %13 = vsyncpa [#allocation5], 0 }
   0x2   :  { %15 = vsyncpa [#allocation5 + $0x1], 0  ;;  %s7828_s24 = smov 0   ;;  %s7830_s25 = smov 0  }
   0x3   :  { %s7832_s26 = smov 0   ;;  %s7834_s27 = smov 0  }
   0x4 LB: > { %s7849_s28 = sadd.s32 4294967295, %s7779_s27   ;;  %s6680_s29 = sadd.s32 4294967294, %s7779_s27   ;;  %s7779_s27 = sphi %s7834_s27, %s11436_s27   ;;  %s7775_s26 = sphi %s7832_s26, %s11435_s26   ;;  %s7771_s25 = sphi %s7830_s25, %s11434_s25   ;;  %s7767_s24 = sphi %s7828_s24, %s11433_s24  }
   0x5   : > { %s7853_s30 = sadd.s32 1, %s7779_s27   ;;  %s185_s8 = sadd.s32 1, %s7775_s26 }
   0x6   : > { %s182_s9 = ssub.s32 %s7779_s27, %s7853_s30  ;;  %p195_p0 = scmp.ne.s32.totalorder %s7775_s26, %s7771_s25 }
   0x7   : > { %p183_p1 = scmp.eq.s32.totalorder %s182_s9, 0  ;;  %p196_p2 = scmp.eq.s32.totalorder %s7849_s28, 1 }
   0x8   : > { %p201_p3 = scmp.ne.s32.totalorder %s7771_s25, %s7767_s24  ;;  %p202_p4 = scmp.eq.s32.totalorder %s6680_s29, 1 }
   0x9   : > { %s7864_s10 = scalar_select %p183_p1, %s7775_s26, %s185_s8  }
   0xa   : > { %p7866_p5 = por %p196_p2, %p195_p0  ;;  %p7870_p6 = por %p202_p4, %p201_p3 }
   0xb   : > { %p6681_p7 = scmp.ge.s32.totalorder %s7779_s27, 1  ;;  %p209_p8 = scmp.lt.s32.totalorder %s7779_s27, 3 }
   0xc   : > { %p7318_p9 = scmp.eq.s32.totalorder %s7849_s28, 0  ;;  %s223_s15 = sshll.u32 %s11088_s3, 4  ;;  %s224_s15 = int_to_ptr.hbm [resolvable:$true] %s223_s15 }
   0xd   : > { %p210_p10 = pnand %p6681_p7, %p209_p8  ;;  %s7781_s16 = smov [#allocation3]  }
   0xe   : > { %s225_s17 = sshll.u32 %s7781_s16, 4  ;;  %s7782_s18 = smov 128   ;;  %s226_s17 = int_to_ptr.vmem [resolvable:$true] %s225_s17 }
   0xf   : > { %p7310_p11 = pneg %p210_p10  ;;  %s7783_s19 = smov 8  }
  0x10   : > { %266 = sbr.rel (%p210_p10) target bundleno = 2189 (0x88d), region = 48 }
  0x11   : > { %p7311_p12 = pnand %p7318_p9, %p7310_p11 }
  0x13   : > { %7313 = dma.hbm_to_vmem [thread:$0]  (!%p7311_p12), %s224_s15, 6912, %s226_s17, [#allocation4], %s7782_s18, %s7782_s18, %s7783_s19  }
  0x15   : > { %7758 = dma.done.wait (%p7318_p9), [#allocation4], 6912  }
  0x16   : > { %7760 = vsyncadd (%p7318_p9), [#allocation4], 4294960384  ;;  %p304_p13 = scmp.lt.s32.totalorder %s7849_s28, 1  ;;  %vm399_vm0 = vcmask 64512   ;;  %v397_v0 = vld [vmem:[%s11087_s2] sm:$0xff]  ;;  %v547_v2 = vld [vmem:[%s11089_s4 + $0x8] sm:$0xff] }
  0x17   : > { %463 = vmatpush.msra.mxu0 %v397_v0  ;;  %7301 = vmatpush.msra.mxu3 %v397_v0  ;;  %v546_v3 = vld [vmem:[%s11089_s4] sm:$0xff]  ;;  %vm314_vm1 = vcmask 130048   ;;  %v680_v6 = vld [vmem:[#allocation3 + $0x8] sm:$0xff]  ;;  %v7784_v20 = vmov 0.0   ;;  %v828_v21 = vld [vmem:[#allocation3 + $0x18] sm:$0xff]  ;;  %vm318_vm2 = vcmask 123904  }
  0x18   : > { %s305_s20 = scalar_select %p304_p13, %s7849_s28, 1  ;;  %7302 = vmatpush.msra.mxu2 %v547_v2  ;;  %611 = vmatpush.msra.mxu1 %v547_v2  ;;  %v679_v19 = vld [vmem:[#allocation3] sm:$0xff]  ;;  %340 = vst.msk [vmem:[#allocation2 + $0xc0] sm:$0xff] %vm314_vm1, %v7784_v20  ;;  %v827_v24 = vld [vmem:[#allocation3 + $0x10] sm:$0xff]  ;;  %v1273_v31 = vld [vmem:[#allocation3 + $0x48] sm:$0xff] }
  0x19   : > { %341 = vst.msk [vmem:[#allocation2 + $0xc8] sm:$0xff] %vm314_vm1, %v7784_v20  ;;  %891 = vmatpush.msrb.mxu3 %v828_v21  ;;  %v976_v32 = vld [vmem:[#allocation3 + $0x28] sm:$0xff]  ;;  %v975_v33 = vld [vmem:[#allocation3 + $0x20] sm:$0xff]  ;;  %v1125_v34 = vld [vmem:[#allocation3 + $0x38] sm:$0xff]  ;;  %s301_s14 = sand.u32 1, %s7771_s25   ;;  %s7733_s13 = scalar_lea.hbm %s11092_s7, 256 }
  0x1a   : > { %s7298_s21 = sshll.u32 %s305_s20, 7  ;;  %7303 = vmatpush.msra.mxu2 %v546_v3  ;;  %612 = vmatpush.msra.mxu1 %v546_v3  ;;  %315 = vst.msk [vmem:[#allocation2] sm:$0xff] %vm314_vm1, %v7784_v20  ;;  %v1124_v35 = vld [vmem:[#allocation3 + $0x30] sm:$0xff]  ;;  %v8128_v57 = vld [vmem:[%s11091_s6] sm:$0xf]  ;;  %s6686_s15 = sshll.u32 %s301_s14, 7 }
  0x1b   : > { %s7891_s29 = scalar_lea.vmem %s11085_s0, %s7298_s21  ;;  %s7907_s19 = scalar_lea.vmem %s11086_s1, %s7298_s21  ;;  %316 = vst.msk [vmem:[#allocation2 + $0x8] sm:$0xff] %vm314_vm1, %v7784_v20  ;;  %892 = vmatpush.msrb.mxu3 %v827_v24  ;;  %1039 = vmatpush.msrb.mxu0 %v976_v32  ;;  %v8131_v58 = vperm.slane %v8128_v57, 3 }
  0x1c   : > { %v381_v1 = vld [vmem:[%s7891_s29] sm:$0xff]  ;;  %v382_v4 = vld [vmem:[%s7891_s29 + $0x8] sm:$0xff]  ;;  %743 = vmatpush.msrb.mxu2 %v680_v6  ;;  %v383_v7 = vld [vmem:[%s7891_s29 + $0x10] sm:$0xff]  ;;  %317 = vst.msk [vmem:[#allocation2 + $0x10] sm:$0xff] %vm314_vm1, %v7784_v20  ;;  %1188 = vmatpush.msrb.mxu1 %v1125_v34  ;;  %s11001_s16 = scalar_lea.vmem [#allocation6], %s6686_s15  ;;  %s6579_s22 = scalar_lea.sflag [#allocation5], %s301_s14 }
  0x1d   : > { %6691 = vmatmul.msk.f32.vlgmr.msra.gmra.mxu0 %vm399_vm0, %v381_v1  ;;  %v521_v5 = vld [vmem:[%s7907_s19 + $0x40] sm:$0xff]  ;;  %v390_v8 = vld [vmem:[%s7891_s29 + $0x48] sm:$0xff]  ;;  %v384_v11 = vld [vmem:[%s7891_s29 + $0x18] sm:$0xff]  ;;  %320 = vst.msk [vmem:[#allocation2 + $0x20] sm:$0xff] %vm314_vm1, %v7784_v20  ;;  %s6591_s20 = sshll.u32 %s11001_s16, 4  ;;  %s6592_s20 = int_to_ptr.vmem [resolvable:$true] %s6591_s20 }
  0x1e   : > { %6715 = vmatmul.msk.f32.vlgmr.msra.gmra.mxu2 %vm314_vm1, %v521_v5  ;;  %v522_v9 = vld [vmem:[%s7907_s19 + $0x48] sm:$0xff]  ;;  %6700 = vmatmul.msk.f32.vlgmr.msra.gmra.mxu3 %vm399_vm0, %v390_v8  ;;  %v513_v10 = vld [vmem:[%s7907_s19] sm:$0xff]  ;;  %v391_v12 = vld [vmem:[%s7891_s29 + $0x50] sm:$0xff]  ;;  %321 = vst.msk [vmem:[#allocation2 + $0x28] sm:$0xff] %vm314_vm1, %v7784_v20 }
  0x1f   : > { %6707 = vmatmul.msk.f32.vlgmr.msra.gmra.mxu1 %vm314_vm1, %v513_v10  ;;  %v523_v13 = vld [vmem:[%s7907_s19 + $0x50] sm:$0xff]  ;;  %v514_v14 = vld [vmem:[%s7907_s19 + $0x8] sm:$0xff]  ;;  %v385_v15 = vld [vmem:[%s7891_s29 + $0x20] sm:$0xff]  ;;  %744 = vmatpush.msrb.mxu2 %v679_v19  ;;  %322 = vst.msk [vmem:[#allocation2 + $0x30] sm:$0xff] %vm314_vm1, %v7784_v20 }
  0x20   : > { %v392_v16 = vld [vmem:[%s7891_s29 + $0x58] sm:$0xff]  ;;  %v515_v18 = vld [vmem:[%s7907_s19 + $0x10] sm:$0xff]  ;;  %v386_v22 = vld [vmem:[%s7891_s29 + $0x28] sm:$0xff]  ;;  %324 = vst.msk [vmem:[#allocation2 + $0x40] sm:$0xff] %vm314_vm1, %v7784_v20  ;;  %1040 = vmatpush.msrb.mxu0 %v975_v33  ;;  %1189 = vmatpush.msrb.mxu1 %v1124_v35 }
  0x21   : > { %v524_v17 = vld [vmem:[%s7907_s19 + $0x58] sm:$0xff]  ;;  %v393_v23 = vld [vmem:[%s7891_s29 + $0x60] sm:$0xff]  ;;  %325 = vst.msk [vmem:[#allocation2 + $0x48] sm:$0xff] %vm314_vm1, %v7784_v20  ;;  %v387_v27 = vld [vmem:[%s7891_s29 + $0x30] sm:$0xff]  ;;  %1336 = vmatpush.msra.mxu2 %v1273_v31 }
  0x22   : > { %v525_v25 = vld [vmem:[%s7907_s19 + $0x60] sm:$0xff]  ;;  %v516_v26 = vld [vmem:[%s7907_s19 + $0x18] sm:$0xff]  ;;  %326 = vst.msk [vmem:[#allocation2 + $0x50] sm:$0xff] %vm314_vm1, %v7784_v20  ;;  %v394_v28 = vld [vmem:[%s7891_s29 + $0x68] sm:$0xff] }
  0x23   : > { %328 = vst.msk [vmem:[#allocation2 + $0x60] sm:$0xff] %vm314_vm1, %v7784_v20  ;;  %v526_v29 = vld [vmem:[%s7907_s19 + $0x68] sm:$0xff]  ;;  %v517_v30 = vld [vmem:[%s7907_s19 + $0x20] sm:$0xff]  ;;  %v388_v36 = vld [vmem:[%s7891_s29 + $0x38] sm:$0xff] }
  0x24   : > { %329 = vst.msk [vmem:[#allocation2 + $0x68] sm:$0xff] %vm314_vm1, %v7784_v20  ;;  %v395_v37 = vld [vmem:[%s7891_s29 + $0x70] sm:$0xff]  ;;  %v518_v39 = vld [vmem:[%s7907_s19 + $0x28] sm:$0xff]  ;;  %v389_v40 = vld [vmem:[%s7891_s29 + $0x40] sm:$0xff] }
  0x25   : > { %6692 = vmatmul.msk.f32.gmra.mxu0 %vm399_vm0, %v382_v4  ;;  %330 = vst.msk [vmem:[#allocation2 + $0x70] sm:$0xff] %vm314_vm1, %v7784_v20  ;;  %v527_v38 = vld [vmem:[%s7907_s19 + $0x70] sm:$0xff]  ;;  %v396_v41 = vld [vmem:[%s7891_s29 + $0x78] sm:$0xff]  ;;  %v810_v44 = vld [vmem:[#allocation2 + $0xc8] sm:$0xff]  ;;  %s7785_s29 = smov 112  }
  0x26   : > { %6716 = vmatmul.msk.f32.gmra.mxu2 %vm314_vm1, %v522_v9  ;;  %6701 = vmatmul.msk.f32.gmra.mxu3 %vm399_vm0, %v391_v12  ;;  %332 = vst.msk [vmem:[#allocation2 + $0x80] sm:$0xff] %vm314_vm1, %v7784_v20  ;;  %v528_v42 = vld [vmem:[%s7907_s19 + $0x78] sm:$0xff]  ;;  %v519_v43 = vld [vmem:[%s7907_s19 + $0x30] sm:$0xff]  ;;  %v663_v46 = vld [vmem:[#allocation2 + $0xc7] sm:$0xff] }
  0x27   : > { %6708 = vmatmul.msk.f32.gmra.mxu1 %vm314_vm1, %v514_v14  ;;  %333 = vst.msk [vmem:[#allocation2 + $0x88] sm:$0xff] %vm314_vm1, %v7784_v20  ;;  %v520_v47 = vld [vmem:[%s7907_s19 + $0x38] sm:$0xff]  ;;  %v1272_v1 = vld [vmem:[#allocation3 + $0x40] sm:$0xff] }
  0x28   : > { %334 = vst.msk [vmem:[#allocation2 + $0x90] sm:$0xff] %vm314_vm1, %v7784_v20  ;;  %1337 = vmatpush.msra.mxu2 %v1272_v1  ;;  %v1420_v1 = vld [vmem:[#allocation3 + $0x50] sm:$0xff] }
  0x29   : > { %336 = vst.msk [vmem:[#allocation2 + $0xa0] sm:$0xff] %vm314_vm1, %v7784_v20 }
  0x2a   : > { %337 = vst.msk [vmem:[#allocation2 + $0xa8] sm:$0xff] %vm314_vm1, %v7784_v20 }
  0x2b   : > { %338 = vst.msk [vmem:[#allocation2 + $0xb0] sm:$0xff] %vm314_vm1, %v7784_v20 }
  0x2c   : > { %342 = vst.msk [vmem:[#allocation2 + $0xd0] sm:$0xff] %vm314_vm1, %v7784_v20 }
  0x2d   : > { %6693 = vmatmul.msk.f32.gmra.mxu0 %vm399_vm0, %v383_v7  ;;  %344 = vst.msk [vmem:[#allocation2 + $0xe0] sm:$0xff] %vm314_vm1, %v7784_v20 }
  0x2e   : > { %6717 = vmatmul.msk.f32.gmra.mxu2 %vm314_vm1, %v523_v13  ;;  %6702 = vmatmul.msk.f32.gmra.mxu3 %vm399_vm0, %v392_v16  ;;  %345 = vst.msk [vmem:[#allocation2 + $0xe8] sm:$0xff] %vm314_vm1, %v7784_v20 }
  0x2f   : > { %6709 = vmatmul.msk.f32.gmra.mxu1 %vm314_vm1, %v515_v18  ;;  %346 = vst.msk [vmem:[#allocation2 + $0xf0] sm:$0xff] %vm314_vm1, %v7784_v20 }
  0x30   : > { %348 = vst.msk [vmem:[#allocation2 + $0x100] sm:$0xff] %vm314_vm1, %v7784_v20 }
  0x31   : > { %349 = vst.msk [vmem:[#allocation2 + $0x108] sm:$0xff] %vm314_vm1, %v7784_v20 }
  0x32   : > { %350 = vst.msk [vmem:[#allocation2 + $0x110] sm:$0xff] %vm314_vm1, %v7784_v20 }
  0x33   : > { %352 = vst.msk [vmem:[#allocation2 + $0x120] sm:$0xff] %vm314_vm1, %v7784_v20  ;;  %v958_v45 = vld [vmem:[#allocation2 + $0xc9] sm:$0xff] }
  0x34   : > { %353 = vst.msk [vmem:[#allocation2 + $0x128] sm:$0xff] %vm314_vm1, %v7784_v20  ;;  %v811_v48 = vld [vmem:[#allocation2 + $0xd0] sm:$0xff] }
  0x35   : > { %6694 = vmatmul.msk.f32.gmra.mxu0 %vm399_vm0, %v384_v11  ;;  %354 = vst.msk [vmem:[#allocation2 + $0x130] sm:$0xff] %vm314_vm1, %v7784_v20  ;;  %v664_v49 = vld [vmem:[#allocation2 + $0xcf] sm:$0xff]  ;;  %v1107_v50 = vld [vmem:[#allocation2 + $0xe7] sm:$0xff] }
  0x36   : > { %6718 = vmatmul.msk.f32.gmra.mxu2 %vm314_vm1, %v524_v17  ;;  %6703 = vmatmul.msk.f32.gmra.mxu3 %vm399_vm0, %v393_v23  ;;  %356 = vst.msk [vmem:[#allocation2 + $0x140] sm:$0xff] %vm314_vm1, %v7784_v20  ;;  %v8079_v51 = vld [vmem:[#allocation2 + $0xe8] sm:$0xff]  ;;  %v8108_v54 = vld [vmem:[#allocation2 + $0xf0] sm:$0xff] }
  0x37   : > { %6710 = vmatmul.msk.f32.gmra.mxu1 %vm314_vm1, %v516_v26  ;;  %357 = vst.msk [vmem:[#allocation2 + $0x148] sm:$0xff] %vm314_vm1, %v7784_v20  ;;  %v1108_v52 = vld [vmem:[#allocation2 + $0xef] sm:$0xff] }
  0x38   : > { %358 = vst.msk [vmem:[#allocation2 + $0x150] sm:$0xff] %vm314_vm1, %v7784_v20  ;;  %v8110_v55 = vld [vmem:[#allocation2 + $0xe9] sm:$0xff] }
  0x39   : > { %360 = vst.msk [vmem:[#allocation2 + $0x160] sm:$0xff] %vm314_vm1, %v7784_v20 }
  0x3a   : > { %361 = vst.msk [vmem:[#allocation2 + $0x168] sm:$0xff] %vm314_vm1, %v7784_v20 }
  0x3b   : > { %362 = vst.msk [vmem:[#allocation2 + $0x170] sm:$0xff] %vm314_vm1, %v7784_v20 }
  0x3c   : > { %364 = vst.msk [vmem:[#allocation2 + $0x180] sm:$0xff] %vm314_vm1, %v7784_v20 }
  0x3d   : > { %6695 = vmatmul.msk.f32.gmra.mxu0 %vm399_vm0, %v385_v15  ;;  %365 = vst.msk [vmem:[#allocation2 + $0x188] sm:$0xff] %vm314_vm1, %v7784_v20 }
  0x3e   : > { %6719 = vmatmul.msk.f32.gmra.mxu2 %vm314_vm1, %v525_v25  ;;  %6704 = vmatmul.msk.f32.gmra.mxu3 %vm399_vm0, %v394_v28  ;;  %366 = vst.msk [vmem:[#allocation2 + $0x190] sm:$0xff] %vm314_vm1, %v7784_v20 }
  0x3f   : > { %6711 = vmatmul.msk.f32.gmra.mxu1 %vm314_vm1, %v517_v30  ;;  %368 = vst.msk [vmem:[#allocation2 + $0x1a0] sm:$0xff] %vm314_vm1, %v7784_v20 }
  0x40   : > { %369 = vst.msk [vmem:[#allocation2 + $0x1a8] sm:$0xff] %vm314_vm1, %v7784_v20 }
  0x41   : > { %370 = vst.msk [vmem:[#allocation2 + $0x1b0] sm:$0xff] %vm314_vm1, %v7784_v20 }
  0x42   : > { %372 = vst.msk [vmem:[#allocation2 + $0x1c0] sm:$0xff] %vm314_vm1, %v7784_v20 }
  0x43   : > { %373 = vst.msk [vmem:[#allocation2 + $0x1c8] sm:$0xff] %vm314_vm1, %v7784_v20 }
  0x44   : > { %374 = vst.msk [vmem:[#allocation2 + $0x1d0] sm:$0xff] %vm314_vm1, %v7784_v20 }
  0x45   : > { %6696 = vmatmul.msk.f32.gmra.mxu0 %vm399_vm0, %v386_v22  ;;  %376 = vst.msk [vmem:[#allocation2 + $0x1e0] sm:$0xff] %vm314_vm1, %v7784_v20 }
  0x46   : > { %6720 = vmatmul.msk.f32.gmra.mxu2 %vm314_vm1, %v526_v29  ;;  %6705 = vmatmul.msk.f32.gmra.mxu3 %vm399_vm0, %v395_v37  ;;  %377 = vst.msk [vmem:[#allocation2 + $0x1e8] sm:$0xff] %vm314_vm1, %v7784_v20 }
  0x47   : > { %6712 = vmatmul.msk.f32.gmra.mxu1 %vm314_vm1, %v518_v39  ;;  %378 = vst.msk [vmem:[#allocation2 + $0x1f0] sm:$0xff] %vm314_vm1, %v7784_v20 }
  0x48   : > { %343 = vst.msk [vmem:[#allocation2 + $0xd8] sm:$0x3] %vm318_vm2, %v7784_v20 }
  0x49   : > { %319 = vst.msk [vmem:[#allocation2 + $0x18] sm:$0x3] %vm318_vm2, %v7784_v20 }
  0x4a   : > { %323 = vst.msk [vmem:[#allocation2 + $0x38] sm:$0x3] %vm318_vm2, %v7784_v20 }
  0x4b   : > { %327 = vst.msk [vmem:[#allocation2 + $0x58] sm:$0x3] %vm318_vm2, %v7784_v20 }
  0x4c   : > { %331 = vst.msk [vmem:[#allocation2 + $0x78] sm:$0x3] %vm318_vm2, %v7784_v20 }
  0x4d   : > { %6697 = vmatmul.msk.f32.gmra.mxu0 %vm399_vm0, %v387_v27  ;;  %335 = vst.msk [vmem:[#allocation2 + $0x98] sm:$0x3] %vm318_vm2, %v7784_v20 }
  0x4e   : > { %6721 = vmatmul.msk.f32.gmra.mxu2 %vm314_vm1, %v527_v38  ;;  %6706 = vmatmul.msk.f32.gmra.mxu3 %vm399_vm0, %v396_v41  ;;  %339 = vst.msk [vmem:[#allocation2 + $0xb8] sm:$0x3] %vm318_vm2, %v7784_v20 }
  0x4f   : > { %6713 = vmatmul.msk.f32.gmra.mxu1 %vm314_vm1, %v519_v43  ;;  %v959_v53 = vld [vmem:[#allocation2 + $0xd1] sm:$0xff]  ;;  %347 = vst.msk [vmem:[#allocation2 + $0xf8] sm:$0x3] %vm318_vm2, %v7784_v20 }
  0x50   : > { %351 = vst.msk [vmem:[#allocation2 + $0x118] sm:$0x3] %vm318_vm2, %v7784_v20 }
  0x51   : > { %355 = vst.msk [vmem:[#allocation2 + $0x138] sm:$0x3] %vm318_vm2, %v7784_v20 }
  0x52   : > { %359 = vst.msk [vmem:[#allocation2 + $0x158] sm:$0x3] %vm318_vm2, %v7784_v20 }
  0x53   : > { %363 = vst.msk [vmem:[#allocation2 + $0x178] sm:$0x3] %vm318_vm2, %v7784_v20 }
  0x54   : > { %367 = vst.msk [vmem:[#allocation2 + $0x198] sm:$0x3] %vm318_vm2, %v7784_v20 }
  0x55   : > { %6698 = vmatmul.msk.f32.gmra.mxu0 %vm399_vm0, %v388_v36  ;;  %371 = vst.msk [vmem:[#allocation2 + $0x1b8] sm:$0x3] %vm318_vm2, %v7784_v20 }
  0x56   : > { %6722 = vmatmul.msk.f32.gmra.mxu2 %vm314_vm1, %v528_v42  ;;  %6739 = vmatmul.msk.f32.vlgmr.msrb.gmra.mxu3 %vm314_vm1, %v810_v44  ;;  %375 = vst.msk [vmem:[#allocation2 + $0x1d8] sm:$0x3] %vm318_vm2, %v7784_v20  ;;  %v8121_v56 = vld [vmem:[#allocation2 + $0xf1] sm:$0xff] }
  0x57   : > { %6714 = vmatmul.msk.f32.gmra.mxu1 %vm314_vm1, %v520_v47  ;;  %379 = vst.msk [vmem:[#allocation2 + $0x1f8] sm:$0x3] %vm318_vm2, %v7784_v20 }
  0x5d   : > { %6699 = vmatmul.msk.f32.gmra.mxu0 %vm399_vm0, %v389_v40 }
  0x5e   : > { %6723 = vmatmul.msk.f32.vlgmr.msrb.gmra.mxu2 %vm314_vm1, %v663_v46  ;;  %6740 = vmatmul.msk.f32.gmra.mxu3 %vm314_vm1, %v811_v48 }
  0x5f   : > { %6771 = vmatmul.msk.f32.vlgmr.msrb.gmra.mxu1 %vm314_vm1, %v1107_v50 }
  0x65   : > { %6755 = vmatmul.msk.f32.vlgmr.msrb.gmra.mxu0 %vm314_vm1, %v958_v45 }
  0x66   : > { %6724 = vmatmul.msk.f32.gmra.mxu2 %vm314_vm1, %v664_v49  ;;  %6741 = vmatmul.msk.f32.gmra.mxu3 %vm314_vm1, %v8079_v51 }
  0x67   : > { %6772 = vmatmul.msk.f32.gmra.mxu1 %vm314_vm1, %v1108_v52 }
  0x6d   : > { %6756 = vmatmul.msk.f32.gmra.mxu0 %vm314_vm1, %v959_v53 }
  0x6e   : > { %6725 = vmatmul.msk.f32.gmra.mxu2 %vm314_vm1, %v1107_v50  ;;  %6742 = vmatmul.msk.f32.gmra.mxu3 %vm314_vm1, %v8108_v54 }
  0x75   : > { %6757 = vmatmul.msk.f32.gmra.mxu0 %vm314_vm1, %v8110_v55 }
  0x76   : > { %6726 = vmatmul.msk.f32.gmra.mxu2 %vm314_vm1, %v1108_v52 }
  0x7d   : > { %6758 = vmatmul.msk.f32.gmra.mxu0 %vm314_vm1, %v8121_v56 }
  0x9a   : > { %v465_v59 = vpop.f32.mrf.mxu0 }
  0x9b   : > { %v8134_v60 = vadd.f32 %v465_v59, %v8131_v58 }
  0x9d   : > { %11159 = vst [vmem:[#allocation9_spill] sm:$0xff] %v8134_v60 }
  0x9e   : > { %530 = vst.msk [vmem:[#allocation2 + $0x108] sm:$0xff] %vm314_vm1, %v8134_v60 }
  0xa1   : > { %v8172_v7 = vpop.f32.mrf.mxu2  ;;  %v492_v8 = vpop.f32.mrf.mxu3 }
  0xa2   : > { %v468_v61 = vpop.f32.mrf.mxu0  ;;  %v8175_v9 = vadd.f32 %v492_v8, %v8131_v58 }
  0xa3   : > { %v8139_v62 = vadd.f32 %v468_v61, %v8131_v58  ;;  %v1421_v61 = vld [vmem:[#allocation3 + $0x58] sm:$0xff] }
  0xa4   : > { %11162 = vst [vmem:[#allocation12_spill] sm:$0xff] %v8175_v9  ;;  %1484 = vmatpush.msra.mxu3 %v1421_v61  ;;  %v1716_v61 = vld [vmem:[#allocation3 + $0x70] sm:$0xff] }
  0xa5   : > { %11160 = vst [vmem:[#allocation10_spill] sm:$0xff] %v8139_v62  ;;  %v8141_v63 = vld [vmem:[#allocation2 + $0x107] sm:$0xff] }
  0xa6   : > { %v8143_v0 = vld [vmem:[#allocation2 + $0x108] sm:$0xff]  ;;  %531 = vst.msk [vmem:[#allocation2 + $0x110] sm:$0xff] %vm314_vm1, %v8139_v62  ;;  %6727 = vmatmul.msk.f32.gmra.mxu2 %vm314_vm1, %v8141_v63  ;;  %6773 = vmatmul.msk.f32.gmra.mxu1 %vm314_vm1, %v8141_v63 }
  0xa7   : > { %6743 = vmatmul.msk.f32.gmra.mxu3 %vm314_vm1, %v8143_v0  ;;  %539 = vst.msk [vmem:[#allocation2 + $0x190] sm:$0xff] %vm314_vm1, %v8175_v9 }
  0xa8   : > { %1485 = vmatpush.msra.mxu3 %v1420_v1 }
  0xa9   : > { %v495_v15 = vpop.f32.mrf.mxu3  ;;  %v8201_v18 = vpop.f32.mrf.mxu2 }
  0xaa   : > { %v471_v2 = vpop.f32.mrf.mxu0  ;;  %v8199_v16 = vadd.f32 %v495_v15, %v8131_v58 }
  0xab   : > { %v8154_v3 = vadd.f32 %v471_v2, %v8131_v58 }
  0xac   : > { %11164 = vst [vmem:[#allocation14_spill] sm:$0xff] %v8199_v16 }
  0xad   : > { %11161 = vst [vmem:[#allocation11_spill] sm:$0xff] %v8154_v3  ;;  %v8156_v4 = vld [vmem:[#allocation2 + $0x10f] sm:$0xff] }
  0xae   : > { %v8158_v5 = vld [vmem:[#allocation2 + $0x110] sm:$0xff]  ;;  %532 = vst.msk [vmem:[#allocation2 + $0x128] sm:$0xff] %vm314_vm1, %v8154_v3  ;;  %6728 = vmatmul.msk.f32.gmra.mxu2 %vm314_vm1, %v8156_v4  ;;  %6774 = vmatmul.msk.f32.gmra.mxu1 %vm314_vm1, %v8156_v4 }
  0xaf   : > { %v8160_v6 = vld [vmem:[#allocation2 + $0x109] sm:$0xff]  ;;  %6744 = vmatmul.msk.f32.gmra.mxu3 %vm314_vm1, %v8158_v5  ;;  %v8192_v14 = vld [vmem:[#allocation2 + $0x111] sm:$0xff]  ;;  %540 = vst.msk [vmem:[#allocation2 + $0x1a8] sm:$0xff] %vm314_vm1, %v8199_v16 }
  0xb0   : > { %6759 = vmatmul.msk.f32.gmra.mxu0 %vm314_vm1, %v8160_v6 }
  0xb1   : > { %v498_v23 = vpop.f32.mrf.mxu3  ;;  %v8236_v29 = vpop.f32.mrf.mxu2 }
  0xb2   : > { %v474_v10 = vpop.f32.mrf.mxu0  ;;  %v8225_v24 = vadd.f32 %v498_v23, %v8131_v58 }
  0xb3   : > { %v8178_v11 = vadd.f32 %v474_v10, %v8131_v58 }
  0xb4   : > { %11166 = vst [vmem:[#allocation16_spill] sm:$0xff] %v8225_v24 }
  0xb5   : > { %11163 = vst [vmem:[#allocation13_spill] sm:$0xff] %v8178_v11  ;;  %v8182_v12 = vld [vmem:[#allocation2 + $0x127] sm:$0xff] }
  0xb6   : > { %v8184_v13 = vld [vmem:[#allocation2 + $0x128] sm:$0xff]  ;;  %533 = vst.msk [vmem:[#allocation2 + $0x130] sm:$0xff] %vm314_vm1, %v8178_v11  ;;  %6729 = vmatmul.msk.f32.gmra.mxu2 %vm314_vm1, %v8182_v12  ;;  %6775 = vmatmul.msk.f32.gmra.mxu1 %vm314_vm1, %v8182_v12 }
  0xb7   : > { %6745 = vmatmul.msk.f32.gmra.mxu3 %vm314_vm1, %v8184_v13  ;;  %541 = vst.msk [vmem:[#allocation2 + $0x1b0] sm:$0xff] %vm314_vm1, %v8225_v24  ;;  %v8363_v1 = vld [vmem:[#allocation2 + $0x1a7] sm:$0xff] }
  0xb8   : > { %6760 = vmatmul.msk.f32.gmra.mxu0 %vm314_vm1, %v8192_v14 }
  0xb9   : > { %v501_v31 = vpop.f32.mrf.mxu3  ;;  %v8274_v38 = vpop.f32.mrf.mxu2 }
  0xba   : > { %v477_v17 = vpop.f32.mrf.mxu0  ;;  %v8251_v32 = vadd.f32 %v501_v31, %v8131_v58  ;;  %v1717_v31 = vld [vmem:[#allocation3 + $0x78] sm:$0xff] }
  0xbb   : > { %v8204_v19 = vadd.f32 %v477_v17, %v8131_v58  ;;  %1780 = vmatpush.msra.mxu1 %v1717_v31 }
  0xbc   : > { %11168 = vst [vmem:[#allocation18_spill] sm:$0xff] %v8251_v32 }
  0xbd   : > { %11165 = vst [vmem:[#allocation15_spill] sm:$0xff] %v8204_v19  ;;  %v8208_v20 = vld [vmem:[#allocation2 + $0x12f] sm:$0xff]  ;;  %1781 = vmatpush.msra.mxu1 %v1716_v61 }
  0xbe   : > { %v8210_v21 = vld [vmem:[#allocation2 + $0x130] sm:$0xff]  ;;  %534 = vst.msk [vmem:[#allocation2 + $0x148] sm:$0xff] %vm314_vm1, %v8204_v19  ;;  %6730 = vmatmul.msk.f32.gmra.mxu2 %vm314_vm1, %v8208_v20  ;;  %6776 = vmatmul.msk.f32.gmra.mxu1 %vm314_vm1, %v8208_v20 }
  0xbf   : > { %v8212_v22 = vld [vmem:[#allocation2 + $0x129] sm:$0xff]  ;;  %6746 = vmatmul.msk.f32.gmra.mxu3 %vm314_vm1, %v8210_v21  ;;  %v8244_v30 = vld [vmem:[#allocation2 + $0x131] sm:$0xff]  ;;  %542 = vst.msk [vmem:[#allocation2 + $0x1c8] sm:$0xff] %vm314_vm1, %v8251_v32 }
  0xc0   : > { %6761 = vmatmul.msk.f32.gmra.mxu0 %vm314_vm1, %v8212_v22  ;;  %v8383_v61 = vld [vmem:[#allocation2 + $0x1af] sm:$0xff] }
  0xc1   : > { %v504_v39 = vpop.f32.mrf.mxu3  ;;  %v8300_v46 = vpop.f32.mrf.mxu2  ;;  %v8403_v16 = vld [vmem:[#allocation2 + $0x1b1] sm:$0xff] }
  0xc2   : > { %v480_v25 = vpop.f32.mrf.mxu0  ;;  %v8277_v40 = vadd.f32 %v504_v39, %v8131_v58  ;;  %v8347_v39 = vld [vmem:[#allocation2 + $0x190] sm:$0xff] }
  0xc3   : > { %v8228_v26 = vadd.f32 %v480_v25, %v8131_v58  ;;  %v1569_v25 = vld [vmem:[#allocation3 + $0x68] sm:$0xff] }
  0xc4   : > { %11170 = vst [vmem:[#allocation20_spill] sm:$0xff] %v8277_v40  ;;  %1632 = vmatpush.msra.mxu0 %v1569_v25  ;;  %v8373_v25 = vld [vmem:[#allocation2 + $0x191] sm:$0xff] }
  0xc5   : > { %11167 = vst [vmem:[#allocation17_spill] sm:$0xff] %v8228_v26  ;;  %v8232_v27 = vld [vmem:[#allocation2 + $0x147] sm:$0xff] }
  0xc6   : > { %v8234_v28 = vld [vmem:[#allocation2 + $0x148] sm:$0xff]  ;;  %535 = vst.msk [vmem:[#allocation2 + $0x150] sm:$0xff] %vm314_vm1, %v8228_v26  ;;  %6731 = vmatmul.msk.f32.gmra.mxu2 %vm314_vm1, %v8232_v27  ;;  %6777 = vmatmul.msk.f32.gmra.mxu1 %vm314_vm1, %v8232_v27 }
  0xc7   : > { %6747 = vmatmul.msk.f32.gmra.mxu3 %vm314_vm1, %v8234_v28  ;;  %543 = vst.msk [vmem:[#allocation2 + $0x1d0] sm:$0xff] %vm314_vm1, %v8277_v40  ;;  %v8401_v24 = vld [vmem:[#allocation2 + $0x1c7] sm:$0xff] }
  0xc8   : > { %6762 = vmatmul.msk.f32.gmra.mxu0 %vm314_vm1, %v8244_v30 }
  0xc9   : > { %v507_v47 = vpop.f32.mrf.mxu3  ;;  %v8329_v10 = vpop.f32.mrf.mxu2 }
  0xca   : > { %v483_v33 = vpop.f32.mrf.mxu0  ;;  %v8303_v48 = vadd.f32 %v507_v47, %v8131_v58 }
  0xcb   : > { %v8254_v34 = vadd.f32 %v483_v33, %v8131_v58  ;;  %v1568_v33 = vld [vmem:[#allocation3 + $0x60] sm:$0xff] }
  0xcc   : > { %11172 = vst [vmem:[#allocation22_spill] sm:$0xff] %v8303_v48  ;;  %1633 = vmatpush.msra.mxu0 %v1568_v33  ;;  %v8381_v33 = vld [vmem:[#allocation2 + $0x1b0] sm:$0xff] }
  0xcd   : > { %11169 = vst [vmem:[#allocation19_spill] sm:$0xff] %v8254_v34  ;;  %v8258_v35 = vld [vmem:[#allocation2 + $0x14f] sm:$0xff] }
  0xce   : > { %v8260_v36 = vld [vmem:[#allocation2 + $0x150] sm:$0xff]  ;;  %536 = vst.msk [vmem:[#allocation2 + $0x168] sm:$0xff] %vm314_vm1, %v8254_v34  ;;  %6732 = vmatmul.msk.f32.gmra.mxu2 %vm314_vm1, %v8258_v35  ;;  %6778 = vmatmul.msk.f32.gmra.mxu1 %vm314_vm1, %v8258_v35 }
  0xcf   : > { %v8262_v37 = vld [vmem:[#allocation2 + $0x149] sm:$0xff]  ;;  %6748 = vmatmul.msk.f32.gmra.mxu3 %vm314_vm1, %v8260_v36  ;;  %v8294_v45 = vld [vmem:[#allocation2 + $0x151] sm:$0xff]  ;;  %544 = vst.msk [vmem:[#allocation2 + $0x1e8] sm:$0xff] %vm314_vm1, %v8303_v48 }
  0xd0   : > { %6763 = vmatmul.msk.f32.gmra.mxu0 %vm314_vm1, %v8262_v37  ;;  %v8419_v34 = vld [vmem:[#allocation2 + $0x1cf] sm:$0xff] }
  0xd1   : > { %v510_v2 = vpop.f32.mrf.mxu3  ;;  %v8351_v47 = vpop.f32.mrf.mxu2 }
  0xd2   : > { %v486_v41 = vpop.f32.mrf.mxu0  ;;  %v8327_v8 = vadd.f32 %v510_v2, %v8131_v58  ;;  %v8365_v2 = vld [vmem:[#allocation2 + $0x1a8] sm:$0xff] }
  0xd3   : > { %v8280_v42 = vadd.f32 %v486_v41, %v8131_v58 }
  0xd4   : > { %11174 = vst [vmem:[#allocation24_spill] sm:$0xff] %v8327_v8 }
  0xd5   : > { %11171 = vst [vmem:[#allocation21_spill] sm:$0xff] %v8280_v42  ;;  %v8284_v43 = vld [vmem:[#allocation2 + $0x167] sm:$0xff] }
  0xd6   : > { %v8286_v44 = vld [vmem:[#allocation2 + $0x168] sm:$0xff]  ;;  %537 = vst.msk [vmem:[#allocation2 + $0x170] sm:$0xff] %vm314_vm1, %v8280_v42  ;;  %6733 = vmatmul.msk.f32.gmra.mxu2 %vm314_vm1, %v8284_v43  ;;  %6779 = vmatmul.msk.f32.gmra.mxu1 %vm314_vm1, %v8284_v43 }
  0xd7   : > { %6749 = vmatmul.msk.f32.gmra.mxu3 %vm314_vm1, %v8286_v44  ;;  %545 = vst.msk [vmem:[#allocation2 + $0x1f0] sm:$0xff] %vm314_vm1, %v8327_v8  ;;  %v8389_v8 = vld [vmem:[#allocation2 + $0x1a9] sm:$0xff] }
  0xd8   : > { %6764 = vmatmul.msk.f32.gmra.mxu0 %vm314_vm1, %v8294_v45 }
  0xd9   : > { %v8379_v31 = vpop.f32.mrf.mxu2  ;;  %v8399_v32 = vpop.f32.mrf.mxu3 }
  0xda   : > { %v489_v49 = vpop.f32.mrf.mxu0 }
  0xdb   : > { %v8306_v50 = vadd.f32 %v489_v49, %v8131_v58  ;;  %v1865_v58 = vld [vmem:[#allocation3 + $0x88] sm:$0xff] }
  0xdc   : > { %1928 = vmatpush.msrb.mxu2 %v1865_v58  ;;  %v8367_v58 = vpop.f32.mrf.mxu1 }
  0xdd   : > { %11173 = vst [vmem:[#allocation23_spill] sm:$0xff] %v8306_v50  ;;  %v8310_v52 = vld [vmem:[#allocation2 + $0x16f] sm:$0xff] }
  0xde   : > { %v8312_v53 = vld [vmem:[#allocation2 + $0x170] sm:$0xff]  ;;  %538 = vst.msk [vmem:[#allocation2 + $0x188] sm:$0xff] %vm314_vm1, %v8306_v50  ;;  %6734 = vmatmul.msk.f32.gmra.mxu2 %vm314_vm1, %v8310_v52  ;;  %6780 = vmatmul.msk.f32.gmra.mxu1 %vm314_vm1, %v8310_v52 }
  0xdf   : > { %v8314_v59 = vld [vmem:[#allocation2 + $0x169] sm:$0xff]  ;;  %6750 = vmatmul.msk.f32.gmra.mxu3 %vm314_vm1, %v8312_v53  ;;  %v8341_v23 = vld [vmem:[#allocation2 + $0x171] sm:$0xff] }
  0xe0   : > { %6765 = vmatmul.msk.f32.gmra.mxu0 %vm314_vm1, %v8314_v59 }
  0xe1   : > { %v8397_v40 = vpop.f32.mrf.mxu2  ;;  %v8417_v42 = vpop.f32.mrf.mxu3 }
  0xe4   : > { %v8395_v48 = vpop.f32.mrf.mxu1 }
  0xe5   : > { %v8333_v15 = vld [vmem:[#allocation2 + $0x187] sm:$0xff]  ;;  %v8349_v41 = vld [vmem:[#allocation2 + $0x18f] sm:$0xff] }
  0xe6   : > { %v8335_v17 = vld [vmem:[#allocation2 + $0x188] sm:$0xff]  ;;  %6735 = vmatmul.msk.f32.gmra.mxu2 %vm314_vm1, %v8333_v15  ;;  %6781 = vmatmul.msk.f32.gmra.mxu1 %vm314_vm1, %v8333_v15 }
  0xe7   : > { %6751 = vmatmul.msk.f32.gmra.mxu3 %vm314_vm1, %v8335_v17  ;;  %v8357_v49 = vld [vmem:[#allocation2 + $0x189] sm:$0xff] }
  0xe8   : > { %6766 = vmatmul.msk.f32.gmra.mxu0 %vm314_vm1, %v8341_v23 }
  0xe9   : > { %v8415_v50 = vpop.f32.mrf.mxu2  ;;  %v8433_v26 = vpop.f32.mrf.mxu3 }
  0xec   : > { %v8413_v9 = vpop.f32.mrf.mxu1 }
  0xee   : > { %6736 = vmatmul.msk.f32.gmra.mxu2 %vm314_vm1, %v8349_v41  ;;  %6782 = vmatmul.msk.f32.gmra.mxu1 %vm314_vm1, %v8349_v41 }
  0xef   : > { %6752 = vmatmul.msk.f32.gmra.mxu3 %vm314_vm1, %v8347_v39 }
  0xf0   : > { %6767 = vmatmul.msk.f32.gmra.mxu0 %vm314_vm1, %v8357_v49 }
  0xf6   : > { %6737 = vmatmul.msk.f32.gmra.mxu2 %vm314_vm1, %v8363_v1  ;;  %6783 = vmatmul.msk.f32.gmra.mxu1 %vm314_vm1, %v8363_v1 }
  0xf7   : > { %6753 = vmatmul.msk.f32.gmra.mxu3 %vm314_vm1, %v8365_v2 }
  0xf8   : > { %6768 = vmatmul.msk.f32.gmra.mxu0 %vm314_vm1, %v8373_v25 }
  0xfe   : > { %6738 = vmatmul.msk.f32.gmra.mxu2 %vm314_vm1, %v8383_v61  ;;  %6784 = vmatmul.msk.f32.gmra.mxu1 %vm314_vm1, %v8383_v61 }
  0xff   : > { %6754 = vmatmul.msk.f32.gmra.mxu3 %vm314_vm1, %v8381_v33 }
 0x100   : > { %6769 = vmatmul.msk.f32.gmra.mxu0 %vm314_vm1, %v8389_v8 }
 0x106   : > { %6787 = vmatmul.msk.f32.vlgmr.msra.gmra.mxu2 %vm314_vm1, %v8079_v51  ;;  %6785 = vmatmul.msk.f32.gmra.mxu1 %vm314_vm1, %v8401_v24  ;;  %v8429_v51 = vpop.f32.mrf.mxu1 }
 0x107   : > { %6803 = vmatmul.msk.f32.vlgmr.msra.gmra.mxu3 %vm314_vm1, %v8110_v55  ;;  %v8431_v55 = vpop.f32.mrf.mxu2 }
 0x108   : > { %6770 = vmatmul.msk.f32.gmra.mxu0 %vm314_vm1, %v8403_v16 }
 0x10e   : > { %6788 = vmatmul.msk.f32.gmra.mxu2 %vm314_vm1, %v8108_v54  ;;  %6786 = vmatmul.msk.f32.gmra.mxu1 %vm314_vm1, %v8419_v34  ;;  %v626_v54 = vpop.f32.mrf.mxu1 }
 0x10f   : > { %6804 = vmatmul.msk.f32.gmra.mxu3 %vm314_vm1, %v8121_v56  ;;  %v8451_v56 = vpop.f32.mrf.mxu2 }
 0x110   : > { %6819 = vmatmul.msk.f32.vlgmr.msra.gmra.mxu0 %vm314_vm1, %v8141_v63  ;;  %v8453_v63 = vpop.f32.mrf.mxu3 }
 0x116   : > { %6789 = vmatmul.msk.f32.gmra.mxu2 %vm314_vm1, %v8143_v0  ;;  %6835 = vmatmul.msk.f32.vlgmr.msra.gmra.mxu1 %vm314_vm1, %v8143_v0 }
 0x117   : > { %6805 = vmatmul.msk.f32.gmra.mxu3 %vm314_vm1, %v8160_v6 }
 0x118   : > { %6820 = vmatmul.msk.f32.gmra.mxu0 %vm314_vm1, %v8156_v4  ;;  %v8456_v4 = vperm.slane %v8128_v57, 0 }
 0x11a   : > { %v627_v0 = vadd.f32 %v626_v54, %v8456_v4 }
 0x11e   : > { %6790 = vmatmul.msk.f32.gmra.mxu2 %vm314_vm1, %v8158_v5  ;;  %6836 = vmatmul.msk.f32.gmra.mxu1 %vm314_vm1, %v8158_v5  ;;  %v1864_v5 = vld [vmem:[#allocation3 + $0x80] sm:$0xff] }
 0x11f   : > { %6806 = vmatmul.msk.f32.gmra.mxu3 %vm314_vm1, %v8192_v14  ;;  %1929 = vmatpush.msrb.mxu2 %v1864_v5 }
 0x120   : > { %6821 = vmatmul.msk.f32.gmra.mxu0 %vm314_vm1, %v8182_v12  ;;  %v629_v12 = vpop.f32.mrf.mxu1 }
 0x121   : > { %v630_v54 = vadd.f32 %v629_v12, %v8456_v4 }
 0x126   : > { %6791 = vmatmul.msk.f32.gmra.mxu2 %vm314_vm1, %v8184_v13  ;;  %6837 = vmatmul.msk.f32.gmra.mxu1 %vm314_vm1, %v8184_v13 }
 0x127   : > { %6807 = vmatmul.msk.f32.gmra.mxu3 %vm314_vm1, %v8212_v22 }
 0x128   : > { %6822 = vmatmul.msk.f32.gmra.mxu0 %vm314_vm1, %v8208_v20 }
 0x129   : > { %v758_v19 = vpop.f32.mrf.mxu2 }
 0x12a   : > { %v906_v57 = vpop.f32.mrf.mxu3  ;;  %v798_v11 = vadd.f32 %v758_v19, %v627_v0  ;;  %v632_v19 = vpop.f32.mrf.mxu1 }
 0x12b   : > { %v633_v0 = vadd.f32 %v632_v19, %v8456_v4 }
 0x12c   : > { %v8467_v3 = vadd.f32 %v906_v57, %v798_v11 }
 0x12e   : > { %6792 = vmatmul.msk.f32.gmra.mxu2 %vm314_vm1, %v8210_v21  ;;  %6838 = vmatmul.msk.f32.gmra.mxu1 %vm314_vm1, %v8210_v21 }
 0x12f   : > { %6808 = vmatmul.msk.f32.gmra.mxu3 %vm314_vm1, %v8244_v30 }
 0x130   : > { %6823 = vmatmul.msk.f32.gmra.mxu0 %vm314_vm1, %v8232_v27 }
 0x131   : > { %v761_v13 = vpop.f32.mrf.mxu2 }
 0x132   : > { %v909_v20 = vpop.f32.mrf.mxu3  ;;  %v799_v5 = vadd.f32 %v761_v13, %v630_v54  ;;  %v635_v54 = vpop.f32.mrf.mxu1 }
 0x133   : > { %v636_v13 = vadd.f32 %v635_v54, %v8456_v4 }
 0x134   : > { %v8478_v11 = vadd.f32 %v909_v20, %v799_v5 }
 0x136   : > { %6793 = vmatmul.msk.f32.gmra.mxu2 %vm314_vm1, %v8234_v28  ;;  %6839 = vmatmul.msk.f32.gmra.mxu1 %vm314_vm1, %v8234_v28  ;;  %v8500_v28 = vpop.f32.mrf.mxu0 }
 0x137   : > { %6809 = vmatmul.msk.f32.gmra.mxu3 %vm314_vm1, %v8262_v37 }
 0x138   : > { %6824 = vmatmul.msk.f32.gmra.mxu0 %vm314_vm1, %v8258_v35 }
 0x139   : > { %v764_v21 = vpop.f32.mrf.mxu2 }
 0x13a   : > { %v912_v27 = vpop.f32.mrf.mxu3  ;;  %v800_v12 = vadd.f32 %v764_v21, %v633_v0 }
 0x13c   : > { %v8489_v57 = vadd.f32 %v912_v27, %v800_v12 }
 0x13e   : > { %6794 = vmatmul.msk.f32.gmra.mxu2 %vm314_vm1, %v8260_v36  ;;  %6840 = vmatmul.msk.f32.gmra.mxu1 %vm314_vm1, %v8260_v36  ;;  %v639_v36 = vadd.f32 %v8172_v7, %v8456_v4  ;;  %v8518_v27 = vpop.f32.mrf.mxu0  ;;  %v642_v7 = vadd.f32 %v8201_v18, %v8456_v4  ;;  %v645_v18 = vadd.f32 %v8236_v29, %v8456_v4 }
 0x13f   : > { %6810 = vmatmul.msk.f32.gmra.mxu3 %vm314_vm1, %v8294_v45  ;;  %v648_v29 = vadd.f32 %v8274_v38, %v8456_v4  ;;  %v651_v38 = vadd.f32 %v8300_v46, %v8456_v4  ;;  %v654_v46 = vadd.f32 %v8329_v10, %v8456_v4 }
 0x140   : > { %6825 = vmatmul.msk.f32.gmra.mxu0 %vm314_vm1, %v8284_v43  ;;  %v8514_v43 = vpop.f32.mrf.mxu1 }
 0x141   : > { %v767_v35 = vpop.f32.mrf.mxu2 }
 0x142   : > { %v801_v20 = vadd.f32 %v767_v35, %v636_v13  ;;  %v915_v5 = vpop.f32.mrf.mxu3 }
 0x144   : > { %v8502_v19 = vadd.f32 %v915_v5, %v801_v20 }
 0x146   : > { %6795 = vmatmul.msk.f32.gmra.mxu2 %vm314_vm1, %v8286_v44  ;;  %6841 = vmatmul.msk.f32.gmra.mxu1 %vm314_vm1, %v8286_v44  ;;  %v8534_v54 = vpop.f32.mrf.mxu0 }
 0x147   : > { %6811 = vmatmul.msk.f32.gmra.mxu3 %vm314_vm1, %v8314_v59 }
 0x148   : > { %6826 = vmatmul.msk.f32.gmra.mxu0 %vm314_vm1, %v8310_v52  ;;  %v8532_v12 = vpop.f32.mrf.mxu1 }
 0x149   : > { %v770_v0 = vpop.f32.mrf.mxu2 }
 0x14a   : > { %v8516_v21 = vadd.f32 %v770_v0, %v639_v36 }
 0x14e   : > { %6796 = vmatmul.msk.f32.gmra.mxu2 %vm314_vm1, %v8312_v53  ;;  %6842 = vmatmul.msk.f32.gmra.mxu1 %vm314_vm1, %v8312_v53  ;;  %v8554_v35 = vpop.f32.mrf.mxu0 }
 0x14f   : > { %6812 = vmatmul.msk.f32.gmra.mxu3 %vm314_vm1, %v8341_v23 }
 0x150   : > { %6827 = vmatmul.msk.f32.gmra.mxu0 %vm314_vm1, %v8333_v15  ;;  %v8548_v13 = vpop.f32.mrf.mxu1 }
 0x151   : > { %v773_v44 = vpop.f32.mrf.mxu2 }
 0x152   : > { %v8530_v52 = vadd.f32 %v773_v44, %v642_v7  ;;  %v1269_v7 = vld [vmem:[#allocation2 + $0x1c8] sm:$0xff] }
 0x153   : > { %v8590_v44 = vld [vmem:[#allocation2 + $0x1c9] sm:$0xff] }
 0x156   : > { %6797 = vmatmul.msk.f32.gmra.mxu2 %vm314_vm1, %v8335_v17  ;;  %6843 = vmatmul.msk.f32.gmra.mxu1 %vm314_vm1, %v8335_v17 }
 0x157   : > { %6813 = vmatmul.msk.f32.gmra.mxu3 %vm314_vm1, %v8357_v49 }
 0x158   : > { %6828 = vmatmul.msk.f32.gmra.mxu0 %vm314_vm1, %v8349_v41  ;;  %v8564_v20 = vpop.f32.mrf.mxu1 }
 0x159   : > { %v776_v53 = vpop.f32.mrf.mxu2 }
 0x15a   : > { %v8546_v15 = vadd.f32 %v776_v53, %v645_v18  ;;  %v1565_v53 = vld [vmem:[#allocation2 + $0x1e7] sm:$0xff] }
 0x15c   : > { %11175 = vst [vmem:[#allocation25_spill] sm:$0xff] %v8546_v15 }
 0x15e   : > { %6798 = vmatmul.msk.f32.gmra.mxu2 %vm314_vm1, %v8347_v39  ;;  %6844 = vmatmul.msk.f32.gmra.mxu1 %vm314_vm1, %v8347_v39  ;;  %v1054_v39 = vpop.f32.mrf.mxu0 }
 0x15f   : > { %6814 = vmatmul.msk.f32.gmra.mxu3 %vm314_vm1, %v8373_v25  ;;  %v1094_v60 = vadd.f32 %v1054_v39, %v8467_v3 }
 0x160   : > { %6829 = vmatmul.msk.f32.gmra.mxu0 %vm314_vm1, %v8363_v1  ;;  %v1203_v36 = vpop.f32.mrf.mxu1 }
 0x161   : > { %v779_v17 = vpop.f32.mrf.mxu2 }
 0x162   : > { %v8562_v41 = vadd.f32 %v779_v17, %v648_v29  ;;  %v1270_v17 = vld [vmem:[#allocation2 + $0x1d0] sm:$0xff] }
 0x164   : > { %11176 = vst [vmem:[#allocation26_spill] sm:$0xff] %v8562_v41 }
 0x166   : > { %6799 = vmatmul.msk.f32.gmra.mxu2 %vm314_vm1, %v8365_v2  ;;  %6845 = vmatmul.msk.f32.gmra.mxu1 %vm314_vm1, %v8365_v2  ;;  %v1057_v0 = vpop.f32.mrf.mxu0 }
 0x167   : > { %6815 = vmatmul.msk.f32.gmra.mxu3 %vm314_vm1, %v8389_v8  ;;  %v1095_v41 = vadd.f32 %v1057_v0, %v8478_v11 }
 0x168   : > { %6830 = vmatmul.msk.f32.gmra.mxu0 %vm314_vm1, %v8383_v61  ;;  %v1206_v10 = vpop.f32.mrf.mxu1 }
 0x169   : > { %v782_v1 = vpop.f32.mrf.mxu2  ;;  %v1244_v15 = vadd.f32 %v1206_v10, %v1095_v41 }
 0x16a   : > { %v8576_v5 = vadd.f32 %v782_v1, %v651_v38  ;;  %v8602_v38 = vld [vmem:[#allocation2 + $0x1d1] sm:$0xff] }
 0x16c   : > { %11177 = vst [vmem:[#allocation27_spill] sm:$0xff] %v8576_v5 }
 0x16e   : > { %6800 = vmatmul.msk.f32.gmra.mxu2 %vm314_vm1, %v8381_v33  ;;  %6846 = vmatmul.msk.f32.gmra.mxu1 %vm314_vm1, %v8381_v33  ;;  %v1060_v29 = vpop.f32.mrf.mxu0 }
 0x16f   : > { %6816 = vmatmul.msk.f32.gmra.mxu3 %vm314_vm1, %v8403_v16 }
 0x170   : > { %6831 = vmatmul.msk.f32.gmra.mxu0 %vm314_vm1, %v8401_v24  ;;  %v657_v24 = vadd.f32 %v8351_v47, %v8456_v4 }
 0x171   : > { %v785_v2 = vpop.f32.mrf.mxu2 }
 0x172   : > { %v8588_v61 = vadd.f32 %v785_v2, %v654_v46  ;;  %v1209_v46 = vpop.f32.mrf.mxu1  ;;  %v1566_v2 = vld [vmem:[#allocation2 + $0x1ef] sm:$0xff] }
 0x174   : > { %11178 = vst [vmem:[#allocation28_spill] sm:$0xff] %v8588_v61 }
 0x176   : > { %6801 = vmatmul.msk.f32.gmra.mxu2 %vm314_vm1, %v1269_v7  ;;  %6847 = vmatmul.msk.f32.gmra.mxu1 %vm314_vm1, %v1269_v7  ;;  %v1713_v7 = vld [vmem:[#allocation2 + $0x1e8] sm:$0xff] }
 0x177   : > { %6817 = vmatmul.msk.f32.gmra.mxu3 %vm314_vm1, %v8590_v44 }
 0x178   : > { %6832 = vmatmul.msk.f32.gmra.mxu0 %vm314_vm1, %v8419_v34  ;;  %v660_v34 = vadd.f32 %v8379_v31, %v8456_v4 }
 0x179   : > { %v788_v33 = vpop.f32.mrf.mxu2 }
 0x17a   : > { %v8600_v18 = vadd.f32 %v788_v33, %v657_v24  ;;  %v1063_v24 = vpop.f32.mrf.mxu0 }
 0x17b   : > { %v1097_v41 = vadd.f32 %v1063_v24, %v8502_v19 }
 0x17c   : > { %11179 = vst [vmem:[#allocation29_spill] sm:$0xff] %v8600_v18 }
 0x17e   : > { %6802 = vmatmul.msk.f32.gmra.mxu2 %vm314_vm1, %v1270_v17  ;;  %6848 = vmatmul.msk.f32.gmra.mxu1 %vm314_vm1, %v1270_v17  ;;  %v1714_v17 = vld [vmem:[#allocation2 + $0x1f0] sm:$0xff] }
 0x17f   : > { %6818 = vmatmul.msk.f32.gmra.mxu3 %vm314_vm1, %v8602_v38 }
 0x180   : > { %6833 = vmatmul.msk.f32.gmra.mxu0 %vm314_vm1, %v1565_v53  ;;  %v1212_v53 = vpop.f32.mrf.mxu1 }
 0x181   : > { %v791_v47 = vpop.f32.mrf.mxu2 }
 0x182   : > { %v8611_v1 = vadd.f32 %v791_v47, %v660_v34  ;;  %v8624_v34 = vpop.f32.mrf.mxu3  ;;  %v8626_v47 = vpop.f32.mrf.mxu0 }
 0x184   : > { %11180 = vst [vmem:[#allocation30_spill] sm:$0xff] %v8611_v1 }
 0x186   : > { %6851 = vmatmul.msk.f32.vlgmr.msrb.gmra.mxu2 %vm314_vm1, %v8160_v6  ;;  %6849 = vmatmul.msk.f32.gmra.mxu1 %vm314_vm1, %v1713_v7 }
 0x188   : > { %6834 = vmatmul.msk.f32.gmra.mxu0 %vm314_vm1, %v1566_v2  ;;  %v8630_v6 = vpop.f32.mrf.mxu1 }
 0x189   : > { %v8617_v33 = vpop.f32.mrf.mxu2 }
 0x18a   : > { %v8634_v7 = vpop.f32.mrf.mxu3 }
 0x18e   : > { %6852 = vmatmul.msk.f32.gmra.mxu2 %vm314_vm1, %v8192_v14  ;;  %6850 = vmatmul.msk.f32.gmra.mxu1 %vm314_vm1, %v1714_v17  ;;  %v8638_v14 = vpop.f32.mrf.mxu0 }
 0x190   : > { %v8640_v17 = vpop.f32.mrf.mxu1 }
 0x191   : > { %v8622_v31 = vpop.f32.mrf.mxu2 }
 0x192   : > { %v8645_v1 = vpop.f32.mrf.mxu3 }
 0x193   : > { %11181 = vst [vmem:[#allocation31_spill] sm:$0xff] %v8645_v1 }
 0x196   : > { %6853 = vmatmul.msk.f32.gmra.mxu2 %vm314_vm1, %v8212_v22  ;;  %v1243_v22 = vadd.f32 %v1203_v36, %v1094_v60  ;;  %v8649_v61 = vpop.f32.mrf.mxu0  ;;  %v1096_v36 = vadd.f32 %v1060_v29, %v8489_v57 }
 0x199   : > { %v8632_v2 = vpop.f32.mrf.mxu2 }
 0x19a   : > { %v8658_v3 = vpop.f32.mrf.mxu3 }
 0x19e   : > { %6854 = vmatmul.msk.f32.gmra.mxu2 %vm314_vm1, %v8244_v30  ;;  %v8653_v30 = vpop.f32.mrf.mxu1 }
 0x1a1   : > { %v8642_v62 = vpop.f32.mrf.mxu2 }
 0x1a2   : > { %v8669_v0 = vpop.f32.mrf.mxu3 }
 0x1a6   : > { %6855 = vmatmul.msk.f32.gmra.mxu2 %vm314_vm1, %v8262_v37  ;;  %v8662_v37 = vpop.f32.mrf.mxu0  ;;  %v8664_v60 = vpop.f32.mrf.mxu1 }
 0x1a9   : > { %v1351_v18 = vpop.f32.mrf.mxu2 }
 0x1aa   : > { %v8651_v5 = vadd.f32 %v1351_v18, %v1243_v22  ;;  %v1245_v18 = vadd.f32 %v1209_v46, %v1096_v36  ;;  %v1246_v22 = vadd.f32 %v1212_v53, %v1097_v41 }
 0x1ae   : > { %6856 = vmatmul.msk.f32.gmra.mxu2 %vm314_vm1, %v8294_v45  ;;  %v8674_v10 = vpop.f32.mrf.mxu0 }
 0x1af   : > { %11182 = vst [vmem:[#allocation32_spill] sm:$0xff] %v8674_v10  ;;  %v1862_v10 = vld [vmem:[#allocation2 + $0x1f1] sm:$0xff] }
 0x1b1   : > { %v1354_v39 = vpop.f32.mrf.mxu2 }
 0x1b2   : > { %v8660_v1 = vadd.f32 %v1354_v39, %v1244_v15  ;;  %v8678_v15 = vpop.f32.mrf.mxu1 }
 0x1b3   : > { %11183 = vst [vmem:[#allocation33_spill] sm:$0xff] %v8678_v15 }
 0x1b6   : > { %6857 = vmatmul.msk.f32.gmra.mxu2 %vm314_vm1, %v8314_v59  ;;  %v8682_v59 = vpop.f32.mrf.mxu3  ;;  %v8686_v46 = vpop.f32.mrf.mxu0 }
 0x1b7   : > { %11184 = vst [vmem:[#allocation34_spill] sm:$0xff] %v8682_v59 }
 0x1b8   : > { %11185 = vst [vmem:[#allocation35_spill] sm:$0xff] %v8686_v46  ;;  %v1861_v46 = vld [vmem:[#allocation2 + $0x1e9] sm:$0xff] }
 0x1b9   : > { %v1357_v11 = vpop.f32.mrf.mxu2 }
 0x1ba   : > { %v8671_v45 = vadd.f32 %v1357_v11, %v1245_v18  ;;  %v8688_v39 = vpop.f32.mrf.mxu1 }
 0x1bb   : > { %11186 = vst [vmem:[#allocation36_spill] sm:$0xff] %v8688_v39  ;;  %v618_v39 = vadd.f32 %v8395_v48, %v8456_v4 }
 0x1bd   : > { %v795_v59 = vadd.f32 %v8415_v50, %v618_v39 }
 0x1be   : > { %6858 = vmatmul.msk.f32.gmra.mxu2 %vm314_vm1, %v8341_v23  ;;  %v8692_v24 = vpop.f32.mrf.mxu3  ;;  %v8698_v53 = vpop.f32.mrf.mxu0 }
 0x1bf   : > { %11187 = vst [vmem:[#allocation37_spill] sm:$0xff] %v8692_v24 }
 0x1c0   : > { %11188 = vst [vmem:[#allocation38_spill] sm:$0xff] %v8698_v53 }
 0x1c1   : > { %v1360_v57 = vpop.f32.mrf.mxu2 }
 0x1c2   : > { %v8680_v29 = vadd.f32 %v1360_v57, %v1246_v22  ;;  %v8700_v36 = vpop.f32.mrf.mxu1 }
 0x1c3   : > { %11189 = vst [vmem:[#allocation39_spill] sm:$0xff] %v8700_v36 }
 0x1c6   : > { %6859 = vmatmul.msk.f32.gmra.mxu2 %vm314_vm1, %v8357_v49  ;;  %v8704_v49 = vpop.f32.mrf.mxu3  ;;  %v8708_v11 = vpop.f32.mrf.mxu0 }
 0x1c7   : > { %11190 = vst [vmem:[#allocation40_spill] sm:$0xff] %v8704_v49  ;;  %v615_v49 = vadd.f32 %v8367_v58, %v8456_v4 }
 0x1c8   : > { %11191 = vst [vmem:[#allocation41_spill] sm:$0xff] %v8708_v11 }
 0x1c9   : > { %v8690_v19 = vpop.f32.mrf.mxu2 }
 0x1ca   : > { %v8710_v41 = vpop.f32.mrf.mxu1 }
 0x1cb   : > { %11192 = vst [vmem:[#allocation42_spill] sm:$0xff] %v8710_v41  ;;  %v794_v41 = vadd.f32 %v8397_v40, %v615_v49 }
 0x1ce   : > { %6860 = vmatmul.msk.f32.gmra.mxu2 %vm314_vm1, %v8373_v25  ;;  %v1487_v22 = vpop.f32.mrf.mxu3  ;;  %v1635_v57 = vpop.f32.mrf.mxu0 }
 0x1d1   : > { %v8696_v23 = vpop.f32.mrf.mxu2 }
 0x1d2   : > { %v1783_v36 = vpop.f32.mrf.mxu1 }
 0x1d6   : > { %6861 = vmatmul.msk.f32.gmra.mxu2 %vm314_vm1, %v8389_v8  ;;  %v1490_v53 = vpop.f32.mrf.mxu3 }
 0x1d9   : > { %v8706_v18 = vpop.f32.mrf.mxu2 }
 0x1da   : > { %v1786_v11 = vpop.f32.mrf.mxu1 }
 0x1de   : > { %6862 = vmatmul.msk.f32.gmra.mxu2 %vm314_vm1, %v8403_v16  ;;  %v1638_v16 = vpop.f32.mrf.mxu0 }
 0x1e1   : > { %v8714_v25 = vpop.f32.mrf.mxu2 }
 0x1e2   : > { %v1789_v49 = vpop.f32.mrf.mxu1 }
 0x1e6   : > { %6863 = vmatmul.msk.f32.gmra.mxu2 %vm314_vm1, %v8590_v44  ;;  %v942_v44 = vadd.f32 %v8399_v32, %v794_v41  ;;  %v1641_v40 = vpop.f32.mrf.mxu0  ;;  %v621_v32 = vadd.f32 %v8413_v9, %v8456_v4 }
 0x1e8   : > { %v1090_v58 = vadd.f32 %v8500_v28, %v942_v44  ;;  %v796_v39 = vadd.f32 %v8431_v55, %v621_v32 }
 0x1e9   : > { %v8718_v8 = vpop.f32.mrf.mxu2 }
 0x1ea   : > { %11193 = vst [vmem:[#allocation43_spill] sm:$0xff] %v8718_v8  ;;  %v1493_v8 = vpop.f32.mrf.mxu3  ;;  %v1239_v15 = vadd.f32 %v8514_v43, %v1090_v58  ;;  %v944_v9 = vadd.f32 %v8433_v26, %v796_v39 }
 0x1ec   : > { %v1387_v48 = vadd.f32 %v8617_v33, %v1239_v15 }
 0x1ee   : > { %6864 = vmatmul.msk.f32.gmra.mxu2 %vm314_vm1, %v8602_v38  ;;  %v1535_v41 = vadd.f32 %v1487_v22, %v1387_v48  ;;  %v1644_v44 = vpop.f32.mrf.mxu0 }
 0x1f0   : > { %v1683_v33 = vadd.f32 %v1635_v57, %v1535_v41 }
 0x1f1   : > { %v8725_v24 = vpop.f32.mrf.mxu2 }
 0x1f2   : > { %11194 = vst [vmem:[#allocation44_spill] sm:$0xff] %v8725_v24  ;;  %v943_v24 = vadd.f32 %v8417_v42, %v795_v59  ;;  %v1792_v42 = vpop.f32.mrf.mxu1  ;;  %v624_v59 = vadd.f32 %v8429_v51, %v8456_v4  ;;  %v1831_v15 = vadd.f32 %v1783_v36, %v1683_v33 }
 0x1f4   : > { %v1091_v28 = vadd.f32 %v8518_v27, %v943_v24  ;;  %v2396_v27 = vld [vmem:[%s11090_s5 + $0x8] sm:$0xff]  ;;  %v1092_v24 = vadd.f32 %v8534_v54, %v944_v9 }
 0x1f5   : > { %2460 = vmatpush.msrb.mxu3 %v2396_v27 }
 0x1f6   : > { %6865 = vmatmul.msk.f32.gmra.mxu2 %vm314_vm1, %v1861_v46  ;;  %v1496_v46 = vpop.f32.mrf.mxu3  ;;  %v1240_v43 = vadd.f32 %v8532_v12, %v1091_v28  ;;  %v797_v12 = vadd.f32 %v8451_v56, %v624_v59  ;;  %v1241_v26 = vadd.f32 %v8548_v13, %v1092_v24  ;;  %v1647_v36 = vpop.f32.mrf.mxu0 }
 0x1f8   : > { %v945_v4 = vadd.f32 %v8453_v63, %v797_v12  ;;  %v1389_v57 = vadd.f32 %v8632_v2, %v1241_v26 }
 0x1f9   : > { %v8733_v38 = vpop.f32.mrf.mxu2 }
 0x1fa   : > { %v1795_v48 = vpop.f32.mrf.mxu1  ;;  %v1093_v56 = vadd.f32 %v8554_v35, %v945_v4 }
 0x1fc   : > { %v1242_v13 = vadd.f32 %v8564_v20, %v1093_v56 }
 0x1fe   : > { %6866 = vmatmul.msk.f32.gmra.mxu2 %vm314_vm1, %v1862_v10  ;;  %v1388_v10 = vadd.f32 %v8622_v31, %v1240_v43  ;;  %v1499_v58 = vpop.f32.mrf.mxu3  ;;  %v1390_v2 = vadd.f32 %v8642_v62, %v1242_v13 }
 0x200   : > { %v1536_v22 = vadd.f32 %v1490_v53, %v1388_v10  ;;  %v1537_v53 = vadd.f32 %v1493_v8, %v1389_v57  ;;  %v1538_v8 = vadd.f32 %v1496_v46, %v1390_v2 }
 0x201   : > { %v8742_v50 = vpop.f32.mrf.mxu2 }
 0x202   : > { %v1684_v31 = vadd.f32 %v1638_v16, %v1536_v22  ;;  %v1685_v16 = vadd.f32 %v1641_v40, %v1537_v53  ;;  %v8767_v33 = vpop.f32.mrf.mxu1  ;;  %v1686_v24 = vadd.f32 %v1644_v44, %v1538_v8 }
 0x204   : > { %v1832_v28 = vadd.f32 %v1786_v11, %v1684_v31  ;;  %v1833_v9 = vadd.f32 %v1789_v49, %v1685_v16  ;;  %v1650_v11 = vpop.f32.mrf.mxu0  ;;  %v1834_v62 = vadd.f32 %v1792_v42, %v1686_v24  ;;  %v1539_v49 = vadd.f32 %v1499_v58, %v8651_v5 }
 0x206   : > { %v1502_v43 = vpop.f32.mrf.mxu3  ;;  %v1687_v53 = vadd.f32 %v1647_v36, %v1539_v49 }
 0x208   : > { %v1835_v16 = vadd.f32 %v1795_v48, %v1687_v53 }
 0x209   : > { %v1931_v55 = vpop.f32.mrf.mxu2 }
 0x20a   : > { %v8755_v32 = vadd.f32 %v1931_v55, %v1831_v15 }
 0x20c   : > { %v6867_v51 = vmul.f32 -1.442695, %v8755_v32  ;;  %v8773_v4 = vpop.f32.mrf.mxu0 }
 0x20e   : > { %7360 = vpow2.f32 %v6867_v51  ;;  %v1505_v12 = vpop.f32.mrf.mxu3 }
 0x211   : > { %v1934_v54 = vpop.f32.mrf.mxu2 }
 0x212   : > { %v8762_v39 = vadd.f32 %v1934_v54, %v1832_v28  ;;  %v8777_v28 = vpop.f32.mrf.mxu1 }
 0x214   : > { %v7361_v41 = vpop.eup %7360  ;;  %v6868_v59 = vmul.f32 -1.442695, %v8762_v39  ;;  %v8787_v24 = vpop.f32.mrf.mxu0 }
 0x215   : > { %v2059_v63 = vadd.f32 1.0, %v7361_v41 }
 0x216   : > { %7362 = vpow2.f32 %v6868_v59  ;;  %v1508_v2 = vpop.f32.mrf.mxu3 }
 0x217   : > { %7364 = vrcp.f32 %v2059_v63  ;;  %v2086_v51 = vand.u32 2147483648, %v2059_v63  ;;  %v2084_v57 = vand.u32 2147483647, %v2059_v63  ;;  %vm2080_vm4 = vweird.f32 %v2059_v63 }
 0x219   : > { %v1937_v35 = vpop.f32.mrf.mxu2  ;;  %v2087_v5 = vor.u32 1.1754944e-38, %v2086_v51  ;;  %vm2085_vm6 = vcmp.eq.f32.partialorder %v2084_v57, 8.507059e+37 }
 0x21a   : > { %v8769_v10 = vadd.f32 %v1937_v35, %v1833_v9  ;;  %v8790_v49 = vpop.f32.mrf.mxu1 }
 0x21c   : > { %v7363_v27 = vpop.eup %7362  ;;  %v6869_v20 = vmul.f32 -1.442695, %v8769_v10 }
 0x21d   : > { %v7365_v15 = vpop.eup %7364  ;;  %v2060_v55 = vadd.f32 1.0, %v7363_v27 }
 0x21e   : > { %7366 = vpow2.f32 %v6869_v20  ;;  %v2076_v40 = vmul.f32 %v7365_v15, %v2059_v63  ;;  %vm2081_vm3 = vweird.f32 %v7365_v15  ;;  %v1540_v63 = vadd.f32 %v1502_v43, %v8660_v1 }
 0x21f   : > { %7368 = vrcp.f32 %v2060_v55  ;;  %vm2082_vm5 = vmor %vm2080_vm4, %vm2081_vm3  ;;  %v2101_v35 = vand.u32 2147483648, %v2060_v55  ;;  %v2099_v20 = vand.u32 2147483647, %v2060_v55  ;;  %vm2095_vm8 = vweird.f32 %v2060_v55 }
 0x220   : > { %v2077_v22 = vsub.f32 1.0, %v2076_v40 }
 0x221   : > { %v1940_v26 = vpop.f32.mrf.mxu2  ;;  %v2102_v1 = vor.u32 1.1754944e-38, %v2101_v35  ;;  %vm2100_vm10 = vcmp.eq.f32.partialorder %v2099_v20, 8.507059e+37 }
 0x222   : > { %v8775_v46 = vadd.f32 %v1940_v26, %v1834_v62  ;;  %v2078_v31 = vmul.f32 %v7365_v15, %v2077_v22  ;;  %v1688_v22 = vadd.f32 %v1650_v11, %v1540_v63  ;;  %v1541_v11 = vadd.f32 %v1505_v12, %v8671_v45  ;;  %v1659_v63 = vpop.f32.mrf.mxu0 }
 0x223   : > { %v950_v45 = vadd.f32 %v8624_v34, %v8516_v21 }
 0x224   : > { %v7367_v44 = vpop.eup %7366  ;;  %v6870_v54 = vmul.f32 -1.442695, %v8775_v46  ;;  %v2079_v56 = vadd.f32 %v7365_v15, %v2078_v31  ;;  %v1836_v57 = vadd.f32 %v8767_v33, %v1688_v22  ;;  %v1689_v12 = vadd.f32 %v8773_v4, %v1541_v11 }
 0x225   : > { %v7369_v42 = vpop.eup %7368  ;;  %v8780_v41 = vadd.f32 1.0, %v7367_v44  ;;  %v1098_v34 = vadd.f32 %v8626_v47, %v950_v45  ;;  %v1542_v4 = vadd.f32 %v1508_v2, %v8680_v29 }
 0x226   : > { %7370 = vpow2.f32 %v6870_v54  ;;  %v2083_v58 = vsel %vm2082_vm5, %v7365_v15, %v2079_v56  ;;  %v2091_v13 = vmul.f32 %v7369_v42, %v2060_v55  ;;  %vm2096_vm7 = vweird.f32 %v7369_v42  ;;  %v1511_v56 = vpop.f32.mrf.mxu3 }
 0x227   : > { %7372 = vrcp.f32 %v8780_v41  ;;  %v2088_v59 = vsel %vm2085_vm6, %v2087_v5, %v2083_v58  ;;  %vm2097_vm9 = vmor %vm2095_vm8, %vm2096_vm7  ;;  %v2116_v54 = vand.u32 2147483648, %v8780_v41  ;;  %v2114_v5 = vand.u32 2147483647, %v8780_v41 }
 0x228   : > { %2331 = vrot.lane.b32.xlu0 %v2088_v59, %s7785_s29  ;;  %v2092_v9 = vsub.f32 1.0, %v2091_v13  ;;  %vm2110_vm12 = vweird.f32 %v8780_v41  ;;  %v1837_v20 = vadd.f32 %v8777_v28, %v1689_v12  ;;  %v951_v28 = vadd.f32 %v8634_v7, %v8530_v52  ;;  %v11195_v12 = vld [vmem:[#allocation25_spill] sm:$0xff] }
 0x229   : > { %v1943_v36 = vpop.f32.mrf.mxu2  ;;  %vm2115_vm14 = vcmp.eq.f32.partialorder %v2114_v5, 8.507059e+37  ;;  %v1690_v2 = vadd.f32 %v8787_v24, %v1542_v4 }
 0x22a   : > { %v8785_v8 = vadd.f32 %v1943_v36, %v1835_v16  ;;  %v2093_v27 = vmul.f32 %v7369_v42, %v2092_v9  ;;  %v2117_v9 = vor.u32 1.1754944e-38, %v2116_v54 }
 0x22c   : > { %v7371_v15 = vpop.eup %7370  ;;  %v6871_v40 = vmul.f32 -1.442695, %v8785_v8  ;;  %v2094_v48 = vadd.f32 %v7369_v42, %v2093_v27  ;;  %v8811_v27 = vpop.f32.mrf.mxu1 }
 0x22d   : > { %v7373_v62 = vpop.eup %7372  ;;  %v8792_v26 = vadd.f32 1.0, %v7371_v15 }
 0x22e   : > { %7374 = vpow2.f32 %v6871_v40  ;;  %v2098_v43 = vsel %vm2097_vm9, %v7369_v42, %v2094_v48  ;;  %v2106_v51 = vmul.f32 %v7373_v62, %v8780_v41  ;;  %vm2111_vm11 = vweird.f32 %v7373_v62 }
 0x22f   : > { %7376 = vrcp.f32 %v8792_v26  ;;  %v2103_v31 = vsel %vm2100_vm10, %v2102_v1, %v2098_v43  ;;  %vm2112_vm13 = vmor %vm2110_vm12, %vm2111_vm11  ;;  %v2131_v40 = vand.u32 2147483648, %v8792_v26  ;;  %v2129_v22 = vand.u32 2147483647, %v8792_v26 }
 0x230   : > { %2333 = vrot.lane.b32.xlu0 %v2103_v31, %s7785_s29  ;;  %v2107_v55 = vsub.f32 1.0, %v2106_v51  ;;  %v1247_v1 = vadd.f32 %v8630_v6, %v1098_v34  ;;  %v1514_v51 = vpop.f32.mrf.mxu3  ;;  %vm2125_vm0 = vweird.f32 %v8792_v26 }
 0x231   : > { %v1946_v44 = vpop.f32.mrf.mxu2  ;;  %v2132_v11 = vor.u32 1.1754944e-38, %v2131_v40  ;;  %vm2130_vm3 = vcmp.eq.f32.partialorder %v2129_v22, 8.507059e+37 }
 0x232   : > { %v8800_v53 = vadd.f32 %v1946_v44, %v1836_v57  ;;  %v2108_v42 = vmul.f32 %v7373_v62, %v2107_v55  ;;  %v1395_v57 = vadd.f32 %v8690_v19, %v1247_v1  ;;  %v1838_v44 = vadd.f32 %v8790_v49, %v1690_v2 }
 0x233   : > { %v1099_v19 = vadd.f32 %v8638_v14, %v951_v28 }
 0x234   : > { %v7375_v58 = vpop.eup %7374  ;;  %v6872_v13 = vmul.f32 -1.442695, %v8800_v53  ;;  %v2109_v59 = vadd.f32 %v7373_v62, %v2108_v42  ;;  %v1543_v54 = vadd.f32 %v1511_v56, %v1395_v57  ;;  %v1810_v42 = vpop.f32.mrf.mxu1 }
 0x235   : > { %v7377_v33 = vpop.eup %7376  ;;  %v8808_v16 = vadd.f32 1.0, %v7375_v58  ;;  %v1248_v45 = vadd.f32 %v8640_v17, %v1099_v19 }
 0x236   : > { %7378 = vpow2.f32 %v6872_v13  ;;  %v2113_v36 = vsel %vm2112_vm13, %v7373_v62, %v2109_v59  ;;  %v2121_v35 = vmul.f32 %v7377_v33, %v8792_v26  ;;  %vm2126_vm15 = vweird.f32 %v7377_v33  ;;  %v1662_v26 = vpop.f32.mrf.mxu0 }
 0x237   : > { %7380 = vrcp.f32 %v8808_v16  ;;  %v2118_v41 = vsel %vm2115_vm14, %v2117_v9, %v2113_v36  ;;  %vm2127_vm2 = vmor %vm2125_vm0, %vm2126_vm15  ;;  %v2146_v58 = vand.u32 2147483648, %v8808_v16  ;;  %v11196_v9 = vld [vmem:[#allocation31_spill] sm:$0xff]  ;;  %vm2140_vm5 = vweird.f32 %v8808_v16 }
 0x238   : > { %2335 = vrot.lane.b32.xlu1 %v2118_v41, %s7785_s29  ;;  %v2122_v21 = vsub.f32 1.0, %v2121_v35  ;;  %v952_v36 = vadd.f32 %v11196_v9, %v11195_v12  ;;  %v1691_v41 = vadd.f32 %v1659_v63, %v1543_v54  ;;  %v1517_v4 = vpop.f32.mrf.mxu3 }
 0x239   : > { %v1949_v15 = vpop.f32.mrf.mxu2  ;;  %v2147_v34 = vor.u32 1.1754944e-38, %v2146_v58 }
 0x23a   : > { %v8819_v48 = vadd.f32 %v1949_v15, %v1837_v20  ;;  %v2123_v62 = vmul.f32 %v7377_v33, %v2122_v21  ;;  %v1396_v20 = vadd.f32 %v8696_v23, %v1248_v45  ;;  %v1839_v63 = vadd.f32 %v8811_v27, %v1691_v41 }
 0x23c   : > { %v7379_v43 = vpop.eup %7378  ;;  %v6873_v47 = vmul.f32 -1.442695, %v8819_v48  ;;  %v2124_v31 = vadd.f32 %v7377_v33, %v2123_v62  ;;  %v1100_v62 = vadd.f32 %v8649_v61, %v952_v36  ;;  %v1544_v22 = vadd.f32 %v1514_v51, %v1396_v20  ;;  %v1813_v27 = vpop.f32.mrf.mxu1 }
 0x23d   : > { %v7381_v29 = vpop.eup %7380  ;;  %v8829_v55 = vadd.f32 1.0, %v7379_v43 }
 0x23e   : > { %7382 = vpow2.f32 %v6873_v47  ;;  %v2128_v6 = vsel %vm2127_vm2, %v7377_v33, %v2124_v31  ;;  %v2136_v52 = vmul.f32 %v7381_v29, %v8808_v16  ;;  %vm2141_vm4 = vweird.f32 %v7381_v29  ;;  %v1665_v28 = vpop.f32.mrf.mxu0 }
 0x23f   : > { %7384 = vrcp.f32 %v8829_v55  ;;  %v2133_v7 = vsel %vm2130_vm3, %v2132_v11, %v2128_v6  ;;  %v2144_v33 = vand.u32 2147483647, %v8808_v16  ;;  %vm2142_vm6 = vmor %vm2140_vm5, %vm2141_vm4  ;;  %v2395_v16 = vld [vmem:[%s11090_s5] sm:$0xff]  ;;  %v2161_v43 = vand.u32 2147483648, %v8829_v55  ;;  %v11197_v11 = vld [vmem:[#allocation26_spill] sm:$0xff] }
 0x240   : > { %2337 = vrot.lane.b32.xlu1 %v2133_v7, %s7785_s29  ;;  %v2137_v24 = vsub.f32 1.0, %v2136_v52  ;;  %2461 = vmatpush.msrb.mxu3 %v2395_v16  ;;  %v1249_v2 = vadd.f32 %v8653_v30, %v1100_v62  ;;  %v953_v6 = vadd.f32 %v8658_v3, %v11197_v11  ;;  %vm2155_vm9 = vweird.f32 %v8829_v55  ;;  %v1520_v58 = vpop.f32.mrf.mxu3  ;;  %v2666_v16 = vld [vmem:[#allocation3 + $0x98] sm:$0xff] }
 0x241   : > { %v1952_v5 = vpop.f32.mrf.mxu2  ;;  %vm2145_vm7 = vcmp.eq.f32.partialorder %v2144_v33, 8.507059e+37  ;;  %v1692_v7 = vadd.f32 %v1662_v26, %v1544_v22  ;;  %v2162_v19 = vor.u32 1.1754944e-38, %v2161_v43  ;;  %2729 = vmatpush.msrb.mxu1 %v2666_v16 }
 0x242   : > { %v8837_v13 = vadd.f32 %v1952_v5, %v1838_v44  ;;  %v2138_v59 = vmul.f32 %v7381_v29, %v2137_v24  ;;  %v1397_v44 = vadd.f32 %v8706_v18, %v1249_v2  ;;  %v1101_v26 = vadd.f32 %v8662_v37, %v953_v6  ;;  %v11201_v6 = vld [vmem:[#allocation28_spill] sm:$0xff] }
 0x243   : > { %v1840_v5 = vadd.f32 %v1810_v42, %v1692_v7  ;;  %v11198_v42 = vld [vmem:[#allocation27_spill] sm:$0xff] }
 0x244   : > { %v7383_v49 = vpop.eup %7382  ;;  %v6874_v35 = vmul.f32 -1.442695, %v8837_v13  ;;  %v2139_v14 = vadd.f32 %v7381_v29, %v2138_v59  ;;  %v1545_v18 = vadd.f32 %v1517_v4, %v1397_v44  ;;  %v1250_v9 = vadd.f32 %v8664_v60, %v1101_v26  ;;  %v1816_v4 = vpop.f32.mrf.mxu1 }
 0x245   : > { %v7385_v56 = vpop.eup %7384  ;;  %v8846_v21 = vadd.f32 1.0, %v7383_v49 }
 0x246   : > { %7386 = vpow2.f32 %v6874_v35  ;;  %v2143_v17 = vsel %vm2142_vm6, %v7381_v29, %v2139_v14  ;;  %v2151_v15 = vmul.f32 %v7385_v56, %v8829_v55  ;;  %vm2156_vm8 = vweird.f32 %v7385_v56  ;;  %v1668_v14 = vpop.f32.mrf.mxu0 }
 0x247   : > { %7388 = vrcp.f32 %v8846_v21  ;;  %v2148_v40 = vsel %vm2145_vm7, %v2147_v34, %v2143_v17  ;;  %v2159_v29 = vand.u32 2147483647, %v8829_v55  ;;  %vm2157_vm10 = vmor %vm2155_vm9, %vm2156_vm8  ;;  %v2176_v33 = vand.u32 2147483648, %v8846_v21 }
 0x248   : > { %2339 = vrot.lane.b32.xlu2 %v2148_v40, %s7785_s29  ;;  %v2152_v23 = vsub.f32 1.0, %v2151_v15  ;;  %v2174_v12 = vand.u32 2147483647, %v8846_v21  ;;  %v954_v35 = vadd.f32 %v8669_v0, %v11198_v42  ;;  %vm2170_vm13 = vweird.f32 %v8846_v21 }
 0x249   : > { %v1955_v1 = vpop.f32.mrf.mxu2  ;;  %vm2160_vm11 = vcmp.eq.f32.partialorder %v2159_v29, 8.507059e+37  ;;  %v1693_v20 = vadd.f32 %v1665_v28, %v1545_v18  ;;  %v1398_v34 = vadd.f32 %v8714_v25, %v1250_v9  ;;  %v2177_v15 = vor.u32 1.1754944e-38, %v2176_v33  ;;  %v1523_v28 = vpop.f32.mrf.mxu3 }
 0x24a   : > { %v8857_v47 = vadd.f32 %v1955_v1, %v1839_v63  ;;  %v2153_v31 = vmul.f32 %v7385_v56, %v2152_v23  ;;  %vm2175_vm15 = vcmp.eq.f32.partialorder %v2174_v12, 8.507059e+37  ;;  %v11199_v23 = vld [vmem:[#allocation32_spill] sm:$0xff] }
 0x24b   : > { %v1841_v63 = vadd.f32 %v1813_v27, %v1693_v20  ;;  %v1102_v62 = vadd.f32 %v11199_v23, %v954_v35  ;;  %v1546_v22 = vadd.f32 %v1520_v58, %v1398_v34  ;;  %v11206_v34 = vld [vmem:[#allocation29_spill] sm:$0xff] }
 0x24c   : > { %v7387_v57 = vpop.eup %7386  ;;  %v6875_v61 = vmul.f32 -1.442695, %v8857_v47  ;;  %v2154_v51 = vadd.f32 %v7385_v56, %v2153_v31  ;;  %v1819_v18 = vpop.f32.mrf.mxu1 }
 0x24d   : > { %v7389_v52 = vpop.eup %7388  ;;  %v8866_v24 = vadd.f32 1.0, %v7387_v57  ;;  %v11200_v57 = vld [vmem:[#allocation33_spill] sm:$0xff] }
 0x24e   : > { %7390 = vpow2.f32 %v6875_v61  ;;  %v2158_v30 = vsel %vm2157_vm10, %v7385_v56, %v2154_v51  ;;  %v2166_v54 = vmul.f32 %v7389_v52, %v8846_v21  ;;  %vm2171_vm12 = vweird.f32 %v7389_v52  ;;  %v6901_v21 = vld [vmem:[%s11089_s4 + $0x18] sm:$0xff]  ;;  %v1671_v58 = vpop.f32.mrf.mxu0 }
 0x24f   : > { %7392 = vrcp.f32 %v8866_v24  ;;  %v2163_v3 = vsel %vm2160_vm11, %v2162_v19, %v2158_v30  ;;  %vm2172_vm14 = vmor %vm2170_vm13, %vm2171_vm12  ;;  %2596 = vmatpush.msrb.mxu0 %v6901_v21  ;;  %v2191_v43 = vand.u32 2147483648, %v8866_v24  ;;  %v2189_v2 = vand.u32 2147483647, %v8866_v24  ;;  %v11202_v61 = vld [vmem:[#allocation34_spill] sm:$0xff]  ;;  %v11203_v30 = vld [vmem:[#allocation43_spill] sm:$0xff] }
 0x250   : > { %2341 = vrot.lane.b32.xlu2 %v2163_v3, %s7785_s29  ;;  %v2167_v55 = vsub.f32 1.0, %v2166_v54  ;;  %v1251_v27 = vadd.f32 %v11200_v57, %v1102_v62  ;;  %v955_v51 = vadd.f32 %v11202_v61, %v11201_v6  ;;  %vm2185_vm2 = vweird.f32 %v8866_v24 }
 0x251   : > { %v1958_v59 = vpop.f32.mrf.mxu2  ;;  %v1694_v19 = vadd.f32 %v1668_v14, %v1546_v22  ;;  %vm2190_vm4 = vcmp.eq.f32.partialorder %v2189_v2, 8.507059e+37  ;;  %v11209_v2 = vld [vmem:[#allocation38_spill] sm:$0xff] }
 0x252   : > { %v8873_v45 = vadd.f32 %v1958_v59, %v1840_v5  ;;  %v2168_v49 = vmul.f32 %v7389_v52, %v2167_v55  ;;  %v1399_v54 = vadd.f32 %v11203_v30, %v1251_v27  ;;  %v2192_v5 = vor.u32 1.1754944e-38, %v2191_v43 }
 0x253   : > { %v1842_v33 = vadd.f32 %v1816_v4, %v1694_v19  ;;  %v11207_v4 = vld [vmem:[#allocation37_spill] sm:$0xff] }
 0x254   : > { %v7391_v36 = vpop.eup %7390  ;;  %v6876_v56 = vmul.f32 -1.442695, %v8873_v45  ;;  %v2169_v37 = vadd.f32 %v7389_v52, %v2168_v49  ;;  %v11204_v49 = vld [vmem:[#allocation35_spill] sm:$0xff]  ;;  %v1547_v9 = vadd.f32 %v1523_v28, %v1399_v54  ;;  %v11211_v54 = vld [vmem:[#allocation30_spill] sm:$0xff] }
 0x255   : > { %v7393_v41 = vpop.eup %7392  ;;  %v8882_v17 = vadd.f32 1.0, %v7391_v36  ;;  %v1103_v12 = vadd.f32 %v11204_v49, %v955_v51 }
 0x256   : > { %7394 = vpow2.f32 %v6876_v56  ;;  %v2173_v60 = vsel %vm2172_vm14, %v7389_v52, %v2169_v37  ;;  %v2181_v0 = vmul.f32 %v7393_v41, %v8866_v24  ;;  %vm2186_vm0 = vweird.f32 %v7393_v41  ;;  %v11205_v37 = vld [vmem:[#allocation36_spill] sm:$0xff]  ;;  %v1674_v28 = vpop.f32.mrf.mxu0 }
 0x257   : > { %7396 = vrcp.f32 %v8882_v17  ;;  %v2178_v40 = vsel %vm2175_vm15, %v2177_v15, %v2173_v60  ;;  %vm2187_vm3 = vmor %vm2185_vm2, %vm2186_vm0  ;;  %v2206_v42 = vand.u32 2147483648, %v8882_v17  ;;  %v2204_v56 = vand.u32 2147483647, %v8882_v17  ;;  %v1526_v60 = vpop.f32.mrf.mxu3 }
 0x258   : > { %2343 = vrot.lane.b32.xlu0 %v2178_v40, %s7785_s29  ;;  %v2182_v25 = vsub.f32 1.0, %v2181_v0  ;;  %v956_v15 = vadd.f32 %v11207_v4, %v11206_v34  ;;  %vm2200_vm6 = vweird.f32 %v8882_v17  ;;  %v1695_v16 = vadd.f32 %v1671_v58, %v1547_v9 }
 0x259   : > { %v1961_v1 = vpop.f32.mrf.mxu2  ;;  %v2207_v62 = vor.u32 1.1754944e-38, %v2206_v42  ;;  %vm2205_vm8 = vcmp.eq.f32.partialorder %v2204_v56, 8.507059e+37  ;;  %v6900_v42 = vld [vmem:[%s11089_s4 + $0x10] sm:$0xff]  ;;  %v7648_v56 = vld [vmem:[%s7907_s19] sm:$0xff] }
 0x25a   : > { %v8892_v31 = vadd.f32 %v1961_v1, %v1841_v63  ;;  %v2183_v29 = vmul.f32 %v7393_v41, %v2182_v25  ;;  %v11208_v63 = vld [vmem:[#allocation44_spill] sm:$0xff]  ;;  %v1104_v57 = vadd.f32 %v11209_v2, %v956_v15  ;;  %2597 = vmatpush.msrb.mxu0 %v6900_v42 }
 0x25b   : > { %6902 = vmatmul.msk.f32.vlgmr.msrb.gmra.mxu0 %vm314_vm1, %v7648_v56 }
 0x25c   : > { %v7395_v11 = vpop.eup %7394  ;;  %v6877_v52 = vmul.f32 -1.442695, %v8892_v31  ;;  %v2184_v7 = vadd.f32 %v7393_v41, %v2183_v29  ;;  %v1843_v29 = vadd.f32 %v1819_v18, %v1695_v16 }
 0x25d   : > { %v7397_v44 = vpop.eup %7396  ;;  %v8901_v3 = vadd.f32 1.0, %v7395_v11  ;;  %v1822_v11 = vpop.f32.mrf.mxu1 }
 0x25e   : > { %7398 = vpow2.f32 %v6877_v52  ;;  %v2188_v55 = vsel %vm2187_vm3, %v7393_v41, %v2184_v7  ;;  %v2196_v26 = vmul.f32 %v7397_v44, %v8882_v17  ;;  %vm2201_vm5 = vweird.f32 %v7397_v44  ;;  %v1677_v15 = vpop.f32.mrf.mxu0 }
 0x25f   : > { %7400 = vrcp.f32 %v8901_v3  ;;  %v2193_v59 = vsel %vm2190_vm4, %v2192_v5, %v2188_v55  ;;  %v1252_v41 = vadd.f32 %v11205_v37, %v1103_v12  ;;  %vm2202_vm7 = vmor %vm2200_vm6, %vm2201_vm5  ;;  %v2221_v61 = vand.u32 2147483648, %v8901_v3  ;;  %v11212_v5 = vld [vmem:[#allocation40_spill] sm:$0xff]  ;;  %v1529_v12 = vpop.f32.mrf.mxu3  ;;  %v11213_v37 = vld [vmem:[#allocation41_spill] sm:$0xff] }
 0x260   : > { %2345 = vrot.lane.b32.xlu1 %v2193_v59, %s7785_s29  ;;  %v2197_v24 = vsub.f32 1.0, %v2196_v26  ;;  %v2219_v7 = vand.u32 2147483647, %v8901_v3  ;;  %v957_v58 = vadd.f32 %v11212_v5, %v11211_v54  ;;  %vm2215_vm10 = vweird.f32 %v8901_v3 }
 0x261   : > { %v1964_v36 = vpop.f32.mrf.mxu2  ;;  %v1400_v25 = vadd.f32 %v11208_v63, %v1252_v41  ;;  %v2222_v49 = vor.u32 1.1754944e-38, %v2221_v61  ;;  %v7649_v61 = vld [vmem:[%s7907_s19 + $0x8] sm:$0xff] }
 0x262   : > { %v8908_v35 = vadd.f32 %v1964_v36, %v1842_v33  ;;  %v2198_v14 = vmul.f32 %v7397_v44, %v2197_v24  ;;  %vm2220_vm12 = vcmp.eq.f32.partialorder %v2219_v7, 8.507059e+37  ;;  %v1105_v41 = vadd.f32 %v11213_v37, %v957_v58 }
 0x263   : > { %v1548_v27 = vadd.f32 %v1526_v60, %v1400_v25  ;;  %6903 = vmatmul.msk.f32.gmra.mxu0 %vm314_vm1, %v7649_v61 }
 0x264   : > { %v7399_v20 = vpop.eup %7398  ;;  %v6878_v0 = vmul.f32 -1.442695, %v8908_v35  ;;  %v2199_v40 = vadd.f32 %v7397_v44, %v2198_v14 }
 0x265   : > { %v7401_v21 = vpop.eup %7400  ;;  %v8917_v23 = vadd.f32 1.0, %v7399_v20  ;;  %v1696_v59 = vadd.f32 %v1674_v28, %v1548_v27  ;;  %v1825_v63 = vpop.f32.mrf.mxu1 }
 0x266   : > { %7402 = vpow2.f32 %v6878_v0  ;;  %v2203_v22 = vsel %vm2202_vm7, %v7397_v44, %v2199_v40  ;;  %v2211_v1 = vmul.f32 %v7401_v21, %v8901_v3  ;;  %vm2216_vm9 = vweird.f32 %v7401_v21  ;;  %v11210_v44 = vld [vmem:[#allocation39_spill] sm:$0xff]  ;;  %v1680_v5 = vpop.f32.mrf.mxu0 }
 0x267   : > { %7404 = vrcp.f32 %v8917_v23  ;;  %v2208_v43 = vsel %vm2205_vm8, %v2207_v62, %v2203_v22  ;;  %v1253_v19 = vadd.f32 %v11210_v44, %v1104_v57  ;;  %vm2217_vm11 = vmor %vm2215_vm10, %vm2216_vm9  ;;  %v2236_v4 = vand.u32 2147483648, %v8917_v23 }
 0x268   : > { %2347 = vrot.lane.b32.xlu2 %v2208_v43, %s7785_s29  ;;  %v2212_v17 = vsub.f32 1.0, %v2211_v1  ;;  %v2234_v40 = vand.u32 2147483647, %v8917_v23  ;;  %vm2230_vm14 = vweird.f32 %v8917_v23 }
 0x269   : > { %v1967_v6 = vpop.f32.mrf.mxu2  ;;  %v1401_v33 = vadd.f32 %v8733_v38, %v1253_v19  ;;  %v1844_v38 = vadd.f32 %v1822_v11, %v1696_v59  ;;  %v1532_v11 = vpop.f32.mrf.mxu3 }
 0x26a   : > { %v8924_v51 = vadd.f32 %v1967_v6, %v1843_v29  ;;  %v2213_v52 = vmul.f32 %v7401_v21, %v2212_v17  ;;  %v2237_v17 = vor.u32 1.1754944e-38, %v2236_v4  ;;  %vm2235_vm0 = vcmp.eq.f32.partialorder %v2234_v40, 8.507059e+37 }
 0x26b   : > { %v1549_v20 = vadd.f32 %v1529_v12, %v1401_v33 }
 0x26c   : > { %v7403_v30 = vpop.eup %7402  ;;  %v6879_v55 = vmul.f32 -1.442695, %v8924_v51  ;;  %v2214_v26 = vadd.f32 %v7401_v21, %v2213_v52 }
 0x26d   : > { %v7405_v18 = vpop.eup %7404  ;;  %v8933_v24 = vadd.f32 1.0, %v7403_v30  ;;  %v1697_v43 = vadd.f32 %v1677_v15, %v1549_v20  ;;  %v1828_v59 = vpop.f32.mrf.mxu1 }
 0x26e   : > { %7406 = vpow2.f32 %v6879_v55  ;;  %v2218_v9 = vsel %vm2217_vm11, %v7401_v21, %v2214_v26  ;;  %v2226_v36 = vmul.f32 %v7405_v18, %v8917_v23  ;;  %vm2231_vm13 = vweird.f32 %v7405_v18  ;;  %v11214_v21 = vld [vmem:[#allocation42_spill] sm:$0xff] }
 0x26f   : > { %7408 = vrcp.f32 %v8933_v24  ;;  %v2223_v3 = vsel %vm2220_vm12, %v2222_v49, %v2218_v9  ;;  %v1254_v16 = vadd.f32 %v11214_v21, %v1105_v41  ;;  %vm2232_vm15 = vmor %vm2230_vm14, %vm2231_vm13  ;;  %v1845_v6 = vadd.f32 %v1825_v63, %v1697_v43 }
 0x270   : > { %2349 = vrot.lane.b32.xlu0 %v2223_v3, %s7785_s29  ;;  %v2227_v14 = vsub.f32 1.0, %v2226_v36  ;;  %v2251_v7 = vand.u32 2147483648, %v8933_v24  ;;  %v2249_v30 = vand.u32 2147483647, %v8933_v24  ;;  %vm2245_vm3 = vweird.f32 %v8933_v24 }
 0x271   : > { %v1970_v34 = vpop.f32.mrf.mxu2  ;;  %v1402_v28 = vadd.f32 %v8742_v50, %v1254_v16 }
 0x272   : > { %v8945_v60 = vadd.f32 %v1970_v34, %v1844_v38  ;;  %v2228_v0 = vmul.f32 %v7405_v18, %v2227_v14  ;;  %v2252_v49 = vor.u32 1.1754944e-38, %v2251_v7  ;;  %vm2250_vm5 = vcmp.eq.f32.partialorder %v2249_v30, 8.507059e+37  ;;  %v7650_v38 = vld [vmem:[%s7907_s19 + $0x10] sm:$0xff] }
 0x273   : > { %v1550_v52 = vadd.f32 %v1532_v11, %v1402_v28  ;;  %6904 = vmatmul.msk.f32.gmra.mxu0 %vm314_vm1, %v7650_v38 }
 0x274   : > { %v7407_v25 = vpop.eup %7406  ;;  %v6880_v62 = vmul.f32 -1.442695, %v8945_v60  ;;  %v2229_v22 = vadd.f32 %v7405_v18, %v2228_v0 }
 0x275   : > { %v7409_v1 = vpop.eup %7408  ;;  %v2071_v29 = vadd.f32 1.0, %v7407_v25 }
 0x276   : > { %7410 = vpow2.f32 %v6880_v62  ;;  %v2233_v2 = vsel %vm2232_vm15, %v7405_v18, %v2229_v22  ;;  %v2241_v57 = vmul.f32 %v7409_v1, %v8933_v24  ;;  %vm2246_vm2 = vweird.f32 %v7409_v1  ;;  %v7651_v62 = vld [vmem:[%s7907_s19 + $0x18] sm:$0xff] }
 0x277   : > { %7412 = vrcp.f32 %v2071_v29  ;;  %v2238_v27 = vsel %vm2235_vm0, %v2237_v17, %v2233_v2  ;;  %v1698_v18 = vadd.f32 %v1680_v5, %v1550_v52  ;;  %vm2247_vm4 = vmor %vm2245_vm3, %vm2246_vm2  ;;  %v2266_v14 = vand.u32 2147483648, %v2071_v29  ;;  %v7652_v52 = vld [vmem:[%s7907_s19 + $0x20] sm:$0xff] }
 0x278   : > { %2351 = vrot.lane.b32.xlu1 %v2238_v27, %s7785_s29  ;;  %v2242_v23 = vsub.f32 1.0, %v2241_v57  ;;  %v2264_v41 = vand.u32 2147483647, %v2071_v29  ;;  %vm2260_vm7 = vweird.f32 %v2071_v29  ;;  %v2665_v27 = vld [vmem:[#allocation3 + $0x90] sm:$0xff] }
 0x279   : > { %v1973_v50 = vpop.f32.mrf.mxu2  ;;  %v1846_v42 = vadd.f32 %v1828_v59, %v1698_v18  ;;  %v2267_v40 = vor.u32 1.1754944e-38, %v2266_v14  ;;  %2730 = vmatpush.msrb.mxu1 %v2665_v27  ;;  %v7653_v59 = vld [vmem:[%s7907_s19 + $0x28] sm:$0xff]  ;;  %v7654_v14 = vld [vmem:[%s7907_s19 + $0x30] sm:$0xff] }
 0x27a   : > { %v8957_v44 = vadd.f32 %v1973_v50, %v1845_v6  ;;  %v2243_v19 = vmul.f32 %v7409_v1, %v2242_v23  ;;  %vm2265_vm9 = vcmp.eq.f32.partialorder %v2264_v41, 8.507059e+37  ;;  %v2796_v27 = vld [vmem:[#allocation2 + $0x88] sm:$0xff] }
 0x27b   : > { %6905 = vmatmul.msk.f32.gmra.mxu0 %vm314_vm1, %v7651_v62 }
 0x27c   : > { %v7411_v54 = vpop.eup %7410  ;;  %v6881_v58 = vmul.f32 -1.442695, %v8957_v44  ;;  %v2244_v55 = vadd.f32 %v7409_v1, %v2243_v19 }
 0x27d   : > { %v7413_v26 = vpop.eup %7412  ;;  %v2072_v33 = vadd.f32 1.0, %v7411_v54 }
 0x27e   : > { %7414 = vpow2.f32 %v6881_v58  ;;  %v2248_v12 = vsel %vm2247_vm4, %v7409_v1, %v2244_v55  ;;  %v2256_v9 = vmul.f32 %v7413_v26, %v2071_v29  ;;  %vm2261_vm6 = vweird.f32 %v7413_v26 }
 0x27f   : > { %7416 = vrcp.f32 %v2072_v33  ;;  %v2253_v36 = vsel %vm2250_vm5, %v2252_v49, %v2248_v12  ;;  %vm2262_vm8 = vmor %vm2260_vm7, %vm2261_vm6  ;;  %v2281_v22 = vand.u32 2147483648, %v2072_v33  ;;  %v2279_v43 = vand.u32 2147483647, %v2072_v33 }
 0x280   : > { %2353 = vrot.lane.b32.xlu2 %v2253_v36, %s7785_s29  ;;  %v2257_v3 = vsub.f32 1.0, %v2256_v9  ;;  %vm2275_vm11 = vweird.f32 %v2072_v33 }
 0x281   : > { %v1976_v24 = vpop.f32.mrf.mxu2  ;;  %v2282_v57 = vor.u32 1.1754944e-38, %v2281_v22  ;;  %vm2280_vm13 = vcmp.eq.f32.partialorder %v2279_v43, 8.507059e+37  ;;  %v7658_v22 = vld [vmem:[%s7907_s19 + $0x50] sm:$0xff] }
 0x282   : > { %v8965_v56 = vadd.f32 %v1976_v24, %v1846_v42  ;;  %v2258_v37 = vmul.f32 %v7413_v26, %v2257_v3 }
 0x283   : > { %6906 = vmatmul.msk.f32.gmra.mxu0 %vm314_vm1, %v7652_v52 }
 0x284   : > { %v7415_v20 = vpop.eup %7414  ;;  %v6882_v34 = vmul.f32 -1.442695, %v8965_v56  ;;  %v2259_v4 = vadd.f32 %v7413_v26, %v2258_v37 }
 0x285   : > { %v7417_v15 = vpop.eup %7416  ;;  %v2073_v0 = vadd.f32 1.0, %v7415_v20 }
 0x286   : > { %7418 = vpow2.f32 %v6882_v34  ;;  %v2263_v21 = vsel %vm2262_vm8, %v7413_v26, %v2259_v4  ;;  %v2271_v16 = vmul.f32 %v7417_v15, %v2072_v33  ;;  %vm2276_vm10 = vweird.f32 %v7417_v15 }
 0x287   : > { %7420 = vrcp.f32 %v2073_v0  ;;  %v2268_v63 = vsel %vm2265_vm9, %v2267_v40, %v2263_v21  ;;  %vm2277_vm12 = vmor %vm2275_vm11, %vm2276_vm10  ;;  %v2296_v50 = vand.u32 2147483648, %v2073_v0  ;;  %v2294_v19 = vand.u32 2147483647, %v2073_v0 }
 0x288   : > { %2355 = vrot.lane.b32.xlu0 %v2268_v63, %s7785_s29  ;;  %v2272_v25 = vsub.f32 1.0, %v2271_v16  ;;  %vm2290_vm15 = vweird.f32 %v2073_v0  ;;  %v7657_v63 = vld [vmem:[%s7907_s19 + $0x48] sm:$0xff] }
 0x289   : > { %v2297_v5 = vor.u32 1.1754944e-38, %v2296_v50  ;;  %vm2295_vm2 = vcmp.eq.f32.partialorder %v2294_v19, 8.507059e+37 }
 0x28a   : > { %v2273_v1 = vmul.f32 %v7417_v15, %v2272_v25 }
 0x28b   : > { %6907 = vmatmul.msk.f32.gmra.mxu0 %vm314_vm1, %v7653_v59 }
 0x28c   : > { %v7419_v28 = vpop.eup %7418  ;;  %v2274_v29 = vadd.f32 %v7417_v15, %v2273_v1 }
 0x28d   : > { %v7421_v17 = vpop.eup %7420  ;;  %v2074_v2 = vadd.f32 1.0, %v7419_v28  ;;  %v2962_v28 = vld [vmem:[#allocation3 + $0xb8] sm:$0xff] }
 0x28e   : > { %v2278_v11 = vsel %vm2277_vm12, %v7417_v15, %v2274_v29  ;;  %v2286_v6 = vmul.f32 %v7421_v17, %v2073_v0  ;;  %vm2291_vm14 = vweird.f32 %v7421_v17  ;;  %v7656_v0 = vld [vmem:[%s7907_s19 + $0x40] sm:$0xff]  ;;  %3025 = vmatpush.msra.mxu3 %v2962_v28 }
 0x28f   : > { %7422 = vrcp.f32 %v2074_v2  ;;  %v2283_v23 = vsel %vm2280_vm13, %v2282_v57, %v2278_v11  ;;  %vm2292_vm0 = vmor %vm2290_vm15, %vm2291_vm14  ;;  %v2311_v33 = vand.u32 2147483648, %v2074_v2  ;;  %v2309_v9 = vand.u32 2147483647, %v2074_v2  ;;  %v2813_v29 = vld [vmem:[#allocation3 + $0xa0] sm:$0xff] }
 0x290   : > { %2357 = vrot.lane.b32.xlu1 %v2283_v23, %s7785_s29  ;;  %v2287_v61 = vsub.f32 1.0, %v2286_v6  ;;  %7424 = vtanh.f32 %v8755_v32  ;;  %vm2305_vm4 = vweird.f32 %v2074_v2  ;;  %v2648_v11 = vld [vmem:[#allocation2 + $0x87] sm:$0xff]  ;;  %v3258_v6 = vld [vmem:[#allocation3 + $0xd8] sm:$0xff] }
 0x291   : > { %7426 = vtanh.f32 %v8762_v39  ;;  %v2312_v3 = vor.u32 1.1754944e-38, %v2311_v33  ;;  %vm2310_vm6 = vcmp.eq.f32.partialorder %v2309_v9, 8.507059e+37  ;;  %v7655_v39 = vld [vmem:[%s7907_s19 + $0x38] sm:$0xff]  ;;  %6918 = vmatmul.msk.f32.vlgmr.msrb.gmra.mxu1 %vm314_vm1, %v2648_v11  ;;  %v7660_v23 = vld [vmem:[%s7907_s19 + $0x60] sm:$0xff]  ;;  %v2799_v33 = vld [vmem:[#allocation2 + $0xb0] sm:$0xff] }
 0x292   : > { %v2288_v7 = vmul.f32 %v7421_v17, %v2287_v61  ;;  %7428 = vtanh.f32 %v8769_v10  ;;  %3321 = vmatpush.msra.mxu1 %v3258_v6 }
 0x293   : > { %6908 = vmatmul.msk.f32.gmra.mxu0 %vm314_vm1, %v7654_v14  ;;  %7430 = vtanh.f32 %v8775_v46  ;;  %v9035_v14 = vld [vmem:[#allocation2 + $0xd0] sm:$0xff] }
 0x294   : > { %v2289_v30 = vadd.f32 %v7421_v17, %v2288_v7  ;;  %7432 = vtanh.f32 %v8785_v8  ;;  %v2814_v8 = vld [vmem:[#allocation3 + $0xa8] sm:$0xff]  ;;  %v2797_v7 = vld [vmem:[#allocation2 + $0x90] sm:$0xff] }
 0x295   : > { %v7423_v54 = vpop.eup %7422  ;;  %7434 = vtanh.f32 %v8800_v53  ;;  %2877 = vmatpush.msra.mxu2 %v2814_v8  ;;  %v7659_v53 = vld [vmem:[%s7907_s19 + $0x58] sm:$0xff]  ;;  %v2944_v8 = vld [vmem:[#allocation2 + $0x89] sm:$0xff] }
 0x296   : > { %v2293_v58 = vsel %vm2292_vm0, %v7421_v17, %v2289_v30  ;;  %v2301_v55 = vmul.f32 %v7423_v54, %v2074_v2  ;;  %v7425_v49 = vpop.eup %7424  ;;  %vm2306_vm3 = vweird.f32 %v7423_v54  ;;  %7436 = vtanh.f32 %v8819_v48  ;;  %v3110_v48 = vld [vmem:[#allocation3 + $0xc8] sm:$0xff] }
 0x297   : > { %v2298_v26 = vsel %vm2295_vm2, %v2297_v5, %v2293_v58  ;;  %vm2307_vm5 = vmor %vm2305_vm4, %vm2306_vm3  ;;  %v7427_v37 = vpop.eup %7426  ;;  %2878 = vmatpush.msra.mxu2 %v2813_v29  ;;  %7438 = vtanh.f32 %v8837_v13  ;;  %3173 = vmatpush.msra.mxu0 %v3110_v48  ;;  %v2649_v13 = vld [vmem:[#allocation2 + $0x8f] sm:$0xff] }
 0x298   : > { %2359 = vrot.lane.b32.xlu2 %v2298_v26, %s7785_s29  ;;  %v2302_v18 = vsub.f32 1.0, %v2301_v55  ;;  %v7429_v34 = vpop.eup %7428  ;;  %6934 = vmatmul.msk.f32.vlgmr.msra.gmra.mxu2 %vm314_vm1, %v2796_v27  ;;  %7440 = vtanh.f32 %v8857_v47  ;;  %v7661_v30 = vld [vmem:[%s7907_s19 + $0x68] sm:$0xff]  ;;  %v7662_v55 = vld [vmem:[%s7907_s19 + $0x70] sm:$0xff] }
 0x299   : > { %v7431_v40 = vpop.eup %7430  ;;  %6919 = vmatmul.msk.f32.gmra.mxu1 %vm314_vm1, %v2649_v13  ;;  %v2798_v58 = vld [vmem:[#allocation2 + $0xa8] sm:$0xff]  ;;  %7442 = vtanh.f32 %v8873_v45  ;;  %v11216_v48 = vld [vmem:[#allocation9_spill] sm:$0xff] }
 0x29a   : > { %v2332_v12 = vpop.permute.xlu0 %2331  ;;  %v2303_v32 = vmul.f32 %v7423_v54, %v2302_v18  ;;  %v7433_v25 = vpop.eup %7432  ;;  %v2650_v47 = vld [vmem:[#allocation2 + $0xa7] sm:$0xff]  ;;  %7444 = vtanh.f32 %v8892_v31  ;;  %v2651_v45 = vld [vmem:[#allocation2 + $0xaf] sm:$0xff] }
 0x29b   : > { %v2379_v36 = vmul.f32 %v7425_v49, %v2332_v12  ;;  %6909 = vmatmul.msk.f32.gmra.mxu0 %vm314_vm1, %v7655_v39  ;;  %v7435_v1 = vpop.eup %7434  ;;  %v7663_v49 = vld [vmem:[%s7907_s19 + $0x78] sm:$0xff]  ;;  %v9027_v12 = vld [vmem:[#allocation2 + $0xc8] sm:$0xff]  ;;  %7446 = vtanh.f32 %v8908_v35  ;;  %v3109_v31 = vld [vmem:[#allocation3 + $0xc0] sm:$0xff] }
 0x29c   : > { %v2304_v42 = vadd.f32 %v7423_v54, %v2303_v32  ;;  %v7437_v17 = vpop.eup %7436  ;;  %3174 = vmatpush.msra.mxu0 %v3109_v31  ;;  %7448 = vtanh.f32 %v8924_v51  ;;  %v2654_v51 = vld [vmem:[#allocation2 + $0xe7] sm:$0xff]  ;;  %v11225_v31 = vld [vmem:[#allocation13_spill] sm:$0xff] }
 0x29d   : > { %6883 = vmatmul.msk.f32.vlgmr.msrb.gmra.mxu3 %vm314_vm1, %v2379_v36  ;;  %v7439_v61 = vpop.eup %7438  ;;  %7450 = vtanh.f32 %v8945_v60  ;;  %v2655_v60 = vld [vmem:[#allocation2 + $0xef] sm:$0xff] }
 0x29e   : > { %v2308_v38 = vsel %vm2307_vm5, %v7423_v54, %v2304_v42  ;;  %v7441_v54 = vpop.eup %7440  ;;  %v2652_v42 = vld [vmem:[#allocation2 + $0xc7] sm:$0xff]  ;;  %7452 = vtanh.f32 %v8957_v44  ;;  %v3257_v44 = vld [vmem:[#allocation3 + $0xd0] sm:$0xff] }
 0x29f   : > { %v2313_v24 = vsel %vm2310_vm6, %v2312_v3, %v2308_v38  ;;  %v7443_v26 = vpop.eup %7442  ;;  %7454 = vtanh.f32 %v8965_v56  ;;  %3322 = vmatpush.msra.mxu1 %v3257_v44  ;;  %v7664_v56 = vld [vmem:[%s11091_s6] sm:$0xf] }
 0x2a0   : > { %2361 = vrot.lane.b32.xlu0 %v2313_v24, %s7785_s29  ;;  %6935 = vmatmul.msk.f32.gmra.mxu2 %vm314_vm1, %v2797_v7  ;;  %v7445_v32 = vpop.eup %7444  ;;  %v9076_v29 = vperm.slane %v7664_v56, 1  ;;  %v11219_v7 = vld [vmem:[#allocation10_spill] sm:$0xff] }
 0x2a1   : > { %6920 = vmatmul.msk.f32.gmra.mxu1 %vm314_vm1, %v2650_v47  ;;  %v7447_v38 = vpop.eup %7446  ;;  %v2947_v47 = vld [vmem:[#allocation2 + $0xb1] sm:$0xff] }
 0x2a2   : > { %v2334_v41 = vpop.permute.xlu0 %2333  ;;  %v2340_v16 = vpop.permute.xlu2 %2339 }
 0x2a3   : > { %v2380_v20 = vmul.f32 %v7427_v37, %v2334_v41  ;;  %6910 = vmatmul.msk.f32.gmra.mxu0 %vm314_vm1, %v7656_v0  ;;  %v2383_v62 = vmul.f32 %v7433_v25, %v2340_v16  ;;  %v2653_v37 = vld [vmem:[#allocation2 + $0xcf] sm:$0xff]  ;;  %v7449_v39 = vpop.eup %7448 }
 0x2a4   : > { %v2961_v41 = vld [vmem:[#allocation3 + $0xb0] sm:$0xff]  ;;  %v7451_v0 = vpop.eup %7450 }
 0x2a5   : > { %6884 = vmatmul.msk.f32.gmra.mxu3 %vm314_vm1, %v2380_v20  ;;  %v9045_v20 = vld [vmem:[#allocation2 + $0xe8] sm:$0xff]  ;;  %v7453_v25 = vpop.eup %7452 }
 0x2a6   : > { %3026 = vmatpush.msra.mxu3 %v2961_v41  ;;  %v9166_v41 = vld [vmem:[#allocation2 + $0xd1] sm:$0xff] }
 0x2a8   : > { %6936 = vmatmul.msk.f32.gmra.mxu2 %vm314_vm1, %v2798_v58 }
 0x2a9   : > { %6921 = vmatmul.msk.f32.gmra.mxu1 %vm314_vm1, %v2651_v45 }
 0x2aa   : > { %v2336_v4 = vpop.permute.xlu1 %2335  ;;  %v2342_v46 = vpop.permute.xlu2 %2341 }
 0x2ab   : > { %v2381_v15 = vmul.f32 %v7429_v34, %v2336_v4  ;;  %6911 = vmatmul.msk.f32.gmra.mxu0 %vm314_vm1, %v7657_v63  ;;  %v2384_v43 = vmul.f32 %v7435_v1, %v2342_v46  ;;  %v7455_v46 = vpop.eup %7454 }
 0x2ad   : > { %6885 = vmatmul.msk.f32.gmra.mxu3 %vm314_vm1, %v2381_v15 }
 0x2b0   : > { %6937 = vmatmul.msk.f32.gmra.mxu2 %vm314_vm1, %v2799_v33 }
 0x2b1   : > { %6922 = vmatmul.msk.f32.gmra.mxu1 %vm314_vm1, %v2652_v42 }
 0x2b2   : > { %v2338_v21 = vpop.permute.xlu1 %2337 }
 0x2b3   : > { %v2382_v10 = vmul.f32 %v7431_v40, %v2338_v21  ;;  %6912 = vmatmul.msk.f32.gmra.mxu0 %vm314_vm1, %v7658_v22 }
 0x2b5   : > { %6886 = vmatmul.msk.f32.gmra.mxu3 %vm314_vm1, %v2382_v10  ;;  %v9055_v10 = vld [vmem:[#allocation2 + $0xf0] sm:$0xff] }
 0x2b8   : > { %6938 = vmatmul.msk.f32.gmra.mxu2 %vm314_vm1, %v9027_v12 }
 0x2b9   : > { %6923 = vmatmul.msk.f32.gmra.mxu1 %vm314_vm1, %v2653_v37 }
 0x2bb   : > { %6913 = vmatmul.msk.f32.gmra.mxu0 %vm314_vm1, %v7659_v53  ;;  %v9078_v53 = vperm.slane %v7664_v56, 2 }
 0x2bd   : > { %6887 = vmatmul.msk.f32.gmra.mxu3 %vm314_vm1, %v2383_v62 }
 0x2c0   : > { %6939 = vmatmul.msk.f32.gmra.mxu2 %vm314_vm1, %v9035_v14 }
 0x2c1   : > { %6924 = vmatmul.msk.f32.gmra.mxu1 %vm314_vm1, %v2654_v51 }
 0x2c2   : > { %v2348_v19 = vpop.permute.xlu2 %2347 }
 0x2c3   : > { %6914 = vmatmul.msk.f32.gmra.mxu0 %vm314_vm1, %v7660_v23  ;;  %v2387_v5 = vmul.f32 %v7441_v54, %v2348_v19 }
 0x2c5   : > { %6888 = vmatmul.msk.f32.gmra.mxu3 %vm314_vm1, %v2384_v43 }
 0x2c8   : > { %6940 = vmatmul.msk.f32.gmra.mxu2 %vm314_vm1, %v9045_v20 }
 0x2c9   : > { %6925 = vmatmul.msk.f32.gmra.mxu1 %vm314_vm1, %v2655_v60 }
 0x2ca   : > { %v2344_v2 = vpop.permute.xlu0 %2343 }
 0x2cb   : > { %v2385_v57 = vmul.f32 %v7437_v17, %v2344_v2  ;;  %6915 = vmatmul.msk.f32.gmra.mxu0 %vm314_vm1, %v7661_v30 }
 0x2cd   : > { %6889 = vmatmul.msk.f32.gmra.mxu3 %vm314_vm1, %v2385_v57  ;;  %v2945_v57 = vld [vmem:[#allocation2 + $0x91] sm:$0xff] }
 0x2d0   : > { %6941 = vmatmul.msk.f32.gmra.mxu2 %vm314_vm1, %v9055_v10 }
 0x2d2   : > { %v2346_v52 = vpop.permute.xlu1 %2345 }
 0x2d3   : > { %v2386_v50 = vmul.f32 %v7439_v61, %v2346_v52  ;;  %6916 = vmatmul.msk.f32.gmra.mxu0 %vm314_vm1, %v7662_v55  ;;  %v2946_v52 = vld [vmem:[#allocation2 + $0xa9] sm:$0xff] }
 0x2d5   : > { %6890 = vmatmul.msk.f32.gmra.mxu3 %vm314_vm1, %v2386_v50 }
 0x2d8   : > { %v9038_v35 = vpop.f32.mrf.mxu0 }
 0x2da   : > { %v2354_v3 = vpop.permute.xlu2 %2353 }
 0x2db   : > { %6917 = vmatmul.msk.f32.gmra.mxu0 %vm314_vm1, %v7663_v49  ;;  %v2390_v24 = vmul.f32 %v7447_v38, %v2354_v3 }
 0x2dd   : > { %6891 = vmatmul.msk.f32.gmra.mxu3 %vm314_vm1, %v2387_v5 }
 0x2e0   : > { %v9051_v15 = vpop.f32.mrf.mxu0 }
 0x2e2   : > { %v2350_v18 = vpop.permute.xlu0 %2349 }
 0x2e3   : > { %v2388_v59 = vmul.f32 %v7443_v26, %v2350_v18  ;;  %6966 = vmatmul.msk.f32.vlgmr.msra.gmra.mxu0 %vm314_vm1, %v2652_v42  ;;  %v11222_v26 = vld [vmem:[#allocation11_spill] sm:$0xff] }
 0x2e5   : > { %6892 = vmatmul.msk.f32.gmra.mxu3 %vm314_vm1, %v2388_v59 }
 0x2ea   : > { %v2352_v9 = vpop.permute.xlu1 %2351 }
 0x2eb   : > { %v2389_v36 = vmul.f32 %v7445_v32, %v2352_v9  ;;  %6967 = vmatmul.msk.f32.gmra.mxu0 %vm314_vm1, %v2653_v37  ;;  %v9140_v32 = vld [vmem:[#allocation2 + $0xc9] sm:$0xff] }
 0x2ed   : > { %6893 = vmatmul.msk.f32.gmra.mxu3 %vm314_vm1, %v2389_v36 }
 0x2f0   : > { %v9061_v63 = vpop.f32.mrf.mxu0 }
 0x2f2   : > { %v2360_v16 = vpop.permute.xlu2 %2359 }
 0x2f3   : > { %6968 = vmatmul.msk.f32.gmra.mxu0 %vm314_vm1, %v2654_v51  ;;  %v2393_v62 = vmul.f32 %v7453_v25, %v2360_v16 }
 0x2f5   : > { %6894 = vmatmul.msk.f32.gmra.mxu3 %vm314_vm1, %v2390_v24 }
 0x2f8   : > { %v9067_v1 = vpop.f32.mrf.mxu0 }
 0x2fa   : > { %v2356_v34 = vpop.permute.xlu0 %2355 }
 0x2fb   : > { %v2391_v4 = vmul.f32 %v7449_v39, %v2356_v34  ;;  %6969 = vmatmul.msk.f32.gmra.mxu0 %vm314_vm1, %v2655_v60  ;;  %v3554_v60 = vld [vmem:[#allocation3 + $0xf8] sm:$0xff] }
 0x2fc   : > { %3617 = vmatpush.msrb.mxu3 %v3554_v60 }
 0x2fd   : > { %6895 = vmatmul.msk.f32.gmra.mxu3 %vm314_vm1, %v2391_v4  ;;  %v11228_v4 = vld [vmem:[#allocation15_spill] sm:$0xff] }
 0x300   : > { %v9070_v28 = vpop.f32.mrf.mxu0 }
 0x302   : > { %v2358_v40 = vpop.permute.xlu1 %2357 }
 0x303   : > { %v2392_v21 = vmul.f32 %v7451_v0, %v2358_v40 }
 0x305   : > { %6896 = vmatmul.msk.f32.gmra.mxu3 %vm314_vm1, %v2392_v21  ;;  %v3406_v21 = vld [vmem:[#allocation3 + $0xe8] sm:$0xff] }
 0x306   : > { %3469 = vmatpush.msrb.mxu2 %v3406_v21 }
 0x308   : > { %v9089_v6 = vpop.f32.mrf.mxu0 }
 0x30d   : > { %6897 = vmatmul.msk.f32.gmra.mxu3 %vm314_vm1, %v2393_v62  ;;  %v9192_v62 = vld [vmem:[#allocation2 + $0xe9] sm:$0xff] }
 0x310   : > { %v9114_v5 = vpop.f32.mrf.mxu0 }
 0x312   : > { %v2362_v22 = vpop.permute.xlu0 %2361 }
 0x313   : > { %v2394_v43 = vmul.f32 %v7455_v46, %v2362_v22  ;;  %v11231_v46 = vld [vmem:[#allocation17_spill] sm:$0xff] }
 0x315   : > { %6898 = vmatmul.msk.f32.gmra.mxu3 %vm314_vm1, %v2394_v43 }
 0x318   : > { %v9142_v9 = vpop.f32.mrf.mxu0 }
 0x31d   : > { %6950 = vmatmul.msk.f32.vlgmr.msra.gmra.mxu3 %vm314_vm1, %v2944_v8 }
 0x320   : > { %v2463_v17 = vpop.f32.mrf.mxu3  ;;  %v9170_v34 = vpop.f32.mrf.mxu0 }
 0x321   : > { %v9081_v2 = vadd.f32 %v2463_v17, %v9076_v29  ;;  %v3405_v17 = vld [vmem:[#allocation3 + $0xe0] sm:$0xff] }
 0x322   : > { %3470 = vmatpush.msrb.mxu2 %v3405_v17 }
 0x323   : > { %11215 = vst [vmem:[#allocation25_spill] sm:$0xff] %v9081_v2  ;;  %v2512_v27 = vmul.f32 %v9078_v53, %v9081_v2  ;;  %v3553_v2 = vld [vmem:[#allocation3 + $0xf0] sm:$0xff] }
 0x324   : > { %3618 = vmatpush.msrb.mxu3 %v3553_v2 }
 0x325   : > { %v9086_v11 = vadd.f32 %v2512_v27, %v11216_v48  ;;  %6951 = vmatmul.msk.f32.gmra.mxu3 %vm314_vm1, %v2945_v57  ;;  %v3702_v57 = vld [vmem:[#allocation3 + $0x108] sm:$0xff]  ;;  %v3850_v48 = vld [vmem:[#allocation3 + $0x118] sm:$0xff] }
 0x326   : > { %3765 = vmatpush.msrb.mxu0 %v3702_v57  ;;  %3913 = vmatpush.msrb.mxu1 %v3850_v48  ;;  %v11240_v48 = vld [vmem:[#allocation23_spill] sm:$0xff] }
 0x327   : > { %11217 = vst [vmem:[#allocation31_spill] sm:$0xff] %v9086_v11 }
 0x328   : > { %2562 = vst.msk [vmem:[#allocation2 + $0x108] sm:$0xff] %vm314_vm1, %v9086_v11  ;;  %v2466_v23 = vpop.f32.mrf.mxu3  ;;  %v9205_v56 = vpop.f32.mrf.mxu0 }
 0x329   : > { %v9094_v61 = vadd.f32 %v2466_v23, %v9076_v29 }
 0x32b   : > { %11218 = vst [vmem:[#allocation26_spill] sm:$0xff] %v9094_v61  ;;  %v2513_v50 = vmul.f32 %v9078_v53, %v9094_v61 }
 0x32d   : > { %v9099_v13 = vadd.f32 %v2513_v50, %v11219_v7  ;;  %6952 = vmatmul.msk.f32.gmra.mxu3 %vm314_vm1, %v2946_v52  ;;  %v9218_v52 = vld [vmem:[#allocation2 + $0xf1] sm:$0xff]  ;;  %v11234_v7 = vld [vmem:[#allocation19_spill] sm:$0xff] }
 0x32f   : > { %11220 = vst [vmem:[#allocation27_spill] sm:$0xff] %v9099_v13  ;;  %v9102_v19 = vld [vmem:[#allocation2 + $0x107] sm:$0xff] }
 0x330   : > { %v9104_v30 = vld [vmem:[#allocation2 + $0x108] sm:$0xff]  ;;  %2563 = vst.msk [vmem:[#allocation2 + $0x110] sm:$0xff] %vm314_vm1, %v9099_v13  ;;  %6926 = vmatmul.msk.f32.gmra.mxu1 %vm314_vm1, %v9102_v19  ;;  %6970 = vmatmul.msk.f32.gmra.mxu0 %vm314_vm1, %v9102_v19  ;;  %v2469_v54 = vpop.f32.mrf.mxu3 }
 0x331   : > { %6942 = vmatmul.msk.f32.gmra.mxu2 %vm314_vm1, %v9104_v30  ;;  %v9117_v58 = vadd.f32 %v2469_v54, %v9076_v29 }
 0x333   : > { %11221 = vst [vmem:[#allocation32_spill] sm:$0xff] %v9117_v58  ;;  %v2514_v55 = vmul.f32 %v9078_v53, %v9117_v58  ;;  %v11247_v58 = vld [vmem:[#allocation14_spill] sm:$0xff] }
 0x335   : > { %v9122_v18 = vadd.f32 %v2514_v55, %v11222_v26  ;;  %6953 = vmatmul.msk.f32.gmra.mxu3 %vm314_vm1, %v2947_v47 }
 0x337   : > { %11223 = vst [vmem:[#allocation33_spill] sm:$0xff] %v9122_v18  ;;  %v9125_v59 = vld [vmem:[#allocation2 + $0x10f] sm:$0xff] }
 0x338   : > { %v9127_v33 = vld [vmem:[#allocation2 + $0x110] sm:$0xff]  ;;  %2564 = vst.msk [vmem:[#allocation2 + $0x128] sm:$0xff] %vm314_vm1, %v9122_v18  ;;  %6927 = vmatmul.msk.f32.gmra.mxu1 %vm314_vm1, %v9125_v59  ;;  %6971 = vmatmul.msk.f32.gmra.mxu0 %vm314_vm1, %v9125_v59  ;;  %v2472_v45 = vpop.f32.mrf.mxu3 }
 0x339   : > { %6943 = vmatmul.msk.f32.gmra.mxu2 %vm314_vm1, %v9127_v33  ;;  %v9138_v49 = vadd.f32 %v2472_v45, %v9076_v29  ;;  %v9239_v45 = vpop.f32.mrf.mxu0 }
 0x33b   : > { %11224 = vst [vmem:[#allocation28_spill] sm:$0xff] %v9138_v49  ;;  %v2515_v36 = vmul.f32 %v9078_v53, %v9138_v49 }
 0x33d   : > { %v9147_v42 = vadd.f32 %v2515_v36, %v11225_v31  ;;  %6954 = vmatmul.msk.f32.gmra.mxu3 %vm314_vm1, %v9140_v32 }
 0x33f   : > { %11226 = vst [vmem:[#allocation34_spill] sm:$0xff] %v9147_v42  ;;  %v9151_v3 = vld [vmem:[#allocation2 + $0x127] sm:$0xff] }
 0x340   : > { %v9153_v38 = vld [vmem:[#allocation2 + $0x128] sm:$0xff]  ;;  %2565 = vst.msk [vmem:[#allocation2 + $0x130] sm:$0xff] %vm314_vm1, %v9147_v42  ;;  %6928 = vmatmul.msk.f32.gmra.mxu1 %vm314_vm1, %v9151_v3  ;;  %6972 = vmatmul.msk.f32.gmra.mxu0 %vm314_vm1, %v9151_v3  ;;  %v2475_v24 = vpop.f32.mrf.mxu3 }
 0x341   : > { %6944 = vmatmul.msk.f32.gmra.mxu2 %vm314_vm1, %v9153_v38  ;;  %v9164_v37 = vadd.f32 %v2475_v24, %v9076_v29  ;;  %v9246_v24 = vld [vmem:[#allocation2 + $0x109] sm:$0xff]  ;;  %v9270_v17 = vpop.f32.mrf.mxu0 }
 0x343   : > { %11227 = vst [vmem:[#allocation43_spill] sm:$0xff] %v9164_v37  ;;  %v2516_v39 = vmul.f32 %v9078_v53, %v9164_v37  ;;  %v3701_v37 = vld [vmem:[#allocation3 + $0x100] sm:$0xff] }
 0x344   : > { %3766 = vmatpush.msrb.mxu0 %v3701_v37 }
 0x345   : > { %v9173_v51 = vadd.f32 %v2516_v39, %v11228_v4  ;;  %6955 = vmatmul.msk.f32.gmra.mxu3 %vm314_vm1, %v9166_v41  ;;  %v9248_v39 = vpop.f32.mrf.mxu1  ;;  %v11237_v4 = vld [vmem:[#allocation21_spill] sm:$0xff] }
 0x347   : > { %11229 = vst [vmem:[#allocation35_spill] sm:$0xff] %v9173_v51  ;;  %v9177_v0 = vld [vmem:[#allocation2 + $0x12f] sm:$0xff] }
 0x348   : > { %v9179_v40 = vld [vmem:[#allocation2 + $0x130] sm:$0xff]  ;;  %2566 = vst.msk [vmem:[#allocation2 + $0x148] sm:$0xff] %vm314_vm1, %v9173_v51  ;;  %6929 = vmatmul.msk.f32.gmra.mxu1 %vm314_vm1, %v9177_v0  ;;  %6973 = vmatmul.msk.f32.gmra.mxu0 %vm314_vm1, %v9177_v0  ;;  %v2478_v16 = vpop.f32.mrf.mxu3 }
 0x349   : > { %6945 = vmatmul.msk.f32.gmra.mxu2 %vm314_vm1, %v9179_v40  ;;  %v9190_v25 = vadd.f32 %v2478_v16, %v9076_v29  ;;  %v9326_v49 = vld [vmem:[#allocation2 + $0x131] sm:$0xff] }
 0x34b   : > { %11230 = vst [vmem:[#allocation36_spill] sm:$0xff] %v9190_v25  ;;  %v2517_v44 = vmul.f32 %v9078_v53, %v9190_v25 }
 0x34d   : > { %v9197_v22 = vadd.f32 %v2517_v44, %v11231_v46  ;;  %6956 = vmatmul.msk.f32.gmra.mxu3 %vm314_vm1, %v9192_v62 }
 0x34f   : > { %11232 = vst [vmem:[#allocation29_spill] sm:$0xff] %v9197_v22  ;;  %v9201_v43 = vld [vmem:[#allocation2 + $0x147] sm:$0xff] }
 0x350   : > { %v9203_v8 = vld [vmem:[#allocation2 + $0x148] sm:$0xff]  ;;  %2567 = vst.msk [vmem:[#allocation2 + $0x150] sm:$0xff] %vm314_vm1, %v9197_v22  ;;  %6930 = vmatmul.msk.f32.gmra.mxu1 %vm314_vm1, %v9201_v43  ;;  %6974 = vmatmul.msk.f32.gmra.mxu0 %vm314_vm1, %v9201_v43  ;;  %v2481_v27 = vpop.f32.mrf.mxu3  ;;  %v11262_v22 = vld [vmem:[#allocation22_spill] sm:$0xff] }
 0x351   : > { %6946 = vmatmul.msk.f32.gmra.mxu2 %vm314_vm1, %v9203_v8  ;;  %v9216_v23 = vadd.f32 %v2481_v27, %v9076_v29  ;;  %v9274_v27 = vld [vmem:[#allocation2 + $0x111] sm:$0xff] }
 0x353   : > { %11233 = vst [vmem:[#allocation37_spill] sm:$0xff] %v9216_v23  ;;  %v2518_v50 = vmul.f32 %v9078_v53, %v9216_v23 }
 0x355   : > { %v9223_v54 = vadd.f32 %v2518_v50, %v11234_v7  ;;  %6957 = vmatmul.msk.f32.gmra.mxu3 %vm314_vm1, %v9218_v52 }
 0x357   : > { %11235 = vst [vmem:[#allocation44_spill] sm:$0xff] %v9223_v54  ;;  %v9227_v47 = vld [vmem:[#allocation2 + $0x14f] sm:$0xff] }
 0x358   : > { %v9229_v55 = vld [vmem:[#allocation2 + $0x150] sm:$0xff]  ;;  %2568 = vst.msk [vmem:[#allocation2 + $0x168] sm:$0xff] %vm314_vm1, %v9223_v54  ;;  %6931 = vmatmul.msk.f32.gmra.mxu1 %vm314_vm1, %v9227_v47  ;;  %6975 = vmatmul.msk.f32.gmra.mxu0 %vm314_vm1, %v9227_v47  ;;  %v2484_v26 = vpop.f32.mrf.mxu3 }
 0x359   : > { %6947 = vmatmul.msk.f32.gmra.mxu2 %vm314_vm1, %v9229_v55  ;;  %v9242_v36 = vadd.f32 %v2484_v26, %v9076_v29 }
 0x35b   : > { %11236 = vst [vmem:[#allocation38_spill] sm:$0xff] %v9242_v36  ;;  %v2519_v31 = vmul.f32 %v9078_v53, %v9242_v36  ;;  %v11244_v36 = vld [vmem:[#allocation12_spill] sm:$0xff] }
 0x35d   : > { %v9251_v21 = vadd.f32 %v2519_v31, %v11237_v4  ;;  %6958 = vmatmul.msk.f32.gmra.mxu3 %vm314_vm1, %v9246_v24  ;;  %v9285_v31 = vpop.f32.mrf.mxu1 }
 0x35f   : > { %11238 = vst [vmem:[#allocation39_spill] sm:$0xff] %v9251_v21  ;;  %v9255_v60 = vld [vmem:[#allocation2 + $0x167] sm:$0xff] }
 0x360   : > { %v9257_v16 = vld [vmem:[#allocation2 + $0x168] sm:$0xff]  ;;  %2569 = vst.msk [vmem:[#allocation2 + $0x170] sm:$0xff] %vm314_vm1, %v9251_v21  ;;  %6932 = vmatmul.msk.f32.gmra.mxu1 %vm314_vm1, %v9255_v60  ;;  %6976 = vmatmul.msk.f32.gmra.mxu0 %vm314_vm1, %v9255_v60  ;;  %v2487_v44 = vpop.f32.mrf.mxu3 }
 0x361   : > { %6948 = vmatmul.msk.f32.gmra.mxu2 %vm314_vm1, %v9257_v16  ;;  %v9268_v46 = vadd.f32 %v2487_v44, %v9076_v29 }
 0x363   : > { %11239 = vst [vmem:[#allocation30_spill] sm:$0xff] %v9268_v46  ;;  %v2520_v57 = vmul.f32 %v9078_v53, %v9268_v46  ;;  %v9302_v46 = vld [vmem:[#allocation2 + $0x129] sm:$0xff] }
 0x365   : > { %v9277_v50 = vadd.f32 %v2520_v57, %v11240_v48  ;;  %6959 = vmatmul.msk.f32.gmra.mxu3 %vm314_vm1, %v9274_v27  ;;  %v9300_v48 = vpop.f32.mrf.mxu0 }
 0x366   : > { %11243 = vst [vmem:[#allocation42_spill] sm:$0xff] %v9300_v48 }
 0x367   : > { %11241 = vst [vmem:[#allocation40_spill] sm:$0xff] %v9277_v50  ;;  %v9281_v7 = vld [vmem:[#allocation2 + $0x16f] sm:$0xff] }
 0x368   : > { %v9283_v26 = vld [vmem:[#allocation2 + $0x170] sm:$0xff]  ;;  %2570 = vst.msk [vmem:[#allocation2 + $0x188] sm:$0xff] %vm314_vm1, %v9277_v50  ;;  %6933 = vmatmul.msk.f32.gmra.mxu1 %vm314_vm1, %v9281_v7  ;;  %6977 = vmatmul.msk.f32.gmra.mxu0 %vm314_vm1, %v9281_v7  ;;  %v2490_v4 = vpop.f32.mrf.mxu3 }
 0x369   : > { %6949 = vmatmul.msk.f32.gmra.mxu2 %vm314_vm1, %v9283_v26  ;;  %v9296_v44 = vadd.f32 %v2490_v4, %v9076_v29  ;;  %v9319_v4 = vpop.f32.mrf.mxu1  ;;  %v9402_v50 = vld [vmem:[#allocation2 + $0x169] sm:$0xff] }
 0x36b   : > { %11242 = vst [vmem:[#allocation41_spill] sm:$0xff] %v9296_v44  ;;  %v2521_v57 = vmul.f32 %v9078_v53, %v9296_v44 }
 0x36d   : > { %v9305_v23 = vadd.f32 %v2521_v57, %v11244_v36  ;;  %6960 = vmatmul.msk.f32.gmra.mxu3 %vm314_vm1, %v9302_v46 }
 0x36f   : > { %11245 = vst [vmem:[#allocation9_spill] sm:$0xff] %v9305_v23  ;;  %v9309_v25 = vld [vmem:[#allocation2 + $0x187] sm:$0xff] }
 0x370   : > { %2571 = vst.msk [vmem:[#allocation2 + $0x190] sm:$0xff] %vm314_vm1, %v9305_v23  ;;  %6982 = vmatmul.msk.f32.vlgmr.msra.gmra.mxu1 %vm314_vm1, %v9027_v12  ;;  %6978 = vmatmul.msk.f32.gmra.mxu0 %vm314_vm1, %v9309_v25  ;;  %v2493_v36 = vpop.f32.mrf.mxu3 }
 0x371   : > { %6998 = vmatmul.msk.f32.vlgmr.msrb.gmra.mxu2 %vm314_vm1, %v9140_v32  ;;  %v9322_v57 = vadd.f32 %v2493_v36, %v9076_v29  ;;  %v9333_v32 = vpop.f32.mrf.mxu0 }
 0x372   : > { %11249 = vst [vmem:[#allocation13_spill] sm:$0xff] %v9333_v32 }
 0x373   : > { %11246 = vst [vmem:[#allocation10_spill] sm:$0xff] %v9322_v57  ;;  %v2522_v44 = vmul.f32 %v9078_v53, %v9322_v57  ;;  %v9352_v57 = vld [vmem:[#allocation2 + $0x149] sm:$0xff] }
 0x375   : > { %v9329_v12 = vadd.f32 %v2522_v44, %v11247_v58  ;;  %6961 = vmatmul.msk.f32.gmra.mxu3 %vm314_vm1, %v9326_v49  ;;  %v9348_v44 = vpop.f32.mrf.mxu1 }
 0x377   : > { %11248 = vst [vmem:[#allocation11_spill] sm:$0xff] %v9329_v12  ;;  %v9335_v61 = vld [vmem:[#allocation2 + $0x18f] sm:$0xff] }
 0x378   : > { %2572 = vst.msk [vmem:[#allocation2 + $0x1a8] sm:$0xff] %vm314_vm1, %v9329_v12  ;;  %6983 = vmatmul.msk.f32.gmra.mxu1 %vm314_vm1, %v9035_v14  ;;  %6979 = vmatmul.msk.f32.gmra.mxu0 %vm314_vm1, %v9335_v61  ;;  %v2496_v58 = vpop.f32.mrf.mxu3  ;;  %v11251_v12 = vld [vmem:[#allocation16_spill] sm:$0xff] }
 0x379   : > { %6999 = vmatmul.msk.f32.gmra.mxu2 %vm314_vm1, %v9166_v41  ;;  %v9346_v37 = vadd.f32 %v2496_v58, %v9076_v29  ;;  %v9367_v58 = vpop.f32.mrf.mxu0 }
 0x37a   : > { %11253 = vst [vmem:[#allocation19_spill] sm:$0xff] %v9367_v58 }
 0x37b   : > { %11250 = vst [vmem:[#allocation15_spill] sm:$0xff] %v9346_v37  ;;  %v2523_v36 = vmul.f32 %v9078_v53, %v9346_v37  ;;  %v9376_v37 = vld [vmem:[#allocation2 + $0x151] sm:$0xff] }
 0x37d   : > { %v9355_v14 = vadd.f32 %v2523_v36, %v11251_v12  ;;  %6962 = vmatmul.msk.f32.gmra.mxu3 %vm314_vm1, %v9352_v57 }
 0x37f   : > { %11252 = vst [vmem:[#allocation17_spill] sm:$0xff] %v9355_v14  ;;  %v9359_v41 = vld [vmem:[#allocation2 + $0x1a7] sm:$0xff] }
 0x380   : > { %2573 = vst.msk [vmem:[#allocation2 + $0x1b0] sm:$0xff] %vm314_vm1, %v9355_v14  ;;  %6984 = vmatmul.msk.f32.gmra.mxu1 %vm314_vm1, %v9045_v20  ;;  %6980 = vmatmul.msk.f32.gmra.mxu0 %vm314_vm1, %v9359_v41  ;;  %v2499_v12 = vpop.f32.mrf.mxu3  ;;  %v9378_v14 = vpop.f32.mrf.mxu1  ;;  %v11255_v20 = vld [vmem:[#allocation18_spill] sm:$0xff] }
 0x381   : > { %7000 = vmatmul.msk.f32.gmra.mxu2 %vm314_vm1, %v9192_v62  ;;  %v9372_v36 = vadd.f32 %v2499_v12, %v9076_v29 }
 0x383   : > { %11254 = vst [vmem:[#allocation21_spill] sm:$0xff] %v9372_v36  ;;  %v2524_v2 = vmul.f32 %v9078_v53, %v9372_v36 }
 0x385   : > { %v9381_v23 = vadd.f32 %v2524_v2, %v11255_v20  ;;  %6963 = vmatmul.msk.f32.gmra.mxu3 %vm314_vm1, %v9376_v37  ;;  %v9398_v20 = vpop.f32.mrf.mxu0 }
 0x386   : > { %11258 = vst [vmem:[#allocation14_spill] sm:$0xff] %v9398_v20 }
 0x387   : > { %11256 = vst [vmem:[#allocation23_spill] sm:$0xff] %v9381_v23  ;;  %v9385_v62 = vld [vmem:[#allocation2 + $0x1af] sm:$0xff] }
 0x388   : > { %2574 = vst.msk [vmem:[#allocation2 + $0x1c8] sm:$0xff] %vm314_vm1, %v9381_v23  ;;  %6985 = vmatmul.msk.f32.gmra.mxu1 %vm314_vm1, %v9055_v10  ;;  %6981 = vmatmul.msk.f32.gmra.mxu0 %vm314_vm1, %v9385_v62  ;;  %v2502_v12 = vpop.f32.mrf.mxu3  ;;  %v9404_v23 = vpop.f32.mrf.mxu2  ;;  %v11259_v10 = vld [vmem:[#allocation20_spill] sm:$0xff] }
 0x389   : > { %7001 = vmatmul.msk.f32.gmra.mxu2 %vm314_vm1, %v9218_v52  ;;  %v9396_v2 = vadd.f32 %v2502_v12, %v9076_v29  ;;  %v9411_v52 = vpop.f32.mrf.mxu1 }
 0x38b   : > { %11257 = vst [vmem:[#allocation12_spill] sm:$0xff] %v9396_v2  ;;  %v2525_v36 = vmul.f32 %v9078_v53, %v9396_v2 }
 0x38d   : > { %v9407_v21 = vadd.f32 %v2525_v36, %v11259_v10  ;;  %6964 = vmatmul.msk.f32.gmra.mxu3 %vm314_vm1, %v9402_v50  ;;  %v3849_v36 = vld [vmem:[#allocation3 + $0x110] sm:$0xff]  ;;  %v9426_v54 = vpop.f32.mrf.mxu0 }
 0x38e   : > { %3914 = vmatpush.msrb.mxu1 %v3849_v36 }
 0x38f   : > { %11260 = vst [vmem:[#allocation16_spill] sm:$0xff] %v9407_v21 }
 0x390   : > { %2575 = vst.msk [vmem:[#allocation2 + $0x1d0] sm:$0xff] %vm314_vm1, %v9407_v21  ;;  %6986 = vmatmul.msk.f32.gmra.mxu1 %vm314_vm1, %v9104_v30  ;;  %7030 = vmatmul.msk.f32.vlgmr.msrb.gmra.mxu0 %vm314_vm1, %v9104_v30  ;;  %v2505_v12 = vpop.f32.mrf.mxu3  ;;  %v9428_v21 = vld [vmem:[#allocation2 + $0x171] sm:$0xff]  ;;  %v9435_v30 = vpop.f32.mrf.mxu2 }
 0x391   : > { %7002 = vmatmul.msk.f32.gmra.mxu2 %vm314_vm1, %v9246_v24  ;;  %v9422_v10 = vadd.f32 %v2505_v12, %v9076_v29 }
 0x393   : > { %11261 = vst [vmem:[#allocation18_spill] sm:$0xff] %v9422_v10  ;;  %v2526_v2 = vmul.f32 %v9078_v53, %v9422_v10  ;;  %v11265_v10 = vld [vmem:[#allocation24_spill] sm:$0xff] }
 0x395   : > { %v9431_v51 = vadd.f32 %v2526_v2, %v11262_v22  ;;  %6965 = vmatmul.msk.f32.gmra.mxu3 %vm314_vm1, %v9428_v21  ;;  %v9445_v22 = vpop.f32.mrf.mxu1  ;;  %v9457_v42 = vpop.f32.mrf.mxu0 }
 0x397   : > { %11263 = vst [vmem:[#allocation20_spill] sm:$0xff] %v9431_v51 }
 0x398   : > { %2576 = vst.msk [vmem:[#allocation2 + $0x1e8] sm:$0xff] %vm314_vm1, %v9431_v51  ;;  %6987 = vmatmul.msk.f32.gmra.mxu1 %vm314_vm1, %v9127_v33  ;;  %7031 = vmatmul.msk.f32.gmra.mxu0 %vm314_vm1, %v9127_v33  ;;  %v2508_v12 = vpop.f32.mrf.mxu3 }
 0x399   : > { %7003 = vmatmul.msk.f32.gmra.mxu2 %vm314_vm1, %v9274_v27  ;;  %v9448_v2 = vadd.f32 %v2508_v12, %v9076_v29 }
 0x39b   : > { %11264 = vst [vmem:[#allocation22_spill] sm:$0xff] %v9448_v2  ;;  %v2527_v36 = vmul.f32 %v9078_v53, %v9448_v2  ;;  %v9469_v53 = vpop.f32.mrf.mxu2 }
 0x39d   : > { %v9453_v51 = vadd.f32 %v2527_v36, %v11265_v10  ;;  %7014 = vmatmul.msk.f32.vlgmr.msrb.gmra.mxu3 %vm314_vm1, %v9102_v19  ;;  %v9471_v33 = vpop.f32.mrf.mxu1  ;;  %v9479_v19 = vpop.f32.mrf.mxu0  ;;  %v6899_v10 = vld [vmem:[%s11091_s6 + $0x4] sm:$0xf] }
 0x39f   : > { %11266 = vst [vmem:[#allocation24_spill] sm:$0xff] %v9453_v51 }
 0x3a0   : > { %2577 = vst.msk [vmem:[#allocation2 + $0x1f0] sm:$0xff] %vm314_vm1, %v9453_v51  ;;  %6988 = vmatmul.msk.f32.gmra.mxu1 %vm314_vm1, %v9153_v38  ;;  %7032 = vmatmul.msk.f32.gmra.mxu0 %vm314_vm1, %v9153_v38  ;;  %v9467_v29 = vpop.f32.mrf.mxu3 }
 0x3a1   : > { %7004 = vmatmul.msk.f32.gmra.mxu2 %vm314_vm1, %v9302_v46 }
 0x3a3   : > { %v2889_v12 = vpop.f32.mrf.mxu2 }
 0x3a5   : > { %7015 = vmatmul.msk.f32.gmra.mxu3 %vm314_vm1, %v9125_v59  ;;  %v9490_v59 = vperm.slane %v6899_v10, 0  ;;  %v3185_v51 = vpop.f32.mrf.mxu0 }
 0x3a7   : > { %v2609_v2 = vadd.f32 %v9067_v1, %v9490_v59 }
 0x3a8   : > { %6989 = vmatmul.msk.f32.gmra.mxu1 %vm314_vm1, %v9179_v40  ;;  %7033 = vmatmul.msk.f32.gmra.mxu0 %vm314_vm1, %v9179_v40  ;;  %v9483_v38 = vpop.f32.mrf.mxu3 }
 0x3a9   : > { %7005 = vmatmul.msk.f32.gmra.mxu2 %vm314_vm1, %v9326_v49  ;;  %v2783_v10 = vadd.f32 %v9348_v44, %v2609_v2 }
 0x3ab   : > { %v2892_v1 = vpop.f32.mrf.mxu2  ;;  %v2931_v13 = vadd.f32 %v2889_v12, %v2783_v10 }
 0x3ad   : > { %v9488_v36 = vpop.f32.mrf.mxu1  ;;  %7016 = vmatmul.msk.f32.gmra.mxu3 %vm314_vm1, %v9151_v3  ;;  %v2612_v3 = vadd.f32 %v9070_v28, %v9490_v59  ;;  %v2615_v28 = vadd.f32 %v9089_v6, %v9490_v59 }
 0x3af   : > { %v2784_v2 = vadd.f32 %v9378_v14, %v2612_v3  ;;  %v2785_v14 = vadd.f32 %v9411_v52, %v2615_v28  ;;  %v2621_v28 = vadd.f32 %v9142_v9, %v9490_v59  ;;  %v3253_v9 = vld [vmem:[#allocation2 + $0x190] sm:$0xff] }
 0x3b0   : > { %6990 = vmatmul.msk.f32.gmra.mxu1 %vm314_vm1, %v9203_v8  ;;  %7034 = vmatmul.msk.f32.gmra.mxu0 %vm314_vm1, %v9203_v8  ;;  %v9502_v40 = vpop.f32.mrf.mxu3 }
 0x3b1   : > { %7006 = vmatmul.msk.f32.gmra.mxu2 %vm314_vm1, %v9352_v57  ;;  %v2932_v12 = vadd.f32 %v2892_v1, %v2784_v2  ;;  %v2618_v1 = vadd.f32 %v9114_v5, %v9490_v59  ;;  %v3252_v5 = vld [vmem:[#allocation2 + $0x188] sm:$0xff] }
 0x3b5   : > { %v9505_v18 = vpop.f32.mrf.mxu1  ;;  %7017 = vmatmul.msk.f32.gmra.mxu3 %vm314_vm1, %v9177_v0  ;;  %v3188_v0 = vpop.f32.mrf.mxu0 }
 0x3b8   : > { %6991 = vmatmul.msk.f32.gmra.mxu1 %vm314_vm1, %v9229_v55  ;;  %7035 = vmatmul.msk.f32.gmra.mxu0 %vm314_vm1, %v9229_v55  ;;  %v3037_v8 = vpop.f32.mrf.mxu3 }
 0x3b9   : > { %7007 = vmatmul.msk.f32.gmra.mxu2 %vm314_vm1, %v9376_v37  ;;  %v3079_v44 = vadd.f32 %v3037_v8, %v2931_v13  ;;  %v2895_v13 = vpop.f32.mrf.mxu2 }
 0x3ba   : > { %v2933_v3 = vadd.f32 %v2895_v13, %v2785_v14 }
 0x3bb   : > { %v9518_v11 = vadd.f32 %v3185_v51, %v3079_v44  ;;  %v2786_v44 = vadd.f32 %v9445_v22, %v2618_v1 }
 0x3bd   : > { %v9520_v20 = vpop.f32.mrf.mxu1  ;;  %7018 = vmatmul.msk.f32.gmra.mxu3 %vm314_vm1, %v9201_v43  ;;  %v3191_v6 = vpop.f32.mrf.mxu0 }
 0x3c0   : > { %6992 = vmatmul.msk.f32.gmra.mxu1 %vm314_vm1, %v9257_v16  ;;  %7036 = vmatmul.msk.f32.gmra.mxu0 %vm314_vm1, %v9257_v16  ;;  %v3040_v51 = vpop.f32.mrf.mxu3 }
 0x3c1   : > { %7008 = vmatmul.msk.f32.gmra.mxu2 %vm314_vm1, %v9402_v50  ;;  %v3080_v55 = vadd.f32 %v3040_v51, %v2932_v12  ;;  %v2898_v8 = vpop.f32.mrf.mxu2  ;;  %v2787_v51 = vadd.f32 %v9471_v33, %v2621_v28  ;;  %v3255_v28 = vld [vmem:[#allocation2 + $0x1b0] sm:$0xff] }
 0x3c2   : > { %v2934_v12 = vadd.f32 %v2898_v8, %v2786_v44  ;;  %v9581_v44 = vld [vmem:[#allocation2 + $0x1a9] sm:$0xff] }
 0x3c3   : > { %v9533_v10 = vadd.f32 %v3188_v0, %v3080_v55  ;;  %v9554_v0 = vld [vmem:[#allocation2 + $0x189] sm:$0xff] }
 0x3c5   : > { %v9535_v43 = vpop.f32.mrf.mxu1  ;;  %7019 = vmatmul.msk.f32.gmra.mxu3 %vm314_vm1, %v9227_v47 }
 0x3c8   : > { %6993 = vmatmul.msk.f32.gmra.mxu1 %vm314_vm1, %v9283_v26  ;;  %7037 = vmatmul.msk.f32.gmra.mxu0 %vm314_vm1, %v9283_v26  ;;  %v3043_v16 = vpop.f32.mrf.mxu3  ;;  %v3194_v26 = vpop.f32.mrf.mxu0 }
 0x3c9   : > { %7009 = vmatmul.msk.f32.gmra.mxu2 %vm314_vm1, %v9428_v21  ;;  %v3081_v52 = vadd.f32 %v3043_v16, %v2933_v3  ;;  %v2901_v55 = vpop.f32.mrf.mxu2 }
 0x3ca   : > { %v2935_v1 = vadd.f32 %v2901_v55, %v2787_v51  ;;  %v3697_v51 = vld [vmem:[#allocation2 + $0x1d0] sm:$0xff]  ;;  %v3548_v55 = vld [vmem:[#allocation2 + $0x1c7] sm:$0xff] }
 0x3cb   : > { %v9548_v47 = vadd.f32 %v3191_v6, %v3081_v52  ;;  %v9569_v6 = vld [vmem:[#allocation2 + $0x191] sm:$0xff] }
 0x3cd   : > { %v9550_v2 = vpop.f32.mrf.mxu1  ;;  %7020 = vmatmul.msk.f32.gmra.mxu3 %vm314_vm1, %v9255_v60 }
 0x3ce   : > { %11267 = vst [vmem:[#allocation45_spill] sm:$0xff] %v9550_v2 }
 0x3d0   : > { %6994 = vmatmul.msk.f32.gmra.mxu1 %vm314_vm1, %v3252_v5  ;;  %7038 = vmatmul.msk.f32.gmra.mxu0 %vm314_vm1, %v3252_v5  ;;  %v3046_v22 = vpop.f32.mrf.mxu3  ;;  %v3197_v16 = vpop.f32.mrf.mxu0 }
 0x3d1   : > { %7010 = vmatmul.msk.f32.gmra.mxu2 %vm314_vm1, %v9554_v0  ;;  %v3082_v13 = vadd.f32 %v3046_v22, %v2934_v12  ;;  %v9591_v12 = vld [vmem:[#allocation2 + $0x1b1] sm:$0xff] }
 0x3d3   : > { %v9563_v60 = vadd.f32 %v3194_v26, %v3082_v13  ;;  %v3696_v26 = vld [vmem:[#allocation2 + $0x1c8] sm:$0xff] }
 0x3d5   : > { %v9565_v14 = vpop.f32.mrf.mxu1  ;;  %7021 = vmatmul.msk.f32.gmra.mxu3 %vm314_vm1, %v9281_v7  ;;  %v3254_v7 = vld [vmem:[#allocation2 + $0x1a8] sm:$0xff] }
 0x3d6   : > { %11268 = vst [vmem:[#allocation46_spill] sm:$0xff] %v9565_v14 }
 0x3d8   : > { %6995 = vmatmul.msk.f32.gmra.mxu1 %vm314_vm1, %v3253_v9  ;;  %7039 = vmatmul.msk.f32.gmra.mxu0 %vm314_vm1, %v3253_v9  ;;  %v3049_v33 = vpop.f32.mrf.mxu3 }
 0x3d9   : > { %7011 = vmatmul.msk.f32.gmra.mxu2 %vm314_vm1, %v9569_v6  ;;  %v3083_v3 = vadd.f32 %v3049_v33, %v2935_v1  ;;  %v3698_v1 = vld [vmem:[#allocation2 + $0x1e8] sm:$0xff] }
 0x3da   : > { %v3549_v33 = vld [vmem:[#allocation2 + $0x1cf] sm:$0xff] }
 0x3db   : > { %v9575_v52 = vadd.f32 %v3197_v16, %v3083_v3 }
 0x3dd   : > { %v9577_v8 = vpop.f32.mrf.mxu1  ;;  %7022 = vmatmul.msk.f32.gmra.mxu3 %vm314_vm1, %v9309_v25 }
 0x3de   : > { %11269 = vst [vmem:[#allocation47_spill] sm:$0xff] %v9577_v8 }
 0x3e0   : > { %6996 = vmatmul.msk.f32.gmra.mxu1 %vm314_vm1, %v3254_v7  ;;  %7040 = vmatmul.msk.f32.gmra.mxu0 %vm314_vm1, %v3254_v7  ;;  %v9610_v13 = vpop.f32.mrf.mxu3  ;;  %v3699_v7 = vld [vmem:[#allocation2 + $0x1f0] sm:$0xff] }
 0x3e1   : > { %7012 = vmatmul.msk.f32.gmra.mxu2 %vm314_vm1, %v9581_v44 }
 0x3e5   : > { %v9587_v5 = vpop.f32.mrf.mxu1  ;;  %7023 = vmatmul.msk.f32.gmra.mxu3 %vm314_vm1, %v9335_v61  ;;  %v9604_v61 = vpop.f32.mrf.mxu2 }
 0x3e6   : > { %11270 = vst [vmem:[#allocation48_spill] sm:$0xff] %v9587_v5 }
 0x3e8   : > { %6997 = vmatmul.msk.f32.gmra.mxu1 %vm314_vm1, %v3255_v28  ;;  %7041 = vmatmul.msk.f32.gmra.mxu0 %vm314_vm1, %v3255_v28 }
 0x3e9   : > { %7013 = vmatmul.msk.f32.gmra.mxu2 %vm314_vm1, %v9591_v12 }
 0x3ed   : > { %v9597_v25 = vpop.f32.mrf.mxu1  ;;  %7024 = vmatmul.msk.f32.gmra.mxu3 %vm314_vm1, %v9359_v41  ;;  %v9615_v41 = vpop.f32.mrf.mxu0 }
 0x3ee   : > { %v9619_v9 = vpop.f32.mrf.mxu2 }
 0x3f0   : > { %7046 = vmatmul.msk.f32.vlgmr.msrb.gmra.mxu1 %vm314_vm1, %v9246_v24  ;;  %7042 = vmatmul.msk.f32.gmra.mxu0 %vm314_vm1, %v3696_v26  ;;  %v3550_v26 = vld [vmem:[#allocation2 + $0x1e7] sm:$0xff] }
 0x3f5   : > { %v9606_v22 = vpop.f32.mrf.mxu1  ;;  %7025 = vmatmul.msk.f32.gmra.mxu3 %vm314_vm1, %v9385_v62  ;;  %v9624_v62 = vpop.f32.mrf.mxu3 }
 0x3f6   : > { %v9630_v3 = vpop.f32.mrf.mxu0  ;;  %v9632_v16 = vpop.f32.mrf.mxu2 }
 0x3f8   : > { %7047 = vmatmul.msk.f32.gmra.mxu1 %vm314_vm1, %v9274_v27  ;;  %7043 = vmatmul.msk.f32.gmra.mxu0 %vm314_vm1, %v3697_v51 }
 0x3fd   : > { %v9617_v24 = vpop.f32.mrf.mxu1  ;;  %7026 = vmatmul.msk.f32.gmra.mxu3 %vm314_vm1, %v3548_v55 }
 0x3fe   : > { %v9644_v51 = vpop.f32.mrf.mxu0  ;;  %v9646_v55 = vpop.f32.mrf.mxu2 }
 0x3ff   : > { %11271 = vst [vmem:[#allocation49_spill] sm:$0xff] %v9644_v51 }
 0x400   : > { %7048 = vmatmul.msk.f32.gmra.mxu1 %vm314_vm1, %v9302_v46  ;;  %7044 = vmatmul.msk.f32.gmra.mxu0 %vm314_vm1, %v3698_v1  ;;  %v9637_v46 = vpop.f32.mrf.mxu3  ;;  %11272 = vst [vmem:[#allocation50_spill] sm:$0xff] %v9646_v55 }
 0x405   : > { %v9627_v27 = vpop.f32.mrf.mxu1  ;;  %7027 = vmatmul.msk.f32.gmra.mxu3 %vm314_vm1, %v3549_v33 }
 0x408   : > { %7049 = vmatmul.msk.f32.gmra.mxu1 %vm314_vm1, %v9326_v49  ;;  %7045 = vmatmul.msk.f32.gmra.mxu0 %vm314_vm1, %v3699_v7  ;;  %v9648_v1 = vpop.f32.mrf.mxu3  ;;  %v3551_v49 = vld [vmem:[#allocation2 + $0x1ef] sm:$0xff]  ;;  %v9655_v7 = vpop.f32.mrf.mxu0 }
 0x409   : > { %11273 = vst [vmem:[#allocation51_spill] sm:$0xff] %v9648_v1  ;;  %v3845_v1 = vld [vmem:[#allocation2 + $0x1d1] sm:$0xff] }
 0x40a   : > { %11274 = vst [vmem:[#allocation52_spill] sm:$0xff] %v9655_v7  ;;  %v3844_v7 = vld [vmem:[#allocation2 + $0x1c9] sm:$0xff] }
 0x40d   : > { %v9639_v28 = vpop.f32.mrf.mxu1  ;;  %7028 = vmatmul.msk.f32.gmra.mxu3 %vm314_vm1, %v3550_v26  ;;  %v9657_v26 = vpop.f32.mrf.mxu2 }
 0x40e   : > { %11275 = vst [vmem:[#allocation53_spill] sm:$0xff] %v9657_v26 }
 0x410   : > { %7050 = vmatmul.msk.f32.gmra.mxu1 %vm314_vm1, %v9352_v57  ;;  %v9661_v57 = vpop.f32.mrf.mxu3  ;;  %v9665_v8 = vpop.f32.mrf.mxu0 }
 0x411   : > { %11276 = vst [vmem:[#allocation54_spill] sm:$0xff] %v9661_v57 }
 0x412   : > { %11277 = vst [vmem:[#allocation55_spill] sm:$0xff] %v9665_v8 }
 0x415   : > { %v9650_v33 = vpop.f32.mrf.mxu1  ;;  %7029 = vmatmul.msk.f32.gmra.mxu3 %vm314_vm1, %v3551_v49  ;;  %v9669_v14 = vpop.f32.mrf.mxu2 }
 0x416   : > { %11278 = vst [vmem:[#allocation56_spill] sm:$0xff] %v9669_v14 }
 0x418   : > { %7051 = vmatmul.msk.f32.gmra.mxu1 %vm314_vm1, %v9376_v37  ;;  %v9673_v37 = vpop.f32.mrf.mxu3  ;;  %v9677_v32 = vpop.f32.mrf.mxu0 }
 0x419   : > { %11279 = vst [vmem:[#allocation57_spill] sm:$0xff] %v9673_v37 }
 0x41a   : > { %11280 = vst [vmem:[#allocation58_spill] sm:$0xff] %v9677_v32 }
 0x41d   : > { %v9659_v5 = vpop.f32.mrf.mxu1  ;;  %v9679_v26 = vpop.f32.mrf.mxu2 }
 0x41e   : > { %11281 = vst [vmem:[#allocation59_spill] sm:$0xff] %v9679_v26 }
 0x420   : > { %7052 = vmatmul.msk.f32.gmra.mxu1 %vm314_vm1, %v9402_v50  ;;  %v9683_v50 = vpop.f32.mrf.mxu3  ;;  %v9689_v14 = vpop.f32.mrf.mxu0 }
 0x421   : > { %11282 = vst [vmem:[#allocation60_spill] sm:$0xff] %v9683_v50 }
 0x422   : > { %11283 = vst [vmem:[#allocation61_spill] sm:$0xff] %v9689_v14 }
 0x425   : > { %v9667_v58 = vpop.f32.mrf.mxu1 }
 0x428   : > { %7053 = vmatmul.msk.f32.gmra.mxu1 %vm314_vm1, %v9428_v21  ;;  %v9691_v21 = vpop.f32.mrf.mxu2  ;;  %v9693_v37 = vpop.f32.mrf.mxu3 }
 0x429   : > { %11284 = vst [vmem:[#allocation62_spill] sm:$0xff] %v9691_v21  ;;  %v9699_v26 = vpop.f32.mrf.mxu0 }
 0x42a   : > { %11285 = vst [vmem:[#allocation63_spill] sm:$0xff] %v9693_v37 }
 0x42b   : > { %11287 = vst [vmem:[#allocation65_spill] sm:$0xff] %v9699_v26 }
 0x42d   : > { %v9675_v49 = vpop.f32.mrf.mxu1 }
 0x430   : > { %7054 = vmatmul.msk.f32.gmra.mxu1 %vm314_vm1, %v9554_v0  ;;  %v3472_v0 = vpop.f32.mrf.mxu2  ;;  %v3620_v32 = vpop.f32.mrf.mxu3 }
 0x435   : > { %v9685_v8 = vpop.f32.mrf.mxu1 }
 0x438   : > { %7055 = vmatmul.msk.f32.gmra.mxu1 %vm314_vm1, %v9569_v6  ;;  %v3768_v6 = vpop.f32.mrf.mxu0  ;;  %v3475_v21 = vpop.f32.mrf.mxu2 }
 0x439   : > { %v3623_v37 = vpop.f32.mrf.mxu3 }
 0x43d   : > { %v9695_v57 = vpop.f32.mrf.mxu1 }
 0x43e   : > { %11286 = vst [vmem:[#allocation64_spill] sm:$0xff] %v9695_v57 }
 0x440   : > { %7056 = vmatmul.msk.f32.gmra.mxu1 %vm314_vm1, %v9581_v44  ;;  %v2600_v44 = vadd.f32 %v9038_v35, %v9490_v59  ;;  %v3771_v26 = vpop.f32.mrf.mxu0  ;;  %v3478_v48 = vpop.f32.mrf.mxu2  ;;  %v3846_v35 = vld [vmem:[#allocation2 + $0x1e9] sm:$0xff] }
 0x445   : > { %v9701_v50 = vpop.f32.mrf.mxu1 }
 0x446   : > { %11288 = vst [vmem:[#allocation66_spill] sm:$0xff] %v9701_v50  ;;  %v2780_v50 = vadd.f32 %v9248_v39, %v2600_v44 }
 0x448   : > { %7057 = vmatmul.msk.f32.gmra.mxu1 %vm314_vm1, %v9591_v12  ;;  %v3626_v12 = vpop.f32.mrf.mxu3  ;;  %v2928_v57 = vadd.f32 %v9404_v23, %v2780_v50  ;;  %v3774_v51 = vpop.f32.mrf.mxu0 }
 0x449   : > { %v3481_v44 = vpop.f32.mrf.mxu2 }
 0x44a   : > { %v3076_v55 = vadd.f32 %v9467_v29, %v2928_v57 }
 0x44c   : > { %v3224_v39 = vadd.f32 %v9426_v54, %v3076_v55 }
 0x44d   : > { %v9705_v14 = vpop.f32.mrf.mxu1 }
 0x44e   : > { %11289 = vst [vmem:[#allocation67_spill] sm:$0xff] %v9705_v14  ;;  %v2603_v14 = vadd.f32 %v9051_v15, %v9490_v59  ;;  %v3372_v23 = vadd.f32 %v9597_v25, %v3224_v39 }
 0x450   : > { %7058 = vmatmul.msk.f32.gmra.mxu1 %vm314_vm1, %v3844_v7  ;;  %v3629_v50 = vpop.f32.mrf.mxu3  ;;  %v3520_v57 = vadd.f32 %v3472_v0, %v3372_v23  ;;  %v3777_v55 = vpop.f32.mrf.mxu0 }
 0x451   : > { %v3484_v25 = vpop.f32.mrf.mxu2 }
 0x455   : > { %v9710_v2 = vpop.f32.mrf.mxu1 }
 0x456   : > { %11290 = vst [vmem:[#allocation68_spill] sm:$0xff] %v9710_v2  ;;  %v2781_v2 = vadd.f32 %v9285_v31, %v2603_v14  ;;  %v3847_v31 = vld [vmem:[#allocation2 + $0x1f1] sm:$0xff] }
 0x458   : > { %7059 = vmatmul.msk.f32.gmra.mxu1 %vm314_vm1, %v3845_v1  ;;  %v2606_v1 = vadd.f32 %v9061_v63, %v9490_v59  ;;  %v2929_v15 = vadd.f32 %v9435_v30, %v2781_v2  ;;  %v7079_v63 = vld [vmem:[%s11090_s5 + $0x18] sm:$0xff]  ;;  %v7098_v30 = vld [vmem:[%s11089_s4 + $0x28] sm:$0xff] }
 0x459   : > { %4446 = vmatpush.msra.mxu2 %v7079_v63  ;;  %4582 = vmatpush.msra.mxu3 %v7098_v30 }
 0x45a   : > { %v3077_v29 = vadd.f32 %v9483_v38, %v2929_v15  ;;  %v2782_v14 = vadd.f32 %v9319_v4, %v2606_v1  ;;  %v3632_v1 = vpop.f32.mrf.mxu3 }
 0x45c   : > { %v3225_v54 = vadd.f32 %v9457_v42, %v3077_v29  ;;  %v2930_v38 = vadd.f32 %v9469_v53, %v2782_v14  ;;  %v4651_v53 = vld [vmem:[#allocation3 + $0x128] sm:$0xff] }
 0x45d   : > { %v9717_v7 = vpop.f32.mrf.mxu1  ;;  %4714 = vmatpush.msra.mxu0 %v4651_v53 }
 0x45e   : > { %11291 = vst [vmem:[#allocation69_spill] sm:$0xff] %v9717_v7  ;;  %v3373_v2 = vadd.f32 %v9606_v22, %v3225_v54  ;;  %v3078_v42 = vadd.f32 %v9502_v40, %v2930_v38 }
 0x460   : > { %7060 = vmatmul.msk.f32.gmra.mxu1 %vm314_vm1, %v3846_v35  ;;  %v3668_v35 = vadd.f32 %v3620_v32, %v3520_v57  ;;  %v3521_v0 = vadd.f32 %v3475_v21, %v3373_v2  ;;  %v3226_v29 = vadd.f32 %v9479_v19, %v3078_v42  ;;  %v3375_v19 = vadd.f32 %v9627_v27, %v9518_v11 }
 0x461   : > { %v3376_v11 = vadd.f32 %v9639_v28, %v9533_v10 }
 0x462   : > { %v3816_v4 = vadd.f32 %v3768_v6, %v3668_v35  ;;  %v3669_v15 = vadd.f32 %v3623_v37, %v3521_v0  ;;  %v3374_v22 = vadd.f32 %v9617_v24, %v3226_v29  ;;  %v3780_v6 = vpop.f32.mrf.mxu0  ;;  %v3487_v35 = vpop.f32.mrf.mxu2  ;;  %v3523_v38 = vadd.f32 %v3481_v44, %v3375_v19 }
 0x463   : > { %v3635_v63 = vpop.f32.mrf.mxu3  ;;  %v3524_v29 = vadd.f32 %v3484_v25, %v3376_v11 }
 0x464   : > { %v3817_v57 = vadd.f32 %v3771_v26, %v3669_v15  ;;  %v3522_v14 = vadd.f32 %v3478_v48, %v3374_v22 }
 0x465   : > { %v9727_v7 = vpop.f32.mrf.mxu1 }
 0x466   : > { %v3670_v54 = vadd.f32 %v3626_v12, %v3522_v14  ;;  %v3671_v12 = vadd.f32 %v3629_v50, %v3523_v38 }
 0x468   : > { %7061 = vmatmul.msk.f32.gmra.mxu1 %vm314_vm1, %v3847_v31  ;;  %v3818_v24 = vadd.f32 %v3774_v51, %v3670_v54  ;;  %v3819_v51 = vadd.f32 %v3777_v55, %v3671_v12 }
 0x46a   : > { %v9754_v48 = vpop.f32.mrf.mxu0 }
 0x46b   : > { %v9761_v27 = vpop.f32.mrf.mxu3 }
 0x46d   : > { %v3916_v32 = vpop.f32.mrf.mxu1 }
 0x46e   : > { %v9742_v39 = vadd.f32 %v3916_v32, %v3816_v4  ;;  %v9756_v32 = vpop.f32.mrf.mxu2 }
 0x470   : > { %v7062_v23 = vmul.f32 -1.442695, %v9742_v39 }
 0x472   : > { %7456 = vpow2.f32 %v7062_v23  ;;  %v9766_v28 = vpop.f32.mrf.mxu0 }
 0x475   : > { %v3919_v31 = vpop.f32.mrf.mxu1 }
 0x476   : > { %v9747_v40 = vadd.f32 %v3919_v31, %v3817_v57  ;;  %v9770_v25 = vpop.f32.mrf.mxu2 }
 0x478   : > { %v7457_v21 = vpop.eup %7456  ;;  %v7063_v37 = vmul.f32 -1.442695, %v9747_v40 }
 0x479   : > { %v4044_v30 = vadd.f32 1.0, %v7457_v21  ;;  %v3672_v21 = vadd.f32 %v3632_v1, %v3524_v29  ;;  %v3377_v1 = vadd.f32 %v9650_v33, %v9548_v47 }
 0x47a   : > { %7458 = vpow2.f32 %v7063_v37 }
 0x47b   : > { %7460 = vrcp.f32 %v4044_v30  ;;  %v4071_v22 = vand.u32 2147483648, %v4044_v30  ;;  %v4069_v31 = vand.u32 2147483647, %v4044_v30  ;;  %vm4065_vm8 = vweird.f32 %v4044_v30 }
 0x47c   : > { %v3525_v12 = vadd.f32 %v3487_v35, %v3377_v1 }
 0x47d   : > { %v3922_v26 = vpop.f32.mrf.mxu1  ;;  %v4072_v55 = vor.u32 1.1754944e-38, %v4071_v22  ;;  %vm4070_vm10 = vcmp.eq.f32.partialorder %v4069_v31, 8.507059e+37 }
 0x47e   : > { %v9752_v2 = vadd.f32 %v3922_v26, %v3818_v24 }
 0x480   : > { %v7459_v4 = vpop.eup %7458  ;;  %v7064_v42 = vmul.f32 -1.442695, %v9752_v2 }
 0x481   : > { %v7461_v0 = vpop.eup %7460  ;;  %v4045_v15 = vadd.f32 1.0, %v7459_v4 }
 0x482   : > { %7462 = vpow2.f32 %v7064_v42  ;;  %v4061_v23 = vmul.f32 %v7461_v0, %v4044_v30  ;;  %vm4066_vm7 = vweird.f32 %v7461_v0  ;;  %v3820_v30 = vadd.f32 %v3780_v6, %v3672_v21  ;;  %v9776_v42 = vpop.f32.mrf.mxu3  ;;  %v9786_v21 = vpop.f32.mrf.mxu0 }
 0x483   : > { %7464 = vrcp.f32 %v4045_v15  ;;  %vm4067_vm9 = vmor %vm4065_vm8, %vm4066_vm7  ;;  %v4086_v11 = vand.u32 2147483648, %v4045_v15  ;;  %vm4080_vm12 = vweird.f32 %v4045_v15 }
 0x484   : > { %v4062_v44 = vsub.f32 1.0, %v4061_v23 }
 0x485   : > { %v3925_v53 = vpop.f32.mrf.mxu1  ;;  %v4087_v6 = vor.u32 1.1754944e-38, %v4086_v11 }
 0x486   : > { %v9763_v57 = vadd.f32 %v3925_v53, %v3819_v51  ;;  %v4063_v50 = vmul.f32 %v7461_v0, %v4062_v44  ;;  %v4084_v44 = vand.u32 2147483647, %v4045_v15  ;;  %v3673_v53 = vadd.f32 %v3635_v63, %v3525_v12 }
 0x488   : > { %v7463_v14 = vpop.eup %7462  ;;  %v7065_v54 = vmul.f32 -1.442695, %v9763_v57  ;;  %v4064_v37 = vadd.f32 %v7461_v0, %v4063_v50  ;;  %vm4085_vm14 = vcmp.eq.f32.partialorder %v4084_v44, 8.507059e+37 }
 0x489   : > { %v7465_v10 = vpop.eup %7464  ;;  %v9768_v19 = vadd.f32 1.0, %v7463_v14  ;;  %v3378_v14 = vadd.f32 %v9659_v5, %v9563_v60 }
 0x48a   : > { %7466 = vpow2.f32 %v7065_v54  ;;  %v4068_v24 = vsel %vm4067_vm9, %v7461_v0, %v4064_v37  ;;  %v4076_v26 = vmul.f32 %v7465_v10, %v4045_v15  ;;  %vm4081_vm11 = vweird.f32 %v7465_v10  ;;  %v9789_v54 = vpop.f32.mrf.mxu2 }
 0x48b   : > { %7468 = vrcp.f32 %v9768_v19  ;;  %v4073_v38 = vsel %vm4070_vm10, %v4072_v55, %v4068_v24  ;;  %vm4082_vm13 = vmor %vm4080_vm12, %vm4081_vm11  ;;  %v3821_v15 = vadd.f32 %v9754_v48, %v3673_v53  ;;  %v3526_v55 = vadd.f32 %v9756_v32, %v3378_v14 }
 0x48c   : > { %4316 = vrot.lane.b32.xlu1 %v4073_v38, %s7785_s29  ;;  %v4077_v4 = vsub.f32 1.0, %v4076_v26  ;;  %v4101_v60 = vand.u32 2147483648, %v9768_v19  ;;  %v4099_v1 = vand.u32 2147483647, %v9768_v19  ;;  %v9800_v38 = vpop.f32.mrf.mxu3  ;;  %vm4095_vm0 = vweird.f32 %v9768_v19 }
 0x48d   : > { %v3928_v23 = vpop.f32.mrf.mxu1  ;;  %v3674_v48 = vadd.f32 %v9761_v27, %v3526_v55  ;;  %v3379_v27 = vadd.f32 %v9667_v58, %v9575_v52 }
 0x48e   : > { %v9778_v51 = vadd.f32 %v3928_v23, %v3820_v30  ;;  %v4078_v0 = vmul.f32 %v7465_v10, %v4077_v4  ;;  %v4102_v11 = vor.u32 1.1754944e-38, %v4101_v60  ;;  %vm4100_vm3 = vcmp.eq.f32.partialorder %v4099_v1, 8.507059e+37 }
 0x490   : > { %v7467_v29 = vpop.eup %7466  ;;  %v7066_v47 = vmul.f32 -1.442695, %v9778_v51  ;;  %v4079_v33 = vadd.f32 %v7465_v10, %v4078_v0 }
 0x491   : > { %v7469_v22 = vpop.eup %7468  ;;  %v9781_v50 = vadd.f32 1.0, %v7467_v29 }
 0x492   : > { %7470 = vpow2.f32 %v7066_v47  ;;  %v4083_v35 = vsel %vm4082_vm13, %v7465_v10, %v4079_v33  ;;  %v4091_v31 = vmul.f32 %v7469_v22, %v9768_v19  ;;  %v2624_v10 = vadd.f32 %v9170_v34, %v9490_v59  ;;  %v9822_v52 = vpop.f32.mrf.mxu2 }
 0x493   : > { %7472 = vrcp.f32 %v9781_v50  ;;  %v4088_v63 = vsel %vm4085_vm14, %v4087_v6, %v4083_v35  ;;  %vm4096_vm15 = vweird.f32 %v7469_v22  ;;  %v2627_v47 = vadd.f32 %v9205_v56, %v9490_v59  ;;  %v9819_v6 = vpop.f32.mrf.mxu0 }
 0x494   : > { %4318 = vrot.lane.b32.xlu2 %v4088_v63, %s7785_s29  ;;  %v4092_v37 = vsub.f32 1.0, %v4091_v31  ;;  %v2788_v32 = vadd.f32 %v9488_v36, %v2624_v10  ;;  %vm4097_vm2 = vmor %vm4095_vm0, %vm4096_vm15  ;;  %v3822_v36 = vadd.f32 %v9766_v28, %v3674_v48  ;;  %v4116_v58 = vand.u32 2147483648, %v9781_v50  ;;  %v9832_v10 = vpop.f32.mrf.mxu3 }
 0x495   : > { %v3931_v24 = vpop.f32.mrf.mxu1  ;;  %v4114_v28 = vand.u32 2147483647, %v9781_v50  ;;  %vm4110_vm5 = vweird.f32 %v9781_v50 }
 0x496   : > { %v9797_v5 = vadd.f32 %v3931_v24, %v3821_v15  ;;  %v4093_v26 = vmul.f32 %v7469_v22, %v4092_v37  ;;  %v2936_v29 = vadd.f32 %v9604_v61, %v2788_v32  ;;  %v2789_v15 = vadd.f32 %v9505_v18, %v2627_v47 }
 0x497   : > { %v4117_v24 = vor.u32 1.1754944e-38, %v4116_v58  ;;  %vm4115_vm7 = vcmp.eq.f32.partialorder %v4114_v28, 8.507059e+37 }
 0x498   : > { %v7471_v30 = vpop.eup %7470  ;;  %v7067_v4 = vmul.f32 -1.442695, %v9797_v5  ;;  %v4094_v12 = vadd.f32 %v7469_v22, %v4093_v26  ;;  %v3084_v33 = vadd.f32 %v9610_v13, %v2936_v29  ;;  %v2937_v26 = vadd.f32 %v9619_v9, %v2789_v15 }
 0x499   : > { %v7473_v34 = vpop.eup %7472  ;;  %v9806_v23 = vadd.f32 1.0, %v7471_v30  ;;  %v2630_v30 = vadd.f32 %v9239_v45, %v9490_v59 }
 0x49a   : > { %7474 = vpow2.f32 %v7067_v4  ;;  %v4098_v0 = vsel %vm4097_vm2, %v7469_v22, %v4094_v12  ;;  %v4106_v44 = vmul.f32 %v7473_v34, %v9781_v50  ;;  %v3527_v22 = vadd.f32 %v9770_v25, %v3379_v27 }
 0x49b   : > { %7476 = vrcp.f32 %v9806_v23  ;;  %v4103_v19 = vsel %vm4100_vm3, %v4102_v11, %v4098_v0  ;;  %vm4111_vm4 = vweird.f32 %v7473_v34  ;;  %v3232_v37 = vadd.f32 %v9615_v41, %v3084_v33  ;;  %v9850_v11 = vpop.f32.mrf.mxu0  ;;  %v9852_v0 = vpop.f32.mrf.mxu2 }
 0x49c   : > { %4320 = vrot.lane.b32.xlu0 %v4103_v19, %s7785_s29  ;;  %v4107_v53 = vsub.f32 1.0, %v4106_v44  ;;  %v3675_v56 = vadd.f32 %v9776_v42, %v3527_v22  ;;  %vm4112_vm6 = vmor %vm4110_vm5, %vm4111_vm4  ;;  %v3085_v48 = vadd.f32 %v9624_v62, %v2937_v26  ;;  %v4131_v9 = vand.u32 2147483648, %v9806_v23  ;;  %v3650_v22 = vpop.f32.mrf.mxu3 }
 0x49d   : > { %v3934_v61 = vpop.f32.mrf.mxu1  ;;  %v3380_v50 = vadd.f32 %v9675_v49, %v3232_v37  ;;  %v4129_v32 = vand.u32 2147483647, %v9806_v23  ;;  %vm4125_vm9 = vweird.f32 %v9806_v23  ;;  %v2790_v29 = vadd.f32 %v9520_v20, %v2630_v30  ;;  %v7078_v20 = vld [vmem:[%s11090_s5 + $0x10] sm:$0xff]  ;;  %v11293_v30 = vld [vmem:[#allocation50_spill] sm:$0xff] }
 0x49e   : > { %v9824_v35 = vadd.f32 %v3934_v61, %v3822_v36  ;;  %v4108_v31 = vmul.f32 %v7473_v34, %v4107_v53  ;;  %v3823_v41 = vadd.f32 %v9786_v21, %v3675_v56  ;;  %v3233_v27 = vadd.f32 %v9630_v3, %v3085_v48  ;;  %v7097_v3 = vld [vmem:[%s11089_s4 + $0x20] sm:$0xff]  ;;  %4447 = vmatpush.msra.mxu2 %v7078_v20 }
 0x49f   : > { %v3528_v4 = vadd.f32 %v9789_v54, %v3380_v50  ;;  %v4132_v36 = vor.u32 1.1754944e-38, %v4131_v9  ;;  %vm4130_vm11 = vcmp.eq.f32.partialorder %v4129_v32, 8.507059e+37  ;;  %4583 = vmatpush.msra.mxu3 %v7097_v3  ;;  %v11295_v32 = vld [vmem:[#allocation42_spill] sm:$0xff] }
 0x4a0   : > { %v7475_v14 = vpop.eup %7474  ;;  %v7068_v13 = vmul.f32 -1.442695, %v9824_v35  ;;  %v4109_v63 = vadd.f32 %v7473_v34, %v4108_v31  ;;  %v3381_v33 = vadd.f32 %v9685_v8, %v3233_v27  ;;  %v2633_v8 = vadd.f32 %v9270_v17, %v9490_v59 }
 0x4a1   : > { %v7477_v25 = vpop.eup %7476  ;;  %v9834_v55 = vadd.f32 1.0, %v7475_v14  ;;  %v3676_v45 = vadd.f32 %v9800_v38, %v3528_v4  ;;  %v2938_v38 = vadd.f32 %v9632_v16, %v2790_v29 }
 0x4a2   : > { %7478 = vpow2.f32 %v7068_v13  ;;  %v4113_v60 = vsel %vm4112_vm6, %v7473_v34, %v4109_v63  ;;  %v4121_v42 = vmul.f32 %v7477_v25, %v9806_v23  ;;  %vm4126_vm8 = vweird.f32 %v7477_v25 }
 0x4a3   : > { %7480 = vrcp.f32 %v9834_v55  ;;  %v4118_v18 = vsel %vm4115_vm7, %v4117_v24, %v4113_v60  ;;  %vm4127_vm10 = vmor %vm4125_vm9, %vm4126_vm8  ;;  %v3824_v61 = vadd.f32 %v9819_v6, %v3676_v45  ;;  %v3086_v58 = vadd.f32 %v9637_v46, %v2938_v38  ;;  %v7665_v6 = vld [vmem:[%s7907_s19] sm:$0xff]  ;;  %v11292_v24 = vld [vmem:[#allocation49_spill] sm:$0xff] }
 0x4a4   : > { %4322 = vrot.lane.b32.xlu1 %v4118_v18, %s7785_s29  ;;  %v4122_v1 = vsub.f32 1.0, %v4121_v42  ;;  %v3529_v31 = vadd.f32 %v9822_v52, %v3381_v33  ;;  %v4146_v14 = vand.u32 2147483648, %v9834_v55  ;;  %v4144_v63 = vand.u32 2147483647, %v9834_v55  ;;  %7099 = vmatmul.msk.f32.vlgmr.msra.gmra.mxu3 %vm314_vm1, %v7665_v6  ;;  %v3798_v42 = vpop.f32.mrf.mxu0  ;;  %v3505_v18 = vpop.f32.mrf.mxu2  ;;  %v11296_v45 = vld [vmem:[#allocation51_spill] sm:$0xff] }
 0x4a5   : > { %v3937_v12 = vpop.f32.mrf.mxu1  ;;  %vm4140_vm13 = vweird.f32 %v9834_v55  ;;  %v2791_v37 = vadd.f32 %v9535_v43, %v2633_v8  ;;  %v3234_v60 = vadd.f32 %v11292_v24, %v3086_v58  ;;  %v11298_v8 = vld [vmem:[#allocation52_spill] sm:$0xff] }
 0x4a6   : > { %v9847_v34 = vadd.f32 %v3937_v12, %v3823_v41  ;;  %v4123_v49 = vmul.f32 %v7477_v25, %v4122_v1  ;;  %v3677_v17 = vadd.f32 %v9832_v10, %v3529_v31  ;;  %v4147_v50 = vor.u32 1.1754944e-38, %v4146_v14  ;;  %v4650_v1 = vld [vmem:[#allocation3 + $0x120] sm:$0xff] }
 0x4a7   : > { %vm4145_vm15 = vcmp.eq.f32.partialorder %v4144_v63, 8.507059e+37  ;;  %v2939_v48 = vadd.f32 %v11293_v30, %v2791_v37  ;;  %4715 = vmatpush.msra.mxu0 %v4650_v1  ;;  %v4633_v12 = vld [vmem:[#allocation2 + $0x6] sm:$0xff]  ;;  %v11299_v63 = vld [vmem:[#allocation53_spill] sm:$0xff] }
 0x4a8   : > { %v7479_v21 = vpop.eup %7478  ;;  %v7069_v62 = vmul.f32 -1.442695, %v9847_v34  ;;  %v4124_v44 = vadd.f32 %v7477_v25, %v4123_v49  ;;  %v3825_v9 = vadd.f32 %v9850_v11, %v3677_v17  ;;  %7115 = vmatmul.msk.f32.vlgmr.msra.gmra.mxu0 %vm314_vm1, %v4633_v12  ;;  %v4781_v37 = vld [vmem:[#allocation2 + $0x8] sm:$0xff]  ;;  %v7667_v12 = vld [vmem:[%s7907_s19 + $0x10] sm:$0xff] }
 0x4a9   : > { %v7481_v54 = vpop.eup %7480  ;;  %v9859_v19 = vadd.f32 1.0, %v7479_v21  ;;  %v2636_v21 = vadd.f32 %v11295_v32, %v9490_v59 }
 0x4aa   : > { %7482 = vpow2.f32 %v7069_v62  ;;  %v4128_v53 = vsel %vm4127_vm10, %v7477_v25, %v4124_v44  ;;  %v4136_v47 = vmul.f32 %v7481_v54, %v9834_v55  ;;  %vm4141_vm12 = vweird.f32 %v7481_v54  ;;  %v11294_v55 = vld [vmem:[#allocation64_spill] sm:$0xff] }
 0x4ab   : > { %7484 = vrcp.f32 %v9859_v19  ;;  %v4133_v23 = vsel %vm4130_vm11, %v4132_v36, %v4128_v53  ;;  %vm4142_vm14 = vmor %vm4140_vm13, %vm4141_vm12  ;;  %v3382_v4 = vadd.f32 %v11294_v55, %v3234_v60  ;;  %v3087_v62 = vadd.f32 %v11296_v45, %v2939_v48 }
 0x4ac   : > { %4324 = vrot.lane.b32.xlu2 %v4133_v23, %s7785_s29  ;;  %v4137_v16 = vsub.f32 1.0, %v4136_v47  ;;  %v4161_v27 = vand.u32 2147483648, %v9859_v19  ;;  %v4159_v11 = vand.u32 2147483647, %v9859_v19  ;;  %v7666_v47 = vld [vmem:[%s7907_s19 + $0x8] sm:$0xff]  ;;  %vm4155_vm2 = vweird.f32 %v9859_v19  ;;  %v3801_v17 = vpop.f32.mrf.mxu0  ;;  %v3508_v24 = vpop.f32.mrf.mxu2 }
 0x4ad   : > { %v3940_v28 = vpop.f32.mrf.mxu1  ;;  %v3530_v44 = vadd.f32 %v9852_v0, %v3382_v4  ;;  %7100 = vmatmul.msk.f32.gmra.mxu3 %vm314_vm1, %v7666_v47  ;;  %v4799_v0 = vld [vmem:[#allocation3 + $0x138] sm:$0xff]  ;;  %v3235_v58 = vadd.f32 %v11298_v8, %v3087_v62 }
 0x4ae   : > { %v9878_v56 = vadd.f32 %v3940_v28, %v3824_v61  ;;  %v4138_v13 = vmul.f32 %v7481_v54, %v4137_v16  ;;  %v11297_v61 = vld [vmem:[#allocation45_spill] sm:$0xff]  ;;  %v4162_v28 = vor.u32 1.1754944e-38, %v4161_v27  ;;  %4862 = vmatpush.msra.mxu1 %v4799_v0  ;;  %vm4160_vm4 = vcmp.eq.f32.partialorder %v4159_v11, 8.507059e+37  ;;  %v11303_v62 = vld [vmem:[#allocation46_spill] sm:$0xff]  ;;  %v4635_v0 = vld [vmem:[#allocation2 + $0x26] sm:$0xff] }
 0x4af   : > { %v3678_v33 = vadd.f32 %v3650_v22, %v3530_v44  ;;  %v2792_v16 = vadd.f32 %v11297_v61, %v2636_v21  ;;  %v4782_v61 = vld [vmem:[#allocation2 + $0x10] sm:$0xff] }
 0x4b0   : > { %v7483_v25 = vpop.eup %7482  ;;  %v7070_v46 = vmul.f32 -1.442695, %v9878_v56  ;;  %v4139_v15 = vadd.f32 %v7481_v54, %v4138_v13  ;;  %v4798_v13 = vld [vmem:[#allocation3 + $0x130] sm:$0xff] }
 0x4b1   : > { %v7485_v52 = vpop.eup %7484  ;;  %v9888_v26 = vadd.f32 1.0, %v7483_v25  ;;  %v2940_v6 = vadd.f32 %v11299_v63, %v2792_v16  ;;  %4863 = vmatpush.msra.mxu1 %v4798_v13 }
 0x4b2   : > { %7486 = vpow2.f32 %v7070_v46  ;;  %v4143_v41 = vsel %vm4142_vm14, %v7481_v54, %v4139_v15  ;;  %v4151_v10 = vmul.f32 %v7485_v52, %v9859_v19  ;;  %v3653_v54 = vpop.f32.mrf.mxu3  ;;  %vm4156_vm0 = vweird.f32 %v7485_v52  ;;  %v11300_v19 = vld [vmem:[#allocation66_spill] sm:$0xff]  ;;  %v4634_v15 = vld [vmem:[#allocation2 + $0xe] sm:$0xff]  ;;  %7131 = vmatmul.msk.f32.vlgmr.msra.gmra.mxu1 %vm314_vm1, %v4781_v37 }
 0x4b3   : > { %7488 = vrcp.f32 %v9888_v26  ;;  %v4148_v43 = vsel %vm4145_vm15, %v4147_v50, %v4143_v41  ;;  %vm4157_vm3 = vmor %vm4155_vm2, %vm4156_vm0  ;;  %v3383_v25 = vadd.f32 %v11300_v19, %v3235_v58  ;;  %7116 = vmatmul.msk.f32.gmra.mxu0 %vm314_vm1, %v4634_v15  ;;  %v11301_v50 = vld [vmem:[#allocation13_spill] sm:$0xff]  ;;  %v4176_v55 = vand.u32 2147483648, %v9888_v26  ;;  %v7668_v15 = vld [vmem:[%s7907_s19 + $0x18] sm:$0xff] }
 0x4b4   : > { %4326 = vrot.lane.b32.xlu0 %v4148_v43, %s7785_s29  ;;  %v4152_v49 = vsub.f32 1.0, %v4151_v10  ;;  %v2639_v41 = vadd.f32 %v11301_v50, %v9490_v59  ;;  %v11302_v10 = vld [vmem:[#allocation54_spill] sm:$0xff]  ;;  %vm4170_vm6 = vweird.f32 %v9888_v26  ;;  %v3804_v13 = vpop.f32.mrf.mxu0  ;;  %v3511_v19 = vpop.f32.mrf.mxu2 }
 0x4b5   : > { %v3943_v29 = vpop.f32.mrf.mxu1  ;;  %v3088_v1 = vadd.f32 %v11302_v10, %v2940_v6  ;;  %v3531_v30 = vadd.f32 %v3505_v18, %v3383_v25  ;;  %7101 = vmatmul.msk.f32.gmra.mxu3 %vm314_vm1, %v7667_v12  ;;  %v4177_v11 = vor.u32 1.1754944e-38, %v4176_v55 }
 0x4b6   : > { %v9902_v36 = vadd.f32 %v3943_v29, %v3825_v9  ;;  %v4153_v53 = vmul.f32 %v7485_v52, %v4152_v49  ;;  %v2793_v44 = vadd.f32 %v11303_v62, %v2639_v41  ;;  %v11304_v29 = vld [vmem:[#allocation55_spill] sm:$0xff]  ;;  %v4783_v62 = vld [vmem:[#allocation2 + $0x28] sm:$0xff] }
 0x4b7   : > { %v3679_v32 = vadd.f32 %v3653_v54, %v3531_v30  ;;  %v3236_v27 = vadd.f32 %v11304_v29, %v3088_v1  ;;  %v11305_v54 = vld [vmem:[#allocation56_spill] sm:$0xff]  ;;  %v11309_v41 = vld [vmem:[#allocation47_spill] sm:$0xff]  ;;  %v11310_v1 = vld [vmem:[#allocation58_spill] sm:$0xff] }
 0x4b8   : > { %v7487_v38 = vpop.eup %7486  ;;  %v7071_v23 = vmul.f32 -1.442695, %v9902_v36  ;;  %v4154_v20 = vadd.f32 %v7485_v52, %v4153_v53 }
 0x4b9   : > { %v7489_v3 = vpop.eup %7488  ;;  %v9911_v31 = vadd.f32 1.0, %v7487_v38  ;;  %v3827_v16 = vadd.f32 %v3801_v17, %v3679_v32  ;;  %v11312_v32 = vld [vmem:[#allocation68_spill] sm:$0xff] }
 0x4ba   : > { %7490 = vpow2.f32 %v7071_v23  ;;  %v4158_v14 = vsel %vm4157_vm3, %v7485_v52, %v4154_v20  ;;  %v4166_v22 = vmul.f32 %v7489_v3, %v9888_v26  ;;  %v3826_v52 = vadd.f32 %v3798_v42, %v3678_v33  ;;  %v3656_v9 = vpop.f32.mrf.mxu3  ;;  %v11306_v23 = vld [vmem:[#allocation67_spill] sm:$0xff]  ;;  %7132 = vmatmul.msk.f32.gmra.mxu1 %vm314_vm1, %v4782_v61 }
 0x4bb   : > { %7492 = vrcp.f32 %v9911_v31  ;;  %v4163_v46 = vsel %vm4160_vm4, %v4162_v28, %v4158_v14  ;;  %vm4171_vm5 = vweird.f32 %v7489_v3  ;;  %v4174_v42 = vand.u32 2147483647, %v9888_v26  ;;  %7117 = vmatmul.msk.f32.gmra.mxu0 %vm314_vm1, %v4635_v0  ;;  %v11308_v28 = vld [vmem:[#allocation57_spill] sm:$0xff]  ;;  %v7669_v0 = vld [vmem:[%s7907_s19 + $0x20] sm:$0xff] }
 0x4bc   : > { %4328 = vrot.lane.b32.xlu1 %v4163_v46, %s7785_s29  ;;  %v4167_v60 = vsub.f32 1.0, %v4166_v22  ;;  %vm4172_vm7 = vmor %vm4170_vm6, %vm4171_vm5  ;;  %v2941_v33 = vadd.f32 %v11305_v54, %v2793_v44  ;;  %v3384_v20 = vadd.f32 %v11306_v23, %v3236_v27  ;;  %v4191_v6 = vand.u32 2147483648, %v9911_v31  ;;  %v3807_v61 = vpop.f32.mrf.mxu0 }
 0x4bd   : > { %v3946_v48 = vpop.f32.mrf.mxu1  ;;  %vm4175_vm8 = vcmp.eq.f32.partialorder %v4174_v42, 8.507059e+37  ;;  %v4189_v17 = vand.u32 2147483647, %v9911_v31  ;;  %7102 = vmatmul.msk.f32.gmra.mxu3 %vm314_vm1, %v7668_v15  ;;  %vm4185_vm10 = vweird.f32 %v9911_v31  ;;  %v11317_v15 = vld [vmem:[#allocation62_spill] sm:$0xff] }
 0x4be   : > { %v9924_v4 = vadd.f32 %v3946_v48, %v3826_v52  ;;  %v4168_v43 = vmul.f32 %v7489_v3, %v4167_v60  ;;  %v3089_v14 = vadd.f32 %v11308_v28, %v2941_v33  ;;  %v3532_v22 = vadd.f32 %v3508_v24, %v3384_v20 }
 0x4bf   : > { %vm4190_vm12 = vcmp.eq.f32.partialorder %v4189_v17, 8.507059e+37 }
 0x4c0   : > { %v7491_v49 = vpop.eup %7490  ;;  %v7072_v21 = vmul.f32 -1.442695, %v9924_v4  ;;  %v4169_v18 = vadd.f32 %v7489_v3, %v4168_v43  ;;  %v3680_v52 = vadd.f32 %v3656_v9, %v3532_v22  ;;  %v3237_v30 = vadd.f32 %v11310_v1, %v3089_v14  ;;  %v11311_v9 = vld [vmem:[#allocation59_spill] sm:$0xff]  ;;  %v11315_v14 = vld [vmem:[#allocation48_spill] sm:$0xff] }
 0x4c1   : > { %v7493_v45 = vpop.eup %7492  ;;  %v9933_v53 = vadd.f32 1.0, %v7491_v49  ;;  %v4192_v43 = vor.u32 1.1754944e-38, %v4191_v6 }
 0x4c2   : > { %7494 = vpow2.f32 %v7072_v21  ;;  %v4173_v47 = vsel %vm4172_vm7, %v7489_v3, %v4169_v18  ;;  %v4181_v38 = vmul.f32 %v7493_v45, %v9911_v31  ;;  %v11307_v3 = vld [vmem:[#allocation19_spill] sm:$0xff]  ;;  %vm4186_vm9 = vweird.f32 %v7493_v45  ;;  %v3659_v48 = vpop.f32.mrf.mxu3  ;;  %v4636_v18 = vld [vmem:[#allocation2 + $0x2e] sm:$0xff]  ;;  %7133 = vmatmul.msk.f32.gmra.mxu1 %vm314_vm1, %v4783_v62 }
 0x4c3   : > { %7496 = vrcp.f32 %v9933_v53  ;;  %v4178_v26 = vsel %vm4175_vm8, %v4177_v11, %v4173_v47  ;;  %v2642_v58 = vadd.f32 %v11307_v3, %v9490_v59  ;;  %vm4187_vm11 = vmor %vm4185_vm10, %vm4186_vm9  ;;  %v3385_v21 = vadd.f32 %v11312_v32, %v3237_v30  ;;  %7118 = vmatmul.msk.f32.gmra.mxu0 %vm314_vm1, %v4636_v18  ;;  %v11314_v11 = vld [vmem:[#allocation60_spill] sm:$0xff] }
 0x4c4   : > { %4330 = vrot.lane.b32.xlu2 %v4178_v26, %s7785_s29  ;;  %v4182_v8 = vsub.f32 1.0, %v4181_v38  ;;  %v3828_v44 = vadd.f32 %v3804_v13, %v3680_v52  ;;  %v4206_v33 = vand.u32 2147483648, %v9933_v53  ;;  %v4204_v26 = vand.u32 2147483647, %v9933_v53  ;;  %v11316_v13 = vld [vmem:[#allocation61_spill] sm:$0xff] }
 0x4c5   : > { %v3949_v63 = vpop.f32.mrf.mxu1  ;;  %v2794_v10 = vadd.f32 %v11309_v41, %v2642_v58  ;;  %v3533_v38 = vadd.f32 %v3511_v19, %v3385_v21  ;;  %7103 = vmatmul.msk.f32.gmra.mxu3 %vm314_vm1, %v7669_v0  ;;  %vm4200_vm14 = vweird.f32 %v9933_v53  ;;  %v11318_v52 = vld [vmem:[#allocation69_spill] sm:$0xff]  ;;  %v4637_v41 = vld [vmem:[#allocation2 + $0x46] sm:$0xff] }
 0x4c6   : > { %v9946_v25 = vadd.f32 %v3949_v63, %v3827_v16  ;;  %v4183_v46 = vmul.f32 %v7493_v45, %v4182_v8  ;;  %v4207_v19 = vor.u32 1.1754944e-38, %v4206_v33  ;;  %vm4205_vm0 = vcmp.eq.f32.partialorder %v4204_v26, 8.507059e+37  ;;  %v7670_v21 = vld [vmem:[%s7907_s19 + $0x28] sm:$0xff] }
 0x4c7   : > { %v2942_v49 = vadd.f32 %v11311_v9, %v2794_v10  ;;  %v3681_v8 = vadd.f32 %v3659_v48, %v3533_v38  ;;  %v4784_v10 = vld [vmem:[#allocation2 + $0x30] sm:$0xff]  ;;  %v4785_v0 = vld [vmem:[#allocation2 + $0x48] sm:$0xff] }
 0x4c8   : > { %v7495_v37 = vpop.eup %7494  ;;  %v7073_v24 = vmul.f32 -1.442695, %v9946_v25  ;;  %v4184_v60 = vadd.f32 %v7493_v45, %v4183_v46 }
 0x4c9   : > { %v7497_v50 = vpop.eup %7496  ;;  %v9955_v55 = vadd.f32 1.0, %v7495_v37  ;;  %v3090_v47 = vadd.f32 %v11314_v11, %v2942_v49  ;;  %v3829_v1 = vadd.f32 %v3807_v61, %v3681_v8  ;;  %v3810_v11 = vpop.f32.mrf.mxu0 }
 0x4ca   : > { %7498 = vpow2.f32 %v7073_v24  ;;  %v4188_v42 = vsel %vm4187_vm11, %v7493_v45, %v4184_v60  ;;  %v4196_v12 = vmul.f32 %v7497_v50, %v9933_v53  ;;  %v11313_v45 = vld [vmem:[#allocation14_spill] sm:$0xff]  ;;  %vm4201_vm13 = vweird.f32 %v7497_v50  ;;  %v3662_v53 = vpop.f32.mrf.mxu3  ;;  %7134 = vmatmul.msk.f32.gmra.mxu1 %vm314_vm1, %v4784_v10  ;;  %v4786_v10 = vld [vmem:[#allocation2 + $0x50] sm:$0xff] }
 0x4cb   : > { %7500 = vrcp.f32 %v9955_v55  ;;  %v4193_v31 = vsel %vm4190_vm12, %v4192_v43, %v4188_v42  ;;  %v2645_v27 = vadd.f32 %v11313_v45, %v9490_v59  ;;  %v3514_v59 = vpop.f32.mrf.mxu2  ;;  %v3238_v63 = vadd.f32 %v11316_v13, %v3090_v47  ;;  %vm4202_vm15 = vmor %vm4200_vm14, %vm4201_vm13  ;;  %7119 = vmatmul.msk.f32.gmra.mxu0 %vm314_vm1, %v4637_v41  ;;  %v11320_v45 = vld [vmem:[#allocation65_spill] sm:$0xff] }
 0x4cc   : > { %4332 = vrot.lane.b32.xlu0 %v4193_v31, %s7785_s29  ;;  %v4197_v29 = vsub.f32 1.0, %v4196_v12  ;;  %v4221_v12 = vand.u32 2147483648, %v9955_v55  ;;  %v4219_v32 = vand.u32 2147483647, %v9955_v55  ;;  %vm4215_vm3 = vweird.f32 %v9955_v55  ;;  %v7671_v13 = vld [vmem:[%s7907_s19 + $0x30] sm:$0xff] }
 0x4cd   : > { %v3952_v54 = vpop.f32.mrf.mxu1  ;;  %v2795_v22 = vadd.f32 %v11315_v14, %v2645_v27  ;;  %v3386_v24 = vadd.f32 %v11318_v52, %v3238_v63  ;;  %7104 = vmatmul.msk.f32.gmra.mxu3 %vm314_vm1, %v7670_v21  ;;  %v7672_v21 = vld [vmem:[%s7907_s19 + $0x38] sm:$0xff] }
 0x4ce   : > { %v9968_v23 = vadd.f32 %v3952_v54, %v3828_v44  ;;  %v4198_v20 = vmul.f32 %v7497_v50, %v4197_v29  ;;  %v4222_v38 = vor.u32 1.1754944e-38, %v4221_v12  ;;  %v4638_v54 = vld [vmem:[#allocation2 + $0x4e] sm:$0xff]  ;;  %vm4220_vm5 = vcmp.eq.f32.partialorder %v4219_v32, 8.507059e+37 }
 0x4cf   : > { %v2943_v37 = vadd.f32 %v11317_v15, %v2795_v22  ;;  %v3534_v43 = vadd.f32 %v3514_v59, %v3386_v24  ;;  %v4947_v24 = vld [vmem:[#allocation3 + $0x148] sm:$0xff] }
 0x4d0   : > { %v7499_v16 = vpop.eup %7498  ;;  %v7074_v3 = vmul.f32 -1.442695, %v9968_v23  ;;  %v4199_v58 = vadd.f32 %v7497_v50, %v4198_v20  ;;  %5010 = vmatpush.msrb.mxu2 %v4947_v24 }
 0x4d1   : > { %v7501_v28 = vpop.eup %7500  ;;  %v9977_v6 = vadd.f32 1.0, %v7499_v16  ;;  %v3682_v18 = vadd.f32 %v3662_v53, %v3534_v43  ;;  %v4639_v53 = vld [vmem:[#allocation2 + $0x66] sm:$0xff] }
 0x4d2   : > { %7502 = vpow2.f32 %v7074_v3  ;;  %v4203_v46 = vsel %vm4202_vm15, %v7497_v50, %v4199_v58  ;;  %v4211_v17 = vmul.f32 %v7501_v28, %v9955_v55  ;;  %v11319_v50 = vld [vmem:[#allocation63_spill] sm:$0xff]  ;;  %vm4216_vm2 = vweird.f32 %v7501_v28  ;;  %v3665_v3 = vpop.f32.mrf.mxu3  ;;  %7135 = vmatmul.msk.f32.gmra.mxu1 %vm314_vm1, %v4785_v0 }
 0x4d3   : > { %7504 = vrcp.f32 %v9977_v6  ;;  %v4208_v60 = vsel %vm4205_vm0, %v4207_v19, %v4203_v46  ;;  %v3091_v48 = vadd.f32 %v11319_v50, %v2943_v37  ;;  %vm4217_vm4 = vmor %vm4215_vm3, %vm4216_vm2  ;;  %v3517_v33 = vpop.f32.mrf.mxu2  ;;  %v3830_v16 = vadd.f32 %v3810_v11, %v3682_v18  ;;  %7120 = vmatmul.msk.f32.gmra.mxu0 %vm314_vm1, %v4638_v54  ;;  %v5243_v11 = vld [vmem:[#allocation3 + $0x168] sm:$0xff] }
 0x4d4   : > { %4334 = vrot.lane.b32.xlu1 %v4208_v60, %s7785_s29  ;;  %v4212_v30 = vsub.f32 1.0, %v4211_v17  ;;  %v4234_v22 = vand.u32 2147483647, %v9977_v6  ;;  %vm4230_vm7 = vweird.f32 %v9977_v6  ;;  %5306 = vmatpush.msrb.mxu0 %v5243_v11 }
 0x4d5   : > { %v3955_v42 = vpop.f32.mrf.mxu1  ;;  %v3239_v27 = vadd.f32 %v11320_v45, %v3091_v48  ;;  %7105 = vmatmul.msk.f32.gmra.mxu3 %vm314_vm1, %v7671_v13  ;;  %v4788_v13 = vld [vmem:[#allocation2 + $0x70] sm:$0xff] }
 0x4d6   : > { %v9989_v9 = vadd.f32 %v3955_v42, %v3829_v1  ;;  %v4213_v49 = vmul.f32 %v7501_v28, %v4212_v30  ;;  %vm4235_vm9 = vcmp.eq.f32.partialorder %v4234_v22, 8.507059e+37  ;;  %v5095_v1 = vld [vmem:[#allocation3 + $0x158] sm:$0xff]  ;;  %v3813_v30 = vpop.f32.mrf.mxu0 }
 0x4d7   : > { %v3387_v61 = vadd.f32 %v9727_v7, %v3239_v27  ;;  %5158 = vmatpush.msrb.mxu3 %v5095_v1  ;;  %v4640_v27 = vld [vmem:[#allocation2 + $0x6e] sm:$0xff] }
 0x4d8   : > { %v7503_v31 = vpop.eup %7502  ;;  %v7075_v62 = vmul.f32 -1.442695, %v9989_v9  ;;  %v4214_v44 = vadd.f32 %v7501_v28, %v4213_v49  ;;  %v10048_v1 = vld [vmem:[#allocation2 + $0x88] sm:$0xff] }
 0x4d9   : > { %v7505_v29 = vpop.eup %7504  ;;  %v9997_v47 = vadd.f32 1.0, %v7503_v31  ;;  %v3535_v8 = vadd.f32 %v3517_v33, %v3387_v61  ;;  %v4787_v33 = vld [vmem:[#allocation2 + $0x68] sm:$0xff] }
 0x4da   : > { %7506 = vpow2.f32 %v7075_v62  ;;  %v4218_v20 = vsel %vm4217_vm4, %v7501_v28, %v4214_v44  ;;  %v4226_v26 = vmul.f32 %v7505_v29, %v9977_v6  ;;  %v4236_v28 = vand.u32 2147483648, %v9977_v6  ;;  %7136 = vmatmul.msk.f32.gmra.mxu1 %vm314_vm1, %v4786_v10 }
 0x4db   : > { %7508 = vrcp.f32 %v9997_v47  ;;  %v4223_v55 = vsel %vm4220_vm5, %v4222_v38, %v4218_v20  ;;  %vm4231_vm6 = vweird.f32 %v7505_v29  ;;  %v3683_v19 = vadd.f32 %v3665_v3, %v3535_v8  ;;  %7121 = vmatmul.msk.f32.gmra.mxu0 %vm314_vm1, %v4639_v53 }
 0x4dc   : > { %4336 = vrot.lane.b32.xlu2 %v4223_v55, %s7785_s29  ;;  %v4227_v59 = vsub.f32 1.0, %v4226_v26  ;;  %vm4232_vm8 = vmor %vm4230_vm7, %vm4231_vm6  ;;  %v4237_v52 = vor.u32 1.1754944e-38, %v4236_v28  ;;  %v4251_v42 = vand.u32 2147483648, %v9997_v47  ;;  %v4249_v32 = vand.u32 2147483647, %v9997_v47  ;;  %v7673_v55 = vld [vmem:[%s7907_s19 + $0x40] sm:$0xff] }
 0x4dd   : > { %v3958_v58 = vpop.f32.mrf.mxu1  ;;  %v3831_v50 = vadd.f32 %v3813_v30, %v3683_v19  ;;  %7106 = vmatmul.msk.f32.gmra.mxu3 %vm314_vm1, %v7672_v21  ;;  %vm4245_vm11 = vweird.f32 %v9997_v47  ;;  %v10037_v28 = vld [vmem:[#allocation2 + $0x86] sm:$0xff] }
 0x4de   : > { %v10006_v14 = vadd.f32 %v3958_v58, %v3830_v16  ;;  %v4228_v7 = vmul.f32 %v7505_v29, %v4227_v59  ;;  %v4252_v45 = vor.u32 1.1754944e-38, %v4251_v42  ;;  %vm4250_vm13 = vcmp.eq.f32.partialorder %v4249_v32, 8.507059e+37 }
 0x4e0   : > { %v7507_v63 = vpop.eup %7506  ;;  %v7076_v46 = vmul.f32 -1.442695, %v10006_v14  ;;  %v4229_v17 = vadd.f32 %v7505_v29, %v4228_v7 }
 0x4e1   : > { %v7509_v15 = vpop.eup %7508  ;;  %v10013_v37 = vadd.f32 1.0, %v7507_v63 }
 0x4e2   : > { %7510 = vpow2.f32 %v7076_v46  ;;  %v4233_v60 = vsel %vm4232_vm8, %v7505_v29, %v4229_v17  ;;  %v4241_v41 = vmul.f32 %v7509_v15, %v9997_v47  ;;  %vm4246_vm10 = vweird.f32 %v7509_v15  ;;  %7137 = vmatmul.msk.f32.gmra.mxu1 %vm314_vm1, %v4787_v33 }
 0x4e3   : > { %7512 = vrcp.f32 %v10013_v37  ;;  %v4238_v6 = vsel %vm4235_vm9, %v4237_v52, %v4233_v60  ;;  %vm4247_vm12 = vmor %vm4245_vm11, %vm4246_vm10  ;;  %7122 = vmatmul.msk.f32.gmra.mxu0 %vm314_vm1, %v4640_v27  ;;  %v4266_v47 = vand.u32 2147483648, %v10013_v37  ;;  %v4264_v61 = vand.u32 2147483647, %v10013_v37  ;;  %v10046_v60 = vld [vmem:[#allocation2 + $0x8e] sm:$0xff]  ;;  %v7676_v27 = vld [vmem:[%s7907_s19 + $0x58] sm:$0xff] }
 0x4e4   : > { %4338 = vrot.lane.b32.xlu0 %v4238_v6, %s7785_s29  ;;  %v4242_v48 = vsub.f32 1.0, %v4241_v41  ;;  %vm4260_vm15 = vweird.f32 %v10013_v37 }
 0x4e5   : > { %v3961_v43 = vpop.f32.mrf.mxu1  ;;  %7107 = vmatmul.msk.f32.gmra.mxu3 %vm314_vm1, %v7673_v55  ;;  %v4267_v58 = vor.u32 1.1754944e-38, %v4266_v47  ;;  %vm4265_vm2 = vcmp.eq.f32.partialorder %v4264_v61, 8.507059e+37 }
 0x4e6   : > { %v10021_v12 = vadd.f32 %v3961_v43, %v3831_v50  ;;  %v4243_v49 = vmul.f32 %v7509_v15, %v4242_v48 }
 0x4e8   : > { %v7511_v31 = vpop.eup %7510  ;;  %v7077_v18 = vmul.f32 -1.442695, %v10021_v12  ;;  %v4244_v62 = vadd.f32 %v7509_v15, %v4243_v49  ;;  %v7675_v49 = vld [vmem:[%s7907_s19 + $0x50] sm:$0xff] }
 0x4e9   : > { %v7513_v44 = vpop.eup %7512  ;;  %v4058_v29 = vadd.f32 1.0, %v7511_v31 }
 0x4ea   : > { %7514 = vpow2.f32 %v7077_v18  ;;  %v4248_v38 = vsel %vm4247_vm12, %v7509_v15, %v4244_v62  ;;  %v4256_v54 = vmul.f32 %v7513_v44, %v10013_v37  ;;  %vm4261_vm14 = vweird.f32 %v7513_v44  ;;  %7138 = vmatmul.msk.f32.gmra.mxu1 %vm314_vm1, %v4788_v13  ;;  %v7674_v37 = vld [vmem:[%s7907_s19 + $0x48] sm:$0xff] }
 0x4eb   : > { %7516 = vrcp.f32 %v4058_v29  ;;  %v4253_v20 = vsel %vm4250_vm13, %v4252_v45, %v4248_v38  ;;  %vm4262_vm0 = vmor %vm4260_vm15, %vm4261_vm14  ;;  %7123 = vmatmul.msk.f32.gmra.mxu0 %vm314_vm1, %v10037_v28  ;;  %v4281_v46 = vand.u32 2147483648, %v4058_v29  ;;  %v4279_v15 = vand.u32 2147483647, %v4058_v29  ;;  %v10059_v18 = vld [vmem:[#allocation2 + $0xa6] sm:$0xff]  ;;  %v10072_v38 = vld [vmem:[#allocation2 + $0xae] sm:$0xff] }
 0x4ec   : > { %4340 = vrot.lane.b32.xlu1 %v4253_v20, %s7785_s29  ;;  %v4257_v26 = vsub.f32 1.0, %v4256_v54  ;;  %vm4275_vm4 = vweird.f32 %v4058_v29  ;;  %v10074_v54 = vld [vmem:[#allocation2 + $0xa8] sm:$0xff] }
 0x4ed   : > { %7108 = vmatmul.msk.f32.gmra.mxu3 %vm314_vm1, %v7674_v37  ;;  %v4282_v53 = vor.u32 1.1754944e-38, %v4281_v46  ;;  %vm4280_vm6 = vcmp.eq.f32.partialorder %v4279_v15, 8.507059e+37  ;;  %v10108_v13 = vld [vmem:[#allocation2 + $0xe6] sm:$0xff]  ;;  %v7680_v15 = vld [vmem:[%s7907_s19 + $0x78] sm:$0xff]  ;;  %v10120_v37 = vld [vmem:[#allocation2 + $0xee] sm:$0xff] }
 0x4ee   : > { %v4258_v0 = vmul.f32 %v7513_v44, %v4257_v26  ;;  %v4319_v45 = vpop.permute.xlu2 %4318  ;;  %v7677_v26 = vld [vmem:[%s7907_s19 + $0x60] sm:$0xff] }
 0x4f0   : > { %v7515_v16 = vpop.eup %7514  ;;  %v4259_v59 = vadd.f32 %v7513_v44, %v4258_v0  ;;  %v10086_v0 = vld [vmem:[#allocation2 + $0xb0] sm:$0xff] }
 0x4f1   : > { %v7517_v8 = vpop.eup %7516  ;;  %v4059_v3 = vadd.f32 1.0, %v7515_v16  ;;  %v7678_v16 = vld [vmem:[%s7907_s19 + $0x68] sm:$0xff] }
 0x4f2   : > { %v4263_v7 = vsel %vm4262_vm0, %v7513_v44, %v4259_v59  ;;  %v4271_v22 = vmul.f32 %v7517_v8, %v4058_v29  ;;  %vm4276_vm3 = vweird.f32 %v7517_v8  ;;  %7139 = vmatmul.msk.f32.gmra.mxu1 %vm314_vm1, %v10048_v1  ;;  %v10061_v44 = vld [vmem:[#allocation2 + $0x90] sm:$0xff] }
 0x4f3   : > { %7518 = vrcp.f32 %v4059_v3  ;;  %v4268_v63 = vsel %vm4265_vm2, %v4267_v58, %v4263_v7  ;;  %vm4277_vm5 = vmor %vm4275_vm4, %vm4276_vm3  ;;  %7124 = vmatmul.msk.f32.gmra.mxu0 %vm314_vm1, %v10046_v60  ;;  %v4294_v42 = vand.u32 2147483647, %v4059_v3  ;;  %vm4290_vm8 = vweird.f32 %v4059_v3  ;;  %v7679_v7 = vld [vmem:[%s7907_s19 + $0x70] sm:$0xff] }
 0x4f4   : > { %4342 = vrot.lane.b32.xlu2 %v4268_v63, %s7785_s29  ;;  %v4272_v19 = vsub.f32 1.0, %v4271_v22  ;;  %7520 = vtanh.f32 %v9742_v39  ;;  %v4296_v39 = vand.u32 2147483648, %v4059_v3  ;;  %v10110_v63 = vld [vmem:[#allocation2 + $0xd0] sm:$0xff] }
 0x4f5   : > { %7109 = vmatmul.msk.f32.gmra.mxu3 %vm314_vm1, %v7675_v49  ;;  %7522 = vtanh.f32 %v9747_v40  ;;  %vm4295_vm10 = vcmp.eq.f32.partialorder %v4294_v42, 8.507059e+37 }
 0x4f6   : > { %v4273_v17 = vmul.f32 %v7517_v8, %v4272_v19  ;;  %v4297_v31 = vor.u32 1.1754944e-38, %v4296_v39  ;;  %7524 = vtanh.f32 %v9752_v2  ;;  %v10084_v2 = vld [vmem:[#allocation2 + $0xc6] sm:$0xff]  ;;  %v5094_v19 = vld [vmem:[#allocation3 + $0x150] sm:$0xff] }
 0x4f7   : > { %7526 = vtanh.f32 %v9763_v57  ;;  %v10096_v57 = vld [vmem:[#allocation2 + $0xce] sm:$0xff]  ;;  %5159 = vmatpush.msrb.mxu3 %v5094_v19 }
 0x4f8   : > { %v4274_v52 = vadd.f32 %v7517_v8, %v4273_v17  ;;  %7528 = vtanh.f32 %v9778_v51  ;;  %v4946_v51 = vld [vmem:[#allocation3 + $0x140] sm:$0xff] }
 0x4f9   : > { %v7519_v24 = vpop.eup %7518  ;;  %7530 = vtanh.f32 %v9797_v5  ;;  %5011 = vmatpush.msrb.mxu2 %v4946_v51 }
 0x4fa   : > { %v4278_v41 = vsel %vm4277_vm5, %v7517_v8, %v4274_v52  ;;  %v4286_v10 = vmul.f32 %v7519_v24, %v4059_v3  ;;  %v7521_v50 = vpop.eup %7520  ;;  %vm4291_vm7 = vweird.f32 %v7519_v24  ;;  %7140 = vmatmul.msk.f32.gmra.mxu1 %vm314_vm1, %v10061_v44  ;;  %v10098_v8 = vld [vmem:[#allocation2 + $0xc8] sm:$0xff]  ;;  %7532 = vtanh.f32 %v9824_v35  ;;  %v5242_v52 = vld [vmem:[#allocation3 + $0x160] sm:$0xff] }
 0x4fb   : > { %v4283_v30 = vsel %vm4280_vm6, %v4282_v53, %v4278_v41  ;;  %vm4292_vm9 = vmor %vm4290_vm8, %vm4291_vm7  ;;  %7125 = vmatmul.msk.f32.gmra.mxu0 %vm314_vm1, %v10059_v18  ;;  %v7523_v40 = vpop.eup %7522  ;;  %7534 = vtanh.f32 %v9847_v34 }
 0x4fc   : > { %4344 = vrot.lane.b32.xlu0 %v4283_v30, %s7785_s29  ;;  %v4287_v6 = vsub.f32 1.0, %v4286_v10  ;;  %v4365_v11 = vmul.f32 %v7523_v40, %v4319_v45  ;;  %v7525_v33 = vpop.eup %7524  ;;  %5307 = vmatpush.msrb.mxu0 %v5242_v52  ;;  %7536 = vtanh.f32 %v9878_v56  ;;  %v10178_v45 = vld [vmem:[#allocation2 + $0xaa] sm:$0xff] }
 0x4fd   : > { %7110 = vmatmul.msk.f32.gmra.mxu3 %vm314_vm1, %v7676_v27  ;;  %v7527_v61 = vpop.eup %7526  ;;  %7538 = vtanh.f32 %v9902_v36 }
 0x4fe   : > { %v4317_v48 = vpop.permute.xlu1 %4316  ;;  %v4288_v43 = vmul.f32 %v7519_v24, %v4287_v6  ;;  %v7529_v58 = vpop.eup %7528  ;;  %v10136_v6 = vld [vmem:[#allocation2 + $0xf0] sm:$0xff]  ;;  %7540 = vtanh.f32 %v9924_v4 }
 0x4ff   : > { %v4364_v32 = vmul.f32 %v7521_v50, %v4317_v48  ;;  %v7531_v46 = vpop.eup %7530  ;;  %7542 = vtanh.f32 %v9946_v25 }
 0x500   : > { %v4289_v21 = vadd.f32 %v7519_v24, %v4288_v43  ;;  %v7533_v53 = vpop.eup %7532  ;;  %v5390_v43 = vld [vmem:[#allocation3 + $0x170] sm:$0xff]  ;;  %7544 = vtanh.f32 %v9968_v23 }
 0x501   : > { %7080 = vmatmul.msk.f32.vlgmr.msra.gmra.mxu2 %vm314_vm1, %v4364_v32  ;;  %v7535_v50 = vpop.eup %7534  ;;  %7546 = vtanh.f32 %v9989_v9 }
 0x502   : > { %v4293_v62 = vsel %vm4292_vm9, %v7519_v24, %v4289_v21  ;;  %7141 = vmatmul.msk.f32.gmra.mxu1 %vm314_vm1, %v10074_v54  ;;  %v10122_v24 = vld [vmem:[#allocation2 + $0xe8] sm:$0xff]  ;;  %7548 = vtanh.f32 %v10006_v14 }
 0x503   : > { %v4298_v29 = vsel %vm4295_vm10, %v4297_v31, %v4293_v62  ;;  %7126 = vmatmul.msk.f32.gmra.mxu0 %vm314_vm1, %v10072_v38  ;;  %v10164_v31 = vld [vmem:[#allocation2 + $0x92] sm:$0xff]  ;;  %7550 = vtanh.f32 %v10021_v12  ;;  %v7681_v12 = vld [vmem:[%s11091_s6 + $0x4] sm:$0xf] }
 0x504   : > { %4346 = vrot.lane.b32.xlu1 %v4298_v29, %s7785_s29 }
 0x505   : > { %7111 = vmatmul.msk.f32.gmra.mxu3 %vm314_vm1, %v7677_v26  ;;  %v10202_v26 = vld [vmem:[#allocation2 + $0xca] sm:$0xff] }
 0x506   : > { %v4325_v3 = vpop.permute.xlu2 %4324 }
 0x507   : > { %v4368_v22 = vmul.f32 %v7529_v58, %v4325_v3 }
 0x509   : > { %7081 = vmatmul.msk.f32.gmra.mxu2 %vm314_vm1, %v4365_v11 }
 0x50a   : > { %7142 = vmatmul.msk.f32.gmra.mxu1 %vm314_vm1, %v10086_v0 }
 0x50b   : > { %7127 = vmatmul.msk.f32.gmra.mxu0 %vm314_vm1, %v10084_v2 }
 0x50d   : > { %7112 = vmatmul.msk.f32.gmra.mxu3 %vm314_vm1, %v7678_v16  ;;  %v5687_v16 = vld [vmem:[#allocation3 + $0x198] sm:$0xff] }
 0x50e   : > { %v4321_v20 = vpop.permute.xlu0 %4320  ;;  %5750 = vmatpush.msra.mxu3 %v5687_v16 }
 0x50f   : > { %v4366_v47 = vmul.f32 %v7525_v33, %v4321_v20 }
 0x511   : > { %7082 = vmatmul.msk.f32.gmra.mxu2 %vm314_vm1, %v4366_v47 }
 0x512   : > { %7143 = vmatmul.msk.f32.gmra.mxu1 %vm314_vm1, %v10098_v8 }
 0x513   : > { %7128 = vmatmul.msk.f32.gmra.mxu0 %vm314_vm1, %v10096_v57 }
 0x515   : > { %7113 = vmatmul.msk.f32.gmra.mxu3 %vm314_vm1, %v7679_v7  ;;  %v10230_v7 = vld [vmem:[#allocation2 + $0xea] sm:$0xff] }
 0x516   : > { %v4323_v55 = vpop.permute.xlu1 %4322 }
 0x517   : > { %v4367_v59 = vmul.f32 %v7527_v61, %v4323_v55  ;;  %v5539_v55 = vld [vmem:[#allocation3 + $0x188] sm:$0xff] }
 0x518   : > { %5602 = vmatpush.msra.mxu2 %v5539_v55 }
 0x519   : > { %7083 = vmatmul.msk.f32.gmra.mxu2 %vm314_vm1, %v4367_v59  ;;  %v10216_v59 = vld [vmem:[#allocation2 + $0xd2] sm:$0xff] }
 0x51a   : > { %7144 = vmatmul.msk.f32.gmra.mxu1 %vm314_vm1, %v10110_v63 }
 0x51b   : > { %7129 = vmatmul.msk.f32.gmra.mxu0 %vm314_vm1, %v10108_v13 }
 0x51d   : > { %7114 = vmatmul.msk.f32.gmra.mxu3 %vm314_vm1, %v7680_v15 }
 0x51e   : > { %v4331_v39 = vpop.permute.xlu2 %4330 }
 0x51f   : > { %v4371_v34 = vmul.f32 %v7535_v50, %v4331_v39 }
 0x521   : > { %7084 = vmatmul.msk.f32.gmra.mxu2 %vm314_vm1, %v4368_v22  ;;  %v5835_v22 = vld [vmem:[#allocation3 + $0x1a8] sm:$0xff] }
 0x522   : > { %7145 = vmatmul.msk.f32.gmra.mxu1 %vm314_vm1, %v10122_v24  ;;  %5898 = vmatpush.msra.mxu0 %v5835_v22 }
 0x523   : > { %7130 = vmatmul.msk.f32.gmra.mxu0 %vm314_vm1, %v10120_v37 }
 0x525   : > { %7163 = vmatmul.msk.f32.vlgmr.msrb.gmra.mxu3 %vm314_vm1, %v10037_v28  ;;  %v10132_v10 = vpop.f32.mrf.mxu0  ;;  %v5391_v28 = vld [vmem:[#allocation3 + $0x178] sm:$0xff] }
 0x526   : > { %v4327_v17 = vpop.permute.xlu0 %4326  ;;  %5454 = vmatpush.msrb.mxu1 %v5391_v28 }
 0x527   : > { %v4369_v5 = vmul.f32 %v7531_v46, %v4327_v17  ;;  %v10134_v30 = vpop.f32.mrf.mxu3  ;;  %v10242_v46 = vld [vmem:[#allocation2 + $0xf2] sm:$0xff] }
 0x528   : > { %5455 = vmatpush.msrb.mxu1 %v5390_v43  ;;  %v11332_v43 = vld [vmem:[#allocation31_spill] sm:$0xff] }
 0x529   : > { %7085 = vmatmul.msk.f32.gmra.mxu2 %vm314_vm1, %v4369_v5 }
 0x52a   : > { %7146 = vmatmul.msk.f32.gmra.mxu1 %vm314_vm1, %v10136_v6 }
 0x52b   : > { %7179 = vmatmul.msk.f32.vlgmr.msrb.gmra.mxu0 %vm314_vm1, %v10048_v1  ;;  %v10150_v1 = vld [vmem:[#allocation2 + $0x8a] sm:$0xff] }
 0x52d   : > { %7164 = vmatmul.msk.f32.gmra.mxu3 %vm314_vm1, %v10046_v60  ;;  %v7537_v60 = vpop.eup %7536 }
 0x52e   : > { %v4329_v41 = vpop.permute.xlu1 %4328  ;;  %v7539_v62 = vpop.eup %7538 }
 0x52f   : > { %v4370_v35 = vmul.f32 %v7533_v53, %v4329_v41  ;;  %v7541_v27 = vpop.eup %7540  ;;  %v10255_v53 = vperm.slane %v7681_v12, 1 }
 0x530   : > { %v10146_v48 = vpop.f32.mrf.mxu0  ;;  %v10148_v42 = vpop.f32.mrf.mxu3 }
 0x531   : > { %7086 = vmatmul.msk.f32.gmra.mxu2 %vm314_vm1, %v4370_v35  ;;  %v7543_v33 = vpop.eup %7542  ;;  %v10259_v35 = vperm.slane %v7681_v12, 2 }
 0x532   : > { %7195 = vmatmul.msk.f32.vlgmr.msrb.gmra.mxu1 %vm314_vm1, %v10150_v1 }
 0x533   : > { %7180 = vmatmul.msk.f32.gmra.mxu0 %vm314_vm1, %v10061_v44 }
 0x535   : > { %7165 = vmatmul.msk.f32.gmra.mxu3 %vm314_vm1, %v10059_v18 }
 0x536   : > { %v4337_v40 = vpop.permute.xlu2 %4336 }
 0x537   : > { %v4374_v4 = vmul.f32 %v7541_v27, %v4337_v40 }
 0x538   : > { %v10160_v32 = vpop.f32.mrf.mxu0  ;;  %v10162_v21 = vpop.f32.mrf.mxu3 }
 0x539   : > { %7087 = vmatmul.msk.f32.gmra.mxu2 %vm314_vm1, %v4371_v34  ;;  %11321 = vst [vmem:[#allocation49_spill] sm:$0xff] %v10160_v32  ;;  %v4930_v34 = vld [vmem:[#allocation2 + $0x12] sm:$0xff] }
 0x53a   : > { %11322 = vst [vmem:[#allocation50_spill] sm:$0xff] %v10162_v21  ;;  %7196 = vmatmul.msk.f32.gmra.mxu1 %vm314_vm1, %v10164_v31 }
 0x53b   : > { %7181 = vmatmul.msk.f32.gmra.mxu0 %vm314_vm1, %v10074_v54 }
 0x53d   : > { %7166 = vmatmul.msk.f32.gmra.mxu3 %vm314_vm1, %v10072_v38  ;;  %v10190_v38 = vld [vmem:[#allocation2 + $0xb2] sm:$0xff] }
 0x53e   : > { %v4333_v49 = vpop.permute.xlu0 %4332 }
 0x53f   : > { %v4372_v56 = vmul.f32 %v7537_v60, %v4333_v49 }
 0x540   : > { %v10174_v18 = vpop.f32.mrf.mxu0  ;;  %v10176_v29 = vpop.f32.mrf.mxu3 }
 0x541   : > { %7088 = vmatmul.msk.f32.gmra.mxu2 %vm314_vm1, %v4372_v56  ;;  %11323 = vst [vmem:[#allocation64_spill] sm:$0xff] %v10174_v18 }
 0x542   : > { %11324 = vst [vmem:[#allocation42_spill] sm:$0xff] %v10176_v29  ;;  %7197 = vmatmul.msk.f32.gmra.mxu1 %vm314_vm1, %v10178_v45 }
 0x543   : > { %7182 = vmatmul.msk.f32.gmra.mxu0 %vm314_vm1, %v10086_v0  ;;  %v7545_v0 = vpop.eup %7544 }
 0x545   : > { %7167 = vmatmul.msk.f32.gmra.mxu3 %vm314_vm1, %v10084_v2 }
 0x546   : > { %v4335_v44 = vpop.permute.xlu1 %4334 }
 0x547   : > { %v4373_v36 = vmul.f32 %v7539_v62, %v4335_v44  ;;  %v10273_v62 = vpop.f32.mrf.mxu1 }
 0x548   : > { %v10188_v11 = vpop.f32.mrf.mxu0  ;;  %v10192_v54 = vpop.f32.mrf.mxu3 }
 0x549   : > { %7089 = vmatmul.msk.f32.gmra.mxu2 %vm314_vm1, %v4373_v36  ;;  %11325 = vst [vmem:[#allocation51_spill] sm:$0xff] %v10188_v11  ;;  %v4931_v36 = vld [vmem:[#allocation2 + $0x2a] sm:$0xff] }
 0x54a   : > { %11326 = vst [vmem:[#allocation45_spill] sm:$0xff] %v10192_v54  ;;  %7198 = vmatmul.msk.f32.gmra.mxu1 %vm314_vm1, %v10190_v38 }
 0x54b   : > { %7183 = vmatmul.msk.f32.gmra.mxu0 %vm314_vm1, %v10098_v8  ;;  %v7547_v8 = vpop.eup %7546 }
 0x54c   : > { %v7549_v51 = vpop.eup %7548 }
 0x54d   : > { %7168 = vmatmul.msk.f32.gmra.mxu3 %vm314_vm1, %v10096_v57  ;;  %v7551_v17 = vpop.eup %7550 }
 0x54e   : > { %v4343_v57 = vpop.permute.xlu2 %4342 }
 0x54f   : > { %v4377_v9 = vmul.f32 %v7547_v8, %v4343_v57  ;;  %v10298_v16 = vpop.f32.mrf.mxu1 }
 0x550   : > { %v10204_v47 = vpop.f32.mrf.mxu0  ;;  %v10210_v2 = vpop.f32.mrf.mxu3 }
 0x551   : > { %7090 = vmatmul.msk.f32.gmra.mxu2 %vm314_vm1, %v4374_v4  ;;  %11327 = vst [vmem:[#allocation52_spill] sm:$0xff] %v10204_v47  ;;  %v11334_v4 = vld [vmem:[#allocation27_spill] sm:$0xff] }
 0x552   : > { %7199 = vmatmul.msk.f32.gmra.mxu1 %vm314_vm1, %v10202_v26  ;;  %11328 = vst [vmem:[#allocation53_spill] sm:$0xff] %v10210_v2 }
 0x553   : > { %7184 = vmatmul.msk.f32.gmra.mxu0 %vm314_vm1, %v10110_v63 }
 0x555   : > { %7169 = vmatmul.msk.f32.gmra.mxu3 %vm314_vm1, %v10108_v13 }
 0x556   : > { %v4339_v20 = vpop.permute.xlu0 %4338 }
 0x557   : > { %v4375_v25 = vmul.f32 %v7543_v33, %v4339_v20 }
 0x558   : > { %v10222_v3 = vpop.f32.mrf.mxu0  ;;  %v10226_v58 = vpop.f32.mrf.mxu3 }
 0x559   : > { %7091 = vmatmul.msk.f32.gmra.mxu2 %vm314_vm1, %v4375_v25  ;;  %11329 = vst [vmem:[#allocation66_spill] sm:$0xff] %v10222_v3 }
 0x55a   : > { %7200 = vmatmul.msk.f32.gmra.mxu1 %vm314_vm1, %v10216_v59  ;;  %11330 = vst [vmem:[#allocation13_spill] sm:$0xff] %v10226_v58 }
 0x55b   : > { %7185 = vmatmul.msk.f32.gmra.mxu0 %vm314_vm1, %v10122_v24  ;;  %v4929_v24 = vld [vmem:[#allocation2 + $0xa] sm:$0xff] }
 0x55d   : > { %7170 = vmatmul.msk.f32.gmra.mxu3 %vm314_vm1, %v10120_v37 }
 0x55e   : > { %v4341_v61 = vpop.permute.xlu1 %4340 }
 0x55f   : > { %v4376_v23 = vmul.f32 %v7545_v0, %v4341_v61 }
 0x560   : > { %v10236_v19 = vpop.f32.mrf.mxu3  ;;  %v10239_v14 = vpop.f32.mrf.mxu0 }
 0x561   : > { %7092 = vmatmul.msk.f32.gmra.mxu2 %vm314_vm1, %v4376_v23  ;;  %v4932_v23 = vld [vmem:[#allocation2 + $0x32] sm:$0xff] }
 0x562   : > { %7201 = vmatmul.msk.f32.gmra.mxu1 %vm314_vm1, %v10230_v7 }
 0x563   : > { %7186 = vmatmul.msk.f32.gmra.mxu0 %vm314_vm1, %v10136_v6 }
 0x568   : > { %v10246_v37 = vpop.f32.mrf.mxu3  ;;  %v10249_v52 = vpop.f32.mrf.mxu0 }
 0x569   : > { %7093 = vmatmul.msk.f32.gmra.mxu2 %vm314_vm1, %v4377_v9  ;;  %v11336_v9 = vld [vmem:[#allocation33_spill] sm:$0xff] }
 0x56a   : > { %7202 = vmatmul.msk.f32.gmra.mxu1 %vm314_vm1, %v10242_v46 }
 0x56e   : > { %v4345_v13 = vpop.permute.xlu0 %4344 }
 0x56f   : > { %v4378_v63 = vmul.f32 %v7549_v51, %v4345_v13 }
 0x570   : > { %v10257_v41 = vpop.f32.mrf.mxu3  ;;  %v10261_v39 = vpop.f32.mrf.mxu0 }
 0x571   : > { %7094 = vmatmul.msk.f32.gmra.mxu2 %vm314_vm1, %v4378_v63 }
 0x576   : > { %v4347_v15 = vpop.permute.xlu1 %4346 }
 0x577   : > { %v4379_v5 = vmul.f32 %v7551_v17, %v4347_v15 }
 0x578   : > { %v10271_v56 = vpop.f32.mrf.mxu3  ;;  %v10278_v40 = vpop.f32.mrf.mxu0 }
 0x579   : > { %7095 = vmatmul.msk.f32.gmra.mxu2 %vm314_vm1, %v4379_v5  ;;  %v4933_v5 = vld [vmem:[#allocation2 + $0x4a] sm:$0xff] }
 0x580   : > { %v10296_v55 = vpop.f32.mrf.mxu3  ;;  %v10302_v8 = vpop.f32.mrf.mxu0 }
 0x581   : > { %7147 = vmatmul.msk.f32.vlgmr.msrb.gmra.mxu2 %vm314_vm1, %v4929_v24 }
 0x584   : > { %v4449_v6 = vpop.f32.mrf.mxu2 }
 0x585   : > { %v10264_v50 = vadd.f32 %v4449_v6, %v10255_v53  ;;  %v10326_v6 = vpop.f32.mrf.mxu1 }
 0x586   : > { %11338 = vst [vmem:[#allocation67_spill] sm:$0xff] %v10326_v6 }
 0x587   : > { %11331 = vst [vmem:[#allocation54_spill] sm:$0xff] %v10264_v50  ;;  %v4498_v28 = vmul.f32 %v10259_v35, %v10264_v50  ;;  %v11347_v50 = vld [vmem:[#allocation44_spill] sm:$0xff] }
 0x588   : > { %v10324_v12 = vpop.f32.mrf.mxu3 }
 0x589   : > { %v4514_v60 = vadd.f32 %v4498_v28, %v11332_v43  ;;  %7148 = vmatmul.msk.f32.gmra.mxu2 %vm314_vm1, %v4930_v34  ;;  %v11339_v34 = vld [vmem:[#allocation34_spill] sm:$0xff] }
 0x58b   : > { %4548 = vst.msk [vmem:[#allocation2 + $0x108] sm:$0xff] %vm314_vm1, %v4514_v60 }
 0x58c   : > { %v4452_v49 = vpop.f32.mrf.mxu2 }
 0x58d   : > { %v10276_v44 = vadd.f32 %v4452_v49, %v10255_v53  ;;  %v10334_v49 = vpop.f32.mrf.mxu0 }
 0x58f   : > { %11333 = vst [vmem:[#allocation46_spill] sm:$0xff] %v10276_v44  ;;  %v4499_v27 = vmul.f32 %v10259_v35, %v10276_v44 }
 0x591   : > { %v4515_v33 = vadd.f32 %v4499_v27, %v11334_v4  ;;  %7149 = vmatmul.msk.f32.gmra.mxu2 %vm314_vm1, %v4931_v36  ;;  %v5538_v27 = vld [vmem:[#allocation3 + $0x180] sm:$0xff] }
 0x592   : > { %v10284_v20 = vld [vmem:[#allocation2 + $0x106] sm:$0xff]  ;;  %5603 = vmatpush.msra.mxu2 %v5538_v27 }
 0x593   : > { %v10286_v25 = vld [vmem:[#allocation2 + $0x108] sm:$0xff]  ;;  %4549 = vst.msk [vmem:[#allocation2 + $0x110] sm:$0xff] %vm314_vm1, %v4515_v33  ;;  %7171 = vmatmul.msk.f32.gmra.mxu3 %vm314_vm1, %v10284_v20  ;;  %v5686_v33 = vld [vmem:[#allocation3 + $0x190] sm:$0xff] }
 0x594   : > { %7187 = vmatmul.msk.f32.gmra.mxu0 %vm314_vm1, %v10286_v25  ;;  %v4455_v0 = vpop.f32.mrf.mxu2  ;;  %5751 = vmatpush.msra.mxu3 %v5686_v33  ;;  %v5834_v33 = vld [vmem:[#allocation3 + $0x1a0] sm:$0xff] }
 0x595   : > { %v10294_v61 = vadd.f32 %v4455_v0, %v10255_v53  ;;  %5899 = vmatpush.msra.mxu0 %v5834_v33 }
 0x597   : > { %11335 = vst [vmem:[#allocation55_spill] sm:$0xff] %v10294_v61  ;;  %v4500_v57 = vmul.f32 %v10259_v35, %v10294_v61 }
 0x599   : > { %v4516_v22 = vadd.f32 %v4500_v57, %v11336_v9  ;;  %7150 = vmatmul.msk.f32.gmra.mxu2 %vm314_vm1, %v4932_v23  ;;  %v4934_v23 = vld [vmem:[#allocation2 + $0x52] sm:$0xff]  ;;  %v11341_v9 = vld [vmem:[#allocation35_spill] sm:$0xff] }
 0x59a   : > { %v10306_v51 = vld [vmem:[#allocation2 + $0x10e] sm:$0xff] }
 0x59b   : > { %v10308_v13 = vld [vmem:[#allocation2 + $0x110] sm:$0xff]  ;;  %4550 = vst.msk [vmem:[#allocation2 + $0x128] sm:$0xff] %vm314_vm1, %v4516_v22  ;;  %7172 = vmatmul.msk.f32.gmra.mxu3 %vm314_vm1, %v10306_v51 }
 0x59c   : > { %v10310_v63 = vld [vmem:[#allocation2 + $0x10a] sm:$0xff]  ;;  %7188 = vmatmul.msk.f32.gmra.mxu0 %vm314_vm1, %v10308_v13  ;;  %v4458_v17 = vpop.f32.mrf.mxu2  ;;  %v10341_v36 = vld [vmem:[#allocation2 + $0x112] sm:$0xff] }
 0x59d   : > { %7203 = vmatmul.msk.f32.gmra.mxu1 %vm314_vm1, %v10310_v63  ;;  %v10320_v15 = vadd.f32 %v4458_v17, %v10255_v53 }
 0x59f   : > { %11337 = vst [vmem:[#allocation56_spill] sm:$0xff] %v10320_v15  ;;  %v4501_v24 = vmul.f32 %v10259_v35, %v10320_v15 }
 0x5a1   : > { %v4517_v28 = vadd.f32 %v4501_v24, %v11339_v34  ;;  %7151 = vmatmul.msk.f32.gmra.mxu2 %vm314_vm1, %v4933_v5  ;;  %v10358_v34 = vpop.f32.mrf.mxu3 }
 0x5a2   : > { %v10330_v43 = vld [vmem:[#allocation2 + $0x126] sm:$0xff] }
 0x5a3   : > { %v10332_v60 = vld [vmem:[#allocation2 + $0x128] sm:$0xff]  ;;  %4551 = vst.msk [vmem:[#allocation2 + $0x130] sm:$0xff] %vm314_vm1, %v4517_v28  ;;  %7173 = vmatmul.msk.f32.gmra.mxu3 %vm314_vm1, %v10330_v43  ;;  %v10360_v28 = vpop.f32.mrf.mxu1 }
 0x5a4   : > { %7189 = vmatmul.msk.f32.gmra.mxu0 %vm314_vm1, %v10332_v60  ;;  %v4461_v4 = vpop.f32.mrf.mxu2  ;;  %11342 = vst [vmem:[#allocation57_spill] sm:$0xff] %v10360_v28 }
 0x5a5   : > { %7204 = vmatmul.msk.f32.gmra.mxu1 %vm314_vm1, %v10341_v36  ;;  %v10346_v0 = vadd.f32 %v4461_v4, %v10255_v53  ;;  %v10369_v4 = vpop.f32.mrf.mxu0 }
 0x5a7   : > { %11340 = vst [vmem:[#allocation19_spill] sm:$0xff] %v10346_v0  ;;  %v4502_v57 = vmul.f32 %v10259_v35, %v10346_v0 }
 0x5a9   : > { %v4518_v22 = vadd.f32 %v4502_v57, %v11341_v9  ;;  %7152 = vmatmul.msk.f32.gmra.mxu2 %vm314_vm1, %v4934_v23  ;;  %v4935_v57 = vld [vmem:[#allocation2 + $0x6a] sm:$0xff] }
 0x5aa   : > { %v10352_v17 = vld [vmem:[#allocation2 + $0x12e] sm:$0xff] }
 0x5ab   : > { %v10354_v5 = vld [vmem:[#allocation2 + $0x130] sm:$0xff]  ;;  %4552 = vst.msk [vmem:[#allocation2 + $0x148] sm:$0xff] %vm314_vm1, %v4518_v22  ;;  %7174 = vmatmul.msk.f32.gmra.mxu3 %vm314_vm1, %v10352_v17 }
 0x5ac   : > { %v10356_v24 = vld [vmem:[#allocation2 + $0x12a] sm:$0xff]  ;;  %7190 = vmatmul.msk.f32.gmra.mxu0 %vm314_vm1, %v10354_v5  ;;  %v4464_v27 = vpop.f32.mrf.mxu2 }
 0x5ad   : > { %7205 = vmatmul.msk.f32.gmra.mxu1 %vm314_vm1, %v10356_v24  ;;  %v10372_v23 = vadd.f32 %v4464_v27, %v10255_v53  ;;  %v11344_v22 = vld [vmem:[#allocation29_spill] sm:$0xff] }
 0x5ae   : > { %v10387_v27 = vld [vmem:[#allocation2 + $0x132] sm:$0xff] }
 0x5af   : > { %11343 = vst [vmem:[#allocation47_spill] sm:$0xff] %v10372_v23  ;;  %v4503_v9 = vmul.f32 %v10259_v35, %v10372_v23  ;;  %v10398_v23 = vpop.f32.mrf.mxu0 }
 0x5b1   : > { %v4519_v0 = vadd.f32 %v4503_v9, %v11344_v22  ;;  %7153 = vmatmul.msk.f32.gmra.mxu2 %vm314_vm1, %v4935_v57  ;;  %v10391_v9 = vpop.f32.mrf.mxu3  ;;  %v10393_v57 = vpop.f32.mrf.mxu1 }
 0x5b2   : > { %v10378_v15 = vld [vmem:[#allocation2 + $0x146] sm:$0xff]  ;;  %11345 = vst [vmem:[#allocation58_spill] sm:$0xff] %v10393_v57 }
 0x5b3   : > { %v10380_v61 = vld [vmem:[#allocation2 + $0x148] sm:$0xff]  ;;  %4553 = vst.msk [vmem:[#allocation2 + $0x150] sm:$0xff] %vm314_vm1, %v4519_v0  ;;  %7175 = vmatmul.msk.f32.gmra.mxu3 %vm314_vm1, %v10378_v15  ;;  %v4936_v0 = vld [vmem:[#allocation2 + $0x72] sm:$0xff]  ;;  %v11350_v57 = vld [vmem:[#allocation39_spill] sm:$0xff] }
 0x5b4   : > { %7191 = vmatmul.msk.f32.gmra.mxu0 %vm314_vm1, %v10380_v61  ;;  %v4467_v33 = vpop.f32.mrf.mxu2 }
 0x5b5   : > { %7206 = vmatmul.msk.f32.gmra.mxu1 %vm314_vm1, %v10387_v27  ;;  %v10396_v22 = vadd.f32 %v4467_v33, %v10255_v53 }
 0x5b7   : > { %11346 = vst [vmem:[#allocation59_spill] sm:$0xff] %v10396_v22  ;;  %v4504_v44 = vmul.f32 %v10259_v35, %v10396_v22  ;;  %v10426_v22 = vpop.f32.mrf.mxu0 }
 0x5b9   : > { %v4520_v3 = vadd.f32 %v4504_v44, %v11347_v50  ;;  %7154 = vmatmul.msk.f32.gmra.mxu2 %vm314_vm1, %v4936_v0  ;;  %v10420_v33 = vpop.f32.mrf.mxu3  ;;  %v10422_v0 = vpop.f32.mrf.mxu1 }
 0x5ba   : > { %v10404_v58 = vld [vmem:[#allocation2 + $0x14e] sm:$0xff]  ;;  %11349 = vst [vmem:[#allocation14_spill] sm:$0xff] %v10422_v0 }
 0x5bb   : > { %v10406_v47 = vld [vmem:[#allocation2 + $0x150] sm:$0xff]  ;;  %4554 = vst.msk [vmem:[#allocation2 + $0x168] sm:$0xff] %vm314_vm1, %v4520_v3  ;;  %7176 = vmatmul.msk.f32.gmra.mxu3 %vm314_vm1, %v10404_v58  ;;  %v11353_v0 = vld [vmem:[#allocation40_spill] sm:$0xff] }
 0x5bc   : > { %v10408_v2 = vld [vmem:[#allocation2 + $0x14a] sm:$0xff]  ;;  %7192 = vmatmul.msk.f32.gmra.mxu0 %vm314_vm1, %v10406_v47  ;;  %v4470_v50 = vpop.f32.mrf.mxu2 }
 0x5bd   : > { %7207 = vmatmul.msk.f32.gmra.mxu1 %vm314_vm1, %v10408_v2  ;;  %v10418_v44 = vadd.f32 %v4470_v50, %v10255_v53  ;;  %v10440_v50 = vld [vmem:[#allocation2 + $0x152] sm:$0xff] }
 0x5bf   : > { %11348 = vst [vmem:[#allocation68_spill] sm:$0xff] %v10418_v44  ;;  %v4505_v3 = vmul.f32 %v10259_v35, %v10418_v44 }
 0x5c1   : > { %v4521_v11 = vadd.f32 %v4505_v3, %v11350_v57  ;;  %7155 = vmatmul.msk.f32.gmra.mxu2 %vm314_vm1, %v10150_v1  ;;  %v10449_v44 = vpop.f32.mrf.mxu3 }
 0x5c2   : > { %v10431_v54 = vld [vmem:[#allocation2 + $0x166] sm:$0xff] }
 0x5c3   : > { %v10433_v28 = vld [vmem:[#allocation2 + $0x168] sm:$0xff]  ;;  %4555 = vst.msk [vmem:[#allocation2 + $0x170] sm:$0xff] %vm314_vm1, %v4521_v11  ;;  %7177 = vmatmul.msk.f32.gmra.mxu3 %vm314_vm1, %v10431_v54  ;;  %v10451_v11 = vpop.f32.mrf.mxu1 }
 0x5c4   : > { %7193 = vmatmul.msk.f32.gmra.mxu0 %vm314_vm1, %v10433_v28  ;;  %v4473_v57 = vpop.f32.mrf.mxu2  ;;  %11352 = vst [vmem:[#allocation48_spill] sm:$0xff] %v10451_v11 }
 0x5c5   : > { %7208 = vmatmul.msk.f32.gmra.mxu1 %vm314_vm1, %v10440_v50  ;;  %v10445_v1 = vadd.f32 %v4473_v57, %v10255_v53  ;;  %v10462_v57 = vpop.f32.mrf.mxu0 }
 0x5c6   : > { %11354 = vst [vmem:[#allocation61_spill] sm:$0xff] %v10462_v57 }
 0x5c7   : > { %11351 = vst [vmem:[#allocation60_spill] sm:$0xff] %v10445_v1  ;;  %v4506_v3 = vmul.f32 %v10259_v35, %v10445_v1  ;;  %v11356_v1 = vld [vmem:[#allocation9_spill] sm:$0xff] }
 0x5c9   : > { %v4522_v18 = vadd.f32 %v4506_v3, %v11353_v0  ;;  %7156 = vmatmul.msk.f32.gmra.mxu2 %vm314_vm1, %v10164_v31 }
 0x5ca   : > { %v10456_v29 = vld [vmem:[#allocation2 + $0x16e] sm:$0xff] }
 0x5cb   : > { %v10458_v6 = vld [vmem:[#allocation2 + $0x170] sm:$0xff]  ;;  %4556 = vst.msk [vmem:[#allocation2 + $0x188] sm:$0xff] %vm314_vm1, %v4522_v18  ;;  %7178 = vmatmul.msk.f32.gmra.mxu3 %vm314_vm1, %v10456_v29  ;;  %v10479_v18 = vpop.f32.mrf.mxu3  ;;  %v10481_v57 = vpop.f32.mrf.mxu1 }
 0x5cc   : > { %v10460_v32 = vld [vmem:[#allocation2 + $0x16a] sm:$0xff]  ;;  %7194 = vmatmul.msk.f32.gmra.mxu0 %vm314_vm1, %v10458_v6  ;;  %v4476_v31 = vpop.f32.mrf.mxu2  ;;  %v10484_v21 = vld [vmem:[#allocation2 + $0x172] sm:$0xff] }
 0x5cd   : > { %7209 = vmatmul.msk.f32.gmra.mxu1 %vm314_vm1, %v10460_v32  ;;  %v10472_v0 = vadd.f32 %v4476_v31, %v10255_v53  ;;  %v10492_v31 = vpop.f32.mrf.mxu0 }
 0x5cf   : > { %11355 = vst [vmem:[#allocation62_spill] sm:$0xff] %v10472_v0  ;;  %v4507_v3 = vmul.f32 %v10259_v35, %v10472_v0 }
 0x5d1   : > { %v4523_v11 = vadd.f32 %v4507_v3, %v11356_v1  ;;  %7157 = vmatmul.msk.f32.gmra.mxu2 %vm314_vm1, %v10178_v45  ;;  %v11358_v3 = vld [vmem:[#allocation11_spill] sm:$0xff] }
 0x5d3   : > { %4557 = vst.msk [vmem:[#allocation2 + $0x190] sm:$0xff] %vm314_vm1, %v4523_v11  ;;  %7227 = vmatmul.msk.f32.vlgmr.msra.gmra.mxu3 %vm314_vm1, %v10286_v25 }
 0x5d4   : > { %7243 = vmatmul.msk.f32.vlgmr.msra.gmra.mxu0 %vm314_vm1, %v10310_v63  ;;  %v4479_v1 = vpop.f32.mrf.mxu2  ;;  %v10507_v63 = vpop.f32.mrf.mxu3 }
 0x5d5   : > { %7210 = vmatmul.msk.f32.gmra.mxu1 %vm314_vm1, %v10484_v21  ;;  %v10495_v45 = vadd.f32 %v4479_v1, %v10255_v53 }
 0x5d7   : > { %11357 = vst [vmem:[#allocation69_spill] sm:$0xff] %v10495_v45  ;;  %v4508_v11 = vmul.f32 %v10259_v35, %v10495_v45  ;;  %v10512_v45 = vpop.f32.mrf.mxu0 }
 0x5d9   : > { %v4524_v0 = vadd.f32 %v4508_v11, %v11358_v3  ;;  %7158 = vmatmul.msk.f32.gmra.mxu2 %vm314_vm1, %v10190_v38  ;;  %v11360_v38 = vld [vmem:[#allocation17_spill] sm:$0xff] }
 0x5db   : > { %4558 = vst.msk [vmem:[#allocation2 + $0x1a8] sm:$0xff] %vm314_vm1, %v4524_v0  ;;  %7228 = vmatmul.msk.f32.gmra.mxu3 %vm314_vm1, %v10308_v13 }
 0x5dc   : > { %7244 = vmatmul.msk.f32.gmra.mxu0 %vm314_vm1, %v10341_v36  ;;  %v4482_v25 = vpop.f32.mrf.mxu2  ;;  %v10527_v0 = vpop.f32.mrf.mxu3 }
 0x5dd   : > { %v10510_v1 = vadd.f32 %v4482_v25, %v10255_v53 }
 0x5df   : > { %11359 = vst [vmem:[#allocation63_spill] sm:$0xff] %v10510_v1  ;;  %v4509_v11 = vmul.f32 %v10259_v35, %v10510_v1 }
 0x5e1   : > { %v4525_v3 = vadd.f32 %v4509_v11, %v11360_v38  ;;  %7159 = vmatmul.msk.f32.gmra.mxu2 %vm314_vm1, %v10202_v26  ;;  %v10531_v11 = vpop.f32.mrf.mxu0  ;;  %v11362_v26 = vld [vmem:[#allocation23_spill] sm:$0xff] }
 0x5e3   : > { %4559 = vst.msk [vmem:[#allocation2 + $0x1b0] sm:$0xff] %vm314_vm1, %v4525_v3  ;;  %7229 = vmatmul.msk.f32.gmra.mxu3 %vm314_vm1, %v10332_v60 }
 0x5e4   : > { %7245 = vmatmul.msk.f32.gmra.mxu0 %vm314_vm1, %v10356_v24  ;;  %v4485_v13 = vpop.f32.mrf.mxu2 }
 0x5e5   : > { %v10525_v36 = vadd.f32 %v4485_v13, %v10255_v53  ;;  %v10546_v13 = vpop.f32.mrf.mxu3 }
 0x5e6   : > { %11364 = vst [vmem:[#allocation27_spill] sm:$0xff] %v10546_v13 }
 0x5e7   : > { %11361 = vst [vmem:[#allocation65_spill] sm:$0xff] %v10525_v36  ;;  %v4510_v25 = vmul.f32 %v10259_v35, %v10525_v36 }
 0x5e9   : > { %v4526_v38 = vadd.f32 %v4510_v25, %v11362_v26  ;;  %7160 = vmatmul.msk.f32.gmra.mxu2 %vm314_vm1, %v10216_v59  ;;  %v11365_v25 = vld [vmem:[#allocation16_spill] sm:$0xff]  ;;  %v10551_v59 = vpop.f32.mrf.mxu0 }
 0x5ea   : > { %11366 = vst [vmem:[#allocation33_spill] sm:$0xff] %v10551_v59 }
 0x5eb   : > { %4560 = vst.msk [vmem:[#allocation2 + $0x1c8] sm:$0xff] %vm314_vm1, %v4526_v38  ;;  %7230 = vmatmul.msk.f32.gmra.mxu3 %vm314_vm1, %v10354_v5 }
 0x5ec   : > { %7246 = vmatmul.msk.f32.gmra.mxu0 %vm314_vm1, %v10387_v27  ;;  %v4488_v60 = vpop.f32.mrf.mxu2 }
 0x5ed   : > { %v10542_v24 = vadd.f32 %v4488_v60, %v10255_v53  ;;  %v11368_v60 = vld [vmem:[#allocation20_spill] sm:$0xff] }
 0x5ef   : > { %11363 = vst [vmem:[#allocation31_spill] sm:$0xff] %v10542_v24  ;;  %v4511_v3 = vmul.f32 %v10259_v35, %v10542_v24 }
 0x5f1   : > { %v4527_v26 = vadd.f32 %v4511_v3, %v11365_v25  ;;  %7161 = vmatmul.msk.f32.gmra.mxu2 %vm314_vm1, %v10230_v7  ;;  %v10566_v7 = vpop.f32.mrf.mxu3 }
 0x5f2   : > { %11369 = vst [vmem:[#allocation35_spill] sm:$0xff] %v10566_v7 }
 0x5f3   : > { %4561 = vst.msk [vmem:[#allocation2 + $0x1d0] sm:$0xff] %vm314_vm1, %v4527_v26  ;;  %7231 = vmatmul.msk.f32.gmra.mxu3 %vm314_vm1, %v10380_v61 }
 0x5f4   : > { %7247 = vmatmul.msk.f32.gmra.mxu0 %vm314_vm1, %v10408_v2  ;;  %v4491_v5 = vpop.f32.mrf.mxu2  ;;  %v10573_v2 = vpop.f32.mrf.mxu0 }
 0x5f5   : > { %v10559_v27 = vadd.f32 %v4491_v5, %v10255_v53  ;;  %11370 = vst [vmem:[#allocation29_spill] sm:$0xff] %v10573_v2 }
 0x5f7   : > { %11367 = vst [vmem:[#allocation34_spill] sm:$0xff] %v10559_v27  ;;  %v4512_v38 = vmul.f32 %v10259_v35, %v10559_v27 }
 0x5f9   : > { %v4528_v3 = vadd.f32 %v4512_v38, %v11368_v60  ;;  %7162 = vmatmul.msk.f32.gmra.mxu2 %vm314_vm1, %v10242_v46  ;;  %v11372_v46 = vld [vmem:[#allocation24_spill] sm:$0xff]  ;;  %v4889_v60 = vpop.f32.mrf.mxu1 }
 0x5fa   : > { %v5825_v38 = vld [vmem:[#allocation2 + $0x18a] sm:$0xff]  ;;  %v5830_v2 = vld [vmem:[#allocation2 + $0x1d2] sm:$0xff] }
 0x5fb   : > { %4562 = vst.msk [vmem:[#allocation2 + $0x1e8] sm:$0xff] %vm314_vm1, %v4528_v3  ;;  %7232 = vmatmul.msk.f32.gmra.mxu3 %vm314_vm1, %v10406_v47  ;;  %v5678_v3 = vld [vmem:[#allocation2 + $0x190] sm:$0xff] }
 0x5fc   : > { %7248 = vmatmul.msk.f32.gmra.mxu0 %vm314_vm1, %v10440_v50  ;;  %v4494_v61 = vpop.f32.mrf.mxu2  ;;  %v10592_v50 = vpop.f32.mrf.mxu0 }
 0x5fd   : > { %v10576_v25 = vadd.f32 %v4494_v61, %v10255_v53  ;;  %v10590_v53 = vpop.f32.mrf.mxu3  ;;  %11374 = vst [vmem:[#allocation40_spill] sm:$0xff] %v10592_v50  ;;  %v5826_v61 = vld [vmem:[#allocation2 + $0x192] sm:$0xff] }
 0x5fe   : > { %11373 = vst [vmem:[#allocation39_spill] sm:$0xff] %v10590_v53 }
 0x5ff   : > { %11371 = vst [vmem:[#allocation44_spill] sm:$0xff] %v10576_v25  ;;  %v4513_v26 = vmul.f32 %v10259_v35, %v10576_v25  ;;  %v5828_v25 = vld [vmem:[#allocation2 + $0x1b2] sm:$0xff] }
 0x601   : > { %v4529_v5 = vadd.f32 %v4513_v26, %v11372_v46  ;;  %7211 = vmatmul.msk.f32.vlgmr.msra.gmra.mxu2 %vm314_vm1, %v10284_v20  ;;  %v10618_v26 = vpop.f32.mrf.mxu1 }
 0x603   : > { %4563 = vst.msk [vmem:[#allocation2 + $0x1f0] sm:$0xff] %vm314_vm1, %v4529_v5  ;;  %7233 = vmatmul.msk.f32.gmra.mxu3 %vm314_vm1, %v10433_v28  ;;  %v5679_v5 = vld [vmem:[#allocation2 + $0x1a8] sm:$0xff] }
 0x604   : > { %7249 = vmatmul.msk.f32.gmra.mxu0 %vm314_vm1, %v10460_v32  ;;  %v10588_v47 = vpop.f32.mrf.mxu2  ;;  %v5330_v28 = vpop.f32.mrf.mxu0  ;;  %v5677_v32 = vld [vmem:[#allocation2 + $0x188] sm:$0xff] }
 0x605   : > { %v5182_v20 = vpop.f32.mrf.mxu3 }
 0x609   : > { %7212 = vmatmul.msk.f32.gmra.mxu2 %vm314_vm1, %v10306_v51 }
 0x60b   : > { %7234 = vmatmul.msk.f32.gmra.mxu3 %vm314_vm1, %v10458_v6 }
 0x60c   : > { %7250 = vmatmul.msk.f32.gmra.mxu0 %vm314_vm1, %v10484_v21  ;;  %v10600_v35 = vpop.f32.mrf.mxu2 }
 0x611   : > { %7213 = vmatmul.msk.f32.gmra.mxu2 %vm314_vm1, %v10330_v43  ;;  %v10612_v21 = vpop.f32.mrf.mxu0 }
 0x613   : > { %7235 = vmatmul.msk.f32.gmra.mxu3 %vm314_vm1, %v5677_v32  ;;  %v5827_v32 = vld [vmem:[#allocation2 + $0x1aa] sm:$0xff] }
 0x614   : > { %7251 = vmatmul.msk.f32.gmra.mxu0 %vm314_vm1, %v5825_v38  ;;  %v10606_v51 = vpop.f32.mrf.mxu2 }
 0x616   : > { %v10608_v6 = vpop.f32.mrf.mxu3 }
 0x619   : > { %7214 = vmatmul.msk.f32.gmra.mxu2 %vm314_vm1, %v10352_v17  ;;  %v10626_v17 = vpop.f32.mrf.mxu0 }
 0x61b   : > { %7236 = vmatmul.msk.f32.gmra.mxu3 %vm314_vm1, %v5678_v3  ;;  %v10630_v3 = vpop.f32.mrf.mxu1 }
 0x61c   : > { %7252 = vmatmul.msk.f32.gmra.mxu0 %vm314_vm1, %v5826_v61  ;;  %v10616_v43 = vpop.f32.mrf.mxu2  ;;  %v5680_v61 = vld [vmem:[#allocation2 + $0x1b0] sm:$0xff] }
 0x61e   : > { %v10622_v46 = vpop.f32.mrf.mxu3 }
 0x621   : > { %7215 = vmatmul.msk.f32.gmra.mxu2 %vm314_vm1, %v10378_v15  ;;  %v10643_v27 = vpop.f32.mrf.mxu0 }
 0x623   : > { %7237 = vmatmul.msk.f32.gmra.mxu3 %vm314_vm1, %v5679_v5  ;;  %v10647_v36 = vpop.f32.mrf.mxu1 }
 0x624   : > { %7253 = vmatmul.msk.f32.gmra.mxu0 %vm314_vm1, %v5827_v32  ;;  %v10628_v38 = vpop.f32.mrf.mxu2  ;;  %v7096_v32 = vld [vmem:[%s11091_s6 + $0x8] sm:$0xf] }
 0x625   : > { %v10645_v24 = vperm.slane %v7096_v32, 0 }
 0x626   : > { %v10636_v15 = vpop.f32.mrf.mxu3 }
 0x629   : > { %7216 = vmatmul.msk.f32.gmra.mxu2 %vm314_vm1, %v10404_v58  ;;  %v5681_v58 = vld [vmem:[#allocation2 + $0x1c8] sm:$0xff]  ;;  %v10660_v53 = vpop.f32.mrf.mxu0 }
 0x62b   : > { %7238 = vmatmul.msk.f32.gmra.mxu3 %vm314_vm1, %v5680_v61  ;;  %v5829_v61 = vld [vmem:[#allocation2 + $0x1ca] sm:$0xff] }
 0x62c   : > { %7254 = vmatmul.msk.f32.gmra.mxu0 %vm314_vm1, %v5828_v25  ;;  %v10638_v5 = vpop.f32.mrf.mxu2  ;;  %v4607_v25 = vadd.f32 %v10236_v19, %v10645_v24  ;;  %v4610_v19 = vadd.f32 %v10246_v37, %v10645_v24  ;;  %v5683_v37 = vld [vmem:[#allocation2 + $0x1e8] sm:$0xff] }
 0x62d   : > { %11375 = vst [vmem:[#allocation9_spill] sm:$0xff] %v10638_v5  ;;  %v5831_v5 = vld [vmem:[#allocation2 + $0x1ea] sm:$0xff] }
 0x62e   : > { %v10657_v50 = vpop.f32.mrf.mxu3  ;;  %v4772_v32 = vadd.f32 %v10239_v14, %v4607_v25  ;;  %v4773_v25 = vadd.f32 %v10249_v52, %v4610_v19 }
 0x630   : > { %v4920_v7 = vadd.f32 %v10481_v57, %v4772_v32  ;;  %v4921_v13 = vadd.f32 %v4889_v60, %v4773_v25 }
 0x631   : > { %7217 = vmatmul.msk.f32.gmra.mxu2 %vm314_vm1, %v10431_v54  ;;  %v5682_v54 = vld [vmem:[#allocation2 + $0x1d0] sm:$0xff]  ;;  %v10677_v32 = vpop.f32.mrf.mxu0 }
 0x633   : > { %7239 = vmatmul.msk.f32.gmra.mxu3 %vm314_vm1, %v5681_v58  ;;  %v10667_v58 = vpop.f32.mrf.mxu1 }
 0x634   : > { %7255 = vmatmul.msk.f32.gmra.mxu0 %vm314_vm1, %v5829_v61  ;;  %v10655_v1 = vpop.f32.mrf.mxu2 }
 0x635   : > { %11376 = vst [vmem:[#allocation11_spill] sm:$0xff] %v10655_v1 }
 0x636   : > { %v10672_v59 = vpop.f32.mrf.mxu3 }
 0x639   : > { %7218 = vmatmul.msk.f32.gmra.mxu2 %vm314_vm1, %v10456_v29  ;;  %v5529_v29 = vld [vmem:[#allocation2 + $0x186] sm:$0xff] }
 0x63b   : > { %7240 = vmatmul.msk.f32.gmra.mxu3 %vm314_vm1, %v5682_v54 }
 0x63c   : > { %7256 = vmatmul.msk.f32.gmra.mxu0 %vm314_vm1, %v5830_v2  ;;  %v5034_v61 = vpop.f32.mrf.mxu2  ;;  %v4613_v2 = vadd.f32 %v10257_v41, %v10645_v24  ;;  %v5832_v41 = vld [vmem:[#allocation2 + $0x1f2] sm:$0xff] }
 0x63d   : > { %v5068_v14 = vadd.f32 %v5034_v61, %v4920_v7  ;;  %v4904_v7 = vpop.f32.mrf.mxu1  ;;  %v5684_v61 = vld [vmem:[#allocation2 + $0x1f0] sm:$0xff] }
 0x63e   : > { %v4774_v54 = vadd.f32 %v10261_v39, %v4613_v2  ;;  %v5200_v60 = vpop.f32.mrf.mxu3  ;;  %v5348_v39 = vpop.f32.mrf.mxu0  ;;  %v4619_v2 = vadd.f32 %v10296_v55, %v10645_v24  ;;  %v4622_v55 = vadd.f32 %v10324_v12, %v10645_v24 }
 0x63f   : > { %v5216_v1 = vadd.f32 %v5182_v20, %v5068_v14 }
 0x640   : > { %v4922_v14 = vadd.f32 %v10618_v26, %v4774_v54 }
 0x641   : > { %7219 = vmatmul.msk.f32.gmra.mxu2 %vm314_vm1, %v5529_v29  ;;  %v10675_v57 = vadd.f32 %v5330_v28, %v5216_v1  ;;  %v5530_v28 = vld [vmem:[#allocation2 + $0x18e] sm:$0xff] }
 0x643   : > { %7241 = vmatmul.msk.f32.gmra.mxu3 %vm314_vm1, %v5683_v37  ;;  %v5531_v37 = vld [vmem:[#allocation2 + $0x1a6] sm:$0xff] }
 0x644   : > { %7257 = vmatmul.msk.f32.gmra.mxu0 %vm314_vm1, %v5831_v5  ;;  %v5037_v52 = vpop.f32.mrf.mxu2  ;;  %v4616_v5 = vadd.f32 %v10271_v56, %v10645_v24 }
 0x645   : > { %v5069_v20 = vadd.f32 %v5037_v52, %v4921_v13  ;;  %v4907_v29 = vpop.f32.mrf.mxu1 }
 0x646   : > { %v4775_v25 = vadd.f32 %v10278_v40, %v4616_v5  ;;  %v5203_v52 = vpop.f32.mrf.mxu3  ;;  %v4776_v40 = vadd.f32 %v10302_v8, %v4619_v2  ;;  %v5534_v2 = vld [vmem:[#allocation2 + $0x1ce] sm:$0xff] }
 0x647   : > { %v5217_v1 = vadd.f32 %v10608_v6, %v5069_v20 }
 0x648   : > { %v4923_v56 = vadd.f32 %v10630_v3, %v4775_v25  ;;  %v4924_v3 = vadd.f32 %v10647_v36, %v4776_v40  ;;  %v4625_v36 = vadd.f32 %v10358_v34, %v10645_v24  ;;  %v4586_v40 = vadd.f32 %v10134_v30, %v10645_v24 }
 0x649   : > { %7220 = vmatmul.msk.f32.gmra.mxu2 %vm314_vm1, %v5530_v28  ;;  %v10687_v19 = vadd.f32 %v10612_v21, %v5217_v1  ;;  %v5351_v1 = vpop.f32.mrf.mxu0 }
 0x64b   : > { %7242 = vmatmul.msk.f32.gmra.mxu3 %vm314_vm1, %v5684_v61 }
 0x64c   : > { %7258 = vmatmul.msk.f32.gmra.mxu0 %vm314_vm1, %v5832_v41  ;;  %v5040_v13 = vpop.f32.mrf.mxu2 }
 0x64d   : > { %v5070_v6 = vadd.f32 %v5040_v13, %v4922_v14  ;;  %v4910_v61 = vpop.f32.mrf.mxu1  ;;  %v4777_v13 = vadd.f32 %v10334_v49, %v4622_v55  ;;  %v4765_v55 = vadd.f32 %v10132_v10, %v4586_v40 }
 0x64e   : > { %v5206_v5 = vpop.f32.mrf.mxu3 }
 0x64f   : > { %v5218_v21 = vadd.f32 %v10622_v46, %v5070_v6  ;;  %v5532_v46 = vld [vmem:[#allocation2 + $0x1ae] sm:$0xff]  ;;  %v5533_v6 = vld [vmem:[#allocation2 + $0x1c6] sm:$0xff]  ;;  %v4913_v30 = vadd.f32 %v10273_v62, %v4765_v55 }
 0x651   : > { %7221 = vmatmul.msk.f32.gmra.mxu2 %vm314_vm1, %v5531_v37  ;;  %v10698_v26 = vadd.f32 %v10626_v17, %v5218_v21 }
 0x654   : > { %v5043_v20 = vpop.f32.mrf.mxu2 }
 0x655   : > { %v5071_v54 = vadd.f32 %v5043_v20, %v4923_v56  ;;  %v5457_v12 = vpop.f32.mrf.mxu1  ;;  %v4778_v56 = vadd.f32 %v10369_v4, %v4625_v36 }
 0x657   : > { %v5219_v28 = vadd.f32 %v10636_v15, %v5071_v54  ;;  %v5354_v15 = vpop.f32.mrf.mxu0  ;;  %v4926_v54 = vadd.f32 %v4904_v7, %v4778_v56 }
 0x659   : > { %7222 = vmatmul.msk.f32.gmra.mxu2 %vm314_vm1, %v5532_v46  ;;  %v10707_v17 = vadd.f32 %v10643_v27, %v5219_v28  ;;  %v4925_v27 = vadd.f32 %v10667_v58, %v4777_v13  ;;  %v4628_v58 = vadd.f32 %v10391_v9, %v10645_v24  ;;  %v4631_v9 = vadd.f32 %v10420_v33, %v10645_v24 }
 0x65c   : > { %v5046_v41 = vpop.f32.mrf.mxu2 }
 0x65d   : > { %v5072_v14 = vadd.f32 %v5046_v41, %v4924_v3  ;;  %v5460_v28 = vpop.f32.mrf.mxu1  ;;  %v5535_v3 = vld [vmem:[#allocation2 + $0x1e6] sm:$0xff] }
 0x65f   : > { %v5220_v8 = vadd.f32 %v10657_v50, %v5072_v14  ;;  %v5753_v50 = vpop.f32.mrf.mxu3 }
 0x661   : > { %7223 = vmatmul.msk.f32.gmra.mxu2 %vm314_vm1, %v5533_v6  ;;  %v10716_v25 = vadd.f32 %v10660_v53, %v5220_v8  ;;  %v5901_v53 = vpop.f32.mrf.mxu0  ;;  %v4780_v8 = vadd.f32 %v10426_v22, %v4631_v9  ;;  %v5061_v6 = vadd.f32 %v10588_v47, %v4913_v30  ;;  %v11377_v22 = vld [vmem:[#allocation50_spill] sm:$0xff]  ;;  %v11382_v30 = vld [vmem:[#allocation64_spill] sm:$0xff] }
 0x662   : > { %v4592_v56 = vadd.f32 %v11377_v22, %v10645_v24 }
 0x663   : > { %v4928_v36 = vadd.f32 %v4910_v61, %v4780_v8  ;;  %v5209_v62 = vadd.f32 %v10449_v44, %v5061_v6 }
 0x664   : > { %v5049_v21 = vpop.f32.mrf.mxu2 }
 0x665   : > { %v5073_v37 = vadd.f32 %v5049_v21, %v4925_v27  ;;  %v5463_v10 = vpop.f32.mrf.mxu1  ;;  %v5536_v27 = vld [vmem:[#allocation2 + $0x1ee] sm:$0xff] }
 0x667   : > { %v5221_v49 = vadd.f32 %v10672_v59, %v5073_v37  ;;  %v4779_v59 = vadd.f32 %v10398_v23, %v4628_v58  ;;  %v5756_v7 = vpop.f32.mrf.mxu3  ;;  %v4589_v23 = vadd.f32 %v10148_v42, %v10645_v24  ;;  %v11379_v58 = vld [vmem:[#allocation49_spill] sm:$0xff] }
 0x669   : > { %7224 = vmatmul.msk.f32.gmra.mxu2 %vm314_vm1, %v5534_v2  ;;  %v10725_v20 = vadd.f32 %v10677_v32, %v5221_v49  ;;  %v4927_v41 = vadd.f32 %v4907_v29, %v4779_v59  ;;  %v5904_v14 = vpop.f32.mrf.mxu0  ;;  %v4766_v29 = vadd.f32 %v10146_v48, %v4589_v23  ;;  %v11378_v48 = vld [vmem:[#allocation61_spill] sm:$0xff] }
 0x66b   : > { %v4914_v42 = vadd.f32 %v10298_v16, %v4766_v29  ;;  %v11380_v16 = vld [vmem:[#allocation67_spill] sm:$0xff] }
 0x66c   : > { %v5052_v34 = vpop.f32.mrf.mxu2 }
 0x66d   : > { %v5074_v4 = vadd.f32 %v5052_v34, %v4926_v54  ;;  %v5357_v54 = vadd.f32 %v11378_v48, %v5209_v62  ;;  %v5466_v34 = vpop.f32.mrf.mxu1 }
 0x66f   : > { %v5222_v46 = vadd.f32 %v5200_v60, %v5074_v4  ;;  %v5759_v21 = vpop.f32.mrf.mxu3  ;;  %v5505_v40 = vadd.f32 %v5457_v12, %v5357_v54  ;;  %v11387_v54 = vld [vmem:[#allocation58_spill] sm:$0xff] }
 0x671   : > { %7225 = vmatmul.msk.f32.gmra.mxu2 %vm314_vm1, %v5535_v3  ;;  %v10734_v32 = vadd.f32 %v5348_v39, %v5222_v46  ;;  %v5907_v47 = vpop.f32.mrf.mxu0  ;;  %v11381_v46 = vld [vmem:[#allocation42_spill] sm:$0xff] }
 0x672   : > { %v4595_v3 = vadd.f32 %v11381_v46, %v10645_v24 }
 0x674   : > { %v5055_v13 = vpop.f32.mrf.mxu2 }
 0x675   : > { %v5075_v60 = vadd.f32 %v5055_v13, %v4927_v41 }
 0x677   : > { %v5223_v39 = vadd.f32 %v5203_v52, %v5075_v60  ;;  %v5062_v52 = vadd.f32 %v10600_v35, %v4914_v42  ;;  %v5762_v41 = vpop.f32.mrf.mxu3 }
 0x679   : > { %7226 = vmatmul.msk.f32.gmra.mxu2 %vm314_vm1, %v5536_v27  ;;  %v10745_v33 = vadd.f32 %v5351_v1, %v5223_v39  ;;  %v4767_v1 = vadd.f32 %v11379_v58, %v4592_v56  ;;  %v5210_v44 = vadd.f32 %v10479_v18, %v5062_v52  ;;  %v5910_v13 = vpop.f32.mrf.mxu0  ;;  %v10765_v18 = vpop.f32.mrf.mxu1  ;;  %v11383_v39 = vld [vmem:[#allocation57_spill] sm:$0xff] }
 0x67b   : > { %v4915_v59 = vadd.f32 %v11380_v16, %v4767_v1  ;;  %v5358_v9 = vadd.f32 %v10492_v31, %v5210_v44 }
 0x67c   : > { %v5058_v37 = vpop.f32.mrf.mxu2 }
 0x67d   : > { %v5076_v49 = vadd.f32 %v5058_v37, %v4928_v36  ;;  %v5063_v35 = vadd.f32 %v10606_v51, %v4915_v59  ;;  %v5506_v8 = vadd.f32 %v5460_v28, %v5358_v9  ;;  %v11384_v51 = vld [vmem:[#allocation45_spill] sm:$0xff]  ;;  %v11385_v28 = vld [vmem:[#allocation51_spill] sm:$0xff] }
 0x67f   : > { %v5224_v2 = vadd.f32 %v5206_v5, %v5076_v49  ;;  %v5211_v12 = vadd.f32 %v10507_v63, %v5063_v35  ;;  %v10777_v62 = vpop.f32.mrf.mxu3 }
 0x681   : > { %v10754_v61 = vadd.f32 %v5354_v15, %v5224_v2  ;;  %v4768_v15 = vadd.f32 %v11382_v30, %v4595_v3  ;;  %v5359_v63 = vadd.f32 %v10512_v45, %v5211_v12  ;;  %v10782_v22 = vpop.f32.mrf.mxu0  ;;  %v10789_v1 = vpop.f32.mrf.mxu1  ;;  %v11389_v3 = vld [vmem:[#allocation27_spill] sm:$0xff]  ;;  %v11390_v30 = vld [vmem:[#allocation14_spill] sm:$0xff] }
 0x683   : > { %v4916_v27 = vadd.f32 %v11383_v39, %v4768_v15  ;;  %v5507_v2 = vadd.f32 %v5463_v10, %v5359_v63 }
 0x684   : > { %v5605_v4 = vpop.f32.mrf.mxu2 }
 0x685   : > { %v5653_v55 = vadd.f32 %v5605_v4, %v5505_v40  ;;  %v5064_v29 = vadd.f32 %v10616_v43, %v4916_v27  ;;  %v11386_v43 = vld [vmem:[#allocation53_spill] sm:$0xff]  ;;  %v11388_v4 = vld [vmem:[#allocation52_spill] sm:$0xff] }
 0x687   : > { %v5801_v5 = vadd.f32 %v5753_v50, %v5653_v55  ;;  %v4598_v50 = vadd.f32 %v11384_v51, %v10645_v24  ;;  %v5212_v49 = vadd.f32 %v10527_v0, %v5064_v29  ;;  %v10796_v59 = vpop.f32.mrf.mxu3 }
 0x689   : > { %v10763_v23 = vadd.f32 %v5901_v53, %v5801_v5  ;;  %v7276_v53 = vld [vmem:[%s11090_s5 + $0x28] sm:$0xff]  ;;  %v4769_v37 = vadd.f32 %v11385_v28, %v4598_v50  ;;  %v5360_v0 = vadd.f32 %v10531_v11, %v5212_v49  ;;  %v10803_v12 = vpop.f32.mrf.mxu0  ;;  %v10806_v27 = vpop.f32.mrf.mxu1 }
 0x68a   : > { %6431 = vmatpush.msra.mxu1 %v7276_v53  ;;  %v11394_v53 = vld [vmem:[#allocation66_spill] sm:$0xff] }
 0x68b   : > { %v7259_v60 = vmul.f32 -1.442695, %v10763_v23  ;;  %v4917_v58 = vadd.f32 %v11387_v54, %v4769_v37  ;;  %v5508_v5 = vadd.f32 %v5466_v34, %v5360_v0  ;;  %v11393_v34 = vld [vmem:[#allocation33_spill] sm:$0xff]  ;;  %v11395_v37 = vld [vmem:[#allocation35_spill] sm:$0xff] }
 0x68c   : > { %v5608_v6 = vpop.f32.mrf.mxu2 }
 0x68d   : > { %7552 = vpow2.f32 %v7259_v60  ;;  %v5654_v31 = vadd.f32 %v5608_v6, %v5506_v8  ;;  %v5065_v44 = vadd.f32 %v10628_v38, %v4917_v58  ;;  %v11391_v38 = vld [vmem:[#allocation13_spill] sm:$0xff] }
 0x68e   : > { %v11392_v6 = vld [vmem:[#allocation9_spill] sm:$0xff] }
 0x68f   : > { %v5802_v36 = vadd.f32 %v5756_v7, %v5654_v31  ;;  %v4601_v7 = vadd.f32 %v11386_v43, %v10645_v24  ;;  %v5213_v55 = vadd.f32 %v11389_v3, %v5065_v44  ;;  %v10816_v54 = vpop.f32.mrf.mxu3 }
 0x691   : > { %v10780_v42 = vadd.f32 %v5904_v14, %v5802_v36  ;;  %v4770_v16 = vadd.f32 %v11388_v4, %v4601_v7  ;;  %v5361_v50 = vadd.f32 %v11393_v34, %v5213_v55  ;;  %v11396_v7 = vld [vmem:[#allocation48_spill] sm:$0xff]  ;;  %v10820_v4 = vpop.f32.mrf.mxu0 }
 0x693   : > { %v7553_v56 = vpop.eup %7552  ;;  %v7260_v52 = vmul.f32 -1.442695, %v10780_v42  ;;  %v4918_v15 = vadd.f32 %v11390_v30, %v4770_v16 }
 0x694   : > { %v6029_v48 = vadd.f32 1.0, %v7553_v56  ;;  %v5611_v45 = vpop.f32.mrf.mxu2 }
 0x695   : > { %7554 = vpow2.f32 %v7260_v52  ;;  %v5655_v14 = vadd.f32 %v5611_v45, %v5507_v2  ;;  %v5066_v39 = vadd.f32 %v11392_v6, %v4918_v15  ;;  %v5509_v2 = vadd.f32 %v10765_v18, %v5361_v50  ;;  %v10827_v15 = vpop.f32.mrf.mxu1 }
 0x696   : > { %7556 = vrcp.f32 %v6029_v48  ;;  %v6054_v36 = vand.u32 2147483647, %v6029_v48  ;;  %vm6050_vm12 = vweird.f32 %v6029_v48 }
 0x697   : > { %v5803_v40 = vadd.f32 %v5759_v21, %v5655_v14  ;;  %v4604_v21 = vadd.f32 %v11391_v38, %v10645_v24  ;;  %v6056_v24 = vand.u32 2147483648, %v6029_v48  ;;  %v5214_v56 = vadd.f32 %v11395_v37, %v5066_v39 }
 0x698   : > { %vm6055_vm14 = vcmp.eq.f32.partialorder %v6054_v36, 8.507059e+37 }
 0x699   : > { %v10794_v10 = vadd.f32 %v5907_v47, %v5803_v40  ;;  %v4771_v29 = vadd.f32 %v11394_v53, %v4604_v21  ;;  %v6057_v14 = vor.u32 1.1754944e-38, %v6056_v24  ;;  %v11400_v24 = vld [vmem:[#allocation40_spill] sm:$0xff]  ;;  %v5922_v37 = vpop.f32.mrf.mxu0 }
 0x69b   : > { %v7555_v46 = vpop.eup %7554  ;;  %v7261_v35 = vmul.f32 -1.442695, %v10794_v10  ;;  %v4919_v45 = vadd.f32 %v11396_v7, %v4771_v29  ;;  %v5774_v29 = vpop.f32.mrf.mxu3 }
 0x69c   : > { %v7557_v9 = vpop.eup %7556  ;;  %v6030_v11 = vadd.f32 1.0, %v7555_v46  ;;  %v5614_v60 = vpop.f32.mrf.mxu2  ;;  %v11398_v46 = vld [vmem:[#allocation11_spill] sm:$0xff] }
 0x69d   : > { %7558 = vpow2.f32 %v7261_v35  ;;  %v5656_v47 = vadd.f32 %v5614_v60, %v5508_v5  ;;  %v6046_v8 = vmul.f32 %v7557_v9, %v6029_v48  ;;  %vm6051_vm11 = vweird.f32 %v7557_v9  ;;  %v11397_v48 = vld [vmem:[#allocation29_spill] sm:$0xff] }
 0x69e   : > { %7560 = vrcp.f32 %v6030_v11  ;;  %vm6052_vm13 = vmor %vm6050_vm12, %vm6051_vm11  ;;  %v5362_v16 = vadd.f32 %v11397_v48, %v5214_v56  ;;  %v5067_v3 = vadd.f32 %v11398_v46, %v4919_v45  ;;  %v6069_v5 = vand.u32 2147483647, %v6030_v11 }
 0x69f   : > { %v5804_v51 = vadd.f32 %v5762_v41, %v5656_v47  ;;  %v6047_v31 = vsub.f32 1.0, %v6046_v8  ;;  %v6071_v30 = vand.u32 2147483648, %v6030_v11  ;;  %v11399_v47 = vld [vmem:[#allocation39_spill] sm:$0xff]  ;;  %vm6065_vm0 = vweird.f32 %v6030_v11 }
 0x6a0   : > { %v5510_v21 = vadd.f32 %v10789_v1, %v5362_v16  ;;  %v5215_v8 = vadd.f32 %v11399_v47, %v5067_v3  ;;  %vm6070_vm3 = vcmp.eq.f32.partialorder %v6069_v5, 8.507059e+37 }
 0x6a1   : > { %v10810_v63 = vadd.f32 %v5910_v13, %v5804_v51  ;;  %v6048_v28 = vmul.f32 %v7557_v9, %v6047_v31  ;;  %v6072_v50 = vor.u32 1.1754944e-38, %v6071_v30  ;;  %v5925_v5 = vpop.f32.mrf.mxu0 }
 0x6a3   : > { %v7559_v49 = vpop.eup %7558  ;;  %v7262_v52 = vmul.f32 -1.442695, %v10810_v63  ;;  %v6049_v43 = vadd.f32 %v7557_v9, %v6048_v28  ;;  %v5777_v46 = vpop.f32.mrf.mxu3 }
 0x6a4   : > { %v7561_v41 = vpop.eup %7560  ;;  %v10818_v58 = vadd.f32 1.0, %v7559_v49  ;;  %v5617_v13 = vpop.f32.mrf.mxu2 }
 0x6a5   : > { %7562 = vpow2.f32 %v7262_v52  ;;  %v5657_v44 = vadd.f32 %v5617_v13, %v5509_v2  ;;  %v6053_v40 = vsel %vm6052_vm13, %v7557_v9, %v6049_v43  ;;  %v6061_v0 = vmul.f32 %v7561_v41, %v6030_v11 }
 0x6a6   : > { %7564 = vrcp.f32 %v10818_v58  ;;  %v6058_v18 = vsel %vm6055_vm14, %v6057_v14, %v6053_v40  ;;  %vm6066_vm15 = vweird.f32 %v7561_v41  ;;  %v5363_v11 = vadd.f32 %v11400_v24, %v5215_v8 }
 0x6a7   : > { %v5805_v55 = vadd.f32 %v10777_v62, %v5657_v44  ;;  %6301 = vrot.lane.b32.xlu2 %v6058_v18, %s7785_s29  ;;  %v6062_v35 = vsub.f32 1.0, %v6061_v0  ;;  %vm6067_vm2 = vmor %vm6065_vm0, %vm6066_vm15  ;;  %v6084_v56 = vand.u32 2147483647, %v10818_v58  ;;  %v6086_v49 = vand.u32 2147483648, %v10818_v58 }
 0x6a8   : > { %vm6080_vm5 = vweird.f32 %v10818_v58 }
 0x6a9   : > { %v10830_v9 = vadd.f32 %v10782_v22, %v5805_v55  ;;  %v6063_v38 = vmul.f32 %v7561_v41, %v6062_v35  ;;  %vm6085_vm7 = vcmp.eq.f32.partialorder %v6084_v56, 8.507059e+37  ;;  %v6087_v40 = vor.u32 1.1754944e-38, %v6086_v49  ;;  %v5928_v49 = vpop.f32.mrf.mxu0 }
 0x6ab   : > { %v7563_v60 = vpop.eup %7562  ;;  %v7263_v6 = vmul.f32 -1.442695, %v10830_v9  ;;  %v6064_v62 = vadd.f32 %v7561_v41, %v6063_v38 }
 0x6ac   : > { %v7565_v39 = vpop.eup %7564  ;;  %v6032_v51 = vadd.f32 1.0, %v7563_v60  ;;  %v5620_v34 = vpop.f32.mrf.mxu2 }
 0x6ad   : > { %7566 = vpow2.f32 %v7263_v6  ;;  %v5658_v22 = vadd.f32 %v5620_v34, %v5510_v21  ;;  %v6068_v31 = vsel %vm6067_vm2, %v7561_v41, %v6064_v62  ;;  %v6076_v53 = vmul.f32 %v7565_v39, %v10818_v58  ;;  %v5481_v41 = vpop.f32.mrf.mxu1 }
 0x6ae   : > { %7568 = vrcp.f32 %v6032_v51  ;;  %v6073_v1 = vsel %vm6070_vm3, %v6072_v50, %v6068_v31  ;;  %vm6081_vm4 = vweird.f32 %v7565_v39  ;;  %v6099_v3 = vand.u32 2147483647, %v6032_v51 }
 0x6af   : > { %v5806_v36 = vadd.f32 %v10796_v59, %v5658_v22  ;;  %6303 = vrot.lane.b32.xlu0 %v6073_v1, %s7785_s29  ;;  %v6077_v28 = vsub.f32 1.0, %v6076_v53  ;;  %v5511_v59 = vadd.f32 %v10806_v27, %v5363_v11  ;;  %vm6082_vm6 = vmor %vm6080_vm5, %vm6081_vm4  ;;  %v6101_v58 = vand.u32 2147483648, %v6032_v51  ;;  %v5780_v1 = vpop.f32.mrf.mxu3 }
 0x6b0   : > { %v5512_v21 = vadd.f32 %v10827_v15, %v10675_v57  ;;  %vm6095_vm9 = vweird.f32 %v6032_v51  ;;  %vm6100_vm11 = vcmp.eq.f32.partialorder %v6099_v3, 8.507059e+37  ;;  %v5513_v11 = vadd.f32 %v5481_v41, %v10687_v19 }
 0x6b1   : > { %v10842_v52 = vadd.f32 %v10803_v12, %v5806_v36  ;;  %v6078_v2 = vmul.f32 %v7565_v39, %v6077_v28  ;;  %v6102_v6 = vor.u32 1.1754944e-38, %v6101_v58 }
 0x6b3   : > { %v7567_v43 = vpop.eup %7566  ;;  %v7264_v7 = vmul.f32 -1.442695, %v10842_v52  ;;  %v6079_v45 = vadd.f32 %v7565_v39, %v6078_v2 }
 0x6b4   : > { %v7569_v13 = vpop.eup %7568  ;;  %v6033_v14 = vadd.f32 1.0, %v7567_v43  ;;  %v5623_v44 = vpop.f32.mrf.mxu2 }
 0x6b5   : > { %7570 = vpow2.f32 %v7264_v7  ;;  %v5659_v12 = vadd.f32 %v5623_v44, %v5511_v59  ;;  %v6083_v0 = vsel %vm6082_vm6, %v7565_v39, %v6079_v45  ;;  %v6091_v18 = vmul.f32 %v7569_v13, %v6032_v51  ;;  %v5484_v62 = vpop.f32.mrf.mxu1 }
 0x6b6   : > { %7572 = vrcp.f32 %v6033_v14  ;;  %v6088_v48 = vsel %vm6085_vm7, %v6087_v40, %v6083_v0  ;;  %vm6096_vm8 = vweird.f32 %v7569_v13  ;;  %v6114_v57 = vand.u32 2147483647, %v6033_v14 }
 0x6b7   : > { %v5807_v16 = vadd.f32 %v10816_v54, %v5659_v12  ;;  %6305 = vrot.lane.b32.xlu1 %v6088_v48, %s7785_s29  ;;  %v6092_v27 = vsub.f32 1.0, %v6091_v18  ;;  %vm6097_vm10 = vmor %vm6095_vm9, %vm6096_vm8  ;;  %v6116_v15 = vand.u32 2147483648, %v6033_v14  ;;  %vm6110_vm13 = vweird.f32 %v6033_v14  ;;  %v5783_v3 = vpop.f32.mrf.mxu3 }
 0x6b8   : > { %vm6115_vm15 = vcmp.eq.f32.partialorder %v6114_v57, 8.507059e+37  ;;  %v5514_v48 = vadd.f32 %v5484_v62, %v10698_v26  ;;  %v7275_v26 = vld [vmem:[%s11090_s5 + $0x20] sm:$0xff] }
 0x6b9   : > { %v10850_v55 = vadd.f32 %v10820_v4, %v5807_v16  ;;  %v6093_v35 = vmul.f32 %v7569_v13, %v6092_v27  ;;  %v6117_v43 = vor.u32 1.1754944e-38, %v6116_v15  ;;  %6432 = vmatpush.msra.mxu1 %v7275_v26 }
 0x6bb   : > { %v7571_v30 = vpop.eup %7570  ;;  %v7265_v38 = vmul.f32 -1.442695, %v10850_v55  ;;  %v6094_v60 = vadd.f32 %v7569_v13, %v6093_v35 }
 0x6bc   : > { %v7573_v54 = vpop.eup %7572  ;;  %v6034_v47 = vadd.f32 1.0, %v7571_v30  ;;  %v5626_v8 = vpop.f32.mrf.mxu2 }
 0x6bd   : > { %7574 = vpow2.f32 %v7265_v38  ;;  %v5660_v4 = vadd.f32 %v5626_v8, %v5512_v21  ;;  %v6098_v39 = vsel %vm6097_vm10, %v7569_v13, %v6094_v60  ;;  %v6106_v34 = vmul.f32 %v7573_v54, %v6033_v14  ;;  %v5487_v13 = vpop.f32.mrf.mxu1  ;;  %v5931_v21 = vpop.f32.mrf.mxu0 }
 0x6be   : > { %7576 = vrcp.f32 %v6034_v47  ;;  %v6103_v50 = vsel %vm6100_vm11, %v6102_v6, %v6098_v39  ;;  %vm6111_vm12 = vweird.f32 %v7573_v54  ;;  %v6129_v41 = vand.u32 2147483647, %v6034_v47 }
 0x6bf   : > { %v5808_v22 = vadd.f32 %v5774_v29, %v5660_v4  ;;  %6307 = vrot.lane.b32.xlu2 %v6103_v50, %s7785_s29  ;;  %v6107_v31 = vsub.f32 1.0, %v6106_v34  ;;  %vm6112_vm14 = vmor %vm6110_vm13, %vm6111_vm12  ;;  %v6131_v14 = vand.u32 2147483648, %v6034_v47  ;;  %vm6125_vm2 = vweird.f32 %v6034_v47 }
 0x6c0   : > { %vm6130_vm4 = vcmp.eq.f32.partialorder %v6129_v41, 8.507059e+37 }
 0x6c1   : > { %v10856_v51 = vadd.f32 %v5922_v37, %v5808_v22  ;;  %v6108_v53 = vmul.f32 %v7573_v54, %v6107_v31  ;;  %v6132_v35 = vor.u32 1.1754944e-38, %v6131_v14  ;;  %v5515_v22 = vadd.f32 %v5487_v13, %v10707_v17 }
 0x6c3   : > { %v7575_v36 = vpop.eup %7574  ;;  %v7266_v24 = vmul.f32 -1.442695, %v10856_v51  ;;  %v6109_v28 = vadd.f32 %v7573_v54, %v6108_v53 }
 0x6c4   : > { %v7577_v56 = vpop.eup %7576  ;;  %v6035_v29 = vadd.f32 1.0, %v7575_v36  ;;  %v5629_v2 = vpop.f32.mrf.mxu2 }
 0x6c5   : > { %7578 = vpow2.f32 %v7266_v24  ;;  %v5661_v37 = vadd.f32 %v5629_v2, %v5513_v11  ;;  %v6113_v7 = vsel %vm6112_vm14, %v7573_v54, %v6109_v28  ;;  %v6121_v59 = vmul.f32 %v7577_v56, %v6034_v47  ;;  %v5490_v62 = vpop.f32.mrf.mxu1  ;;  %v5786_v28 = vpop.f32.mrf.mxu3 }
 0x6c6   : > { %7580 = vrcp.f32 %v6035_v29  ;;  %v6118_v45 = vsel %vm6115_vm15, %v6117_v43, %v6113_v7  ;;  %vm6126_vm0 = vweird.f32 %v7577_v56  ;;  %v6144_v8 = vand.u32 2147483647, %v6035_v29  ;;  %v5934_v17 = vpop.f32.mrf.mxu0 }
 0x6c7   : > { %v5809_v44 = vadd.f32 %v5777_v46, %v5661_v37  ;;  %6309 = vrot.lane.b32.xlu0 %v6118_v45, %s7785_s29  ;;  %v6122_v19 = vsub.f32 1.0, %v6121_v59  ;;  %vm6127_vm3 = vmor %vm6125_vm2, %vm6126_vm0  ;;  %v6146_v6 = vand.u32 2147483648, %v6035_v29  ;;  %vm6140_vm6 = vweird.f32 %v6035_v29 }
 0x6c8   : > { %vm6145_vm8 = vcmp.eq.f32.partialorder %v6144_v8, 8.507059e+37 }
 0x6c9   : > { %v10861_v40 = vadd.f32 %v5925_v5, %v5809_v44  ;;  %v6123_v12 = vmul.f32 %v7577_v56, %v6122_v19  ;;  %v5516_v44 = vadd.f32 %v5490_v62, %v10716_v25 }
 0x6cb   : > { %v7579_v0 = vpop.eup %7578  ;;  %v7267_v18 = vmul.f32 -1.442695, %v10861_v40  ;;  %v6124_v16 = vadd.f32 %v7577_v56, %v6123_v12 }
 0x6cc   : > { %v7581_v27 = vpop.eup %7580  ;;  %v6036_v58 = vadd.f32 1.0, %v7579_v0  ;;  %v5632_v46 = vpop.f32.mrf.mxu2 }
 0x6cd   : > { %7582 = vpow2.f32 %v7267_v18  ;;  %v5662_v30 = vadd.f32 %v5632_v46, %v5514_v48  ;;  %v6128_v5 = vsel %vm6127_vm3, %v7577_v56, %v6124_v16  ;;  %v6136_v38 = vmul.f32 %v7581_v27, %v6035_v29  ;;  %v5493_v45 = vpop.f32.mrf.mxu1 }
 0x6ce   : > { %7584 = vrcp.f32 %v6036_v58  ;;  %v6133_v60 = vsel %vm6130_vm4, %v6132_v35, %v6128_v5  ;;  %vm6141_vm5 = vweird.f32 %v7581_v27  ;;  %v6159_v43 = vand.u32 2147483647, %v6036_v58  ;;  %v5789_v35 = vpop.f32.mrf.mxu3 }
 0x6cf   : > { %v5810_v54 = vadd.f32 %v5780_v1, %v5662_v30  ;;  %6311 = vrot.lane.b32.xlu1 %v6133_v60, %s7785_s29  ;;  %v6137_v47 = vsub.f32 1.0, %v6136_v38  ;;  %vm6142_vm7 = vmor %vm6140_vm6, %vm6141_vm5  ;;  %v6147_v1 = vor.u32 1.1754944e-38, %v6146_v6  ;;  %v6161_v29 = vand.u32 2147483648, %v6036_v58  ;;  %v5937_v38 = vpop.f32.mrf.mxu0 }
 0x6d0   : > { %vm6155_vm10 = vweird.f32 %v6036_v58  ;;  %vm6160_vm12 = vcmp.eq.f32.partialorder %v6159_v43, 8.507059e+37  ;;  %v5517_v26 = vadd.f32 %v5493_v45, %v10725_v20 }
 0x6d1   : > { %v10869_v4 = vadd.f32 %v5928_v49, %v5810_v54  ;;  %v6138_v39 = vmul.f32 %v7581_v27, %v6137_v47  ;;  %v6162_v0 = vor.u32 1.1754944e-38, %v6161_v29 }
 0x6d3   : > { %v7583_v34 = vpop.eup %7582  ;;  %v7268_v50 = vmul.f32 -1.442695, %v10869_v4  ;;  %v6139_v31 = vadd.f32 %v7581_v27, %v6138_v39 }
 0x6d4   : > { %v7585_v57 = vpop.eup %7584  ;;  %v6037_v15 = vadd.f32 1.0, %v7583_v34  ;;  %v5635_v53 = vpop.f32.mrf.mxu2 }
 0x6d5   : > { %7586 = vpow2.f32 %v7268_v50  ;;  %v5663_v36 = vadd.f32 %v5635_v53, %v5515_v22  ;;  %v6143_v24 = vsel %vm6142_vm7, %v7581_v27, %v6139_v31  ;;  %v6151_v11 = vmul.f32 %v7585_v57, %v6036_v58  ;;  %v5496_v39 = vpop.f32.mrf.mxu1 }
 0x6d6   : > { %7588 = vrcp.f32 %v6037_v15  ;;  %v6148_v56 = vsel %vm6145_vm8, %v6147_v1, %v6143_v24  ;;  %vm6156_vm9 = vweird.f32 %v7585_v57  ;;  %v6174_v25 = vand.u32 2147483647, %v6037_v15  ;;  %v5792_v24 = vpop.f32.mrf.mxu3 }
 0x6d7   : > { %v5811_v49 = vadd.f32 %v5783_v3, %v5663_v36  ;;  %6313 = vrot.lane.b32.xlu2 %v6148_v56, %s7785_s29  ;;  %v6152_v2 = vsub.f32 1.0, %v6151_v11  ;;  %vm6157_vm11 = vmor %vm6155_vm10, %vm6156_vm9  ;;  %v6176_v30 = vand.u32 2147483648, %v6037_v15  ;;  %vm6170_vm14 = vweird.f32 %v6037_v15 }
 0x6d8   : > { %vm6175_vm0 = vcmp.eq.f32.partialorder %v6174_v25, 8.507059e+37  ;;  %v5518_v56 = vadd.f32 %v5496_v39, %v10734_v32 }
 0x6d9   : > { %v10874_v37 = vadd.f32 %v5931_v21, %v5811_v49  ;;  %v6153_v7 = vmul.f32 %v7585_v57, %v6152_v2  ;;  %v6177_v62 = vor.u32 1.1754944e-38, %v6176_v30 }
 0x6db   : > { %v7587_v59 = vpop.eup %7586  ;;  %v7269_v13 = vmul.f32 -1.442695, %v10874_v37  ;;  %v6154_v19 = vadd.f32 %v7585_v57, %v6153_v7 }
 0x6dc   : > { %v7589_v41 = vpop.eup %7588  ;;  %v6038_v14 = vadd.f32 1.0, %v7587_v59  ;;  %v5638_v12 = vpop.f32.mrf.mxu2 }
 0x6dd   : > { %7590 = vpow2.f32 %v7269_v13  ;;  %v5664_v18 = vadd.f32 %v5638_v12, %v5516_v44  ;;  %v6158_v48 = vsel %vm6157_vm11, %v7585_v57, %v6154_v19  ;;  %v6166_v16 = vmul.f32 %v7589_v41, %v6037_v15  ;;  %v5499_v19 = vpop.f32.mrf.mxu1 }
 0x6de   : > { %7592 = vrcp.f32 %v6038_v14  ;;  %v6163_v27 = vsel %vm6160_vm12, %v6162_v0, %v6158_v48  ;;  %vm6171_vm13 = vweird.f32 %v7589_v41  ;;  %v6189_v20 = vand.u32 2147483647, %v6038_v14 }
 0x6df   : > { %v5812_v3 = vadd.f32 %v5786_v28, %v5664_v18  ;;  %6315 = vrot.lane.b32.xlu0 %v6163_v27, %s7785_s29  ;;  %v6167_v46 = vsub.f32 1.0, %v6166_v16  ;;  %vm6172_vm15 = vmor %vm6170_vm14, %vm6171_vm13  ;;  %v6191_v1 = vand.u32 2147483648, %v6038_v14  ;;  %vm6185_vm3 = vweird.f32 %v6038_v14 }
 0x6e0   : > { %vm6190_vm5 = vcmp.eq.f32.partialorder %v6189_v20, 8.507059e+37  ;;  %v5519_v27 = vadd.f32 %v5499_v19, %v10745_v33 }
 0x6e1   : > { %v10879_v58 = vadd.f32 %v5934_v17, %v5812_v3  ;;  %v6168_v5 = vmul.f32 %v7589_v41, %v6167_v46  ;;  %v5940_v17 = vpop.f32.mrf.mxu0  ;;  %v6192_v7 = vor.u32 1.1754944e-38, %v6191_v1 }
 0x6e3   : > { %v7591_v21 = vpop.eup %7590  ;;  %v7270_v60 = vmul.f32 -1.442695, %v10879_v58  ;;  %v6169_v54 = vadd.f32 %v7589_v41, %v6168_v5 }
 0x6e4   : > { %v7593_v47 = vpop.eup %7592  ;;  %v6039_v8 = vadd.f32 1.0, %v7591_v21  ;;  %v5641_v6 = vpop.f32.mrf.mxu2 }
 0x6e5   : > { %7594 = vpow2.f32 %v7270_v60  ;;  %v5665_v34 = vadd.f32 %v5641_v6, %v5517_v26  ;;  %v6173_v50 = vsel %vm6172_vm15, %v7589_v41, %v6169_v54  ;;  %v6181_v22 = vmul.f32 %v7593_v47, %v6038_v14 }
 0x6e6   : > { %7596 = vrcp.f32 %v6039_v8  ;;  %v6178_v31 = vsel %vm6175_vm0, %v6177_v62, %v6173_v50  ;;  %vm6186_vm2 = vweird.f32 %v7593_v47  ;;  %v6204_v12 = vand.u32 2147483647, %v6039_v8  ;;  %v5502_v62 = vpop.f32.mrf.mxu1 }
 0x6e7   : > { %v5813_v57 = vadd.f32 %v5789_v35, %v5665_v34  ;;  %6317 = vrot.lane.b32.xlu1 %v6178_v31, %s7785_s29  ;;  %v6182_v53 = vsub.f32 1.0, %v6181_v22  ;;  %vm6187_vm4 = vmor %vm6185_vm3, %vm6186_vm2  ;;  %v6206_v14 = vand.u32 2147483648, %v6039_v8  ;;  %vm6200_vm7 = vweird.f32 %v6039_v8  ;;  %v5795_v35 = vpop.f32.mrf.mxu3 }
 0x6e8   : > { %vm6205_vm9 = vcmp.eq.f32.partialorder %v6204_v12, 8.507059e+37  ;;  %v5520_v50 = vadd.f32 %v5502_v62, %v10754_v61 }
 0x6e9   : > { %v10884_v15 = vadd.f32 %v5937_v38, %v5813_v57  ;;  %v6183_v36 = vmul.f32 %v7593_v47, %v6182_v53  ;;  %v6207_v5 = vor.u32 1.1754944e-38, %v6206_v14  ;;  %v5943_v26 = vpop.f32.mrf.mxu0 }
 0x6eb   : > { %v7595_v11 = vpop.eup %7594  ;;  %v7271_v28 = vmul.f32 -1.442695, %v10884_v15  ;;  %v6184_v49 = vadd.f32 %v7593_v47, %v6183_v36 }
 0x6ec   : > { %v7597_v2 = vpop.eup %7596  ;;  %v6040_v43 = vadd.f32 1.0, %v7595_v11  ;;  %v5644_v29 = vpop.f32.mrf.mxu2 }
 0x6ed   : > { %7598 = vpow2.f32 %v7271_v28  ;;  %v5666_v59 = vadd.f32 %v5644_v29, %v5518_v56  ;;  %v6188_v45 = vsel %vm6187_vm4, %v7593_v47, %v6184_v49  ;;  %v6196_v13 = vmul.f32 %v7597_v2, %v6039_v8 }
 0x6ee   : > { %7600 = vrcp.f32 %v6040_v43  ;;  %v6193_v44 = vsel %vm6190_vm5, %v6192_v7, %v6188_v45  ;;  %vm6201_vm6 = vweird.f32 %v7597_v2  ;;  %v6219_v8 = vand.u32 2147483647, %v6040_v43 }
 0x6ef   : > { %v5814_v41 = vadd.f32 %v5792_v24, %v5666_v59  ;;  %6319 = vrot.lane.b32.xlu2 %v6193_v44, %s7785_s29  ;;  %v6197_v32 = vsub.f32 1.0, %v6196_v13  ;;  %vm6202_vm8 = vmor %vm6200_vm7, %vm6201_vm6  ;;  %v6221_v6 = vand.u32 2147483648, %v6040_v43  ;;  %vm6215_vm11 = vweird.f32 %v6040_v43  ;;  %v5798_v56 = vpop.f32.mrf.mxu3 }
 0x6f0   : > { %vm6220_vm13 = vcmp.eq.f32.partialorder %v6219_v8, 8.507059e+37 }
 0x6f1   : > { %v10889_v0 = vadd.f32 %v5940_v17, %v5814_v41  ;;  %v6198_v18 = vmul.f32 %v7597_v2, %v6197_v32  ;;  %v6222_v36 = vor.u32 1.1754944e-38, %v6221_v6 }
 0x6f3   : > { %v7599_v48 = vpop.eup %7598  ;;  %v7272_v16 = vmul.f32 -1.442695, %v10889_v0  ;;  %v6199_v3 = vadd.f32 %v7597_v2, %v6198_v18 }
 0x6f4   : > { %v7601_v46 = vpop.eup %7600  ;;  %v10893_v25 = vadd.f32 1.0, %v7599_v48  ;;  %v5647_v30 = vpop.f32.mrf.mxu2 }
 0x6f5   : > { %7602 = vpow2.f32 %v7272_v16  ;;  %v5667_v38 = vadd.f32 %v5647_v30, %v5519_v27  ;;  %v6203_v21 = vsel %vm6202_vm8, %v7597_v2, %v6199_v3  ;;  %v6211_v60 = vmul.f32 %v7601_v46, %v6040_v43  ;;  %v5946_v2 = vpop.f32.mrf.mxu0 }
 0x6f6   : > { %7604 = vrcp.f32 %v10893_v25  ;;  %v6208_v54 = vsel %vm6205_vm9, %v6207_v5, %v6203_v21  ;;  %vm6216_vm10 = vweird.f32 %v7601_v46  ;;  %v6236_v17 = vand.u32 2147483648, %v10893_v25 }
 0x6f7   : > { %v5815_v47 = vadd.f32 %v5795_v35, %v5667_v38  ;;  %6321 = vrot.lane.b32.xlu0 %v6208_v54, %s7785_s29  ;;  %v6212_v33 = vsub.f32 1.0, %v6211_v60  ;;  %7606 = vtanh.f32 %v10763_v23  ;;  %vm6217_vm12 = vmor %vm6215_vm11, %vm6216_vm10  ;;  %v6234_v45 = vand.u32 2147483647, %v10893_v25 }
 0x6f8   : > { %vm6230_vm15 = vweird.f32 %v10893_v25  ;;  %v6237_v14 = vor.u32 1.1754944e-38, %v6236_v17 }
 0x6f9   : > { %v10897_v39 = vadd.f32 %v5943_v26, %v5815_v47  ;;  %v6213_v34 = vmul.f32 %v7601_v46, %v6212_v33  ;;  %vm6235_vm2 = vcmp.eq.f32.partialorder %v6234_v45, 8.507059e+37 }
 0x6fb   : > { %v7603_v22 = vpop.eup %7602  ;;  %v7273_v31 = vmul.f32 -1.442695, %v10897_v39  ;;  %v6214_v57 = vadd.f32 %v7601_v46, %v6213_v34 }
 0x6fc   : > { %v7605_v53 = vpop.eup %7604  ;;  %v6042_v20 = vadd.f32 1.0, %v7603_v22  ;;  %v5650_v1 = vpop.f32.mrf.mxu2 }
 0x6fd   : > { %7608 = vpow2.f32 %v7273_v31  ;;  %v5668_v24 = vadd.f32 %v5650_v1, %v5520_v50  ;;  %v6218_v11 = vsel %vm6217_vm12, %v7601_v46, %v6214_v57  ;;  %v6226_v28 = vmul.f32 %v7605_v53, %v10893_v25  ;;  %v7607_v43 = vpop.eup %7606 }
 0x6fe   : > { %7610 = vrcp.f32 %v6042_v20  ;;  %v6223_v61 = vsel %vm6220_vm13, %v6222_v36, %v6218_v11  ;;  %vm6231_vm14 = vweird.f32 %v7605_v53  ;;  %v6251_v3 = vand.u32 2147483648, %v6042_v20 }
 0x6ff   : > { %v5816_v49 = vadd.f32 %v5798_v56, %v5668_v24  ;;  %6323 = vrot.lane.b32.xlu1 %v6223_v61, %s7785_s29  ;;  %v6227_v23 = vsub.f32 1.0, %v6226_v28  ;;  %vm6232_vm0 = vmor %vm6230_vm15, %vm6231_vm14  ;;  %v6249_v35 = vand.u32 2147483647, %v6042_v20  ;;  %vm6245_vm4 = vweird.f32 %v6042_v20 }
 0x700   : > { %v6252_v21 = vor.u32 1.1754944e-38, %v6251_v3 }
 0x701   : > { %v10905_v29 = vadd.f32 %v5946_v2, %v5816_v49  ;;  %v6302_v7 = vpop.permute.xlu2 %6301  ;;  %v6228_v59 = vmul.f32 %v7605_v53, %v6227_v23  ;;  %vm6250_vm6 = vcmp.eq.f32.partialorder %v6249_v35, 8.507059e+37 }
 0x702   : > { %v6349_v13 = vmul.f32 %v7607_v43, %v6302_v7 }
 0x703   : > { %v7609_v44 = vpop.eup %7608  ;;  %v7274_v19 = vmul.f32 -1.442695, %v10905_v29  ;;  %v6229_v41 = vadd.f32 %v7605_v53, %v6228_v59 }
 0x704   : > { %v7611_v32 = vpop.eup %7610  ;;  %v6043_v12 = vadd.f32 1.0, %v7609_v44  ;;  %7277 = vmatmul.msk.f32.vlgmr.msra.gmra.mxu1 %vm314_vm1, %v6349_v13 }
 0x705   : > { %7612 = vpow2.f32 %v7274_v19  ;;  %v6233_v18 = vsel %vm6232_vm0, %v7605_v53, %v6229_v41  ;;  %v6241_v48 = vmul.f32 %v7611_v32, %v6042_v20  ;;  %vm6246_vm3 = vweird.f32 %v7611_v32 }
 0x706   : > { %7614 = vrcp.f32 %v6043_v12  ;;  %v6238_v16 = vsel %vm6235_vm2, %v6237_v14, %v6233_v18  ;;  %vm6247_vm5 = vmor %vm6245_vm4, %vm6246_vm3  ;;  %v6266_v33 = vand.u32 2147483648, %v6043_v12  ;;  %v6264_v6 = vand.u32 2147483647, %v6043_v12 }
 0x707   : > { %6325 = vrot.lane.b32.xlu2 %v6238_v16, %s7785_s29  ;;  %v6242_v27 = vsub.f32 1.0, %v6241_v48  ;;  %vm6260_vm8 = vweird.f32 %v6043_v12 }
 0x708   : > { %v6267_v50 = vor.u32 1.1754944e-38, %v6266_v33  ;;  %vm6265_vm10 = vcmp.eq.f32.partialorder %v6264_v6, 8.507059e+37 }
 0x709   : > { %v6243_v46 = vmul.f32 %v7611_v32, %v6242_v27 }
 0x70b   : > { %v7613_v25 = vpop.eup %7612  ;;  %v6244_v30 = vadd.f32 %v7611_v32, %v6243_v46 }
 0x70c   : > { %v7615_v5 = vpop.eup %7614  ;;  %v6044_v38 = vadd.f32 1.0, %v7613_v25 }
 0x70d   : > { %v6248_v60 = vsel %vm6247_vm5, %v7611_v32, %v6244_v30  ;;  %v6256_v26 = vmul.f32 %v7615_v5, %v6043_v12  ;;  %vm6261_vm7 = vweird.f32 %v7615_v5 }
 0x70e   : > { %7616 = vrcp.f32 %v6044_v38  ;;  %v6253_v54 = vsel %vm6250_vm6, %v6252_v21, %v6248_v60  ;;  %vm6262_vm9 = vmor %vm6260_vm8, %vm6261_vm7  ;;  %v6281_v20 = vand.u32 2147483648, %v6044_v38  ;;  %v6279_v36 = vand.u32 2147483647, %v6044_v38 }
 0x70f   : > { %6327 = vrot.lane.b32.xlu0 %v6253_v54, %s7785_s29  ;;  %v6257_v47 = vsub.f32 1.0, %v6256_v26  ;;  %7618 = vtanh.f32 %v10780_v42  ;;  %vm6275_vm12 = vweird.f32 %v6044_v38  ;;  %v11401_v54 = vld [vmem:[#allocation25_spill] sm:$0xff] }
 0x710   : > { %v6282_v11 = vor.u32 1.1754944e-38, %v6281_v20  ;;  %vm6280_vm14 = vcmp.eq.f32.partialorder %v6279_v36, 8.507059e+37  ;;  %7620 = vtanh.f32 %v10794_v10 }
 0x711   : > { %v6258_v8 = vmul.f32 %v7615_v5, %v6257_v47  ;;  %7622 = vtanh.f32 %v10810_v63 }
 0x712   : > { %7624 = vtanh.f32 %v10830_v9 }
 0x713   : > { %v6259_v62 = vadd.f32 %v7615_v5, %v6258_v8  ;;  %7626 = vtanh.f32 %v10842_v52 }
 0x714   : > { %v7617_v34 = vpop.eup %7616  ;;  %7628 = vtanh.f32 %v10850_v55 }
 0x715   : > { %v6263_v22 = vsel %vm6262_vm9, %v7615_v5, %v6259_v62  ;;  %v6271_v31 = vmul.f32 %v7617_v34, %v6044_v38  ;;  %vm6276_vm11 = vweird.f32 %v7617_v34  ;;  %v7619_v61 = vpop.eup %7618  ;;  %7630 = vtanh.f32 %v10856_v51 }
 0x716   : > { %v6268_v57 = vsel %vm6265_vm10, %v6267_v50, %v6263_v22  ;;  %vm6277_vm13 = vmor %vm6275_vm12, %vm6276_vm11  ;;  %v7621_v2 = vpop.eup %7620  ;;  %7632 = vtanh.f32 %v10861_v40 }
 0x717   : > { %6329 = vrot.lane.b32.xlu1 %v6268_v57, %s7785_s29  ;;  %v6272_v53 = vsub.f32 1.0, %v6271_v31  ;;  %v7623_v7 = vpop.eup %7622  ;;  %7634 = vtanh.f32 %v10869_v4 }
 0x718   : > { %v7625_v45 = vpop.eup %7624  ;;  %7636 = vtanh.f32 %v10874_v37  ;;  %v7682_v37 = vld [vmem:[%s11091_s6 + $0x8] sm:$0xf] }
 0x719   : > { %v6273_v1 = vmul.f32 %v7617_v34, %v6272_v53  ;;  %v6308_v42 = vpop.permute.xlu2 %6307  ;;  %v7627_v10 = vpop.eup %7626  ;;  %7638 = vtanh.f32 %v10879_v58  ;;  %v10943_v58 = vperm.slane %v7682_v37, 1  ;;  %v11403_v53 = vld [vmem:[#allocation26_spill] sm:$0xff] }
 0x71a   : > { %v6352_v59 = vmul.f32 %v7623_v7, %v6308_v42  ;;  %v7629_v32 = vpop.eup %7628  ;;  %7640 = vtanh.f32 %v10884_v15  ;;  %v11402_v15 = vld [vmem:[#allocation54_spill] sm:$0xff] }
 0x71b   : > { %v6274_v24 = vadd.f32 %v7617_v34, %v6273_v1  ;;  %v7631_v9 = vpop.eup %7630  ;;  %7642 = vtanh.f32 %v10889_v0  ;;  %v4530_v47 = vadd.f32 %v11402_v15, %v11401_v54 }
 0x71c   : > { %v7633_v52 = vpop.eup %7632  ;;  %7644 = vtanh.f32 %v10897_v39  ;;  %v11404_v39 = vld [vmem:[#allocation46_spill] sm:$0xff] }
 0x71d   : > { %v6278_v28 = vsel %vm6277_vm13, %v7617_v34, %v6274_v24  ;;  %v7635_v27 = vpop.eup %7634  ;;  %7646 = vtanh.f32 %v10905_v29  ;;  %v4531_v20 = vadd.f32 %v11404_v39, %v11403_v53 }
 0x71e   : > { %v6283_v56 = vsel %vm6280_vm14, %v6282_v11, %v6278_v28  ;;  %v7637_v51 = vpop.eup %7636  ;;  %v11405_v11 = vld [vmem:[#allocation32_spill] sm:$0xff]  ;;  %v11406_v28 = vld [vmem:[#allocation55_spill] sm:$0xff] }
 0x71f   : > { %6331 = vrot.lane.b32.xlu2 %v6283_v56, %s7785_s29  ;;  %v7639_v40 = vpop.eup %7638  ;;  %v4532_v29 = vadd.f32 %v11406_v28, %v11405_v11 }
 0x720   : > { %v7641_v5 = vpop.eup %7640 }
 0x721   : > { %v6304_v49 = vpop.permute.xlu0 %6303  ;;  %v7643_v21 = vpop.eup %7642 }
 0x722   : > { %v6350_v23 = vmul.f32 %v7619_v61, %v6304_v49  ;;  %v7645_v6 = vpop.eup %7644 }
 0x723   : > { %v7647_v22 = vpop.eup %7646 }
 0x724   : > { %7278 = vmatmul.msk.f32.gmra.mxu1 %vm314_vm1, %v6350_v23  ;;  %v11407_v23 = vld [vmem:[#allocation28_spill] sm:$0xff] }
 0x729   : > { %v6306_v17 = vpop.permute.xlu1 %6305 }
 0x72a   : > { %v6351_v43 = vmul.f32 %v7621_v2, %v6306_v17  ;;  %v11408_v2 = vld [vmem:[#allocation56_spill] sm:$0xff] }
 0x72b   : > { %v4533_v17 = vadd.f32 %v11408_v2, %v11407_v23 }
 0x72c   : > { %7279 = vmatmul.msk.f32.gmra.mxu1 %vm314_vm1, %v6351_v43 }
 0x731   : > { %v6314_v63 = vpop.permute.xlu2 %6313 }
 0x732   : > { %v6355_v12 = vmul.f32 %v7629_v32, %v6314_v63  ;;  %v11412_v63 = vld [vmem:[#allocation47_spill] sm:$0xff] }
 0x734   : > { %7280 = vmatmul.msk.f32.gmra.mxu1 %vm314_vm1, %v6352_v59  ;;  %v11409_v59 = vld [vmem:[#allocation43_spill] sm:$0xff] }
 0x739   : > { %v6310_v13 = vpop.permute.xlu0 %6309 }
 0x73a   : > { %v6353_v44 = vmul.f32 %v7625_v45, %v6310_v13  ;;  %v11410_v45 = vld [vmem:[#allocation19_spill] sm:$0xff] }
 0x73b   : > { %v4534_v13 = vadd.f32 %v11410_v45, %v11409_v59  ;;  %v11430_v59 = vld [vmem:[#allocation34_spill] sm:$0xff] }
 0x73c   : > { %7281 = vmatmul.msk.f32.gmra.mxu1 %vm314_vm1, %v6353_v44 }
 0x741   : > { %v6312_v19 = vpop.permute.xlu1 %6311 }
 0x742   : > { %v6354_v41 = vmul.f32 %v7627_v10, %v6312_v19 }
 0x744   : > { %7282 = vmatmul.msk.f32.gmra.mxu1 %vm314_vm1, %v6354_v41  ;;  %v11411_v41 = vld [vmem:[#allocation36_spill] sm:$0xff] }
 0x745   : > { %v4535_v32 = vadd.f32 %v11412_v63, %v11411_v41  ;;  %v11432_v41 = vld [vmem:[#allocation44_spill] sm:$0xff] }
 0x749   : > { %v6320_v55 = vpop.permute.xlu2 %6319 }
 0x74a   : > { %v6358_v3 = vmul.f32 %v7635_v27, %v6320_v55 }
 0x74c   : > { %7283 = vmatmul.msk.f32.gmra.mxu1 %vm314_vm1, %v6355_v12 }
 0x751   : > { %v6316_v14 = vpop.permute.xlu0 %6315 }
 0x752   : > { %v6356_v18 = vmul.f32 %v7631_v9, %v6316_v14 }
 0x754   : > { %7284 = vmatmul.msk.f32.gmra.mxu1 %vm314_vm1, %v6356_v18  ;;  %v11413_v18 = vld [vmem:[#allocation37_spill] sm:$0xff] }
 0x759   : > { %v6318_v48 = vpop.permute.xlu1 %6317 }
 0x75a   : > { %v6357_v16 = vmul.f32 %v7633_v52, %v6318_v48  ;;  %v11414_v52 = vld [vmem:[#allocation59_spill] sm:$0xff] }
 0x75b   : > { %v4536_v48 = vadd.f32 %v11414_v52, %v11413_v18 }
 0x75c   : > { %7285 = vmatmul.msk.f32.gmra.mxu1 %vm314_vm1, %v6357_v16 }
 0x761   : > { %v6326_v4 = vpop.permute.xlu2 %6325 }
 0x762   : > { %v6361_v38 = vmul.f32 %v7641_v5, %v6326_v4  ;;  %v11418_v4 = vld [vmem:[#allocation60_spill] sm:$0xff] }
 0x764   : > { %7286 = vmatmul.msk.f32.gmra.mxu1 %vm314_vm1, %v6358_v3  ;;  %v11415_v3 = vld [vmem:[#allocation38_spill] sm:$0xff] }
 0x769   : > { %v6322_v46 = vpop.permute.xlu0 %6321 }
 0x76a   : > { %v6359_v35 = vmul.f32 %v7637_v51, %v6322_v46  ;;  %v11416_v51 = vld [vmem:[#allocation68_spill] sm:$0xff] }
 0x76b   : > { %v4537_v46 = vadd.f32 %v11416_v51, %v11415_v3 }
 0x76c   : > { %7287 = vmatmul.msk.f32.gmra.mxu1 %vm314_vm1, %v6359_v35 }
 0x771   : > { %v6324_v25 = vpop.permute.xlu1 %6323 }
 0x772   : > { %v6360_v30 = vmul.f32 %v7639_v40, %v6324_v25 }
 0x774   : > { %7288 = vmatmul.msk.f32.gmra.mxu1 %vm314_vm1, %v6360_v30  ;;  %v11417_v30 = vld [vmem:[#allocation30_spill] sm:$0xff] }
 0x775   : > { %v4538_v5 = vadd.f32 %v11418_v4, %v11417_v30 }
 0x779   : > { %v6332_v50 = vpop.permute.xlu2 %6331 }
 0x77a   : > { %v6364_v31 = vmul.f32 %v7647_v22, %v6332_v50  ;;  %v11423_v22 = vld [vmem:[#allocation15_spill] sm:$0xff] }
 0x77c   : > { %7289 = vmatmul.msk.f32.gmra.mxu1 %vm314_vm1, %v6361_v38 }
 0x781   : > { %v6434_v60 = vpop.f32.mrf.mxu1  ;;  %v6328_v26 = vpop.permute.xlu0 %6327 }
 0x782   : > { %v6435_v33 = vadd.f32 %v6434_v60, %v10943_v58  ;;  %v6362_v8 = vmul.f32 %v7643_v21, %v6328_v26  ;;  %v11419_v60 = vld [vmem:[#allocation41_spill] sm:$0xff]  ;;  %v11420_v26 = vld [vmem:[#allocation62_spill] sm:$0xff] }
 0x783   : > { %v4539_v54 = vadd.f32 %v11420_v26, %v11419_v60 }
 0x784   : > { %v6482_v0 = vadd.f32 %v6435_v33, %v4530_v47  ;;  %7290 = vmatmul.msk.f32.gmra.mxu1 %vm314_vm1, %v6362_v8  ;;  %v11421_v8 = vld [vmem:[#allocation10_spill] sm:$0xff] }
 0x786   : > { %6514 = vrot.lane.b32.xlu0 %v6482_v0, %s7785_s29  ;;  %v11422_v0 = vld [vmem:[#allocation69_spill] sm:$0xff] }
 0x789   : > { %v6330_v62 = vpop.permute.xlu1 %6329 }
 0x78a   : > { %v6363_v34 = vmul.f32 %v7645_v6, %v6330_v62  ;;  %v4540_v6 = vadd.f32 %v11422_v0, %v11421_v8 }
 0x78c   : > { %7291 = vmatmul.msk.f32.gmra.mxu1 %vm314_vm1, %v6363_v34 }
 0x794   : > { %7292 = vmatmul.msk.f32.gmra.mxu1 %vm314_vm1, %v6364_v31  ;;  %v11424_v31 = vld [vmem:[#allocation63_spill] sm:$0xff] }
 0x7a1   : > { %v6437_v57 = vpop.f32.mrf.mxu1 }
 0x7a2   : > { %v6438_v1 = vadd.f32 %v6437_v57, %v10943_v58  ;;  %v4541_v57 = vadd.f32 %v11424_v31, %v11423_v22 }
 0x7a4   : > { %v6483_v36 = vadd.f32 %v6438_v1, %v4531_v20 }
 0x7a6   : > { %6516 = vrot.lane.b32.xlu1 %v6483_v36, %s7785_s29  ;;  %v11425_v36 = vld [vmem:[#allocation21_spill] sm:$0xff] }
 0x7a9   : > { %v6440_v24 = vpop.f32.mrf.mxu1 }
 0x7aa   : > { %v6441_v56 = vadd.f32 %v6440_v24, %v10943_v58  ;;  %v11426_v24 = vld [vmem:[#allocation65_spill] sm:$0xff] }
 0x7ab   : > { %v4542_v11 = vadd.f32 %v11426_v24, %v11425_v36 }
 0x7ac   : > { %v6484_v61 = vadd.f32 %v6441_v56, %v4532_v29 }
 0x7ae   : > { %6518 = vrot.lane.b32.xlu2 %v6484_v61, %s7785_s29  ;;  %v11427_v61 = vld [vmem:[#allocation12_spill] sm:$0xff] }
 0x7b1   : > { %v6443_v49 = vpop.f32.mrf.mxu1 }
 0x7b2   : > { %v6444_v43 = vadd.f32 %v6443_v49, %v10943_v58  ;;  %v11428_v49 = vld [vmem:[#allocation31_spill] sm:$0xff] }
 0x7b3   : > { %v4543_v23 = vadd.f32 %v11428_v49, %v11427_v61 }
 0x7b4   : > { %v6485_v42 = vadd.f32 %v6444_v43, %v4533_v17 }
 0x7b6   : > { %6520 = vrot.lane.b32.xlu0 %v6485_v42, %s7785_s29 }
 0x7b9   : > { %v6446_v7 = vpop.f32.mrf.mxu1 }
 0x7ba   : > { %v6447_v44 = vadd.f32 %v6446_v7, %v10943_v58  ;;  %v11429_v7 = vld [vmem:[#allocation18_spill] sm:$0xff] }
 0x7bb   : > { %v4544_v45 = vadd.f32 %v11430_v59, %v11429_v7 }
 0x7bc   : > { %v6486_v10 = vadd.f32 %v6447_v44, %v4534_v13 }
 0x7be   : > { %6522 = vrot.lane.b32.xlu1 %v6486_v10, %s7785_s29 }
 0x7c1   : > { %v6449_v19 = vpop.f32.mrf.mxu1 }
 0x7c2   : > { %v6450_v12 = vadd.f32 %v6449_v19, %v10943_v58  ;;  %v11431_v19 = vld [vmem:[#allocation22_spill] sm:$0xff] }
 0x7c3   : > { %v4545_v63 = vadd.f32 %v11432_v41, %v11431_v19 }
 0x7c4   : > { %v6487_v9 = vadd.f32 %v6450_v12, %v4535_v32 }
 0x7c6   : > { %6524 = vrot.lane.b32.xlu2 %v6487_v9, %s7785_s29 }
 0x7c9   : > { %v6452_v14 = vpop.f32.mrf.mxu1 }
 0x7ca   : > { %v6453_v16 = vadd.f32 %v6452_v14, %v10943_v58 }
 0x7cc   : > { %v6488_v55 = vadd.f32 %v6453_v16, %v4536_v48 }
 0x7ce   : > { %6526 = vrot.lane.b32.xlu0 %v6488_v55, %s7785_s29 }
 0x7d1   : > { %v6455_v27 = vpop.f32.mrf.mxu1 }
 0x7d2   : > { %v6456_v35 = vadd.f32 %v6455_v27, %v10943_v58 }
 0x7d4   : > { %v6489_v40 = vadd.f32 %v6456_v35, %v4537_v46 }
 0x7d6   : > { %6528 = vrot.lane.b32.xlu1 %v6489_v40, %s7785_s29 }
 0x7d9   : > { %v6458_v25 = vpop.f32.mrf.mxu1 }
 0x7da   : > { %v6459_v38 = vadd.f32 %v6458_v25, %v10943_v58 }
 0x7dc   : > { %v6490_v37 = vadd.f32 %v6459_v38, %v4538_v5 }
 0x7de   : > { %6530 = vrot.lane.b32.xlu2 %v6490_v37, %s7785_s29 }
 0x7e1   : > { %v6461_v21 = vpop.f32.mrf.mxu1 }
 0x7e2   : > { %v6462_v15 = vadd.f32 %v6461_v21, %v10943_v58 }
 0x7e4   : > { %v6491_v47 = vadd.f32 %v6462_v15, %v4539_v54 }
 0x7e6   : > { %6532 = vrot.lane.b32.xlu0 %v6491_v47, %s7785_s29 }
 0x7e9   : > { %v6464_v33 = vpop.f32.mrf.mxu1 }
 0x7ea   : > { %v6465_v62 = vadd.f32 %v6464_v33, %v10943_v58 }
 0x7ec   : > { %v6492_v34 = vadd.f32 %v6465_v62, %v4540_v6 }
 0x7ee   : > { %6534 = vrot.lane.b32.xlu1 %v6492_v34, %s7785_s29 }
 0x7f1   : > { %v6467_v50 = vpop.f32.mrf.mxu1 }
 0x7f2   : > { %v6468_v53 = vadd.f32 %v6467_v50, %v10943_v58 }
 0x7f4   : > { %v6493_v39 = vadd.f32 %v6468_v53, %v4541_v57 }
 0x7f6   : > { %6536 = vrot.lane.b32.xlu2 %v6493_v39, %s7785_s29 }
 0x7f8   : > { %v6515_v20 = vpop.permute.xlu0 %6514 }
 0x7f9   : > { %6562 = vst.msk [vmem:[%s11001_s16] sm:$0xff] %vm314_vm1, %v6515_v20  ;;  %v6470_v1 = vpop.f32.mrf.mxu1 }
 0x7fa   : > { %v6471_v28 = vadd.f32 %v6470_v1, %v10943_v58 }
 0x7fc   : > { %v6494_v29 = vadd.f32 %v6471_v28, %v4542_v11 }
 0x7fe   : > { %6538 = vrot.lane.b32.xlu0 %v6494_v29, %s7785_s29 }
 0x801   : > { %v6473_v56 = vpop.f32.mrf.mxu1 }
 0x802   : > { %v6474_v2 = vadd.f32 %v6473_v56, %v10943_v58 }
 0x804   : > { %v6495_v17 = vadd.f32 %v6474_v2, %v4543_v23 }
 0x806   : > { %6540 = vrot.lane.b32.xlu1 %v6495_v17, %s7785_s29 }
 0x808   : > { %v6519_v43 = vpop.permute.xlu2 %6518 }
 0x809   : > { %6564 = vst.msk [vmem:[%s11001_s16 + $0x10] sm:$0xff] %vm314_vm1, %v6519_v43  ;;  %v6476_v42 = vpop.f32.mrf.mxu1 }
 0x80a   : > { %v6477_v13 = vadd.f32 %v6476_v42, %v10943_v58 }
 0x80c   : > { %v6496_v44 = vadd.f32 %v6477_v13, %v4544_v45 }
 0x80e   : > { %6542 = vrot.lane.b32.xlu2 %v6496_v44, %s7785_s29 }
 0x811   : > { %v6479_v10 = vpop.f32.mrf.mxu1 }
 0x812   : > { %v6480_v32 = vadd.f32 %v6479_v10, %v10943_v58 }
 0x814   : > { %v6497_v12 = vadd.f32 %v6480_v32, %v4545_v63 }
 0x816   : > { %6544 = vrot.lane.b32.xlu0 %v6497_v12, %s7785_s29  ;;  %s7300_s29 = sshll.u32 %s7849_s28, 7 }
 0x817   : > { %s6590_s18 = scalar_lea.hbm %s11092_s7, %s7300_s29 }
 0x818   : > { %v6517_v9 = vpop.permute.xlu1 %6516  ;;  %s6593_s21 = sshll.u32 %s6590_s18, 4  ;;  %s6594_s21 = int_to_ptr.hbm [resolvable:$true] %s6593_s21 }
 0x819   : > { %6563 = vst.msk [vmem:[%s11001_s16 + $0x8] sm:$0xff] %vm314_vm1, %v6517_v9  ;;  %s7727_s23 = sshra.s32 %s6594_s21, 4  ;;  %s7728_s23 = int_to_ptr.hbm [resolvable:$true] %s7727_s23 }
 0x81a   : > { %s7729_s8 = scalar_lea.hbm %s7728_s23, 128  ;;  %p7734_p3 = scmp.lt.s32.totalorder %s7728_s23, %s11092_s7 }
 0x81b   : > { %p7730_p0 = scmp.ne.s32.totalorder %s7728_s23, %s7729_s8  ;;  %p7735_p4 = scmp.lt.s32.totalorder %s7733_s13, %s7729_s8 }
 0x81d   : > { %p7731_p1 = pnand %p7730_p0, %p7866_p5  ;;  %p7736_p7 = por %p7735_p4, %p7734_p3 }
 0x81f   : > { %p7732_p2 = pneg %p7731_p1 }
 0x820   : > { %v6525_v14 = vpop.permute.xlu2 %6524 }
 0x821   : > { %6567 = vst.msk [vmem:[%s11001_s16 + $0x28] sm:$0xff] %vm314_vm1, %v6525_v14  ;;  %p7737_p8 = pnand %p7736_p7, %p7732_p2 }
 0x828   : > { %v6521_v18 = vpop.permute.xlu0 %6520 }
 0x829   : > { %6565 = vst.msk [vmem:[%s11001_s16 + $0x18] sm:$0xff] %vm314_vm1, %v6521_v18 }
 0x830   : > { %v6523_v52 = vpop.permute.xlu1 %6522 }
 0x831   : > { %6566 = vst.msk [vmem:[%s11001_s16 + $0x20] sm:$0xff] %vm314_vm1, %v6523_v52 }
 0x838   : > { %v6531_v58 = vpop.permute.xlu2 %6530 }
 0x839   : > { %6570 = vst.msk [vmem:[%s11001_s16 + $0x40] sm:$0xff] %vm314_vm1, %v6531_v58 }
 0x840   : > { %v6527_v48 = vpop.permute.xlu0 %6526 }
 0x841   : > { %6568 = vst.msk [vmem:[%s11001_s16 + $0x30] sm:$0xff] %vm314_vm1, %v6527_v48 }
 0x848   : > { %v6529_v16 = vpop.permute.xlu1 %6528 }
 0x849   : > { %6569 = vst.msk [vmem:[%s11001_s16 + $0x38] sm:$0xff] %vm314_vm1, %v6529_v16 }
 0x850   : > { %v6537_v55 = vpop.permute.xlu2 %6536 }
 0x851   : > { %6573 = vst.msk [vmem:[%s11001_s16 + $0x58] sm:$0xff] %vm314_vm1, %v6537_v55 }
 0x858   : > { %v6533_v27 = vpop.permute.xlu0 %6532 }
 0x859   : > { %6571 = vst.msk [vmem:[%s11001_s16 + $0x48] sm:$0xff] %vm314_vm1, %v6533_v27 }
 0x860   : > { %v6535_v3 = vpop.permute.xlu1 %6534 }
 0x861   : > { %6572 = vst.msk [vmem:[%s11001_s16 + $0x50] sm:$0xff] %vm314_vm1, %v6535_v3 }
 0x868   : > { %v6543_v51 = vpop.permute.xlu2 %6542 }
 0x869   : > { %6576 = vst.msk [vmem:[%s11001_s16 + $0x70] sm:$0xff] %vm314_vm1, %v6543_v51 }
 0x870   : > { %v6539_v46 = vpop.permute.xlu0 %6538 }
 0x871   : > { %6574 = vst.msk [vmem:[%s11001_s16 + $0x60] sm:$0xff] %vm314_vm1, %v6539_v46 }
 0x878   : > { %v6541_v35 = vpop.permute.xlu1 %6540 }
 0x879   : > { %6575 = vst.msk [vmem:[%s11001_s16 + $0x68] sm:$0xff] %vm314_vm1, %v6541_v35 }
 0x888   : > { %v6545_v40 = vpop.permute.xlu0 %6544 }
 0x889   : > { %6577 = vst.msk [vmem:[%s11001_s16 + $0x78] sm:$0xff] %vm314_vm1, %v6545_v40 }
 0x88a   : > { %7740 = shalt.err (!%p7737_p8)
}
 0x88b   : > { %s7786_s14 = smov 128   ;;  %s7787_s16 = smov 8  }
 0x88c   : > { %7308 = dma.vmem_to_hbm [thread:$0]  (%p7866_p5), %s6592_s20, 2048, %s6594_s21, %s6579_s22, %s7786_s14, %s7786_s14, %s7787_s16  }
 0x88d PF: > { %p7320_p9 = scmp.ge.s32.totalorder %s7779_s27, 2  ;;  %s6608_s19 = sand.u32 1, %s7767_s24  }
 0x88e   : > { %s6609_s17 = scalar_lea.sflag [#allocation5], %s6608_s19 }
 0x88f   : > { %p7315_p10 = pnand %p7320_p9, %p7870_p6 }
 0x891   : > { %p7316_p11 = pneg %p7315_p10 }
 0x893   : > { %7762 = dma.done.wait (%p7316_p11), %s6609_s17, 2048  }
 0x894   : > { %7764 = vsyncadd (%p7316_p11), %s6609_s17, 4294965248  ;;  %p18_p12 = scmp.ge.s32.totalorder %s7853_s30, 4   ;;  %s11433_s24 = smov %s7771_s25 }
 0x895   : > { %s11434_s25 = smov %s7775_s26  ;;  %s11435_s26 = smov %s7864_s10 }
 0x896   : > { %s11436_s27 = smov %s7853_s30  ;;  %20 = sbr.rel (!%p18_p12) target bundleno = 4 (0x4), region = 127 }
 0x89b   :  { %6615 = vsyncpa [#allocation4], 1 }
 0x89c   :  { %6617 = vsyncpa [#allocation4 + $0x1], 1 }
 0x89d   :  { %6618 = vsyncpa [#allocation5], 1 }
 0x89e   :  { %6620 = vsyncpa [#allocation5 + $0x1], 1 }

</bundles_post_ra>
